<compile_context>
chip_gen: v5e
topology: v5e:2x2
jax: 0.10.0
libtpu: 0.0.40
codegen_flags: <defaults>
</compile_context>

<pallas_src>
import math
from functools import partial

import jax
import jax.numpy as jnp
from jax import lax
from jax.experimental import pallas as pl
from jax.experimental.pallas import tpu as pltpu

LN_EPS = 1e-12        # BertConfig.layer_norm_eps
MASK_NEG = -10000.0   # HF extended-attention-mask fill value


def _layernorm(x, gamma, beta, eps=LN_EPS):
    mu = jnp.mean(x, axis=-1, keepdims=True)
    var = jnp.mean((x - mu) ** 2, axis=-1, keepdims=True)
    return (x - mu) * lax.rsqrt(var + eps) * gamma + beta


def _gelu(x):
    # TODO(synk): HF BERT's default "gelu" is the exact erf GELU; tanh approximation used here.
    return 0.5 * x * (1.0 + jnp.tanh(0.7978845608028654 * (x + 0.044715 * x * x * x)))


# ---------------------------------------------------------------------------
# Kernel 1: comb_proj + stacked LSTM (zero init state), time-major layout.
#   emb_ref: (S*B, Dc_pad) f32   row = s*B + b
#   wc_ref : (Dc_pad, H) bf16, bc_ref: (1, H) f32
#   wih_ref/whh_ref: (L, H, 4H) bf16 (gate order i,f,g,o), bl_ref: (L, 1, 4H) f32 (b_ih + b_hh folded)
#   out_ref: (S, B, H) f32 (top-layer hidden states), gx_ref: (S, B, 4H) f32 VMEM scratch
# ---------------------------------------------------------------------------
def comb_lstm_kernel(emb_ref, wc_ref, bc_ref, wih_ref, whh_ref, bl_ref,
                     out_ref, gx_ref):
    S, B, H = out_ref.shape
    n_layers = wih_ref.shape[0]

    # comb_proj over the whole flattened slab (one MXU pass, bf16 operands, f32 accumulation)
    x0 = jnp.dot(emb_ref[...].astype(jnp.bfloat16), wc_ref[...],
                 preferred_element_type=jnp.float32) + bc_ref[...]          # (S*B, H)

    for l in range(n_layers):                     # static unroll over stacked LSTM layers
        xin = x0 if l == 0 else out_ref[...].reshape(S * B, H)
        # precompute x_t @ W_ih + b for ALL timesteps as one big matmul
        gx = jnp.dot(xin.astype(jnp.bfloat16), wih_ref[l],
                     preferred_element_type=jnp.float32) + bl_ref[l]        # (S*B, 4H)
        gx_ref[...] = gx.reshape(S, B, 4 * H)

        def step(t, carry):
            h, c = carry
            gates = gx_ref[t] + jnp.dot(h.astype(jnp.bfloat16), whh_ref[l],
                                        preferred_element_type=jnp.float32)  # (B, 4H)
            i = jax.nn.sigmoid(gates[:, 0 * H:1 * H])
            f = jax.nn.sigmoid(gates[:, 1 * H:2 * H])
            g = jnp.tanh(gates[:, 2 * H:3 * H])
            o = jax.nn.sigmoid(gates[:, 3 * H:4 * H])
            c_new = f * c + i * g
            h_new = o * jnp.tanh(c_new)
            out_ref[t] = h_new                     # write hidden state for timestep t
            return (h_new, c_new)

        zeros = jnp.zeros((B, H), jnp.float32)     # init_hidden: zero (h, c)
        lax.fori_loop(0, S, step, (zeros, zeros))


def comb_proj_lstm(emb2d, wc, bc, wih, whh, bl, *, S, B, H):
    return pl.pallas_call(
        comb_lstm_kernel,
        out_shape=jax.ShapeDtypeStruct((S, B, H), jnp.float32),
        scratch_shapes=[pltpu.VMEM((S, B, 4 * H), jnp.float32)],
    )(emb2d, wc, bc, wih, whh, bl)


# ---------------------------------------------------------------------------
# Kernel 2: one BERT encoder layer (MHA + add&LN + GELU FFN + add&LN) fused with fc + sigmoid.
#   x_ref: (B, S, H) f32, maskb_ref: (n_heads*B, 1, S) f32 additive key mask (group g = h*B + b)
#   output: (B, S) f32 predictions (lane-dense)
# ---------------------------------------------------------------------------
def bert_fc_kernel(x_ref, maskb_ref,
                   wq_ref, bq_ref, wk_ref, bk_ref, wv_ref, bv_ref,
                   wo_ref, bo_ref, g1_ref, b1_ref,
                   wi_ref, bi_ref, wo2_ref, bo2_ref, g2_ref, b2_ref,
                   wf_ref, bf_ref, out_ref, *, n_heads):
    B, S, H = x_ref.shape
    hd = H // n_heads

    x2 = x_ref[...].reshape(B * S, H)                       # (BS, H) f32
    xb = x2.astype(jnp.bfloat16)

    q = (jnp.dot(xb, wq_ref[...], preferred_element_type=jnp.float32)
         + bq_ref[...]).astype(jnp.bfloat16)
    k = (jnp.dot(xb, wk_ref[...], preferred_element_type=jnp.float32)
         + bk_ref[...]).astype(jnp.bfloat16)
    v = (jnp.dot(xb, wv_ref[...], preferred_element_type=jnp.float32)
         + bv_ref[...]).astype(jnp.bfloat16)

    def heads_to_batch(t):                                  # (BS, H) -> (nh*B, S, hd)
        parts = [t[:, h * hd:(h + 1) * hd].reshape(B, S, hd) for h in range(n_heads)]
        return jnp.stack(parts, axis=0).reshape(n_heads * B, S, hd)

    qg, kg, vg = heads_to_batch(q), heads_to_batch(k), heads_to_batch(v)

    # single batched contraction over all (head, batch) groups; K consumed untransposed
    scale = 1.0 / math.sqrt(hd)
    s = jnp.einsum('gqd,gkd->gqk', qg, kg, preferred_element_type=jnp.float32) * scale
    s = s + maskb_ref[...]                                  # additive key mask, broadcast over q
    m = jnp.max(s, axis=-1, keepdims=True)
    e = jnp.exp(s - m)
    p = (e * pl.reciprocal(jnp.sum(e, axis=-1, keepdims=True), approx=True)).astype(jnp.bfloat16)
    ctx_g = jnp.einsum('gqk,gkd->gqd', p, vg, preferred_element_type=jnp.float32)   # (G, S, hd)

    ctx4 = ctx_g.reshape(n_heads, B, S, hd)
    ctx = jnp.concatenate([ctx4[h].reshape(B * S, hd) for h in range(n_heads)], axis=-1)  # (BS, H)

    attn = jnp.dot(ctx.astype(jnp.bfloat16), wo_ref[...],
                   preferred_element_type=jnp.float32) + bo_ref[...]
    h1 = _layernorm(attn + x2, g1_ref[...], b1_ref[...])
    inter = _gelu(jnp.dot(h1.astype(jnp.bfloat16), wi_ref[...],
                          preferred_element_type=jnp.float32) + bi_ref[...])
    ffo = jnp.dot(inter.astype(jnp.bfloat16), wo2_ref[...],
                  preferred_element_type=jnp.float32) + bo2_ref[...]
    h2 = _layernorm(ffo + h1, g2_ref[...], b2_ref[...])

    # fc (H -> 1) + sigmoid as a lane-dense row reduction; output is (B, S), not (B*S, 1)
    logits = jnp.sum(h2.reshape(B, S, H) * wf_ref[...], axis=-1) + bf_ref[...]
    out_ref[...] = jax.nn.sigmoid(logits)


def bert_encoder_fc(x, maskb, bp, wf, bf, *, n_heads):
    B, S, H = x.shape
    kernel = partial(bert_fc_kernel, n_heads=n_heads)
    return pl.pallas_call(
        kernel,
        out_shape=jax.ShapeDtypeStruct((B, S), jnp.float32),
    )(x, maskb,
      bp["wq"], bp["bq"], bp["wk"], bp["bk"], bp["wv"], bp["bv"],
      bp["wo"], bp["bo"], bp["ln1_g"], bp["ln1_b"],
      bp["wi"], bp["bi"], bp["wo2"], bp["bo2"], bp["ln2_g"], bp["ln2_b"],
      wf, bf)


# ---------------------------------------------------------------------------
# Parameters (deterministic, synthetic) and full forward
# ---------------------------------------------------------------------------
def init_params(key, n_test, n_questions, n_tag, hidden_dim, n_layers):
    d3 = hidden_dim // 3
    H = hidden_dim
    keys = iter(jax.random.split(key, 32))
    bf16 = jnp.bfloat16

    def nrm(shape, scale=0.02, dtype=jnp.float32):
        return (scale * jax.random.normal(next(keys), shape)).astype(dtype)

    zeros = lambda s: jnp.zeros(s, jnp.float32)
    ones = lambda s: jnp.ones(s, jnp.float32)

    return dict(
        emb_interaction=nrm((3, d3)),
        emb_test=nrm((n_test + 1, d3)),
        emb_question=nrm((n_questions + 1, d3)),
        emb_tag=nrm((n_tag + 1, d3)),
        wc=nrm((4 * d3, H), dtype=bf16), bc=zeros((1, H)),
        # stacked LSTM weights, PyTorch gate order [i, f, g, o], stored (in_features, 4H)
        wih=nrm((n_layers, H, 4 * H), dtype=bf16),
        whh=nrm((n_layers, H, 4 * H), dtype=bf16),
        bl=zeros((n_layers, 1, 4 * H)),                     # b_ih + b_hh folded
        bert=dict(                                          # one BertLayer, intermediate_size == H
            wq=nrm((H, H), dtype=bf16), bq=zeros((1, H)),
            wk=nrm((H, H), dtype=bf16), bk=zeros((1, H)),
            wv=nrm((H, H), dtype=bf16), bv=zeros((1, H)),
            wo=nrm((H, H), dtype=bf16), bo=zeros((1, H)),
            ln1_g=ones((1, H)), ln1_b=zeros((1, H)),
            wi=nrm((H, H), dtype=bf16), bi=zeros((1, H)),
            wo2=nrm((H, H), dtype=bf16), bo2=zeros((1, H)),
            ln2_g=ones((1, H)), ln2_b=zeros((1, H)),
        ),
        wf=nrm((1, H)), bf=zeros((1, 1)),
    )


def lstmattn_forward(params, test, question, tag, mask, interaction, *, n_heads):
    B, S = interaction.shape
    H = params["wc"].shape[1]

    # embedding lookups + concat (plain-JAX glue), same order as the PyTorch module
    e = jnp.concatenate([
        params["emb_interaction"][interaction],
        params["emb_test"][test],
        params["emb_question"][question],
        params["emb_tag"][tag],
    ], axis=2)                                              # (B, S, 4*(H//3))
    Dc = e.shape[-1]
    Dc_pad = ((Dc + 127) // 128) * 128                      # lane-align comb_proj contraction dim

    # time-major flatten so the LSTM kernel indexes timesteps on the leading axis (row = s*B + b)
    emb2d = jnp.transpose(e, (1, 0, 2)).reshape(S * B, Dc)
    emb2d = jnp.pad(emb2d, ((0, 0), (0, Dc_pad - Dc)))
    wc_p = jnp.pad(params["wc"], ((0, Dc_pad - Dc), (0, 0)))

    lstm_tm = comb_proj_lstm(emb2d, wc_p, params["bc"],
                             params["wih"], params["whh"], params["bl"],
                             S=S, B=B, H=H)                 # (S, B, H)
    x = jnp.transpose(lstm_tm, (1, 0, 2))                   # (B, S, H)

    # extended attention mask: (1 - mask) * -10000, replicated per head (group g = h*B + b)
    mb = (1.0 - mask.astype(jnp.float32)) * MASK_NEG        # (B, S)
    maskb = jnp.broadcast_to(mb[None, :, None, :],
                             (n_heads, B, 1, S)).reshape(n_heads * B, 1, S)

    return bert_encoder_fc(x, maskb, params["bert"],
                           params["wf"], params["bf"], n_heads=n_heads)   # (B, S)


if __name__ == "__main__":
    # small, lane/sublane-friendly shapes consistent with the module:
    # B=8 (full sublane tile, B*S = 128 MXU rows), S=16, hidden=128 (lane-dense), head_dim=64
    B, S = 8, 16
    hidden_dim, n_layers, n_heads = 128, 2, 2
    n_test, n_questions, n_tag = 10, 20, 7
    # TODO(synk): drop_out ignored — dropout is identity in inference/eval forward.

    key = jax.random.PRNGKey(0)
    pkey, k1, k2, k3, k4, k5 = jax.random.split(key, 6)
    params = init_params(pkey, n_test, n_questions, n_tag, hidden_dim, n_layers)

    test = jax.random.randint(k1, (B, S), 0, n_test + 1)
    question = jax.random.randint(k2, (B, S), 0, n_questions + 1)
    tag = jax.random.randint(k3, (B, S), 0, n_tag + 1)
    interaction = jax.random.randint(k4, (B, S), 0, 3)
    mask = (jax.random.uniform(k5, (B, S)) > 0.2).astype(jnp.float32)

    fwd = jax.jit(partial(lstmattn_forward, n_heads=n_heads))
    preds = jax.block_until_ready(fwd(params, test, question, tag, mask, interaction))
    assert preds.shape == (B, S)
    assert bool(jnp.all(jnp.isfinite(preds)))
    print("KERNEL_OK")
</pallas_src>

<mosaic_0001>
module attributes {stable_mosaic.version = 11 : i64} {
  func.func @comb_lstm_kernel(%arg0: memref<128x256xf32, #tpu.memory_space<vmem>>, %arg1: memref<256x128xbf16, #tpu.memory_space<vmem>>, %arg2: memref<1x128xf32, #tpu.memory_space<vmem>>, %arg3: memref<2x128x512xbf16, #tpu.memory_space<vmem>>, %arg4: memref<2x128x512xbf16, #tpu.memory_space<vmem>>, %arg5: memref<2x1x512xf32, #tpu.memory_space<vmem>>, %arg6: memref<16x8x128xf32, #tpu.memory_space<vmem>>, %arg7: memref<16x8x512xf32, #tpu.memory_space<vmem>>) attributes {dimension_semantics = [], scalar_prefetch = 0 : i64, scratch_operands = 1 : i64, tpu.core_type = #tpu.core_type<tc>} {
    %c0 = arith.constant 0 : index
    %c0_0 = arith.constant 0 : index
    %0 = vector.load %arg0[%c0, %c0_0] : memref<128x256xf32, #tpu.memory_space<vmem>>, vector<128x256xf32>
    %1 = arith.truncf %0 : vector<128x256xf32> to vector<128x256xbf16>
    %c0_1 = arith.constant 0 : index
    %c0_2 = arith.constant 0 : index
    %2 = vector.load %arg1[%c0_1, %c0_2] : memref<256x128xbf16, #tpu.memory_space<vmem>>, vector<256x128xbf16>
    %cst = arith.constant dense<0.000000e+00> : vector<128x128xf32>
    %3 = tpu.matmul %1, %2, %cst {dimension_numbers = #tpu.dot_dimension_numbers<[1], [0], [0], [1], [0, 0, 1, 1], [], []>} : vector<128x256xbf16>, vector<256x128xbf16>, vector<128x128xf32> -> vector<128x128xf32>
    %c0_3 = arith.constant 0 : index
    %c0_4 = arith.constant 0 : index
    %4 = vector.load %arg2[%c0_3, %c0_4] : memref<1x128xf32, #tpu.memory_space<vmem>>, vector<1x128xf32>
    %5 = vector.broadcast %4 : vector<1x128xf32> to vector<128x128xf32>
    %6 = arith.addf %3, %5 : vector<128x128xf32>
    %7 = arith.truncf %6 : vector<128x128xf32> to vector<128x128xbf16>
    %c0_5 = arith.constant 0 : index
    %c0_6 = arith.constant 0 : index
    %c0_7 = arith.constant 0 : index
    %8 = vector.load %arg3[%c0_5, %c0_6, %c0_7] : memref<2x128x512xbf16, #tpu.memory_space<vmem>>, vector<1x128x512xbf16>
    %9 = vector.shape_cast %8 : vector<1x128x512xbf16> to vector<128x512xbf16>
    %cst_8 = arith.constant dense<0.000000e+00> : vector<128x512xf32>
    %10 = tpu.matmul %7, %9, %cst_8 {dimension_numbers = #tpu.dot_dimension_numbers<[1], [0], [0], [1], [0, 0, 1, 1], [], []>} : vector<128x128xbf16>, vector<128x512xbf16>, vector<128x512xf32> -> vector<128x512xf32>
    %c0_9 = arith.constant 0 : index
    %c0_10 = arith.constant 0 : index
    %c0_11 = arith.constant 0 : index
    %11 = vector.load %arg5[%c0_9, %c0_10, %c0_11] : memref<2x1x512xf32, #tpu.memory_space<vmem>>, vector<1x1x512xf32>
    %12 = vector.shape_cast %11 : vector<1x1x512xf32> to vector<1x512xf32>
    %13 = vector.broadcast %12 : vector<1x512xf32> to vector<128x512xf32>
    %14 = arith.addf %10, %13 : vector<128x512xf32>
    %15 = vector.shape_cast %14 : vector<128x512xf32> to vector<16x8x512xf32>
    %c0_12 = arith.constant 0 : index
    %c0_13 = arith.constant 0 : index
    %c0_14 = arith.constant 0 : index
    %16 = vector.load %arg7[%c0_12, %c0_13, %c0_14] : memref<16x8x512xf32, #tpu.memory_space<vmem>>, vector<16x8x512xf32>
    tpu.vector_store %arg7[%c0_12, %c0_13, %c0_14], %15 {strides = array<i32>} : memref<16x8x512xf32, #tpu.memory_space<vmem>>, vector<16x8x512xf32>,
    %cst_15 = arith.constant 0.000000e+00 : f32
    %17 = vector.broadcast %cst_15 : f32 to vector<8x128xf32>
    %c0_i32 = arith.constant 0 : i32
    %c16_i32 = arith.constant 16 : i32
    %18 = arith.addi %c0_i32, %c16_i32 : i32
    %c1_i32 = arith.constant 1 : i32
    %19:2 = scf.for %arg8 = %c0_i32 to %18 step %c1_i32 iter_args(%arg9 = %17, %arg10 = %17) -> (vector<8x128xf32>, vector<8x128xf32>)  : i32 {
      %35 = arith.index_cast %arg8 : i32 to index
      %c0_34 = arith.constant 0 : index
      %c0_35 = arith.constant 0 : index
      %36 = vector.load %arg7[%35, %c0_34, %c0_35] : memref<16x8x512xf32, #tpu.memory_space<vmem>>, vector<1x8x512xf32>
      %37 = vector.shape_cast %36 : vector<1x8x512xf32> to vector<8x512xf32>
      %38 = arith.truncf %arg9 : vector<8x128xf32> to vector<8x128xbf16>
      %c0_36 = arith.constant 0 : index
      %c0_37 = arith.constant 0 : index
      %c0_38 = arith.constant 0 : index
      %39 = vector.load %arg4[%c0_36, %c0_37, %c0_38] : memref<2x128x512xbf16, #tpu.memory_space<vmem>>, vector<1x128x512xbf16>
      %40 = vector.shape_cast %39 : vector<1x128x512xbf16> to vector<128x512xbf16>
      %cst_39 = arith.constant dense<0.000000e+00> : vector<8x512xf32>
      %41 = tpu.matmul %38, %40, %cst_39 {dimension_numbers = #tpu.dot_dimension_numbers<[1], [0], [0], [1], [0, 0, 1, 1], [], []>} : vector<8x128xbf16>, vector<128x512xbf16>, vector<8x512xf32> -> vector<8x512xf32>
      %42 = arith.addf %37, %41 : vector<8x512xf32>
      %43 = vector.extract_strided_slice %42 {offsets = [0, 0], sizes = [8, 128], strides = [1, 1]} : vector<8x512xf32> to vector<8x128xf32>
      %44 = arith.negf %43 : vector<8x128xf32>
      %45 = math.exp %44 : vector<8x128xf32>
      %cst_40 = arith.constant 1.000000e+00 : f32
      %46 = vector.broadcast %cst_40 : f32 to vector<8x128xf32>
      %47 = arith.addf %46, %45 : vector<8x128xf32>
      %48 = arith.divf %46, %47 : vector<8x128xf32>
      %49 = vector.extract_strided_slice %42 {offsets = [0, 128], sizes = [8, 128], strides = [1, 1]} : vector<8x512xf32> to vector<8x128xf32>
      %50 = arith.negf %49 : vector<8x128xf32>
      %51 = math.exp %50 : vector<8x128xf32>
      %cst_41 = arith.constant 1.000000e+00 : f32
      %52 = vector.broadcast %cst_41 : f32 to vector<8x128xf32>
      %53 = arith.addf %52, %51 : vector<8x128xf32>
      %54 = arith.divf %52, %53 : vector<8x128xf32>
      %55 = vector.extract_strided_slice %42 {offsets = [0, 256], sizes = [8, 128], strides = [1, 1]} : vector<8x512xf32> to vector<8x128xf32>
      %56 = math.tanh %55 : vector<8x128xf32>
      %57 = vector.extract_strided_slice %42 {offsets = [0, 384], sizes = [8, 128], strides = [1, 1]} : vector<8x512xf32> to vector<8x128xf32>
      %58 = arith.negf %57 : vector<8x128xf32>
      %59 = math.exp %58 : vector<8x128xf32>
      %cst_42 = arith.constant 1.000000e+00 : f32
      %60 = vector.broadcast %cst_42 : f32 to vector<8x128xf32>
      %61 = arith.addf %60, %59 : vector<8x128xf32>
      %62 = arith.divf %60, %61 : vector<8x128xf32>
      %63 = arith.mulf %54, %arg10 : vector<8x128xf32>
      %64 = arith.mulf %48, %56 : vector<8x128xf32>
      %65 = arith.addf %63, %64 : vector<8x128xf32>
      %66 = math.tanh %65 : vector<8x128xf32>
      %67 = arith.mulf %62, %66 : vector<8x128xf32>
      %68 = arith.index_cast %arg8 : i32 to index
      %c0_43 = arith.constant 0 : index
      %c0_44 = arith.constant 0 : index
      %69 = vector.load %arg6[%68, %c0_43, %c0_44] : memref<16x8x128xf32, #tpu.memory_space<vmem>>, vector<1x8x128xf32>
      %70 = vector.shape_cast %69 : vector<1x8x128xf32> to vector<8x128xf32>
      %71 = vector.shape_cast %67 : vector<8x128xf32> to vector<1x8x128xf32>
      tpu.vector_store %arg6[%68, %c0_43, %c0_44], %71 {strides = array<i32>} : memref<16x8x128xf32, #tpu.memory_space<vmem>>, vector<1x8x128xf32>,
      scf.yield %67, %65 : vector<8x128xf32>, vector<8x128xf32>
    }
    %c16_i32_16 = arith.constant 16 : i32
    %c0_17 = arith.constant 0 : index
    %c0_18 = arith.constant 0 : index
    %c0_19 = arith.constant 0 : index
    %20 = vector.load %arg6[%c0_17, %c0_18, %c0_19] : memref<16x8x128xf32, #tpu.memory_space<vmem>>, vector<16x8x128xf32>
    %21 = vector.shape_cast %20 : vector<16x8x128xf32> to vector<128x128xf32>
    %22 = arith.truncf %21 : vector<128x128xf32> to vector<128x128xbf16>
    %c1 = arith.constant 1 : index
    %c0_20 = arith.constant 0 : index
    %c0_21 = arith.constant 0 : index
    %23 = vector.load %arg3[%c1, %c0_20, %c0_21] : memref<2x128x512xbf16, #tpu.memory_space<vmem>>, vector<1x128x512xbf16>
    %24 = vector.shape_cast %23 : vector<1x128x512xbf16> to vector<128x512xbf16>
    %cst_22 = arith.constant dense<0.000000e+00> : vector<128x512xf32>
    %25 = tpu.matmul %22, %24, %cst_22 {dimension_numbers = #tpu.dot_dimension_numbers<[1], [0], [0], [1], [0, 0, 1, 1], [], []>} : vector<128x128xbf16>, vector<128x512xbf16>, vector<128x512xf32> -> vector<128x512xf32>
    %c1_23 = arith.constant 1 : index
    %c0_24 = arith.constant 0 : index
    %c0_25 = arith.constant 0 : index
    %26 = vector.load %arg5[%c1_23, %c0_24, %c0_25] : memref<2x1x512xf32, #tpu.memory_space<vmem>>, vector<1x1x512xf32>
    %27 = vector.shape_cast %26 : vector<1x1x512xf32> to vector<1x512xf32>
    %28 = vector.broadcast %27 : vector<1x512xf32> to vector<128x512xf32>
    %29 = arith.addf %25, %28 : vector<128x512xf32>
    %30 = vector.shape_cast %29 : vector<128x512xf32> to vector<16x8x512xf32>
    %c0_26 = arith.constant 0 : index
    %c0_27 = arith.constant 0 : index
    %c0_28 = arith.constant 0 : index
    %31 = vector.load %arg7[%c0_26, %c0_27, %c0_28] : memref<16x8x512xf32, #tpu.memory_space<vmem>>, vector<16x8x512xf32>
    tpu.vector_store %arg7[%c0_26, %c0_27, %c0_28], %30 {strides = array<i32>} : memref<16x8x512xf32, #tpu.memory_space<vmem>>, vector<16x8x512xf32>,
    %cst_29 = arith.constant 0.000000e+00 : f32
    %32 = vector.broadcast %cst_29 : f32 to vector<8x128xf32>
    %c0_i32_30 = arith.constant 0 : i32
    %c16_i32_31 = arith.constant 16 : i32
    %33 = arith.addi %c0_i32_30, %c16_i32_31 : i32
    %c1_i32_32 = arith.constant 1 : i32
    %34:2 = scf.for %arg8 = %c0_i32_30 to %33 step %c1_i32_32 iter_args(%arg9 = %32, %arg10 = %32) -> (vector<8x128xf32>, vector<8x128xf32>)  : i32 {
      %35 = arith.index_cast %arg8 : i32 to index
      %c0_34 = arith.constant 0 : index
      %c0_35 = arith.constant 0 : index
      %36 = vector.load %arg7[%35, %c0_34, %c0_35] : memref<16x8x512xf32, #tpu.memory_space<vmem>>, vector<1x8x512xf32>
      %37 = vector.shape_cast %36 : vector<1x8x512xf32> to vector<8x512xf32>
      %38 = arith.truncf %arg9 : vector<8x128xf32> to vector<8x128xbf16>
      %c1_36 = arith.constant 1 : index
      %c0_37 = arith.constant 0 : index
      %c0_38 = arith.constant 0 : index
      %39 = vector.load %arg4[%c1_36, %c0_37, %c0_38] : memref<2x128x512xbf16, #tpu.memory_space<vmem>>, vector<1x128x512xbf16>
      %40 = vector.shape_cast %39 : vector<1x128x512xbf16> to vector<128x512xbf16>
      %cst_39 = arith.constant dense<0.000000e+00> : vector<8x512xf32>
      %41 = tpu.matmul %38, %40, %cst_39 {dimension_numbers = #tpu.dot_dimension_numbers<[1], [0], [0], [1], [0, 0, 1, 1], [], []>} : vector<8x128xbf16>, vector<128x512xbf16>, vector<8x512xf32> -> vector<8x512xf32>
      %42 = arith.addf %37, %41 : vector<8x512xf32>
      %43 = vector.extract_strided_slice %42 {offsets = [0, 0], sizes = [8, 128], strides = [1, 1]} : vector<8x512xf32> to vector<8x128xf32>
      %44 = arith.negf %43 : vector<8x128xf32>
      %45 = math.exp %44 : vector<8x128xf32>
      %cst_40 = arith.constant 1.000000e+00 : f32
      %46 = vector.broadcast %cst_40 : f32 to vector<8x128xf32>
      %47 = arith.addf %46, %45 : vector<8x128xf32>
      %48 = arith.divf %46, %47 : vector<8x128xf32>
      %49 = vector.extract_strided_slice %42 {offsets = [0, 128], sizes = [8, 128], strides = [1, 1]} : vector<8x512xf32> to vector<8x128xf32>
      %50 = arith.negf %49 : vector<8x128xf32>
      %51 = math.exp %50 : vector<8x128xf32>
      %cst_41 = arith.constant 1.000000e+00 : f32
      %52 = vector.broadcast %cst_41 : f32 to vector<8x128xf32>
      %53 = arith.addf %52, %51 : vector<8x128xf32>
      %54 = arith.divf %52, %53 : vector<8x128xf32>
      %55 = vector.extract_strided_slice %42 {offsets = [0, 256], sizes = [8, 128], strides = [1, 1]} : vector<8x512xf32> to vector<8x128xf32>
      %56 = math.tanh %55 : vector<8x128xf32>
      %57 = vector.extract_strided_slice %42 {offsets = [0, 384], sizes = [8, 128], strides = [1, 1]} : vector<8x512xf32> to vector<8x128xf32>
      %58 = arith.negf %57 : vector<8x128xf32>
      %59 = math.exp %58 : vector<8x128xf32>
      %cst_42 = arith.constant 1.000000e+00 : f32
      %60 = vector.broadcast %cst_42 : f32 to vector<8x128xf32>
      %61 = arith.addf %60, %59 : vector<8x128xf32>
      %62 = arith.divf %60, %61 : vector<8x128xf32>
      %63 = arith.mulf %54, %arg10 : vector<8x128xf32>
      %64 = arith.mulf %48, %56 : vector<8x128xf32>
      %65 = arith.addf %63, %64 : vector<8x128xf32>
      %66 = math.tanh %65 : vector<8x128xf32>
      %67 = arith.mulf %62, %66 : vector<8x128xf32>
      %68 = arith.index_cast %arg8 : i32 to index
      %c0_43 = arith.constant 0 : index
      %c0_44 = arith.constant 0 : index
      %69 = vector.load %arg6[%68, %c0_43, %c0_44] : memref<16x8x128xf32, #tpu.memory_space<vmem>>, vector<1x8x128xf32>
      %70 = vector.shape_cast %69 : vector<1x8x128xf32> to vector<8x128xf32>
      %71 = vector.shape_cast %67 : vector<8x128xf32> to vector<1x8x128xf32>
      tpu.vector_store %arg6[%68, %c0_43, %c0_44], %71 {strides = array<i32>} : memref<16x8x128xf32, #tpu.memory_space<vmem>>, vector<1x8x128xf32>,
      scf.yield %67, %65 : vector<8x128xf32>, vector<8x128xf32>
    }
    %c16_i32_33 = arith.constant 16 : i32
    return
  }
}

module attributes {stable_mosaic.version = 11 : i64} {
  func.func @bert_fc_kernel(%arg0: memref<8x16x128xf32, #tpu.memory_space<vmem>>, %arg1: memref<16x1x16xf32, #tpu.memory_space<vmem>>, %arg2: memref<128x128xbf16, #tpu.memory_space<vmem>>, %arg3: memref<1x128xf32, #tpu.memory_space<vmem>>, %arg4: memref<128x128xbf16, #tpu.memory_space<vmem>>, %arg5: memref<1x128xf32, #tpu.memory_space<vmem>>, %arg6: memref<128x128xbf16, #tpu.memory_space<vmem>>, %arg7: memref<1x128xf32, #tpu.memory_space<vmem>>, %arg8: memref<128x128xbf16, #tpu.memory_space<vmem>>, %arg9: memref<1x128xf32, #tpu.memory_space<vmem>>, %arg10: memref<1x128xf32, #tpu.memory_space<vmem>>, %arg11: memref<1x128xf32, #tpu.memory_space<vmem>>, %arg12: memref<128x128xbf16, #tpu.memory_space<vmem>>, %arg13: memref<1x128xf32, #tpu.memory_space<vmem>>, %arg14: memref<128x128xbf16, #tpu.memory_space<vmem>>, %arg15: memref<1x128xf32, #tpu.memory_space<vmem>>, %arg16: memref<1x128xf32, #tpu.memory_space<vmem>>, %arg17: memref<1x128xf32, #tpu.memory_space<vmem>>, %arg18: memref<1x128xf32, #tpu.memory_space<vmem>>, %arg19: memref<1x1xf32, #tpu.memory_space<vmem>>, %arg20: memref<8x16xf32, #tpu.memory_space<vmem>>) attributes {dimension_semantics = [], scalar_prefetch = 0 : i64, scratch_operands = 0 : i64, tpu.core_type = #tpu.core_type<tc>} {
    %c0 = arith.constant 0 : index
    %c0_0 = arith.constant 0 : index
    %c0_1 = arith.constant 0 : index
    %0 = vector.load %arg0[%c0, %c0_0, %c0_1] : memref<8x16x128xf32, #tpu.memory_space<vmem>>, vector<8x16x128xf32>
    %1 = vector.shape_cast %0 : vector<8x16x128xf32> to vector<128x128xf32>
    %2 = arith.truncf %1 : vector<128x128xf32> to vector<128x128xbf16>
    %c0_2 = arith.constant 0 : index
    %c0_3 = arith.constant 0 : index
    %3 = vector.load %arg2[%c0_2, %c0_3] : memref<128x128xbf16, #tpu.memory_space<vmem>>, vector<128x128xbf16>
    %cst = arith.constant dense<0.000000e+00> : vector<128x128xf32>
    %4 = tpu.matmul %2, %3, %cst {dimension_numbers = #tpu.dot_dimension_numbers<[1], [0], [0], [1], [0, 0, 1, 1], [], []>} : vector<128x128xbf16>, vector<128x128xbf16>, vector<128x128xf32> -> vector<128x128xf32>
    %c0_4 = arith.constant 0 : index
    %c0_5 = arith.constant 0 : index
    %5 = vector.load %arg3[%c0_4, %c0_5] : memref<1x128xf32, #tpu.memory_space<vmem>>, vector<1x128xf32>
    %6 = vector.broadcast %5 : vector<1x128xf32> to vector<128x128xf32>
    %7 = arith.addf %4, %6 : vector<128x128xf32>
    %8 = arith.truncf %7 : vector<128x128xf32> to vector<128x128xbf16>
    %c0_6 = arith.constant 0 : index
    %c0_7 = arith.constant 0 : index
    %9 = vector.load %arg4[%c0_6, %c0_7] : memref<128x128xbf16, #tpu.memory_space<vmem>>, vector<128x128xbf16>
    %cst_8 = arith.constant dense<0.000000e+00> : vector<128x128xf32>
    %10 = tpu.matmul %2, %9, %cst_8 {dimension_numbers = #tpu.dot_dimension_numbers<[1], [0], [0], [1], [0, 0, 1, 1], [], []>} : vector<128x128xbf16>, vector<128x128xbf16>, vector<128x128xf32> -> vector<128x128xf32>
    %c0_9 = arith.constant 0 : index
    %c0_10 = arith.constant 0 : index
    %11 = vector.load %arg5[%c0_9, %c0_10] : memref<1x128xf32, #tpu.memory_space<vmem>>, vector<1x128xf32>
    %12 = vector.broadcast %11 : vector<1x128xf32> to vector<128x128xf32>
    %13 = arith.addf %10, %12 : vector<128x128xf32>
    %14 = arith.truncf %13 : vector<128x128xf32> to vector<128x128xbf16>
    %c0_11 = arith.constant 0 : index
    %c0_12 = arith.constant 0 : index
    %15 = vector.load %arg6[%c0_11, %c0_12] : memref<128x128xbf16, #tpu.memory_space<vmem>>, vector<128x128xbf16>
    %cst_13 = arith.constant dense<0.000000e+00> : vector<128x128xf32>
    %16 = tpu.matmul %2, %15, %cst_13 {dimension_numbers = #tpu.dot_dimension_numbers<[1], [0], [0], [1], [0, 0, 1, 1], [], []>} : vector<128x128xbf16>, vector<128x128xbf16>, vector<128x128xf32> -> vector<128x128xf32>
    %c0_14 = arith.constant 0 : index
    %c0_15 = arith.constant 0 : index
    %17 = vector.load %arg7[%c0_14, %c0_15] : memref<1x128xf32, #tpu.memory_space<vmem>>, vector<1x128xf32>
    %18 = vector.broadcast %17 : vector<1x128xf32> to vector<128x128xf32>
    %19 = arith.addf %16, %18 : vector<128x128xf32>
    %20 = arith.truncf %19 : vector<128x128xf32> to vector<128x128xbf16>
    %21 = vector.extract_strided_slice %8 {offsets = [0, 0], sizes = [128, 64], strides = [1, 1]} : vector<128x128xbf16> to vector<128x64xbf16>
    %22 = vector.shape_cast %21 : vector<128x64xbf16> to vector<8x16x64xbf16>
    %23 = vector.extract_strided_slice %8 {offsets = [0, 64], sizes = [128, 64], strides = [1, 1]} : vector<128x128xbf16> to vector<128x64xbf16>
    %24 = vector.shape_cast %23 : vector<128x64xbf16> to vector<8x16x64xbf16>
    %25 = vector.shape_cast %22 : vector<8x16x64xbf16> to vector<1x8x16x64xbf16>
    %26 = vector.shape_cast %24 : vector<8x16x64xbf16> to vector<1x8x16x64xbf16>
    %27 = tpu.concatenate %25, %26 in 0 : vector<1x8x16x64xbf16>, vector<1x8x16x64xbf16> -> vector<2x8x16x64xbf16>
    %28 = vector.shape_cast %27 : vector<2x8x16x64xbf16> to vector<16x16x64xbf16>
    %29 = vector.extract_strided_slice %14 {offsets = [0, 0], sizes = [128, 64], strides = [1, 1]} : vector<128x128xbf16> to vector<128x64xbf16>
    %30 = vector.shape_cast %29 : vector<128x64xbf16> to vector<8x16x64xbf16>
    %31 = vector.extract_strided_slice %14 {offsets = [0, 64], sizes = [128, 64], strides = [1, 1]} : vector<128x128xbf16> to vector<128x64xbf16>
    %32 = vector.shape_cast %31 : vector<128x64xbf16> to vector<8x16x64xbf16>
    %33 = vector.shape_cast %30 : vector<8x16x64xbf16> to vector<1x8x16x64xbf16>
    %34 = vector.shape_cast %32 : vector<8x16x64xbf16> to vector<1x8x16x64xbf16>
    %35 = tpu.concatenate %33, %34 in 0 : vector<1x8x16x64xbf16>, vector<1x8x16x64xbf16> -> vector<2x8x16x64xbf16>
    %36 = vector.shape_cast %35 : vector<2x8x16x64xbf16> to vector<16x16x64xbf16>
    %37 = vector.extract_strided_slice %20 {offsets = [0, 0], sizes = [128, 64], strides = [1, 1]} : vector<128x128xbf16> to vector<128x64xbf16>
    %38 = vector.shape_cast %37 : vector<128x64xbf16> to vector<8x16x64xbf16>
    %39 = vector.extract_strided_slice %20 {offsets = [0, 64], sizes = [128, 64], strides = [1, 1]} : vector<128x128xbf16> to vector<128x64xbf16>
    %40 = vector.shape_cast %39 : vector<128x64xbf16> to vector<8x16x64xbf16>
    %41 = vector.shape_cast %38 : vector<8x16x64xbf16> to vector<1x8x16x64xbf16>
    %42 = vector.shape_cast %40 : vector<8x16x64xbf16> to vector<1x8x16x64xbf16>
    %43 = tpu.concatenate %41, %42 in 0 : vector<1x8x16x64xbf16>, vector<1x8x16x64xbf16> -> vector<2x8x16x64xbf16>
    %44 = vector.shape_cast %43 : vector<2x8x16x64xbf16> to vector<16x16x64xbf16>
    "tpu.trace_start"() <{level = 10 : i32, message = "gqd,gkd->gqk"}> : () -> ()
    %cst_16 = arith.constant dense<0.000000e+00> : vector<16x16x16xf32>
    %45 = tpu.matmul %28, %36, %cst_16 {dimension_numbers = #tpu.dot_dimension_numbers<[2], [2], [1], [1], [0, 0, 0, 1, 1, 1], [0], [0]>} : vector<16x16x64xbf16>, vector<16x16x64xbf16>, vector<16x16x16xf32> -> vector<16x16x16xf32>
    "tpu.trace_stop"() : () -> ()
    %cst_17 = arith.constant 1.250000e-01 : f32
    %46 = vector.broadcast %cst_17 : f32 to vector<16x16x16xf32>
    %47 = arith.mulf %45, %46 : vector<16x16x16xf32>
    %c0_18 = arith.constant 0 : index
    %c0_19 = arith.constant 0 : index
    %c0_20 = arith.constant 0 : index
    %48 = vector.load %arg1[%c0_18, %c0_19, %c0_20] : memref<16x1x16xf32, #tpu.memory_space<vmem>>, vector<16x1x16xf32>
    %49 = vector.broadcast %48 : vector<16x1x16xf32> to vector<16x16x16xf32>
    %50 = arith.addf %47, %49 : vector<16x16x16xf32>
    %cst_21 = arith.constant dense<0xFF800000> : vector<16x16xf32>
    %51 = vector.multi_reduction <maximumf>, %50, %cst_21 [2] : vector<16x16x16xf32> to vector<16x16xf32>
    %52 = vector.shape_cast %51 : vector<16x16xf32> to vector<16x16x1xf32>
    %53 = vector.broadcast %52 : vector<16x16x1xf32> to vector<16x16x16xf32>
    %54 = arith.subf %50, %53 : vector<16x16x16xf32>
    %55 = math.exp %54 : vector<16x16x16xf32>
    %cst_22 = arith.constant dense<0.000000e+00> : vector<16x16xf32>
    %56 = vector.multi_reduction <add>, %55, %cst_22 [2] : vector<16x16x16xf32> to vector<16x16xf32>
    %57 = vector.shape_cast %56 : vector<16x16xf32> to vector<16x16x1xf32>
    %58 = tpu.reciprocal %57 {approx = true} : vector<16x16x1xf32> -> vector<16x16x1xf32>
    %59 = vector.broadcast %58 : vector<16x16x1xf32> to vector<16x16x16xf32>
    %60 = arith.mulf %55, %59 : vector<16x16x16xf32>
    %61 = arith.truncf %60 : vector<16x16x16xf32> to vector<16x16x16xbf16>
    "tpu.trace_start"() <{level = 10 : i32, message = "gqk,gkd->gqd"}> : () -> ()
    %cst_23 = arith.constant dense<0.000000e+00> : vector<16x16x64xf32>
    %62 = tpu.matmul %61, %44, %cst_23 {dimension_numbers = #tpu.dot_dimension_numbers<[2], [1], [1], [2], [0, 0, 0, 1, 1, 2], [0], [0]>} : vector<16x16x16xbf16>, vector<16x16x64xbf16>, vector<16x16x64xf32> -> vector<16x16x64xf32>
    "tpu.trace_stop"() : () -> ()
    %63 = vector.shape_cast %62 : vector<16x16x64xf32> to vector<2x8x16x64xf32>
    %64 = vector.extract_strided_slice %63 {offsets = [0, 0, 0, 0], sizes = [1, 8, 16, 64], strides = [1, 1, 1, 1]} : vector<2x8x16x64xf32> to vector<1x8x16x64xf32>
    %65 = vector.shape_cast %64 : vector<1x8x16x64xf32> to vector<8x16x64xf32>
    %66 = vector.shape_cast %65 : vector<8x16x64xf32> to vector<128x64xf32>
    %67 = vector.extract_strided_slice %63 {offsets = [1, 0, 0, 0], sizes = [1, 8, 16, 64], strides = [1, 1, 1, 1]} : vector<2x8x16x64xf32> to vector<1x8x16x64xf32>
    %68 = vector.shape_cast %67 : vector<1x8x16x64xf32> to vector<8x16x64xf32>
    %69 = vector.shape_cast %68 : vector<8x16x64xf32> to vector<128x64xf32>
    %70 = tpu.concatenate %66, %69 in 1 : vector<128x64xf32>, vector<128x64xf32> -> vector<128x128xf32>
    %71 = arith.truncf %70 : vector<128x128xf32> to vector<128x128xbf16>
    %c0_24 = arith.constant 0 : index
    %c0_25 = arith.constant 0 : index
    %72 = vector.load %arg8[%c0_24, %c0_25] : memref<128x128xbf16, #tpu.memory_space<vmem>>, vector<128x128xbf16>
    %cst_26 = arith.constant dense<0.000000e+00> : vector<128x128xf32>
    %73 = tpu.matmul %71, %72, %cst_26 {dimension_numbers = #tpu.dot_dimension_numbers<[1], [0], [0], [1], [0, 0, 1, 1], [], []>} : vector<128x128xbf16>, vector<128x128xbf16>, vector<128x128xf32> -> vector<128x128xf32>
    %c0_27 = arith.constant 0 : index
    %c0_28 = arith.constant 0 : index
    %74 = vector.load %arg9[%c0_27, %c0_28] : memref<1x128xf32, #tpu.memory_space<vmem>>, vector<1x128xf32>
    %75 = vector.broadcast %74 : vector<1x128xf32> to vector<128x128xf32>
    %76 = arith.addf %73, %75 : vector<128x128xf32>
    %77 = arith.addf %76, %1 : vector<128x128xf32>
    %c0_29 = arith.constant 0 : index
    %c0_30 = arith.constant 0 : index
    %78 = vector.load %arg10[%c0_29, %c0_30] : memref<1x128xf32, #tpu.memory_space<vmem>>, vector<1x128xf32>
    %c0_31 = arith.constant 0 : index
    %c0_32 = arith.constant 0 : index
    %79 = vector.load %arg11[%c0_31, %c0_32] : memref<1x128xf32, #tpu.memory_space<vmem>>, vector<1x128xf32>
    %cst_33 = arith.constant dense<0.000000e+00> : vector<128xf32>
    %80 = vector.multi_reduction <add>, %77, %cst_33 [1] : vector<128x128xf32> to vector<128xf32>
    %81 = vector.shape_cast %80 : vector<128xf32> to vector<128x1xf32>
    %cst_34 = arith.constant 1.280000e+02 : f32
    %82 = vector.broadcast %cst_34 : f32 to vector<128x1xf32>
    %83 = arith.divf %81, %82 : vector<128x1xf32>
    %84 = vector.broadcast %83 : vector<128x1xf32> to vector<128x128xf32>
    %85 = arith.subf %77, %84 : vector<128x128xf32>
    %86 = arith.mulf %85, %85 : vector<128x128xf32>
    %cst_35 = arith.constant dense<0.000000e+00> : vector<128xf32>
    %87 = vector.multi_reduction <add>, %86, %cst_35 [1] : vector<128x128xf32> to vector<128xf32>
    %88 = vector.shape_cast %87 : vector<128xf32> to vector<128x1xf32>
    %cst_36 = arith.constant 1.280000e+02 : f32
    %89 = vector.broadcast %cst_36 : f32 to vector<128x1xf32>
    %90 = arith.divf %88, %89 : vector<128x1xf32>
    %91 = vector.broadcast %83 : vector<128x1xf32> to vector<128x128xf32>
    %92 = arith.subf %77, %91 : vector<128x128xf32>
    %cst_37 = arith.constant 9.99999996E-13 : f32
    %93 = vector.broadcast %cst_37 : f32 to vector<128x1xf32>
    %94 = arith.addf %90, %93 : vector<128x1xf32>
    %95 = math.rsqrt %94 : vector<128x1xf32>
    %96 = vector.broadcast %95 : vector<128x1xf32> to vector<128x128xf32>
    %97 = arith.mulf %92, %96 : vector<128x128xf32>
    %98 = vector.broadcast %78 : vector<1x128xf32> to vector<128x128xf32>
    %99 = arith.mulf %97, %98 : vector<128x128xf32>
    %100 = vector.broadcast %79 : vector<1x128xf32> to vector<128x128xf32>
    %101 = arith.addf %99, %100 : vector<128x128xf32>
    %102 = arith.truncf %101 : vector<128x128xf32> to vector<128x128xbf16>
    %c0_38 = arith.constant 0 : index
    %c0_39 = arith.constant 0 : index
    %103 = vector.load %arg12[%c0_38, %c0_39] : memref<128x128xbf16, #tpu.memory_space<vmem>>, vector<128x128xbf16>
    %cst_40 = arith.constant dense<0.000000e+00> : vector<128x128xf32>
    %104 = tpu.matmul %102, %103, %cst_40 {dimension_numbers = #tpu.dot_dimension_numbers<[1], [0], [0], [1], [0, 0, 1, 1], [], []>} : vector<128x128xbf16>, vector<128x128xbf16>, vector<128x128xf32> -> vector<128x128xf32>
    %c0_41 = arith.constant 0 : index
    %c0_42 = arith.constant 0 : index
    %105 = vector.load %arg13[%c0_41, %c0_42] : memref<1x128xf32, #tpu.memory_space<vmem>>, vector<1x128xf32>
    %106 = vector.broadcast %105 : vector<1x128xf32> to vector<128x128xf32>
    %107 = arith.addf %104, %106 : vector<128x128xf32>
    %cst_43 = arith.constant 5.000000e-01 : f32
    %108 = vector.broadcast %cst_43 : f32 to vector<128x128xf32>
    %109 = arith.mulf %108, %107 : vector<128x128xf32>
    %cst_44 = arith.constant 4.471500e-02 : f32
    %110 = vector.broadcast %cst_44 : f32 to vector<128x128xf32>
    %111 = arith.mulf %110, %107 : vector<128x128xf32>
    %112 = arith.mulf %111, %107 : vector<128x128xf32>
    %113 = arith.mulf %112, %107 : vector<128x128xf32>
    %114 = arith.addf %107, %113 : vector<128x128xf32>
    %cst_45 = arith.constant 0.797884583 : f32
    %115 = vector.broadcast %cst_45 : f32 to vector<128x128xf32>
    %116 = arith.mulf %115, %114 : vector<128x128xf32>
    %117 = math.tanh %116 : vector<128x128xf32>
    %cst_46 = arith.constant 1.000000e+00 : f32
    %118 = vector.broadcast %cst_46 : f32 to vector<128x128xf32>
    %119 = arith.addf %118, %117 : vector<128x128xf32>
    %120 = arith.mulf %109, %119 : vector<128x128xf32>
    %121 = arith.truncf %120 : vector<128x128xf32> to vector<128x128xbf16>
    %c0_47 = arith.constant 0 : index
    %c0_48 = arith.constant 0 : index
    %122 = vector.load %arg14[%c0_47, %c0_48] : memref<128x128xbf16, #tpu.memory_space<vmem>>, vector<128x128xbf16>
    %cst_49 = arith.constant dense<0.000000e+00> : vector<128x128xf32>
    %123 = tpu.matmul %121, %122, %cst_49 {dimension_numbers = #tpu.dot_dimension_numbers<[1], [0], [0], [1], [0, 0, 1, 1], [], []>} : vector<128x128xbf16>, vector<128x128xbf16>, vector<128x128xf32> -> vector<128x128xf32>
    %c0_50 = arith.constant 0 : index
    %c0_51 = arith.constant 0 : index
    %124 = vector.load %arg15[%c0_50, %c0_51] : memref<1x128xf32, #tpu.memory_space<vmem>>, vector<1x128xf32>
    %125 = vector.broadcast %124 : vector<1x128xf32> to vector<128x128xf32>
    %126 = arith.addf %123, %125 : vector<128x128xf32>
    %127 = arith.addf %126, %101 : vector<128x128xf32>
    %c0_52 = arith.constant 0 : index
    %c0_53 = arith.constant 0 : index
    %128 = vector.load %arg16[%c0_52, %c0_53] : memref<1x128xf32, #tpu.memory_space<vmem>>, vector<1x128xf32>
    %c0_54 = arith.constant 0 : index
    %c0_55 = arith.constant 0 : index
    %129 = vector.load %arg17[%c0_54, %c0_55] : memref<1x128xf32, #tpu.memory_space<vmem>>, vector<1x128xf32>
    %cst_56 = arith.constant dense<0.000000e+00> : vector<128xf32>
    %130 = vector.multi_reduction <add>, %127, %cst_56 [1] : vector<128x128xf32> to vector<128xf32>
    %131 = vector.shape_cast %130 : vector<128xf32> to vector<128x1xf32>
    %cst_57 = arith.constant 1.280000e+02 : f32
    %132 = vector.broadcast %cst_57 : f32 to vector<128x1xf32>
    %133 = arith.divf %131, %132 : vector<128x1xf32>
    %134 = vector.broadcast %133 : vector<128x1xf32> to vector<128x128xf32>
    %135 = arith.subf %127, %134 : vector<128x128xf32>
    %136 = arith.mulf %135, %135 : vector<128x128xf32>
    %cst_58 = arith.constant dense<0.000000e+00> : vector<128xf32>
    %137 = vector.multi_reduction <add>, %136, %cst_58 [1] : vector<128x128xf32> to vector<128xf32>
    %138 = vector.shape_cast %137 : vector<128xf32> to vector<128x1xf32>
    %cst_59 = arith.constant 1.280000e+02 : f32
    %139 = vector.broadcast %cst_59 : f32 to vector<128x1xf32>
    %140 = arith.divf %138, %139 : vector<128x1xf32>
    %141 = vector.broadcast %133 : vector<128x1xf32> to vector<128x128xf32>
    %142 = arith.subf %127, %141 : vector<128x128xf32>
    %cst_60 = arith.constant 9.99999996E-13 : f32
    %143 = vector.broadcast %cst_60 : f32 to vector<128x1xf32>
    %144 = arith.addf %140, %143 : vector<128x1xf32>
    %145 = math.rsqrt %144 : vector<128x1xf32>
    %146 = vector.broadcast %145 : vector<128x1xf32> to vector<128x128xf32>
    %147 = arith.mulf %142, %146 : vector<128x128xf32>
    %148 = vector.broadcast %128 : vector<1x128xf32> to vector<128x128xf32>
    %149 = arith.mulf %147, %148 : vector<128x128xf32>
    %150 = vector.broadcast %129 : vector<1x128xf32> to vector<128x128xf32>
    %151 = arith.addf %149, %150 : vector<128x128xf32>
    %152 = vector.shape_cast %151 : vector<128x128xf32> to vector<8x16x128xf32>
    %c0_61 = arith.constant 0 : index
    %c0_62 = arith.constant 0 : index
    %153 = vector.load %arg18[%c0_61, %c0_62] : memref<1x128xf32, #tpu.memory_space<vmem>>, vector<1x128xf32>
    %154 = vector.shape_cast %153 : vector<1x128xf32> to vector<1x1x128xf32>
    %155 = vector.broadcast %154 : vector<1x1x128xf32> to vector<8x16x128xf32>
    %156 = arith.mulf %152, %155 : vector<8x16x128xf32>
    %cst_63 = arith.constant dense<0.000000e+00> : vector<8x16xf32>
    %157 = vector.multi_reduction <add>, %156, %cst_63 [2] : vector<8x16x128xf32> to vector<8x16xf32>
    %c0_64 = arith.constant 0 : index
    %c0_65 = arith.constant 0 : index
    %158 = vector.load %arg19[%c0_64, %c0_65] : memref<1x1xf32, #tpu.memory_space<vmem>>, vector<1x1xf32>
    %159 = vector.broadcast %158 : vector<1x1xf32> to vector<8x16xf32>
    %160 = arith.addf %157, %159 : vector<8x16xf32>
    %161 = arith.negf %160 : vector<8x16xf32>
    %162 = math.exp %161 : vector<8x16xf32>
    %cst_66 = arith.constant 1.000000e+00 : f32
    %163 = vector.broadcast %cst_66 : f32 to vector<8x16xf32>
    %164 = arith.addf %163, %162 : vector<8x16xf32>
    %165 = arith.divf %163, %164 : vector<8x16xf32>
    %c0_67 = arith.constant 0 : index
    %c0_68 = arith.constant 0 : index
    %166 = vector.load %arg20[%c0_67, %c0_68] : memref<8x16xf32, #tpu.memory_space<vmem>>, vector<8x16xf32>
    tpu.vector_store %arg20[%c0_67, %c0_68], %165 {strides = array<i32>} : memref<8x16xf32, #tpu.memory_space<vmem>>, vector<8x16xf32>,
    return
  }
}

</mosaic_0001>

<bundles_post_ra>
// kernel: lstmattn_forward.2
= control target key start
LH: loop header
LB: loop body
LE: loop exit
PB: predicated region body
PF: predicated region fallthrough
CT: control target
= control target key end

     0   :  { %s3369_s23 = smov 0   ;;  %s4124_s1 = inlined_call_operand.vmem [shape: bf16[256,128], index: 1, kind: input, shape index: {}]   ;;  %s4125_s4 = inlined_call_operand.vmem [shape: bf16[2,128,512], index: 4, kind: input, shape index: {}]   ;;  %s4126_s6 = inlined_call_operand.vmem [shape: f32[16,8,128], index: 6, kind: output, shape index: {}]   ;;  %s4127_s2 = inlined_call_operand.vmem [shape: f32[1,128], index: 2, kind: input, shape index: {}]   ;;  %s4128_s0 = inlined_call_operand.vmem [shape: f32[128,256], index: 0, kind: input, shape index: {}]   ;;  %s4129_s3 = inlined_call_operand.vmem [shape: bf16[2,128,512], index: 3, kind: input, shape index: {}]   ;;  %s4130_s5 = inlined_call_operand.vmem [shape: f32[2,1,512], index: 5, kind: input, shape index: {}]  }
   0x1   :  { %v2614_v0 = vld [vmem:[%s4124_s1 + $0x38] sm:$0xff]  ;;  %v2613_v2 = vld [vmem:[%s4124_s1 + $0x30] sm:$0xff]  ;;  %v2612_v4 = vld [vmem:[%s4124_s1 + $0x28] sm:$0xff] }
   0x2   :  { %v2622_v1 = vld [vmem:[%s4124_s1 + $0x78] sm:$0xff]  ;;  %203 = vmatpush.bf16.msra.mxu0 %v2614_v0  ;;  %v2621_v3 = vld [vmem:[%s4124_s1 + $0x70] sm:$0xff]  ;;  %2753 = vmatpush.bf16.msra.mxu2 %v2614_v0  ;;  %v2620_v5 = vld [vmem:[%s4124_s1 + $0x68] sm:$0xff] }
   0x3   :  { %252 = vmatpush.bf16.msra.mxu1 %v2622_v1  ;;  %2761 = vmatpush.bf16.msra.mxu3 %v2622_v1  ;;  %v2611_v6 = vld [vmem:[%s4124_s1 + $0x20] sm:$0xff]  ;;  %v2610_v8 = vld [vmem:[%s4124_s1 + $0x18] sm:$0xff]  ;;  %v2609_v10 = vld [vmem:[%s4124_s1 + $0x10] sm:$0xff] }
   0x4   :  { %v2619_v7 = vld [vmem:[%s4124_s1 + $0x60] sm:$0xff]  ;;  %v2618_v9 = vld [vmem:[%s4124_s1 + $0x58] sm:$0xff]  ;;  %v2617_v11 = vld [vmem:[%s4124_s1 + $0x50] sm:$0xff] }
   0x5   :  { %v2608_v12 = vld [vmem:[%s4124_s1 + $0x8] sm:$0xff]  ;;  %v2607_v14 = vld [vmem:[%s4124_s1] sm:$0xff]  ;;  %v25_v17 = vld [vmem:[%s4128_s0 + $0x10] sm:$0xff] }
   0x6   :  { %204 = vmatpush.bf16.msra.mxu0 %v2613_v2  ;;  %2754 = vmatpush.bf16.msra.mxu2 %v2613_v2  ;;  %v2616_v13 = vld [vmem:[%s4124_s1 + $0x48] sm:$0xff]  ;;  %v2615_v15 = vld [vmem:[%s4124_s1 + $0x40] sm:$0xff]  ;;  %v26_v19 = vld [vmem:[%s4128_s0 + $0x18] sm:$0xff] }
   0x7   :  { %253 = vmatpush.bf16.msra.mxu1 %v2621_v3  ;;  %2762 = vmatpush.bf16.msra.mxu3 %v2621_v3  ;;  %v23_v16 = vld [vmem:[%s4128_s0] sm:$0xff]  ;;  %v24_v18 = vld [vmem:[%s4128_s0 + $0x8] sm:$0xff]  ;;  %v29_v23 = vld [vmem:[%s4128_s0 + $0x30] sm:$0xff] }
   0x8   :  { %v55_v20 = vpack.c.bf16 %v25_v17, %v23_v16  ;;  %v56_v21 = vpack.c.bf16 %v26_v19, %v24_v18  ;;  %v27_v22 = vld [vmem:[%s4128_s0 + $0x20] sm:$0xff]  ;;  %v28_v24 = vld [vmem:[%s4128_s0 + $0x28] sm:$0xff]  ;;  %v30_v25 = vld [vmem:[%s4128_s0 + $0x38] sm:$0xff] }
   0x9   :  { %v57_v26 = vpack.c.bf16 %v29_v23, %v27_v22  ;;  %v58_v27 = vpack.c.bf16 %v30_v25, %v28_v24  ;;  %v39_v28 = vld [vmem:[%s4128_s0 + $0x80] sm:$0xff]  ;;  %v41_v29 = vld [vmem:[%s4128_s0 + $0x90] sm:$0xff]  ;;  %v40_v31 = vld [vmem:[%s4128_s0 + $0x88] sm:$0xff] }
   0xa   :  { %205 = vmatpush.bf16.msra.mxu0 %v2612_v4  ;;  %2755 = vmatpush.bf16.msra.mxu2 %v2612_v4  ;;  %v63_v30 = vpack.c.bf16 %v41_v29, %v39_v28  ;;  %v42_v32 = vld [vmem:[%s4128_s0 + $0x98] sm:$0xff]  ;;  %v2132_v34 = vld [vmem:[%s4129_s3 + $0xe0] sm:$0xf]  ;;  %v2653_v35 = vld [vmem:[%s4129_s3 + $0xec] sm:$0xf0] }
   0xb   :  { %254 = vmatpush.bf16.msra.mxu1 %v2620_v5  ;;  %2763 = vmatpush.bf16.msra.mxu3 %v2620_v5  ;;  %v64_v33 = vpack.c.bf16 %v42_v32, %v40_v31  ;;  %v2651_v36 = vld [vmem:[%s4129_s3 + $0xe4] sm:$0xf]  ;;  %v2133_v37 = vor.u32 %v2653_v35, %v2132_v34  ;;  %v2134_v38 = vld [vmem:[%s4129_s3 + $0xf0] sm:$0xf0]  ;;  %v2140_v40 = vld [vmem:[%s4129_s3 + $0xe8] sm:$0xf] }
   0xc   :  { %v2137_v39 = vor.u32 %v2651_v36, %v2134_v38  ;;  %v2654_v41 = vld [vmem:[%s4129_s3 + $0xf4] sm:$0xf0]  ;;  %v2652_v42 = vld [vmem:[%s4129_s3 + $0xec] sm:$0xf]  ;;  %v2142_v44 = vld [vmem:[%s4129_s3 + $0xf8] sm:$0xf0] }
   0xd   :  { %v2141_v43 = vor.u32 %v2654_v41, %v2140_v40  ;;  %v2145_v45 = vor.u32 %v2652_v42, %v2142_v44  ;;  %v2116_v46 = vld [vmem:[%s4129_s3 + $0xc0] sm:$0xf]  ;;  %v2649_v47 = vld [vmem:[%s4129_s3 + $0xcc] sm:$0xf0]  ;;  %v2647_v48 = vld [vmem:[%s4129_s3 + $0xc4] sm:$0xf] }
   0xe   :  { %206 = vmatpush.bf16.msra.mxu0 %v2611_v6  ;;  %2756 = vmatpush.bf16.msra.mxu2 %v2611_v6  ;;  %v31_v49 = vld [vmem:[%s4128_s0 + $0x40] sm:$0xff]  ;;  %v33_v50 = vld [vmem:[%s4128_s0 + $0x50] sm:$0xff]  ;;  %v32_v51 = vld [vmem:[%s4128_s0 + $0x48] sm:$0xff]  ;;  %v2117_v53 = vor.u32 %v2649_v47, %v2116_v46 }
   0xf   :  { %255 = vmatpush.bf16.msra.mxu1 %v2619_v7  ;;  %2764 = vmatpush.bf16.msra.mxu3 %v2619_v7  ;;  %v34_v52 = vld [vmem:[%s4128_s0 + $0x58] sm:$0xff]  ;;  %v2118_v54 = vld [vmem:[%s4129_s3 + $0xd0] sm:$0xf0]  ;;  %v2124_v55 = vld [vmem:[%s4129_s3 + $0xc8] sm:$0xf]  ;;  %v59_v6 = vpack.c.bf16 %v33_v50, %v31_v49 }
  0x10   :  { %v2650_v56 = vld [vmem:[%s4129_s3 + $0xd4] sm:$0xf0]  ;;  %v2121_v57 = vor.u32 %v2647_v48, %v2118_v54  ;;  %v2648_v59 = vld [vmem:[%s4129_s3 + $0xcc] sm:$0xf]  ;;  %v2126_v60 = vld [vmem:[%s4129_s3 + $0xd8] sm:$0xf0]  ;;  %v60_v7 = vpack.c.bf16 %v34_v52, %v32_v51 }
  0x11   :  { %v2125_v58 = vor.u32 %v2650_v56, %v2124_v55  ;;  %v2100_v61 = vld [vmem:[%s4129_s3 + $0xa0] sm:$0xf]  ;;  %v2129_v62 = vor.u32 %v2648_v59, %v2126_v60  ;;  %v2645_v63 = vld [vmem:[%s4129_s3 + $0xac] sm:$0xf0]  ;;  %v2643_v0 = vld [vmem:[%s4129_s3 + $0xa4] sm:$0xf] }
  0x12   :  { %207 = vmatpush.bf16.msra.mxu0 %v2610_v8  ;;  %2757 = vmatpush.bf16.msra.mxu2 %v2610_v8  ;;  %v2102_v1 = vld [vmem:[%s4129_s3 + $0xb0] sm:$0xf0]  ;;  %v2101_v2 = vor.u32 %v2645_v63, %v2100_v61  ;;  %v43_v4 = vld [vmem:[%s4128_s0 + $0xa0] sm:$0xff]  ;;  %v44_v8 = vld [vmem:[%s4128_s0 + $0xa8] sm:$0xff] }
  0x13   :  { %256 = vmatpush.bf16.msra.mxu1 %v2618_v9  ;;  %2765 = vmatpush.bf16.msra.mxu3 %v2618_v9  ;;  %v2105_v3 = vor.u32 %v2643_v0, %v2102_v1  ;;  %v45_v5 = vld [vmem:[%s4128_s0 + $0xb0] sm:$0xff]  ;;  %v46_v9 = vld [vmem:[%s4128_s0 + $0xb8] sm:$0xff]  ;;  %v2084_v18 = vld [vmem:[%s4129_s3 + $0x80] sm:$0xf] }
  0x14   :  { %v2110_v16 = vld [vmem:[%s4129_s3 + $0xb8] sm:$0xf0]  ;;  %v2641_v19 = vld [vmem:[%s4129_s3 + $0x8c] sm:$0xf0]  ;;  %v2086_v22 = vld [vmem:[%s4129_s3 + $0x90] sm:$0xf0] }
  0x15   :  { %v2092_v23 = vld [vmem:[%s4129_s3 + $0x88] sm:$0xf]  ;;  %v2642_v24 = vld [vmem:[%s4129_s3 + $0x94] sm:$0xf0]  ;;  %v2094_v28 = vld [vmem:[%s4129_s3 + $0x98] sm:$0xf0] }
  0x16   :  { %208 = vmatpush.bf16.msra.mxu0 %v2609_v10  ;;  %2758 = vmatpush.bf16.msra.mxu2 %v2609_v10  ;;  %v65_v10 = vpack.c.bf16 %v45_v5, %v43_v4  ;;  %v2068_v29 = vld [vmem:[%s4129_s3 + $0x60] sm:$0xf]  ;;  %v37_v31 = vld [vmem:[%s4128_s0 + $0x70] sm:$0xff]  ;;  %v36_v32 = vld [vmem:[%s4128_s0 + $0x68] sm:$0xff] }
  0x17   :  { %257 = vmatpush.bf16.msra.mxu1 %v2617_v11  ;;  %2766 = vmatpush.bf16.msra.mxu3 %v2617_v11  ;;  %v66_v11 = vpack.c.bf16 %v46_v9, %v44_v8  ;;  %v2637_v35 = vld [vmem:[%s4129_s3 + $0x6c] sm:$0xf0]  ;;  %v2635_v36 = vld [vmem:[%s4129_s3 + $0x64] sm:$0xf]  ;;  %v2076_v40 = vld [vmem:[%s4129_s3 + $0x68] sm:$0xf] }
  0x18   :  { %v2069_v38 = vor.u32 %v2637_v35, %v2068_v29  ;;  %v2638_v41 = vld [vmem:[%s4129_s3 + $0x74] sm:$0xf0]  ;;  %v2636_v42 = vld [vmem:[%s4129_s3 + $0x6c] sm:$0xf]  ;;  %v49_v44 = vld [vmem:[%s4128_s0 + $0xd0] sm:$0xff] }
  0x19   :  { %v2078_v46 = vld [vmem:[%s4129_s3 + $0x78] sm:$0xf0]  ;;  %v2052_v47 = vld [vmem:[%s4129_s3 + $0x40] sm:$0xf]  ;;  %v2633_v48 = vld [vmem:[%s4129_s3 + $0x4c] sm:$0xf0] }
  0x1a   :  { %209 = vmatpush.bf16.msra.mxu0 %v2608_v12  ;;  %2759 = vmatpush.bf16.msra.mxu2 %v2608_v12  ;;  %v2108_v12 = vld [vmem:[%s4129_s3 + $0xa8] sm:$0xf]  ;;  %v2081_v50 = vor.u32 %v2636_v42, %v2078_v46  ;;  %v2631_v51 = vld [vmem:[%s4129_s3 + $0x44] sm:$0xf]  ;;  %v2054_v52 = vld [vmem:[%s4129_s3 + $0x50] sm:$0xf0]  ;;  %v2053_v54 = vor.u32 %v2633_v48, %v2052_v47 }
  0x1b   :  { %258 = vmatpush.bf16.msra.mxu1 %v2616_v13  ;;  %2767 = vmatpush.bf16.msra.mxu3 %v2616_v13  ;;  %v2646_v13 = vld [vmem:[%s4129_s3 + $0xb4] sm:$0xf0]  ;;  %v48_v49 = vld [vmem:[%s4128_s0 + $0xc8] sm:$0xff]  ;;  %v2036_v61 = vld [vmem:[%s4129_s3 + $0x20] sm:$0xf]  ;;  %v2057_v63 = vor.u32 %v2631_v51, %v2054_v52 }
  0x1c   :  { %v2634_v55 = vld [vmem:[%s4129_s3 + $0x54] sm:$0xf0]  ;;  %v2632_v56 = vld [vmem:[%s4129_s3 + $0x4c] sm:$0xf]  ;;  %v2038_v4 = vld [vmem:[%s4129_s3 + $0x30] sm:$0xf0] }
  0x1d   :  { %v50_v60 = vld [vmem:[%s4128_s0 + $0xd8] sm:$0xff]  ;;  %v51_v8 = vld [vmem:[%s4128_s0 + $0xe0] sm:$0xff]  ;;  %v53_v9 = vld [vmem:[%s4128_s0 + $0xf0] sm:$0xff] }
  0x1e   :  { %210 = vmatpush.bf16.msra.mxu0 %v2607_v14  ;;  %2760 = vmatpush.bf16.msra.mxu2 %v2607_v14  ;;  %v2644_v14 = vld [vmem:[%s4129_s3 + $0xac] sm:$0xf]  ;;  %v68_v5 = vpack.c.bf16 %v50_v60, %v48_v49 }
  0x1f   :  { %259 = vmatpush.bf16.msra.mxu1 %v2615_v15  ;;  %2768 = vmatpush.bf16.msra.mxu3 %v2615_v15  ;;  %v2109_v15 = vor.u32 %v2646_v13, %v2108_v12  ;;  %v2113_v17 = vor.u32 %v2644_v14, %v2110_v16  ;;  %v69_v12 = vpack.c.bf16 %v53_v9, %v51_v8  ;;  %v2044_v14 = vld [vmem:[%s4129_s3 + $0x28] sm:$0xf]  ;;  %v2628_v16 = vld [vmem:[%s4129_s3 + $0x2c] sm:$0xf] }
  0x21   :  { %211 = vmatmul.bf16.vlgmr.msra.gmra.mxu0 %v55_v20  ;;  %231 = vmatmul.bf16.vlgmr.msra.gmra.mxu2 %v63_v30  ;;  %v2639_v20 = vld [vmem:[%s4129_s3 + $0x84] sm:$0xf] }
  0x22   :  { %260 = vmatmul.bf16.vlgmr.msra.gmra.mxu1 %v56_v21  ;;  %280 = vmatmul.bf16.vlgmr.msra.gmra.mxu3 %v64_v33  ;;  %v2085_v21 = vor.u32 %v2641_v19, %v2084_v18  ;;  %v2089_v25 = vor.u32 %v2639_v20, %v2086_v22  ;;  %v35_v30 = vld [vmem:[%s4128_s0 + $0x60] sm:$0xff]  ;;  %v38_v33 = vld [vmem:[%s4128_s0 + $0x78] sm:$0xff]  ;;  %v2625_v20 = vld [vmem:[%s4129_s3 + $0xc] sm:$0xf0] }
  0x23   :  { %511 = vmatpush.bf16.msrb.mxu2 %v2133_v37  ;;  %560 = vmatpush.bf16.msrb.mxu3 %v2137_v39  ;;  %v2070_v37 = vld [vmem:[%s4129_s3 + $0x70] sm:$0xf0]  ;;  %v62_v59 = vpack.c.bf16 %v38_v33, %v36_v32  ;;  %v2046_v18 = vld [vmem:[%s4129_s3 + $0x38] sm:$0xf0]  ;;  %v2020_v19 = vld [vmem:[%s4129_s3] sm:$0xf] }
  0x24   :  { %609 = vmatpush.bf16.msrb.mxu0 %v2141_v43  ;;  %658 = vmatpush.bf16.msrb.mxu1 %v2145_v45  ;;  %v2073_v39 = vor.u32 %v2635_v36, %v2070_v37  ;;  %v47_v43 = vld [vmem:[%s4128_s0 + $0xc0] sm:$0xff]  ;;  %v2077_v45 = vor.u32 %v2638_v41, %v2076_v40  ;;  %v2021_v22 = vor.u32 %v2625_v20, %v2020_v19 }
  0x25   :  { %v67_v1 = vpack.c.bf16 %v49_v44, %v47_v43 }
  0x27   :  { %512 = vmatpush.bf16.msrb.mxu2 %v2117_v53  ;;  %561 = vmatpush.bf16.msrb.mxu3 %v2121_v57  ;;  %v2060_v53 = vld [vmem:[%s4129_s3 + $0x48] sm:$0xf]  ;;  %v2062_v57 = vld [vmem:[%s4129_s3 + $0x58] sm:$0xf0] }
  0x28   :  { %610 = vmatpush.bf16.msrb.mxu0 %v2125_v58  ;;  %659 = vmatpush.bf16.msrb.mxu1 %v2129_v62  ;;  %v61_v58 = vpack.c.bf16 %v37_v31, %v35_v30  ;;  %v2629_v62 = vld [vmem:[%s4129_s3 + $0x2c] sm:$0xf0]  ;;  %v2061_v0 = vor.u32 %v2634_v55, %v2060_v53  ;;  %v2030_v30 = vld [vmem:[%s4129_s3 + $0x18] sm:$0xf0] }
  0x2b   :  { %513 = vmatpush.bf16.msrb.mxu2 %v2101_v2  ;;  %562 = vmatpush.bf16.msrb.mxu3 %v2105_v3  ;;  %v2065_v2 = vor.u32 %v2632_v56, %v2062_v57  ;;  %v2627_v3 = vld [vmem:[%s4129_s3 + $0x24] sm:$0xf] }
  0x2c   :  { %611 = vmatpush.bf16.msrb.mxu0 %v2109_v15  ;;  %660 = vmatpush.bf16.msrb.mxu1 %v2113_v17  ;;  %v2630_v15 = vld [vmem:[%s4129_s3 + $0x34] sm:$0xf0] }
  0x2d   :  { %v2045_v17 = vor.u32 %v2630_v15, %v2044_v14 }
  0x2f   :  { %514 = vmatpush.bf16.msrb.mxu2 %v2085_v21  ;;  %563 = vmatpush.bf16.msrb.mxu3 %v2089_v25  ;;  %v2049_v21 = vor.u32 %v2628_v16, %v2046_v18 }
  0x31   :  { %216 = vmatmul.bf16.gmra.mxu0 %v57_v26  ;;  %236 = vmatmul.bf16.gmra.mxu2 %v65_v10  ;;  %v2093_v26 = vor.u32 %v2642_v24, %v2092_v23  ;;  %v52_v10 = vld [vmem:[%s4128_s0 + $0xe8] sm:$0xff]  ;;  %v2623_v23 = vld [vmem:[%s4129_s3 + $0x4] sm:$0xf]  ;;  %v2022_v24 = vld [vmem:[%s4129_s3 + $0x10] sm:$0xf0] }
  0x32   :  { %265 = vmatmul.bf16.gmra.mxu1 %v58_v27  ;;  %285 = vmatmul.bf16.gmra.mxu3 %v66_v11  ;;  %v2640_v27 = vld [vmem:[%s4129_s3 + $0x8c] sm:$0xf]  ;;  %v54_v11 = vld [vmem:[%s4128_s0 + $0xf8] sm:$0xff]  ;;  %v2025_v25 = vor.u32 %v2623_v23, %v2022_v24 }
  0x33   :  { %v2097_v34 = vor.u32 %v2640_v27, %v2094_v28  ;;  %612 = vmatpush.bf16.msrb.mxu0 %v2093_v26  ;;  %515 = vmatpush.bf16.msrb.mxu2 %v2069_v38  ;;  %v70_v13 = vpack.c.bf16 %v54_v11, %v52_v10  ;;  %v2028_v26 = vld [vmem:[%s4129_s3 + $0x8] sm:$0xf]  ;;  %v2626_v27 = vld [vmem:[%s4129_s3 + $0x14] sm:$0xf0]  ;;  %v2624_v28 = vld [vmem:[%s4129_s3 + $0xc] sm:$0xf] }
  0x34   :  { %564 = vmatpush.bf16.msrb.mxu3 %v2073_v39  ;;  %v2029_v29 = vor.u32 %v2626_v27, %v2028_v26  ;;  %v2033_v31 = vor.u32 %v2624_v28, %v2030_v30 }
  0x35   :  { %661 = vmatpush.bf16.msrb.mxu1 %v2097_v34  ;;  %v3272_v34 = vld [vmem:[%s4127_s2] ss:$0 sm:$0xff] }
  0x37   :  { %613 = vmatpush.bf16.msrb.mxu0 %v2077_v45  ;;  %516 = vmatpush.bf16.msrb.mxu2 %v2053_v54 }
  0x38   :  { %565 = vmatpush.bf16.msrb.mxu3 %v2057_v63 }
  0x39   :  { %662 = vmatpush.bf16.msrb.mxu1 %v2081_v50 }
  0x3b   :  { %614 = vmatpush.bf16.msrb.mxu0 %v2061_v0 }
  0x3d   :  { %663 = vmatpush.bf16.msrb.mxu1 %v2065_v2 }
  0x3f   :  { %615 = vmatpush.bf16.msrb.mxu0 %v2045_v17 }
  0x41   :  { %221 = vmatmul.bf16.gmra.mxu0 %v59_v6  ;;  %v2037_v6 = vor.u32 %v2629_v62, %v2036_v61  ;;  %241 = vmatmul.bf16.gmra.mxu2 %v67_v1 }
  0x42   :  { %270 = vmatmul.bf16.gmra.mxu1 %v60_v7  ;;  %v2041_v7 = vor.u32 %v2627_v3, %v2038_v4  ;;  %290 = vmatmul.bf16.gmra.mxu3 %v68_v5 }
  0x43   :  { %517 = vmatpush.bf16.msrb.mxu2 %v2037_v6  ;;  %664 = vmatpush.bf16.msrb.mxu1 %v2049_v21 }
  0x44   :  { %566 = vmatpush.bf16.msrb.mxu3 %v2041_v7  ;;  %616 = vmatpush.bf16.msrb.mxu0 %v2029_v29 }
  0x47   :  { %518 = vmatpush.bf16.msrb.mxu2 %v2021_v22  ;;  %665 = vmatpush.bf16.msrb.mxu1 %v2033_v31 }
  0x48   :  { %567 = vmatpush.bf16.msrb.mxu3 %v2025_v25 }
  0x51   :  { %226 = vmatmul.bf16.gmra.mxu0 %v61_v58  ;;  %246 = vmatmul.bf16.gmra.mxu2 %v69_v12 }
  0x52   :  { %275 = vmatmul.bf16.gmra.mxu1 %v62_v59  ;;  %295 = vmatmul.bf16.gmra.mxu3 %v70_v13 }
  0x9e   :  { %v212_v32 = vpop.f32.mrf.mxu0 }
  0x9f   :  { %v261_v33 = vpop.f32.mrf.mxu1  ;;  %v213_v35 = vadd.f32 %v3272_v34, %v212_v32 }
  0xa1   :  { %v262_v39 = vadd.f32 %v261_v33, %v213_v35 }
  0xa4   :  { %v232_v59 = vpop.f32.mrf.mxu2 }
  0xa5   :  { %v281_v61 = vpop.f32.mrf.mxu3  ;;  %v233_v11 = vadd.f32 %v3272_v34, %v232_v59 }
  0xa6   :  { %v214_v36 = vpop.f32.mrf.mxu0 }
  0xa7   :  { %v263_v37 = vpop.f32.mrf.mxu1  ;;  %v215_v38 = vadd.f32 %v3272_v34, %v214_v36  ;;  %v282_v13 = vadd.f32 %v281_v61, %v233_v11 }
  0xa9   :  { %v264_v40 = vadd.f32 %v263_v37, %v215_v38 }
  0xab   :  { %v301_v41 = vpack.c.bf16 %v264_v40, %v262_v39 }
  0xac   :  { %v234_v0 = vpop.f32.mrf.mxu2 }
  0xad   :  { %519 = vmatmul.bf16.vlgmr.msrb.gmra.mxu2 %v301_v41  ;;  %568 = vmatmul.bf16.vlgmr.msrb.gmra.mxu3 %v301_v41  ;;  %v283_v5 = vpop.f32.mrf.mxu3  ;;  %v235_v12 = vadd.f32 %v3272_v34, %v234_v0 }
  0xae   :  { %617 = vmatmul.bf16.vlgmr.msrb.gmra.mxu0 %v301_v41  ;;  %666 = vmatmul.bf16.vlgmr.msrb.gmra.mxu1 %v301_v41  ;;  %v217_v42 = vpop.f32.mrf.mxu0 }
  0xaf   :  { %v266_v43 = vpop.f32.mrf.mxu1  ;;  %v218_v44 = vadd.f32 %v3272_v34, %v217_v42  ;;  %v284_v14 = vadd.f32 %v283_v5, %v235_v12  ;;  %v341_v42 = vld [vmem:[%s4130_s5] sm:$0xf] }
  0xb1   :  { %v267_v48 = vadd.f32 %v266_v43, %v218_v44  ;;  %v305_v16 = vpack.c.bf16 %v284_v14, %v282_v13  ;;  %v3293_v43 = vperm.slane %v341_v42, 2  ;;  %v3295_v44 = vperm.slane %v341_v42, 3 }
  0xb4   :  { %v237_v9 = vpop.f32.mrf.mxu2 }
  0xb5   :  { %v286_v10 = vpop.f32.mrf.mxu3  ;;  %v238_v19 = vadd.f32 %v3272_v34, %v237_v9 }
  0xb6   :  { %v219_v45 = vpop.f32.mrf.mxu0 }
  0xb7   :  { %v268_v46 = vpop.f32.mrf.mxu1  ;;  %v220_v47 = vadd.f32 %v3272_v34, %v219_v45  ;;  %v287_v22 = vadd.f32 %v286_v10, %v238_v19 }
  0xb9   :  { %v269_v49 = vadd.f32 %v268_v46, %v220_v47 }
  0xbb   :  { %v302_v50 = vpack.c.bf16 %v269_v49, %v267_v48  ;;  %v3299_v48 = vperm.slane %v341_v42, 0  ;;  %v3301_v49 = vperm.slane %v341_v42, 1 }
  0xbc   :  { %v239_v15 = vpop.f32.mrf.mxu2 }
  0xbd   :  { %524 = vmatmul.bf16.gmra.mxu2 %v302_v50  ;;  %573 = vmatmul.bf16.gmra.mxu3 %v302_v50  ;;  %v288_v17 = vpop.f32.mrf.mxu3  ;;  %v240_v20 = vadd.f32 %v3272_v34, %v239_v15 }
  0xbe   :  { %622 = vmatmul.bf16.gmra.mxu0 %v302_v50  ;;  %671 = vmatmul.bf16.gmra.mxu1 %v302_v50  ;;  %v222_v51 = vpop.f32.mrf.mxu0 }
  0xbf   :  { %v271_v52 = vpop.f32.mrf.mxu1  ;;  %v223_v53 = vadd.f32 %v3272_v34, %v222_v51  ;;  %v289_v23 = vadd.f32 %v288_v17, %v240_v20 }
  0xc1   :  { %v272_v57 = vadd.f32 %v271_v52, %v223_v53  ;;  %v306_v24 = vpack.c.bf16 %v289_v23, %v287_v22 }
  0xc4   :  { %v242_v18 = vpop.f32.mrf.mxu2 }
  0xc5   :  { %v291_v21 = vpop.f32.mrf.mxu3  ;;  %v243_v27 = vadd.f32 %v3272_v34, %v242_v18 }
  0xc6   :  { %v224_v54 = vpop.f32.mrf.mxu0 }
  0xc7   :  { %v273_v55 = vpop.f32.mrf.mxu1  ;;  %v225_v56 = vadd.f32 %v3272_v34, %v224_v54  ;;  %v292_v30 = vadd.f32 %v291_v21, %v243_v27 }
  0xc9   :  { %v274_v58 = vadd.f32 %v273_v55, %v225_v56 }
  0xcb   :  { %v303_v60 = vpack.c.bf16 %v274_v58, %v272_v57 }
  0xcc   :  { %v244_v25 = vpop.f32.mrf.mxu2 }
  0xcd   :  { %529 = vmatmul.bf16.gmra.mxu2 %v303_v60  ;;  %578 = vmatmul.bf16.gmra.mxu3 %v303_v60  ;;  %v293_v26 = vpop.f32.mrf.mxu3  ;;  %v245_v28 = vadd.f32 %v3272_v34, %v244_v25 }
  0xce   :  { %627 = vmatmul.bf16.gmra.mxu0 %v303_v60  ;;  %676 = vmatmul.bf16.gmra.mxu1 %v303_v60  ;;  %v227_v62 = vpop.f32.mrf.mxu0 }
  0xcf   :  { %v276_v63 = vpop.f32.mrf.mxu1  ;;  %v228_v1 = vadd.f32 %v3272_v34, %v227_v62  ;;  %v294_v31 = vadd.f32 %v293_v26, %v245_v28 }
  0xd1   :  { %v277_v6 = vadd.f32 %v276_v63, %v228_v1  ;;  %v307_v33 = vpack.c.bf16 %v294_v31, %v292_v30 }
  0xd4   :  { %v247_v29 = vpop.f32.mrf.mxu2 }
  0xd5   :  { %v296_v32 = vpop.f32.mrf.mxu3  ;;  %v248_v36 = vadd.f32 %v3272_v34, %v247_v29 }
  0xd6   :  { %v229_v2 = vpop.f32.mrf.mxu0 }
  0xd7   :  { %v230_v3 = vadd.f32 %v3272_v34, %v229_v2  ;;  %v278_v4 = vpop.f32.mrf.mxu1  ;;  %v297_v39 = vadd.f32 %v296_v32, %v248_v36 }
  0xd9   :  { %v279_v7 = vadd.f32 %v278_v4, %v230_v3 }
  0xdb   :  { %v304_v8 = vpack.c.bf16 %v279_v7, %v277_v6 }
  0xdc   :  { %v249_v35 = vpop.f32.mrf.mxu2 }
  0xdd   :  { %534 = vmatmul.bf16.gmra.mxu2 %v304_v8  ;;  %583 = vmatmul.bf16.gmra.mxu3 %v304_v8  ;;  %v250_v37 = vadd.f32 %v3272_v34, %v249_v35  ;;  %v298_v38 = vpop.f32.mrf.mxu3 }
  0xde   :  { %632 = vmatmul.bf16.gmra.mxu0 %v304_v8  ;;  %681 = vmatmul.bf16.gmra.mxu1 %v304_v8 }
  0xdf   :  { %v299_v40 = vadd.f32 %v298_v38, %v250_v37 }
  0xe1   :  { %v308_v41 = vpack.c.bf16 %v299_v40, %v297_v39 }
  0xed   :  { %539 = vmatmul.bf16.gmra.mxu2 %v305_v16  ;;  %588 = vmatmul.bf16.gmra.mxu3 %v305_v16 }
  0xee   :  { %637 = vmatmul.bf16.gmra.mxu0 %v305_v16  ;;  %686 = vmatmul.bf16.gmra.mxu1 %v305_v16 }
  0xfd   :  { %544 = vmatmul.bf16.gmra.mxu2 %v306_v24  ;;  %593 = vmatmul.bf16.gmra.mxu3 %v306_v24 }
  0xfe   :  { %642 = vmatmul.bf16.gmra.mxu0 %v306_v24  ;;  %691 = vmatmul.bf16.gmra.mxu1 %v306_v24 }
 0x10d   :  { %549 = vmatmul.bf16.gmra.mxu2 %v307_v33  ;;  %598 = vmatmul.bf16.gmra.mxu3 %v307_v33 }
 0x10e   :  { %647 = vmatmul.bf16.gmra.mxu0 %v307_v33  ;;  %696 = vmatmul.bf16.gmra.mxu1 %v307_v33 }
 0x11d   :  { %554 = vmatmul.bf16.gmra.mxu2 %v308_v41  ;;  %603 = vmatmul.bf16.gmra.mxu3 %v308_v41 }
 0x11e   :  { %652 = vmatmul.bf16.gmra.mxu0 %v308_v41  ;;  %701 = vmatmul.bf16.gmra.mxu1 %v308_v41 }
 0x12b   :  { %v618_v45 = vpop.f32.mrf.mxu0  ;;  %v667_v46 = vpop.f32.mrf.mxu1 }
 0x12c   :  { %v619_v34 = vadd.f32 %v618_v45, %v3293_v43  ;;  %v668_v47 = vadd.f32 %v667_v46, %v3295_v44 }
 0x12e   :  { %709 = vst [vmem:[#allocation2 + $0x10] sm:$0xff] %v619_v34 }
 0x12f   :  { %710 = vst [vmem:[#allocation2 + $0x18] sm:$0xff] %v668_v47 }
 0x130   :  { %v520_v50 = vpop.f32.mrf.mxu2  ;;  %v569_v51 = vpop.f32.mrf.mxu3 }
 0x131   :  { %v521_v52 = vadd.f32 %v520_v50, %v3299_v48  ;;  %v570_v53 = vadd.f32 %v569_v51, %v3301_v49 }
 0x133   :  { %707 = vst [vmem:[#allocation2] sm:$0xff] %v521_v52  ;;  %v620_v54 = vpop.f32.mrf.mxu0  ;;  %v669_v55 = vpop.f32.mrf.mxu1 }
 0x134   :  { %708 = vst [vmem:[#allocation2 + $0x8] sm:$0xff] %v570_v53  ;;  %v621_v56 = vadd.f32 %v620_v54, %v3293_v43  ;;  %v670_v57 = vadd.f32 %v669_v55, %v3295_v44 }
 0x136   :  { %713 = vst [vmem:[#allocation2 + $0x30] sm:$0xff] %v621_v56 }
 0x137   :  { %714 = vst [vmem:[#allocation2 + $0x38] sm:$0xff] %v670_v57 }
 0x138   :  { %v522_v58 = vpop.f32.mrf.mxu2  ;;  %v571_v59 = vpop.f32.mrf.mxu3 }
 0x139   :  { %v523_v60 = vadd.f32 %v522_v58, %v3299_v48  ;;  %v572_v61 = vadd.f32 %v571_v59, %v3301_v49 }
 0x13b   :  { %711 = vst [vmem:[#allocation2 + $0x20] sm:$0xff] %v523_v60  ;;  %v623_v62 = vpop.f32.mrf.mxu0  ;;  %v672_v63 = vpop.f32.mrf.mxu1 }
 0x13c   :  { %712 = vst [vmem:[#allocation2 + $0x28] sm:$0xff] %v572_v61  ;;  %v624_v0 = vadd.f32 %v623_v62, %v3293_v43  ;;  %v673_v1 = vadd.f32 %v672_v63, %v3295_v44 }
 0x13e   :  { %717 = vst [vmem:[#allocation2 + $0x50] sm:$0xff] %v624_v0 }
 0x13f   :  { %718 = vst [vmem:[#allocation2 + $0x58] sm:$0xff] %v673_v1 }
 0x140   :  { %v525_v2 = vpop.f32.mrf.mxu2  ;;  %v574_v3 = vpop.f32.mrf.mxu3 }
 0x141   :  { %v526_v4 = vadd.f32 %v525_v2, %v3299_v48  ;;  %v575_v5 = vadd.f32 %v574_v3, %v3301_v49 }
 0x143   :  { %715 = vst [vmem:[#allocation2 + $0x40] sm:$0xff] %v526_v4  ;;  %v625_v6 = vpop.f32.mrf.mxu0  ;;  %v674_v7 = vpop.f32.mrf.mxu1 }
 0x144   :  { %716 = vst [vmem:[#allocation2 + $0x48] sm:$0xff] %v575_v5  ;;  %v626_v8 = vadd.f32 %v625_v6, %v3293_v43  ;;  %v675_v9 = vadd.f32 %v674_v7, %v3295_v44 }
 0x146   :  { %721 = vst [vmem:[#allocation2 + $0x70] sm:$0xff] %v626_v8 }
 0x147   :  { %722 = vst [vmem:[#allocation2 + $0x78] sm:$0xff] %v675_v9 }
 0x148   :  { %v527_v10 = vpop.f32.mrf.mxu2  ;;  %v576_v11 = vpop.f32.mrf.mxu3 }
 0x149   :  { %v528_v12 = vadd.f32 %v527_v10, %v3299_v48  ;;  %v577_v13 = vadd.f32 %v576_v11, %v3301_v49 }
 0x14b   :  { %719 = vst [vmem:[#allocation2 + $0x60] sm:$0xff] %v528_v12  ;;  %v628_v14 = vpop.f32.mrf.mxu0  ;;  %v677_v15 = vpop.f32.mrf.mxu1 }
 0x14c   :  { %720 = vst [vmem:[#allocation2 + $0x68] sm:$0xff] %v577_v13  ;;  %v629_v16 = vadd.f32 %v628_v14, %v3293_v43  ;;  %v678_v17 = vadd.f32 %v677_v15, %v3295_v44 }
 0x14e   :  { %725 = vst [vmem:[#allocation2 + $0x90] sm:$0xff] %v629_v16 }
 0x14f   :  { %726 = vst [vmem:[#allocation2 + $0x98] sm:$0xff] %v678_v17 }
 0x150   :  { %v530_v18 = vpop.f32.mrf.mxu2  ;;  %v579_v19 = vpop.f32.mrf.mxu3 }
 0x151   :  { %v531_v20 = vadd.f32 %v530_v18, %v3299_v48  ;;  %v580_v21 = vadd.f32 %v579_v19, %v3301_v49 }
 0x153   :  { %723 = vst [vmem:[#allocation2 + $0x80] sm:$0xff] %v531_v20  ;;  %v630_v22 = vpop.f32.mrf.mxu0  ;;  %v679_v23 = vpop.f32.mrf.mxu1 }
 0x154   :  { %724 = vst [vmem:[#allocation2 + $0x88] sm:$0xff] %v580_v21  ;;  %v631_v24 = vadd.f32 %v630_v22, %v3293_v43  ;;  %v680_v25 = vadd.f32 %v679_v23, %v3295_v44 }
 0x156   :  { %729 = vst [vmem:[#allocation2 + $0xb0] sm:$0xff] %v631_v24 }
 0x157   :  { %730 = vst [vmem:[#allocation2 + $0xb8] sm:$0xff] %v680_v25 }
 0x158   :  { %v532_v26 = vpop.f32.mrf.mxu2  ;;  %v581_v27 = vpop.f32.mrf.mxu3 }
 0x159   :  { %v533_v28 = vadd.f32 %v532_v26, %v3299_v48  ;;  %v582_v29 = vadd.f32 %v581_v27, %v3301_v49 }
 0x15b   :  { %727 = vst [vmem:[#allocation2 + $0xa0] sm:$0xff] %v533_v28  ;;  %v633_v30 = vpop.f32.mrf.mxu0  ;;  %v682_v31 = vpop.f32.mrf.mxu1 }
 0x15c   :  { %728 = vst [vmem:[#allocation2 + $0xa8] sm:$0xff] %v582_v29  ;;  %v634_v32 = vadd.f32 %v633_v30, %v3293_v43  ;;  %v683_v33 = vadd.f32 %v682_v31, %v3295_v44 }
 0x15e   :  { %733 = vst [vmem:[#allocation2 + $0xd0] sm:$0xff] %v634_v32 }
 0x15f   :  { %734 = vst [vmem:[#allocation2 + $0xd8] sm:$0xff] %v683_v33 }
 0x160   :  { %v535_v35 = vpop.f32.mrf.mxu2  ;;  %v584_v36 = vpop.f32.mrf.mxu3 }
 0x161   :  { %v536_v37 = vadd.f32 %v535_v35, %v3299_v48  ;;  %v585_v38 = vadd.f32 %v584_v36, %v3301_v49 }
 0x163   :  { %731 = vst [vmem:[#allocation2 + $0xc0] sm:$0xff] %v536_v37  ;;  %v635_v39 = vpop.f32.mrf.mxu0  ;;  %v684_v40 = vpop.f32.mrf.mxu1 }
 0x164   :  { %732 = vst [vmem:[#allocation2 + $0xc8] sm:$0xff] %v585_v38  ;;  %v636_v41 = vadd.f32 %v635_v39, %v3293_v43  ;;  %v685_v42 = vadd.f32 %v684_v40, %v3295_v44 }
 0x166   :  { %737 = vst [vmem:[#allocation2 + $0xf0] sm:$0xff] %v636_v41 }
 0x167   :  { %738 = vst [vmem:[#allocation2 + $0xf8] sm:$0xff] %v685_v42 }
 0x168   :  { %v537_v45 = vpop.f32.mrf.mxu2  ;;  %v586_v46 = vpop.f32.mrf.mxu3 }
 0x169   :  { %v538_v34 = vadd.f32 %v537_v45, %v3299_v48  ;;  %v587_v47 = vadd.f32 %v586_v46, %v3301_v49 }
 0x16b   :  { %735 = vst [vmem:[#allocation2 + $0xe0] sm:$0xff] %v538_v34  ;;  %v638_v50 = vpop.f32.mrf.mxu0  ;;  %v687_v51 = vpop.f32.mrf.mxu1 }
 0x16c   :  { %736 = vst [vmem:[#allocation2 + $0xe8] sm:$0xff] %v587_v47  ;;  %v639_v52 = vadd.f32 %v638_v50, %v3293_v43  ;;  %v688_v53 = vadd.f32 %v687_v51, %v3295_v44 }
 0x16e   :  { %741 = vst [vmem:[#allocation2 + $0x110] sm:$0xff] %v639_v52 }
 0x16f   :  { %742 = vst [vmem:[#allocation2 + $0x118] sm:$0xff] %v688_v53 }
 0x170   :  { %v540_v54 = vpop.f32.mrf.mxu2  ;;  %v589_v55 = vpop.f32.mrf.mxu3 }
 0x171   :  { %v541_v56 = vadd.f32 %v540_v54, %v3299_v48  ;;  %v590_v57 = vadd.f32 %v589_v55, %v3301_v49  ;;  %v3365_v54 = vmov 0.0   ;;  %v3367_v55 = vmov 0.0  }
 0x173   :  { %739 = vst [vmem:[#allocation2 + $0x100] sm:$0xff] %v541_v56  ;;  %v640_v58 = vpop.f32.mrf.mxu0  ;;  %v689_v59 = vpop.f32.mrf.mxu1 }
 0x174   :  { %740 = vst [vmem:[#allocation2 + $0x108] sm:$0xff] %v590_v57  ;;  %v641_v60 = vadd.f32 %v640_v58, %v3293_v43  ;;  %v690_v61 = vadd.f32 %v689_v59, %v3295_v44 }
 0x176   :  { %745 = vst [vmem:[#allocation2 + $0x130] sm:$0xff] %v641_v60 }
 0x177   :  { %746 = vst [vmem:[#allocation2 + $0x138] sm:$0xff] %v690_v61 }
 0x178   :  { %v542_v62 = vpop.f32.mrf.mxu2  ;;  %v591_v63 = vpop.f32.mrf.mxu3 }
 0x179   :  { %v543_v0 = vadd.f32 %v542_v62, %v3299_v48  ;;  %v592_v1 = vadd.f32 %v591_v63, %v3301_v49 }
 0x17b   :  { %743 = vst [vmem:[#allocation2 + $0x120] sm:$0xff] %v543_v0  ;;  %v643_v2 = vpop.f32.mrf.mxu0  ;;  %v692_v3 = vpop.f32.mrf.mxu1 }
 0x17c   :  { %744 = vst [vmem:[#allocation2 + $0x128] sm:$0xff] %v592_v1  ;;  %v644_v4 = vadd.f32 %v643_v2, %v3293_v43  ;;  %v693_v5 = vadd.f32 %v692_v3, %v3295_v44 }
 0x17e   :  { %749 = vst [vmem:[#allocation2 + $0x150] sm:$0xff] %v644_v4 }
 0x17f   :  { %750 = vst [vmem:[#allocation2 + $0x158] sm:$0xff] %v693_v5 }
 0x180   :  { %v545_v6 = vpop.f32.mrf.mxu2  ;;  %v594_v7 = vpop.f32.mrf.mxu3 }
 0x181   :  { %v546_v8 = vadd.f32 %v545_v6, %v3299_v48  ;;  %v595_v9 = vadd.f32 %v594_v7, %v3301_v49 }
 0x183   :  { %747 = vst [vmem:[#allocation2 + $0x140] sm:$0xff] %v546_v8  ;;  %v645_v10 = vpop.f32.mrf.mxu0  ;;  %v694_v11 = vpop.f32.mrf.mxu1 }
 0x184   :  { %748 = vst [vmem:[#allocation2 + $0x148] sm:$0xff] %v595_v9  ;;  %v646_v12 = vadd.f32 %v645_v10, %v3293_v43  ;;  %v695_v13 = vadd.f32 %v694_v11, %v3295_v44 }
 0x186   :  { %753 = vst [vmem:[#allocation2 + $0x170] sm:$0xff] %v646_v12 }
 0x187   :  { %754 = vst [vmem:[#allocation2 + $0x178] sm:$0xff] %v695_v13 }
 0x188   :  { %v547_v14 = vpop.f32.mrf.mxu2  ;;  %v596_v15 = vpop.f32.mrf.mxu3 }
 0x189   :  { %v548_v16 = vadd.f32 %v547_v14, %v3299_v48  ;;  %v597_v17 = vadd.f32 %v596_v15, %v3301_v49 }
 0x18b   :  { %751 = vst [vmem:[#allocation2 + $0x160] sm:$0xff] %v548_v16  ;;  %v648_v18 = vpop.f32.mrf.mxu0  ;;  %v697_v19 = vpop.f32.mrf.mxu1 }
 0x18c   :  { %752 = vst [vmem:[#allocation2 + $0x168] sm:$0xff] %v597_v17  ;;  %v649_v20 = vadd.f32 %v648_v18, %v3293_v43  ;;  %v698_v21 = vadd.f32 %v697_v19, %v3295_v44 }
 0x18e   :  { %757 = vst [vmem:[#allocation2 + $0x190] sm:$0xff] %v649_v20 }
 0x18f   :  { %758 = vst [vmem:[#allocation2 + $0x198] sm:$0xff] %v698_v21 }
 0x190   :  { %v550_v22 = vpop.f32.mrf.mxu2  ;;  %v599_v23 = vpop.f32.mrf.mxu3 }
 0x191   :  { %v551_v24 = vadd.f32 %v550_v22, %v3299_v48  ;;  %v600_v25 = vadd.f32 %v599_v23, %v3301_v49 }
 0x193   :  { %755 = vst [vmem:[#allocation2 + $0x180] sm:$0xff] %v551_v24  ;;  %v650_v26 = vpop.f32.mrf.mxu0  ;;  %v699_v27 = vpop.f32.mrf.mxu1 }
 0x194   :  { %756 = vst [vmem:[#allocation2 + $0x188] sm:$0xff] %v600_v25  ;;  %v651_v28 = vadd.f32 %v650_v26, %v3293_v43  ;;  %v700_v29 = vadd.f32 %v699_v27, %v3295_v44 }
 0x196   :  { %761 = vst [vmem:[#allocation2 + $0x1b0] sm:$0xff] %v651_v28 }
 0x197   :  { %762 = vst [vmem:[#allocation2 + $0x1b8] sm:$0xff] %v700_v29 }
 0x198   :  { %v552_v30 = vpop.f32.mrf.mxu2  ;;  %v601_v31 = vpop.f32.mrf.mxu3 }
 0x199   :  { %v553_v32 = vadd.f32 %v552_v30, %v3299_v48  ;;  %v602_v33 = vadd.f32 %v601_v31, %v3301_v49 }
 0x19b   :  { %759 = vst [vmem:[#allocation2 + $0x1a0] sm:$0xff] %v553_v32  ;;  %v653_v35 = vpop.f32.mrf.mxu0  ;;  %v702_v36 = vpop.f32.mrf.mxu1 }
 0x19c   :  { %760 = vst [vmem:[#allocation2 + $0x1a8] sm:$0xff] %v602_v33  ;;  %v654_v37 = vadd.f32 %v653_v35, %v3293_v43  ;;  %v703_v38 = vadd.f32 %v702_v36, %v3295_v44 }
 0x19e   :  { %765 = vst [vmem:[#allocation2 + $0x1d0] sm:$0xff] %v654_v37 }
 0x19f   :  { %766 = vst [vmem:[#allocation2 + $0x1d8] sm:$0xff] %v703_v38 }
 0x1a0   :  { %v555_v39 = vpop.f32.mrf.mxu2  ;;  %v604_v40 = vpop.f32.mrf.mxu3 }
 0x1a1   :  { %v556_v41 = vadd.f32 %v555_v39, %v3299_v48  ;;  %v605_v42 = vadd.f32 %v604_v40, %v3301_v49 }
 0x1a3   :  { %763 = vst [vmem:[#allocation2 + $0x1c0] sm:$0xff] %v556_v41  ;;  %v655_v45 = vpop.f32.mrf.mxu0  ;;  %v704_v46 = vpop.f32.mrf.mxu1 }
 0x1a4   :  { %764 = vst [vmem:[#allocation2 + $0x1c8] sm:$0xff] %v605_v42  ;;  %v656_v34 = vadd.f32 %v655_v45, %v3293_v43  ;;  %v705_v47 = vadd.f32 %v704_v46, %v3295_v44 }
 0x1a6   :  { %769 = vst [vmem:[#allocation2 + $0x1f0] sm:$0xff] %v656_v34 }
 0x1a7   :  { %770 = vst [vmem:[#allocation2 + $0x1f8] sm:$0xff] %v705_v47 }
 0x1a8   :  { %v557_v50 = vpop.f32.mrf.mxu2  ;;  %v606_v51 = vpop.f32.mrf.mxu3 }
 0x1a9   :  { %v558_v52 = vadd.f32 %v557_v50, %v3299_v48  ;;  %v607_v53 = vadd.f32 %v606_v51, %v3301_v49 }
 0x1ab   :  { %767 = vst [vmem:[#allocation2 + $0x1e0] sm:$0xff] %v558_v52 }
 0x1ac   :  { %768 = vst [vmem:[#allocation2 + $0x1e8] sm:$0xff] %v607_v53 }
 0x1ad LB: > { %v2262_v43 = vld [vmem:[%s4125_s4 + $0xe0] sm:$0xf]  ;;  %v2686_v44 = vld [vmem:[%s4125_s4 + $0xec] sm:$0xf0]  ;;  %v2684_v48 = vld [vmem:[%s4125_s4 + $0xe4] sm:$0xf]  ;;  %s2884_s23 = sphi %s3369_s23, %s776_s23   ;;  %v2880_v55 = vphi %v3367_v55, %v1097_v55   ;;  %v2876_v54 = vphi %v3365_v54, %v1095_v54  }
 0x1ae   : > { %v2263_v49 = vor.u32 %v2686_v44, %v2262_v43  ;;  %v2264_v56 = vld [vmem:[%s4125_s4 + $0xf0] sm:$0xf0]  ;;  %v2685_v57 = vld [vmem:[%s4125_s4 + $0xec] sm:$0xf]  ;;  %v2272_v58 = vld [vmem:[%s4125_s4 + $0xf8] sm:$0xf0] }
 0x1af   : > { %v2267_v59 = vor.u32 %v2684_v48, %v2264_v56  ;;  %v2275_v60 = vor.u32 %v2685_v57, %v2272_v58  ;;  %v2246_v61 = vld [vmem:[%s4125_s4 + $0xc0] sm:$0xf]  ;;  %v2682_v62 = vld [vmem:[%s4125_s4 + $0xcc] sm:$0xf0]  ;;  %v2680_v63 = vld [vmem:[%s4125_s4 + $0xc4] sm:$0xf] }
 0x1b0   : > { %979 = vmatpush.bf16.msra.mxu0 %v2263_v49  ;;  %v2247_v0 = vor.u32 %v2682_v62, %v2246_v61  ;;  %v2248_v1 = vld [vmem:[%s4125_s4 + $0xd0] sm:$0xf0]  ;;  %v2681_v2 = vld [vmem:[%s4125_s4 + $0xcc] sm:$0xf]  ;;  %v2256_v3 = vld [vmem:[%s4125_s4 + $0xd8] sm:$0xf0] }
 0x1b1   : > { %992 = vmatpush.bf16.msra.mxu1 %v2267_v59  ;;  %1018 = vmatpush.bf16.msra.mxu3 %v2275_v60  ;;  %v2251_v4 = vor.u32 %v2680_v63, %v2248_v1  ;;  %v2259_v5 = vor.u32 %v2681_v2, %v2256_v3  ;;  %v2270_v6 = vld [vmem:[%s4125_s4 + $0xe8] sm:$0xf]  ;;  %v2687_v7 = vld [vmem:[%s4125_s4 + $0xf4] sm:$0xf0]  ;;  %v2230_v8 = vld [vmem:[%s4125_s4 + $0xa0] sm:$0xf] }
 0x1b2   : > { %v2271_v9 = vor.u32 %v2687_v7, %v2270_v6  ;;  %v2678_v10 = vld [vmem:[%s4125_s4 + $0xac] sm:$0xf0]  ;;  %v2676_v11 = vld [vmem:[%s4125_s4 + $0xa4] sm:$0xf]  ;;  %v2232_v12 = vld [vmem:[%s4125_s4 + $0xb0] sm:$0xf0] }
 0x1b3   : > { %v2677_v13 = vld [vmem:[%s4125_s4 + $0xac] sm:$0xf]  ;;  %v2240_v14 = vld [vmem:[%s4125_s4 + $0xb8] sm:$0xf0]  ;;  %v2254_v15 = vld [vmem:[%s4125_s4 + $0xc8] sm:$0xf]  ;;  %v2231_v16 = vor.u32 %v2678_v10, %v2230_v8  ;;  %v2235_v20 = vor.u32 %v2676_v11, %v2232_v12 }
 0x1b4   : > { %980 = vmatpush.bf16.msra.mxu0 %v2247_v0  ;;  %1005 = vmatpush.bf16.msra.mxu2 %v2271_v9  ;;  %v2683_v17 = vld [vmem:[%s4125_s4 + $0xd4] sm:$0xf0]  ;;  %v2214_v18 = vld [vmem:[%s4125_s4 + $0x80] sm:$0xf]  ;;  %v2674_v19 = vld [vmem:[%s4125_s4 + $0x8c] sm:$0xf0]  ;;  %v2243_v21 = vor.u32 %v2677_v13, %v2240_v14 }
 0x1b5   : > { %993 = vmatpush.bf16.msra.mxu1 %v2251_v4  ;;  %1019 = vmatpush.bf16.msra.mxu3 %v2259_v5  ;;  %v2255_v22 = vor.u32 %v2683_v17, %v2254_v15  ;;  %v2672_v23 = vld [vmem:[%s4125_s4 + $0x84] sm:$0xf]  ;;  %v2216_v24 = vld [vmem:[%s4125_s4 + $0x90] sm:$0xf0]  ;;  %v2673_v25 = vld [vmem:[%s4125_s4 + $0x8c] sm:$0xf]  ;;  %v2215_v29 = vor.u32 %v2674_v19, %v2214_v18 }
 0x1b6   : > { %v2224_v26 = vld [vmem:[%s4125_s4 + $0x98] sm:$0xf0]  ;;  %v2238_v27 = vld [vmem:[%s4125_s4 + $0xa8] sm:$0xf]  ;;  %v2679_v28 = vld [vmem:[%s4125_s4 + $0xb4] sm:$0xf0]  ;;  %v2219_v33 = vor.u32 %v2672_v23, %v2216_v24 }
 0x1b7   : > { %v2239_v30 = vor.u32 %v2679_v28, %v2238_v27  ;;  %v2198_v31 = vld [vmem:[%s4125_s4 + $0x60] sm:$0xf]  ;;  %v2670_v32 = vld [vmem:[%s4125_s4 + $0x6c] sm:$0xf0]  ;;  %v2227_v35 = vor.u32 %v2673_v25, %v2224_v26  ;;  %v2668_v36 = vld [vmem:[%s4125_s4 + $0x64] sm:$0xf] }
 0x1b8   : > { %981 = vmatpush.bf16.msra.mxu0 %v2231_v16  ;;  %1006 = vmatpush.bf16.msra.mxu2 %v2255_v22  ;;  %v2222_v37 = vld [vmem:[%s4125_s4 + $0x88] sm:$0xf]  ;;  %v2675_v38 = vld [vmem:[%s4125_s4 + $0x94] sm:$0xf0]  ;;  %v2200_v39 = vld [vmem:[%s4125_s4 + $0x70] sm:$0xf0]  ;;  %v2199_v42 = vor.u32 %v2670_v32, %v2198_v31 }
 0x1b9   : > { %994 = vmatpush.bf16.msra.mxu1 %v2235_v20  ;;  %1020 = vmatpush.bf16.msra.mxu3 %v2243_v21  ;;  %v2669_v40 = vld [vmem:[%s4125_s4 + $0x6c] sm:$0xf]  ;;  %v2208_v41 = vld [vmem:[%s4125_s4 + $0x78] sm:$0xf0]  ;;  %v2223_v45 = vor.u32 %v2675_v38, %v2222_v37  ;;  %v2182_v46 = vld [vmem:[%s4125_s4 + $0x40] sm:$0xf]  ;;  %v2203_v47 = vor.u32 %v2668_v36, %v2200_v39  ;;  %v786_v21 = vpack.c.bf16 %v2880_v55, %v2880_v55 }
 0x1ba   : > { %v2666_v34 = vld [vmem:[%s4125_s4 + $0x4c] sm:$0xf0]  ;;  %v2211_v50 = vor.u32 %v2669_v40, %v2208_v41  ;;  %v2664_v51 = vld [vmem:[%s4125_s4 + $0x44] sm:$0xf]  ;;  %v2206_v52 = vld [vmem:[%s4125_s4 + $0x68] sm:$0xf] }
 0x1bb   : > { %v2671_v53 = vld [vmem:[%s4125_s4 + $0x74] sm:$0xf0]  ;;  %v2184_v43 = vld [vmem:[%s4125_s4 + $0x50] sm:$0xf0]  ;;  %v2665_v44 = vld [vmem:[%s4125_s4 + $0x4c] sm:$0xf]  ;;  %v2183_v49 = vor.u32 %v2666_v34, %v2182_v46 }
 0x1bc   : > { %982 = vmatpush.bf16.msra.mxu0 %v2215_v29  ;;  %1007 = vmatpush.bf16.msra.mxu2 %v2239_v30  ;;  %v2192_v48 = vld [vmem:[%s4125_s4 + $0x58] sm:$0xf0]  ;;  %v2207_v56 = vor.u32 %v2671_v53, %v2206_v52  ;;  %v2166_v57 = vld [vmem:[%s4125_s4 + $0x20] sm:$0xf]  ;;  %v2662_v58 = vld [vmem:[%s4125_s4 + $0x2c] sm:$0xf0]  ;;  %v2187_v59 = vor.u32 %v2664_v51, %v2184_v43 }
 0x1bd   : > { %995 = vmatpush.bf16.msra.mxu1 %v2219_v33  ;;  %1021 = vmatpush.bf16.msra.mxu3 %v2227_v35  ;;  %v2195_v60 = vor.u32 %v2665_v44, %v2192_v48  ;;  %v2660_v61 = vld [vmem:[%s4125_s4 + $0x24] sm:$0xf]  ;;  %v2190_v62 = vld [vmem:[%s4125_s4 + $0x48] sm:$0xf]  ;;  %v2667_v63 = vld [vmem:[%s4125_s4 + $0x54] sm:$0xf0]  ;;  %v2167_v3 = vor.u32 %v2662_v58, %v2166_v57 }
 0x1be   : > { %v2168_v0 = vld [vmem:[%s4125_s4 + $0x30] sm:$0xf0]  ;;  %v2661_v1 = vld [vmem:[%s4125_s4 + $0x2c] sm:$0xf]  ;;  %v2176_v2 = vld [vmem:[%s4125_s4 + $0x38] sm:$0xf0]  ;;  %v2191_v4 = vor.u32 %v2667_v63, %v2190_v62 }
 0x1bf   : > { %v2150_v5 = vld [vmem:[%s4125_s4] sm:$0xf]  ;;  %v2658_v6 = vld [vmem:[%s4125_s4 + $0xc] sm:$0xf0]  ;;  %v2171_v7 = vor.u32 %v2660_v61, %v2168_v0  ;;  %v2179_v8 = vor.u32 %v2661_v1, %v2176_v2  ;;  %v2656_v9 = vld [vmem:[%s4125_s4 + $0x4] sm:$0xf] }
 0x1c0   : > { %983 = vmatpush.bf16.msra.mxu0 %v2199_v42  ;;  %1008 = vmatpush.bf16.msra.mxu2 %v2223_v45  ;;  %v2174_v10 = vld [vmem:[%s4125_s4 + $0x28] sm:$0xf]  ;;  %v2663_v11 = vld [vmem:[%s4125_s4 + $0x34] sm:$0xf0]  ;;  %v2152_v12 = vld [vmem:[%s4125_s4 + $0x10] sm:$0xf0]  ;;  %v2151_v15 = vor.u32 %v2658_v6, %v2150_v5 }
 0x1c1   : > { %996 = vmatpush.bf16.msra.mxu1 %v2203_v47  ;;  %1022 = vmatpush.bf16.msra.mxu3 %v2211_v50  ;;  %v2657_v13 = vld [vmem:[%s4125_s4 + $0xc] sm:$0xf]  ;;  %v2160_v14 = vld [vmem:[%s4125_s4 + $0x18] sm:$0xf0]  ;;  %v2175_v16 = vor.u32 %v2663_v11, %v2174_v10  ;;  %v2155_v17 = vor.u32 %v2656_v9, %v2152_v12  ;;  %v2158_v19 = vld [vmem:[%s4125_s4 + $0x8] sm:$0xf] }
 0x1c2   : > { %v2163_v18 = vor.u32 %v2657_v13, %v2160_v14  ;;  %v2659_v20 = vld [vmem:[%s4125_s4 + $0x14] sm:$0xf0]  ;;  %s2655_s2 = sshll.u32 %s2884_s23, 5  ;;  %s2279_s24 = sshll.u32 %s2884_s23, 3 }
 0x1c3   : > { %v2159_v22 = vor.u32 %v2659_v20, %v2158_v19  ;;  %s781_s22 = scalar_lea.vmem [#allocation2], %s2655_s2  ;;  %s1099_s27 = scalar_lea.vmem %s4126_s6, %s2279_s24 }
 0x1c4   : > { %984 = vmatpush.bf16.msra.mxu0 %v2183_v49  ;;  %1009 = vmatpush.bf16.msra.mxu2 %v2207_v56  ;;  %v782_v23 = vld [vmem:[%s781_s22] sm:$0xff]  ;;  %v783_v24 = vld [vmem:[%s781_s22 + $0x8] sm:$0xff]  ;;  %v785_v30 = vld [vmem:[%s781_s22 + $0x18] sm:$0xff]  ;;  %s776_s23 = sadd.s32 1, %s2884_s23  }
 0x1c5   : > { %997 = vmatpush.bf16.msra.mxu1 %v2187_v59  ;;  %1023 = vmatpush.bf16.msra.mxu3 %v2195_v60  ;;  %v784_v42 = vld [vmem:[%s781_s22 + $0x10] sm:$0xff]  ;;  %p773_p0 = scmp.ge.s32.totalorder %s776_s23, 16  }
 0x1c6   :  { %v2427_v19 = vld [vmem:[%s4129_s3 + $0x1e0] sm:$0xf] (%p773_p0)  ;;  %v2718_v20 = vld [vmem:[%s4129_s3 + $0x1ec] sm:$0xf0] (%p773_p0) }
 0x1c8   : > { %985 = vmatpush.bf16.msra.mxu0 %v2167_v3  ;;  %1010 = vmatpush.bf16.msra.mxu2 %v2191_v4 }
 0x1c9   : > { %998 = vmatpush.bf16.msra.mxu1 %v2171_v7  ;;  %1024 = vmatpush.bf16.msra.mxu3 %v2179_v8 }
 0x1cc   : > { %986 = vmatpush.bf16.msra.mxu0 %v2151_v15  ;;  %1011 = vmatpush.bf16.msra.mxu2 %v2175_v16 }
 0x1cd   : > { %999 = vmatpush.bf16.msra.mxu1 %v2155_v17  ;;  %1025 = vmatpush.bf16.msra.mxu3 %v2163_v18 }
 0x1cf   : > { %987 = vmatmul.bf16.vlgmr.msra.gmra.mxu0 %v786_v21 }
 0x1d0   : > { %1000 = vmatmul.bf16.vlgmr.msra.gmra.mxu1 %v786_v21  ;;  %1026 = vmatmul.bf16.vlgmr.msra.gmra.mxu3 %v786_v21 }
 0x1d1   : > { %1012 = vmatpush.bf16.msra.mxu2 %v2159_v22  ;;  %v2428_v22 = vor.u32 (%p773_p0), %v2718_v20, %v2427_v19  ;;  %v2355_v19 = vld [vmem:[%s4129_s3 + $0x148] sm:$0xf] (%p773_p0)  ;;  %v2699_v20 = vld [vmem:[%s4129_s3 + $0x154] sm:$0xf0] (%p773_p0) }
 0x1d3   :  { %1329 = vmatpush.bf16.msra.mxu0 (%p773_p0), %v2428_v22  ;;  %v2357_v22 = vld [vmem:[%s4129_s3 + $0x158] sm:$0xf0] (%p773_p0) }
 0x1d4   : > { %1013 = vmatmul.bf16.vlgmr.msra.gmra.mxu2 %v786_v21  ;;  %v2716_v21 = vld [vmem:[%s4129_s3 + $0x1e4] sm:$0xf] (%p773_p0) }
 0x24c   : > { %v988_v25 = vpop.f32.mrf.mxu0 }
 0x24d   : > { %v1031_v26 = vadd.f32 %v988_v25, %v782_v23  ;;  %v1001_v27 = vpop.f32.mrf.mxu1  ;;  %v2429_v23 = vld [vmem:[%s4129_s3 + $0x1f0] sm:$0xf0] (%p773_p0) }
 0x24e   : > { %v1032_v28 = vadd.f32 %v1001_v27, %v783_v24  ;;  %v2719_v24 = vld [vmem:[%s4129_s3 + $0x1f4] sm:$0xf0] (%p773_p0)  ;;  %v2432_v25 = vor.u32 (%p773_p0), %v2716_v21, %v2429_v23  ;;  %v2717_v27 = vld [vmem:[%s4129_s3 + $0x1ec] sm:$0xf] (%p773_p0) }
 0x24f   : > { %v2276_v29 = vmul.f32 -1.442695, %v1031_v26  ;;  %v2697_v21 = vld [vmem:[%s4129_s3 + $0x14c] sm:$0xf] (%p773_p0) }
 0x250   : > { %v2277_v55 = vmul.f32 -1.442695, %v1032_v28  ;;  %v2437_v28 = vld [vmem:[%s4129_s3 + $0x1f8] sm:$0xf0] (%p773_p0)  ;;  %1378 = vmatpush.bf16.msra.mxu1 (%p773_p0), %v2432_v25  ;;  %v2331_v25 = vld [vmem:[%s4129_s3 + $0x120] sm:$0xf] (%p773_p0) }
 0x251   : > { %2818 = vpow2.f32 %v2276_v29  ;;  %v2411_v29 = vld [vmem:[%s4129_s3 + $0x1c0] sm:$0xf] (%p773_p0) }
 0x252   : > { %2820 = vpow2.f32 %v2277_v55 }
 0x253   : > { %v1027_v31 = vpop.f32.mrf.mxu3 }
 0x254   : > { %v1034_v32 = vadd.f32 %v1027_v31, %v785_v30  ;;  %v990_v33 = vpop.f32.mrf.mxu0  ;;  %v2714_v30 = vld [vmem:[%s4129_s3 + $0x1cc] sm:$0xf0] (%p773_p0)  ;;  %v2712_v31 = vld [vmem:[%s4129_s3 + $0x1c4] sm:$0xf] (%p773_p0) }
 0x255   : > { %v1003_v35 = vpop.f32.mrf.mxu1  ;;  %v2412_v33 = vor.u32 (%p773_p0), %v2714_v30, %v2411_v29  ;;  %v2333_v29 = vld [vmem:[%s4129_s3 + $0x130] sm:$0xf0] (%p773_p0)  ;;  %v2695_v30 = vld [vmem:[%s4129_s3 + $0x134] sm:$0xf0] (%p773_p0) }
 0x256   : > { %v2278_v36 = vmul.f32 -1.442695, %v1034_v32  ;;  %v2413_v32 = vld [vmem:[%s4129_s3 + $0x1d0] sm:$0xf0] (%p773_p0) }
 0x257   : > { %v2819_v37 = vpop.eup %2818  ;;  %v1014_v38 = vpop.f32.mrf.mxu2  ;;  %v2416_v35 = vor.u32 (%p773_p0), %v2712_v31, %v2413_v32  ;;  %1330 = vmatpush.bf16.msra.mxu0 (%p773_p0), %v2412_v33  ;;  %v2693_v31 = vld [vmem:[%s4129_s3 + $0x12c] sm:$0xf] (%p773_p0)  ;;  %v2341_v32 = vld [vmem:[%s4129_s3 + $0x138] sm:$0xf0] (%p773_p0) }
 0x258   : > { %v2821_v39 = vpop.eup %2820  ;;  %v1038_v40 = vadd.f32 1.0, %v2819_v37  ;;  %2822 = vpow2.f32 %v2278_v36  ;;  %v1033_v34 = vadd.f32 %v1014_v38, %v784_v42  ;;  %v2419_v36 = vld [vmem:[%s4129_s3 + $0x1c8] sm:$0xf] (%p773_p0)  ;;  %v2715_v37 = vld [vmem:[%s4129_s3 + $0x1d4] sm:$0xf0] (%p773_p0) }
 0x259   : > { %v1057_v41 = vadd.f32 1.0, %v2821_v39  ;;  %v2713_v38 = vld [vmem:[%s4129_s3 + $0x1cc] sm:$0xf] (%p773_p0)  ;;  %v2420_v39 = vor.u32 (%p773_p0), %v2715_v37, %v2419_v36  ;;  %v2710_v42 = vld [vmem:[%s4129_s3 + $0x1ac] sm:$0xf0] (%p773_p0)  ;;  %1379 = vmatpush.bf16.msra.mxu1 (%p773_p0), %v2416_v35 }
 0x25a   : > { %2824 = vrcp.f32 %v1038_v40  ;;  %v1050_v49 = vand.u32 2147483648, %v1038_v40  ;;  %v1048_v58 = vand.u32 2147483647, %v1038_v40  ;;  %vm1044_vm2 = vweird.f32 %v1038_v40  ;;  %v2315_v37 = vld [vmem:[%s4129_s3 + $0x100] sm:$0xf] (%p773_p0) }
 0x25b   : > { %2826 = vrcp.f32 %v1057_v41  ;;  %v1029_v45 = vpop.f32.mrf.mxu3  ;;  %v1069_v56 = vand.u32 2147483648, %v1057_v41  ;;  %v1067_v60 = vand.u32 2147483647, %v1057_v41  ;;  %vm1063_vm3 = vweird.f32 %v1057_v41 }
 0x25c   : > { %v1051_v1 = vor.u32 1.1754944e-38, %v1050_v49  ;;  %vm1049_vm6 = vcmp.eq.f32.partialorder %v1048_v58, 8.507059e+37  ;;  %v2706_v49 = vld [vmem:[%s4129_s3 + $0x18c] sm:$0xf0] (%p773_p0)  ;;  %v2381_v58 = vld [vmem:[%s4129_s3 + $0x190] sm:$0xf0] (%p773_p0) }
 0x25d   : > { %v1070_v3 = vor.u32 1.1754944e-38, %v1069_v56  ;;  %vm1068_vm7 = vcmp.eq.f32.partialorder %v1067_v60, 8.507059e+37  ;;  %v2704_v56 = vld [vmem:[%s4129_s3 + $0x184] sm:$0xf] (%p773_p0)  ;;  %v2707_v60 = vld [vmem:[%s4129_s3 + $0x194] sm:$0xf0] (%p773_p0) }
 0x25e   : > { %v2823_v46 = vpop.eup %2822 }
 0x25f   : > { %v1077_v47 = vadd.f32 1.0, %v2823_v46  ;;  %v1016_v50 = vpop.f32.mrf.mxu2  ;;  %v2708_v46 = vld [vmem:[%s4129_s3 + $0x1a4] sm:$0xf] (%p773_p0) }
 0x260   : > { %v2825_v51 = vpop.eup %2824 }
 0x261   : > { %v2827_v52 = vpop.eup %2826  ;;  %v1040_v53 = vmul.f32 %v2825_v51, %v1038_v40  ;;  %2828 = vrcp.f32 %v1077_v47  ;;  %vm1045_vm0 = vweird.f32 %v2825_v51  ;;  %v1089_v13 = vand.u32 2147483648, %v1077_v47  ;;  %v2421_v40 = vld [vmem:[%s4129_s3 + $0x1d8] sm:$0xf0] (%p773_p0) }
 0x262   : > { %v1059_v43 = vmul.f32 %v2827_v52, %v1057_v41  ;;  %2830 = vtanh.f32 %v1033_v34  ;;  %vm1064_vm1 = vweird.f32 %v2827_v52  ;;  %vm1046_vm4 = vmor %vm1044_vm2, %vm1045_vm0  ;;  %vm1083_vm9 = vweird.f32 %v1077_v47  ;;  %v2395_v41 = vld [vmem:[%s4129_s3 + $0x1a0] sm:$0xf] (%p773_p0)  ;;  %v2397_v34 = vld [vmem:[%s4129_s3 + $0x1b0] sm:$0xf0] (%p773_p0) }
 0x263   : > { %v1041_v44 = vsub.f32 1.0, %v1040_v53  ;;  %vm1065_vm5 = vmor %vm1063_vm3, %vm1064_vm1  ;;  %v1087_v14 = vand.u32 2147483647, %v1077_v47  ;;  %v1090_v16 = vor.u32 1.1754944e-38, %v1089_v13  ;;  %v2424_v45 = vor.u32 (%p773_p0), %v2713_v38, %v2421_v40  ;;  %v2405_v53 = vld [vmem:[%s4129_s3 + $0x1b8] sm:$0xf0] (%p773_p0) }
 0x264   : > { %v1060_v48 = vsub.f32 1.0, %v1059_v43  ;;  %v2396_v50 = vor.u32 (%p773_p0), %v2710_v42, %v2395_v41  ;;  %v2400_v43 = vor.u32 (%p773_p0), %v2708_v46, %v2397_v34  ;;  %v2690_v38 = vld [vmem:[%s4129_s3 + $0x10c] sm:$0xf0] (%p773_p0)  ;;  %v2344_v40 = vor.u32 (%p773_p0), %v2693_v31, %v2341_v32  ;;  %v2317_v41 = vld [vmem:[%s4129_s3 + $0x110] sm:$0xf0] (%p773_p0) }
 0x265   : > { %v1042_v57 = vmul.f32 %v2825_v51, %v1041_v44  ;;  %vm1088_vm11 = vcmp.eq.f32.partialorder %v1087_v14, 8.507059e+37  ;;  %v2347_v14 = vld [vmem:[%s4129_s3 + $0x140] sm:$0xf] (%p773_p0)  ;;  %v2323_v42 = vld [vmem:[%s4129_s3 + $0x108] sm:$0xf] (%p773_p0) }
 0x266   : > { %v1061_v59 = vmul.f32 %v2827_v52, %v1060_v48  ;;  %v2379_v48 = vld [vmem:[%s4129_s3 + $0x180] sm:$0xf] (%p773_p0)  ;;  %1331 = vmatpush.bf16.msra.mxu0 (%p773_p0), %v2396_v50  ;;  %1380 = vmatpush.bf16.msra.mxu1 (%p773_p0), %v2400_v43  ;;  %v2689_v46 = vld [vmem:[%s4129_s3 + $0x10c] sm:$0xf] (%p773_p0)  ;;  %v2325_v34 = vld [vmem:[%s4129_s3 + $0x118] sm:$0xf0] (%p773_p0) }
 0x267   : > { %v2829_v61 = vpop.eup %2828  ;;  %v1043_v62 = vadd.f32 %v2825_v51, %v1042_v57  ;;  %v2328_v43 = vor.u32 (%p773_p0), %v2689_v46, %v2325_v34 }
 0x268   : > { %v2831_v63 = vpop.eup %2830  ;;  %v1079_v0 = vmul.f32 %v2829_v61, %v1077_v47  ;;  %v1062_v2 = vadd.f32 %v2827_v52, %v1061_v59  ;;  %vm1084_vm8 = vweird.f32 %v2829_v61  ;;  %v2403_v47 = vld [vmem:[%s4129_s3 + $0x1a8] sm:$0xf] (%p773_p0) }
 0x269   : > { %v1047_v4 = vsel %vm1046_vm4, %v2825_v51, %v1043_v62  ;;  %vm1085_vm10 = vmor %vm1083_vm9, %vm1084_vm8  ;;  %v2711_v51 = vld [vmem:[%s4129_s3 + $0x1b4] sm:$0xf0] (%p773_p0)  ;;  %v2387_v59 = vld [vmem:[%s4129_s3 + $0x188] sm:$0xf] (%p773_p0) }
 0x26a   : > { %v1080_v5 = vsub.f32 1.0, %v1079_v0  ;;  %v1052_v6 = vsel %vm1049_vm6, %v1051_v1, %v1047_v4  ;;  %v1066_v7 = vsel %vm1065_vm5, %v2827_v52, %v1062_v2  ;;  %v2709_v52 = vld [vmem:[%s4129_s3 + $0x1ac] sm:$0xf] (%p773_p0)  ;;  %v2404_v44 = vor.u32 (%p773_p0), %v2711_v51, %v2403_v47  ;;  %v2389_v62 = vld [vmem:[%s4129_s3 + $0x198] sm:$0xf0] (%p773_p0) }
 0x26b   : > { %v1071_v8 = vsel %vm1068_vm7, %v1070_v3, %v1066_v7  ;;  %v1094_v9 = vmul.f32 %v2831_v63, %v1052_v6  ;;  %v2408_v57 = vor.u32 (%p773_p0), %v2709_v52, %v2405_v53  ;;  %v2380_v63 = vor.u32 (%p773_p0), %v2706_v49, %v2379_v48  ;;  %v2363_v2 = vld [vmem:[%s4129_s3 + $0x160] sm:$0xf] (%p773_p0)  ;;  %v2702_v3 = vld [vmem:[%s4129_s3 + $0x16c] sm:$0xf0] (%p773_p0)  ;;  %v2700_v4 = vld [vmem:[%s4129_s3 + $0x164] sm:$0xf] (%p773_p0) }
 0x26c   : > { %v1081_v10 = vmul.f32 %v2829_v61, %v1080_v5  ;;  %v1093_v11 = vmul.f32 %v2876_v54, %v1071_v8  ;;  %v2384_v0 = vor.u32 (%p773_p0), %v2704_v56, %v2381_v58  ;;  %v2388_v1 = vor.u32 (%p773_p0), %v2707_v60, %v2387_v59  ;;  %v2365_v6 = vld [vmem:[%s4129_s3 + $0x170] sm:$0xf0] (%p773_p0)  ;;  %v2371_v7 = vld [vmem:[%s4129_s3 + $0x168] sm:$0xf] (%p773_p0)  ;;  %v2703_v8 = vld [vmem:[%s4129_s3 + $0x174] sm:$0xf0] (%p773_p0) }
 0x26d   :  { %1332 = vmatpush.bf16.msra.mxu0 (%p773_p0), %v2380_v63  ;;  %v2372_v13 = vor.u32 (%p773_p0), %v2703_v8, %v2371_v7  ;;  %v2316_v47 = vor.u32 (%p773_p0), %v2690_v38, %v2315_v37 }
 0x26e   : > { %v1095_v54 = vadd.f32 %v1094_v9, %v1093_v11   ;;  %v1082_v12 = vadd.f32 %v2829_v61, %v1081_v10  ;;  %v2701_v9 = vld [vmem:[%s4129_s3 + $0x16c] sm:$0xf] (%p773_p0)  ;;  %v2373_v10 = vld [vmem:[%s4129_s3 + $0x178] sm:$0xf0] (%p773_p0)  ;;  %v2364_v11 = vor.u32 (%p773_p0), %v2702_v3, %v2363_v2  ;;  %1381 = vmatpush.bf16.msra.mxu1 (%p773_p0), %v2384_v0 }
 0x270   : > { %2832 = vtanh.f32 %v1095_v54  ;;  %v1086_v15 = vsel %vm1085_vm10, %v2829_v61, %v1082_v12  ;;  %v2435_v54 = vld [vmem:[%s4129_s3 + $0x1e8] sm:$0xf] (%p773_p0)  ;;  %v2705_v61 = vld [vmem:[%s4129_s3 + $0x18c] sm:$0xf] (%p773_p0)  ;;  %v2368_v12 = vor.u32 (%p773_p0), %v2700_v4, %v2365_v6 }
 0x271   : > { %v1091_v18 = vsel %vm1088_vm11, %v1090_v16, %v1086_v15  ;;  %v2436_v26 = vor.u32 (%p773_p0), %v2719_v24, %v2435_v54  ;;  %v2392_v5 = vor.u32 (%p773_p0), %v2705_v61, %v2389_v62  ;;  %v2698_v15 = vld [vmem:[%s4129_s3 + $0x14c] sm:$0xf0] (%p773_p0)  ;;  %v2696_v16 = vld [vmem:[%s4129_s3 + $0x144] sm:$0xf] (%p773_p0)  ;;  %1333 = vmatpush.bf16.msra.mxu0 (%p773_p0), %v2364_v11  ;;  %v2356_v24 = vor.u32 (%p773_p0), %v2699_v20, %v2355_v19 }
 0x272   :  { %v2348_v23 = vor.u32 (%p773_p0), %v2698_v15, %v2347_v14  ;;  %1382 = vmatpush.bf16.msra.mxu1 (%p773_p0), %v2368_v12  ;;  %v2312_v11 = vld [vmem:[%s4130_s5 + $0x4] sm:$0xf] (%p773_p0)  ;;  %s3906_s5 = smov (%p773_p0), 0  }
 0x273   :  { %1427 = vmatpush.bf16.msra.mxu2 (%p773_p0), %v2436_v26  ;;  %v2694_v26 = vld [vmem:[%s4129_s3 + $0x12c] sm:$0xf0] (%p773_p0)  ;;  %v3830_v12 = vperm.slane (%p773_p0), %v2312_v11, 0  ;;  %v3838_v19 = vperm.slane (%p773_p0), %v2312_v11, 3 }
 0x274   :  { %v2332_v33 = vor.u32 (%p773_p0), %v2694_v26, %v2331_v25 }
 0x275   :  { %775 = sbr.rel (!%p773_p0) target bundleno = 429 (0x1ad), region = 65  ;;  %1334 = vmatpush.bf16.msra.mxu0 (%p773_p0), %v2348_v23 }
 0x276   : > { %v2833_v17 = vpop.eup %2832 }
 0x277   : > { %v1097_v55 = vmul.f32 %v2833_v17, %v1091_v18   ;;  %1428 = vmatpush.bf16.msra.mxu2 (%p773_p0), %v2420_v39  ;;  %v2376_v17 = vor.u32 (%p773_p0), %v2701_v9, %v2373_v10  ;;  %v2349_v18 = vld [vmem:[%s4129_s3 + $0x150] sm:$0xf0] (%p773_p0)  ;;  %v2688_v39 = vld [vmem:[%s4129_s3 + $0x104] sm:$0xf] (%p773_p0) }
 0x278   :  { %v2352_v54 = vor.u32 (%p773_p0), %v2696_v16, %v2349_v18  ;;  %v2320_v52 = vor.u32 (%p773_p0), %v2688_v39, %v2317_v41  ;;  %v3836_v18 = vperm.slane (%p773_p0), %v2312_v11, 2 }
 0x279   : > { %1100 = vst [vmem:[%s1099_s27] sm:$0xff] %v1097_v55  ;;  %v2440_v55 = vor.u32 (%p773_p0), %v2717_v27, %v2437_v28  ;;  %v2692_v27 = vld [vmem:[%s4129_s3 + $0x124] sm:$0xf] (%p773_p0)  ;;  %v2360_v28 = vor.u32 (%p773_p0), %v2697_v21, %v2357_v22  ;;  %1335 = vmatpush.bf16.msra.mxu0 (%p773_p0), %v2332_v33 }
 0x27a   :  { %1383 = vmatpush.bf16.msra.mxu1 %v2352_v54  ;;  %v2336_v35 = vor.u32 %v2692_v27, %v2333_v29 }
 0x27b   :  { %1476 = vmatpush.bf16.msra.mxu3 %v2440_v55  ;;  %1429 = vmatpush.bf16.msra.mxu2 %v2404_v44  ;;  %v2339_v55 = vld [vmem:[%s4129_s3 + $0x128] sm:$0xf] }
 0x27c   :  { %v2340_v36 = vor.u32 %v2695_v30, %v2339_v55 }
 0x27d   :  { %1336 = vmatpush.bf16.msra.mxu0 %v2316_v47 }
 0x27e   :  { %1384 = vmatpush.bf16.msra.mxu1 %v2336_v35 }
 0x27f   :  { %1477 = vmatpush.bf16.msra.mxu3 %v2424_v45  ;;  %1430 = vmatpush.bf16.msra.mxu2 %v2388_v1  ;;  %v2691_v45 = vld [vmem:[%s4129_s3 + $0x114] sm:$0xf0] }
 0x280   :  { %v1101_v50 = vld [vmem:[%s4126_s6] sm:$0xff]  ;;  %v1102_v51 = vld [vmem:[%s4126_s6 + $0x8] sm:$0xff]  ;;  %v2324_v53 = vor.u32 %v2691_v45, %v2323_v42  ;;  %v1103_v48 = vld [vmem:[%s4126_s6 + $0x10] sm:$0xff] }
 0x281   :  { %v1117_v44 = vpack.c.bf16 %v1102_v51, %v1101_v50  ;;  %v1104_v49 = vld [vmem:[%s4126_s6 + $0x18] sm:$0xff]  ;;  %v1106_v58 = vld [vmem:[%s4126_s6 + $0x28] sm:$0xff]  ;;  %v1107_v60 = vld [vmem:[%s4126_s6 + $0x30] sm:$0xff] }
 0x282   :  { %1385 = vmatpush.bf16.msra.mxu1 %v2320_v52  ;;  %v1118_v56 = vpack.c.bf16 %v1104_v49, %v1103_v48  ;;  %v1108_v61 = vld [vmem:[%s4126_s6 + $0x38] sm:$0xff]  ;;  %v1109_v63 = vld [vmem:[%s4126_s6 + $0x40] sm:$0xff]  ;;  %v1110_v0 = vld [vmem:[%s4126_s6 + $0x48] sm:$0xff] }
 0x283   :  { %1478 = vmatpush.bf16.msra.mxu3 %v2408_v57  ;;  %1431 = vmatpush.bf16.msra.mxu2 %v2372_v13  ;;  %v1105_v57 = vld [vmem:[%s4126_s6 + $0x20] sm:$0xff]  ;;  %v1120_v62 = vpack.c.bf16 %v1108_v61, %v1107_v60  ;;  %v1121_v1 = vpack.c.bf16 %v1110_v0, %v1109_v63  ;;  %v1111_v2 = vld [vmem:[%s4126_s6 + $0x50] sm:$0xff]  ;;  %v1112_v3 = vld [vmem:[%s4126_s6 + $0x58] sm:$0xff]  ;;  %v3832_v13 = vperm.slane %v2312_v11, 1 }
 0x284   :  { %1337 = vmatmul.bf16.vlgmr.msra.gmra.mxu0 %v1117_v44  ;;  %v1119_v59 = vpack.c.bf16 %v1106_v58, %v1105_v57  ;;  %v1122_v4 = vpack.c.bf16 %v1112_v3, %v1111_v2  ;;  %v1114_v6 = vld [vmem:[%s4126_s6 + $0x68] sm:$0xff]  ;;  %v1115_v8 = vld [vmem:[%s4126_s6 + $0x70] sm:$0xff]  ;;  %v1116_v9 = vld [vmem:[%s4126_s6 + $0x78] sm:$0xff] }
 0x285   :  { %1386 = vmatmul.bf16.vlgmr.msra.gmra.mxu1 %v1117_v44  ;;  %v1124_v10 = vpack.c.bf16 %v1116_v9, %v1115_v8 }
 0x287   :  { %1479 = vmatpush.bf16.msra.mxu3 %v2392_v5  ;;  %1432 = vmatpush.bf16.msra.mxu2 %v2356_v24  ;;  %v1113_v5 = vld [vmem:[%s4126_s6 + $0x60] sm:$0xff] }
 0x288   :  { %v1123_v7 = vpack.c.bf16 %v1114_v6, %v1113_v5 }
 0x28b   :  { %1480 = vmatpush.bf16.msra.mxu3 %v2376_v17  ;;  %1433 = vmatpush.bf16.msra.mxu2 %v2340_v36 }
 0x28f   :  { %1481 = vmatpush.bf16.msra.mxu3 %v2360_v28  ;;  %1434 = vmatpush.bf16.msra.mxu2 %v2324_v53 }
 0x292   :  { %1435 = vmatmul.bf16.vlgmr.msra.gmra.mxu2 %v1117_v44 }
 0x293   :  { %1482 = vmatpush.bf16.msra.mxu3 %v2344_v40 }
 0x294   :  { %1342 = vmatmul.bf16.gmra.mxu0 %v1118_v56 }
 0x295   :  { %1391 = vmatmul.bf16.gmra.mxu1 %v1118_v56 }
 0x297   :  { %1483 = vmatpush.bf16.msra.mxu3 %v2328_v43 }
 0x29a   :  { %1484 = vmatmul.bf16.vlgmr.msra.gmra.mxu3 %v1117_v44 }
 0x2a2   :  { %1440 = vmatmul.bf16.gmra.mxu2 %v1118_v56 }
 0x2a4   :  { %1347 = vmatmul.bf16.gmra.mxu0 %v1119_v59 }
 0x2a5   :  { %1396 = vmatmul.bf16.gmra.mxu1 %v1119_v59 }
 0x2aa   :  { %1489 = vmatmul.bf16.gmra.mxu3 %v1118_v56 }
 0x2b2   :  { %1445 = vmatmul.bf16.gmra.mxu2 %v1119_v59 }
 0x2b4   :  { %1352 = vmatmul.bf16.gmra.mxu0 %v1120_v62 }
 0x2b5   :  { %1401 = vmatmul.bf16.gmra.mxu1 %v1120_v62 }
 0x2ba   :  { %1494 = vmatmul.bf16.gmra.mxu3 %v1119_v59 }
 0x2c2   :  { %1450 = vmatmul.bf16.gmra.mxu2 %v1120_v62 }
 0x2c4   :  { %1357 = vmatmul.bf16.gmra.mxu0 %v1121_v1 }
 0x2c5   :  { %1406 = vmatmul.bf16.gmra.mxu1 %v1121_v1 }
 0x2ca   :  { %1499 = vmatmul.bf16.gmra.mxu3 %v1120_v62 }
 0x2d2   :  { %1455 = vmatmul.bf16.gmra.mxu2 %v1121_v1 }
 0x2d4   :  { %1362 = vmatmul.bf16.gmra.mxu0 %v1122_v4 }
 0x2d5   :  { %1411 = vmatmul.bf16.gmra.mxu1 %v1122_v4 }
 0x2da   :  { %1504 = vmatmul.bf16.gmra.mxu3 %v1121_v1 }
 0x2e2   :  { %1460 = vmatmul.bf16.gmra.mxu2 %v1122_v4 }
 0x2e4   :  { %1367 = vmatmul.bf16.gmra.mxu0 %v1123_v7 }
 0x2e5   :  { %1416 = vmatmul.bf16.gmra.mxu1 %v1123_v7 }
 0x2ea   :  { %1509 = vmatmul.bf16.gmra.mxu3 %v1122_v4 }
 0x2f2   :  { %1465 = vmatmul.bf16.gmra.mxu2 %v1123_v7 }
 0x2f4   :  { %1372 = vmatmul.bf16.gmra.mxu0 %v1124_v10 }
 0x2f5   :  { %1421 = vmatmul.bf16.gmra.mxu1 %v1124_v10 }
 0x2fa   :  { %1514 = vmatmul.bf16.gmra.mxu3 %v1123_v7 }
 0x301   :  { %v1338_v14 = vpop.f32.mrf.mxu0 }
 0x302   :  { %1470 = vmatmul.bf16.gmra.mxu2 %v1124_v10  ;;  %v1339_v15 = vadd.f32 %v1338_v14, %v3830_v12  ;;  %v1387_v16 = vpop.f32.mrf.mxu1 }
 0x303   :  { %v1388_v17 = vadd.f32 %v1387_v16, %v3832_v13 }
 0x304   :  { %1525 = vst [vmem:[#allocation2] sm:$0xff] %v1339_v15 }
 0x305   :  { %1526 = vst [vmem:[#allocation2 + $0x8] sm:$0xff] %v1388_v17 }
 0x309   :  { %v1340_v23 = vpop.f32.mrf.mxu0 }
 0x30a   :  { %1519 = vmatmul.bf16.gmra.mxu3 %v1124_v10  ;;  %v1341_v24 = vadd.f32 %v1340_v23, %v3830_v12  ;;  %v1389_v25 = vpop.f32.mrf.mxu1 }
 0x30b   :  { %v1390_v26 = vadd.f32 %v1389_v25, %v3832_v13 }
 0x30c   :  { %1529 = vst [vmem:[#allocation2 + $0x20] sm:$0xff] %v1341_v24 }
 0x30d   :  { %1530 = vst [vmem:[#allocation2 + $0x28] sm:$0xff] %v1390_v26 }
 0x311   :  { %v1343_v55 = vpop.f32.mrf.mxu0 }
 0x312   :  { %v1344_v31 = vadd.f32 %v1343_v55, %v3830_v12  ;;  %v1392_v32 = vpop.f32.mrf.mxu1 }
 0x313   :  { %v1393_v33 = vadd.f32 %v1392_v32, %v3832_v13 }
 0x314   :  { %1533 = vst [vmem:[#allocation2 + $0x40] sm:$0xff] %v1344_v31 }
 0x315   :  { %v1436_v20 = vpop.f32.mrf.mxu2  ;;  %1534 = vst [vmem:[#allocation2 + $0x48] sm:$0xff] %v1393_v33 }
 0x316   :  { %v1437_v21 = vadd.f32 %v1436_v20, %v3836_v18 }
 0x318   :  { %1527 = vst [vmem:[#allocation2 + $0x10] sm:$0xff] %v1437_v21 }
 0x319   :  { %v1345_v38 = vpop.f32.mrf.mxu0 }
 0x31a   :  { %v1346_v40 = vadd.f32 %v1345_v38, %v3830_v12  ;;  %v1394_v41 = vpop.f32.mrf.mxu1 }
 0x31b   :  { %v1395_v42 = vadd.f32 %v1394_v41, %v3832_v13 }
 0x31c   :  { %1537 = vst [vmem:[#allocation2 + $0x60] sm:$0xff] %v1346_v40 }
 0x31d   :  { %v1485_v22 = vpop.f32.mrf.mxu3  ;;  %v1438_v27 = vpop.f32.mrf.mxu2  ;;  %1538 = vst [vmem:[#allocation2 + $0x68] sm:$0xff] %v1395_v42 }
 0x31e   :  { %v1486_v54 = vadd.f32 %v1485_v22, %v3838_v19  ;;  %v1439_v28 = vadd.f32 %v1438_v27, %v3836_v18 }
 0x320   :  { %1528 = vst [vmem:[#allocation2 + $0x18] sm:$0xff] %v1486_v54 }
 0x321   :  { %1531 = vst [vmem:[#allocation2 + $0x30] sm:$0xff] %v1439_v28  ;;  %v1348_v47 = vpop.f32.mrf.mxu0 }
 0x322   :  { %v1349_v51 = vadd.f32 %v1348_v47, %v3830_v12  ;;  %v1397_v52 = vpop.f32.mrf.mxu1 }
 0x323   :  { %v1398_v53 = vadd.f32 %v1397_v52, %v3832_v13 }
 0x324   :  { %1541 = vst [vmem:[#allocation2 + $0x80] sm:$0xff] %v1349_v51 }
 0x325   :  { %v1487_v29 = vpop.f32.mrf.mxu3  ;;  %v1441_v35 = vpop.f32.mrf.mxu2  ;;  %1542 = vst [vmem:[#allocation2 + $0x88] sm:$0xff] %v1398_v53 }
 0x326   :  { %v1488_v30 = vadd.f32 %v1487_v29, %v3838_v19  ;;  %v1442_v36 = vadd.f32 %v1441_v35, %v3836_v18 }
 0x328   :  { %1532 = vst [vmem:[#allocation2 + $0x38] sm:$0xff] %v1488_v30 }
 0x329   :  { %1535 = vst [vmem:[#allocation2 + $0x50] sm:$0xff] %v1442_v36  ;;  %v1350_v49 = vpop.f32.mrf.mxu0 }
 0x32a   :  { %v1351_v57 = vadd.f32 %v1350_v49, %v3830_v12  ;;  %v1399_v58 = vpop.f32.mrf.mxu1 }
 0x32b   :  { %v1400_v59 = vadd.f32 %v1399_v58, %v3832_v13 }
 0x32c   :  { %1545 = vst [vmem:[#allocation2 + $0xa0] sm:$0xff] %v1351_v57 }
 0x32d   :  { %v1490_v37 = vpop.f32.mrf.mxu3  ;;  %v1443_v45 = vpop.f32.mrf.mxu2  ;;  %1546 = vst [vmem:[#allocation2 + $0xa8] sm:$0xff] %v1400_v59 }
 0x32e   :  { %v1491_v39 = vadd.f32 %v1490_v37, %v3838_v19  ;;  %v1444_v46 = vadd.f32 %v1443_v45, %v3836_v18 }
 0x330   :  { %1536 = vst [vmem:[#allocation2 + $0x58] sm:$0xff] %v1491_v39 }
 0x331   :  { %1539 = vst [vmem:[#allocation2 + $0x70] sm:$0xff] %v1444_v46  ;;  %v1353_v63 = vpop.f32.mrf.mxu0 }
 0x332   :  { %v1354_v1 = vadd.f32 %v1353_v63, %v3830_v12  ;;  %v1402_v2 = vpop.f32.mrf.mxu1 }
 0x333   :  { %v1403_v3 = vadd.f32 %v1402_v2, %v3832_v13 }
 0x334   :  { %1549 = vst [vmem:[#allocation2 + $0xc0] sm:$0xff] %v1354_v1 }
 0x335   :  { %v1492_v34 = vpop.f32.mrf.mxu3  ;;  %v1446_v43 = vpop.f32.mrf.mxu2  ;;  %1550 = vst [vmem:[#allocation2 + $0xc8] sm:$0xff] %v1403_v3 }
 0x336   :  { %v1493_v50 = vadd.f32 %v1492_v34, %v3838_v19  ;;  %v1447_v44 = vadd.f32 %v1446_v43, %v3836_v18 }
 0x338   :  { %1540 = vst [vmem:[#allocation2 + $0x78] sm:$0xff] %v1493_v50 }
 0x339   :  { %1543 = vst [vmem:[#allocation2 + $0x90] sm:$0xff] %v1447_v44  ;;  %v1355_v7 = vpop.f32.mrf.mxu0 }
 0x33a   :  { %v1356_v9 = vadd.f32 %v1355_v7, %v3830_v12  ;;  %v1404_v10 = vpop.f32.mrf.mxu1 }
 0x33b   :  { %v1405_v11 = vadd.f32 %v1404_v10, %v3832_v13 }
 0x33c   :  { %1553 = vst [vmem:[#allocation2 + $0xe0] sm:$0xff] %v1356_v9 }
 0x33d   :  { %v1495_v48 = vpop.f32.mrf.mxu3  ;;  %v1448_v60 = vpop.f32.mrf.mxu2  ;;  %1554 = vst [vmem:[#allocation2 + $0xe8] sm:$0xff] %v1405_v11 }
 0x33e   :  { %v1496_v56 = vadd.f32 %v1495_v48, %v3838_v19  ;;  %v1449_v61 = vadd.f32 %v1448_v60, %v3836_v18 }
 0x340   :  { %1544 = vst [vmem:[#allocation2 + $0x98] sm:$0xff] %v1496_v56 }
 0x341   :  { %1547 = vst [vmem:[#allocation2 + $0xb0] sm:$0xff] %v1449_v61  ;;  %v1358_v17 = vpop.f32.mrf.mxu0 }
 0x342   :  { %v1359_v21 = vadd.f32 %v1358_v17, %v3830_v12  ;;  %v1407_v22 = vpop.f32.mrf.mxu1 }
 0x343   :  { %v1408_v23 = vadd.f32 %v1407_v22, %v3832_v13 }
 0x344   :  { %1557 = vst [vmem:[#allocation2 + $0x100] sm:$0xff] %v1359_v21 }
 0x345   :  { %v1497_v62 = vpop.f32.mrf.mxu3  ;;  %v1451_v4 = vpop.f32.mrf.mxu2  ;;  %1558 = vst [vmem:[#allocation2 + $0x108] sm:$0xff] %v1408_v23 }
 0x346   :  { %v1498_v0 = vadd.f32 %v1497_v62, %v3838_v19  ;;  %v1452_v5 = vadd.f32 %v1451_v4, %v3836_v18 }
 0x348   :  { %1548 = vst [vmem:[#allocation2 + $0xb8] sm:$0xff] %v1498_v0 }
 0x349   :  { %1551 = vst [vmem:[#allocation2 + $0xd0] sm:$0xff] %v1452_v5  ;;  %v1360_v26 = vpop.f32.mrf.mxu0 }
 0x34a   :  { %v1361_v28 = vadd.f32 %v1360_v26, %v3830_v12  ;;  %v1409_v29 = vpop.f32.mrf.mxu1 }
 0x34b   :  { %v1410_v55 = vadd.f32 %v1409_v29, %v3832_v13 }
 0x34c   :  { %1561 = vst [vmem:[#allocation2 + $0x120] sm:$0xff] %v1361_v28 }
 0x34d   :  { %v1500_v6 = vpop.f32.mrf.mxu3  ;;  %v1453_v14 = vpop.f32.mrf.mxu2  ;;  %1562 = vst [vmem:[#allocation2 + $0x128] sm:$0xff] %v1410_v55 }
 0x34e   :  { %v1501_v8 = vadd.f32 %v1500_v6, %v3838_v19  ;;  %v1454_v15 = vadd.f32 %v1453_v14, %v3836_v18 }
 0x350   :  { %1552 = vst [vmem:[#allocation2 + $0xd8] sm:$0xff] %v1501_v8 }
 0x351   :  { %1555 = vst [vmem:[#allocation2 + $0xf0] sm:$0xff] %v1454_v15  ;;  %v1363_v33 = vpop.f32.mrf.mxu0 }
 0x352   :  { %v1364_v36 = vadd.f32 %v1363_v33, %v3830_v12  ;;  %v1412_v37 = vpop.f32.mrf.mxu1 }
 0x353   :  { %v1413_v38 = vadd.f32 %v1412_v37, %v3832_v13 }
 0x354   :  { %1565 = vst [vmem:[#allocation2 + $0x140] sm:$0xff] %v1364_v36 }
 0x355   :  { %v1502_v16 = vpop.f32.mrf.mxu3  ;;  %v1456_v54 = vpop.f32.mrf.mxu2  ;;  %1566 = vst [vmem:[#allocation2 + $0x148] sm:$0xff] %v1413_v38 }
 0x356   :  { %v1503_v20 = vadd.f32 %v1502_v16, %v3838_v19  ;;  %v1457_v24 = vadd.f32 %v1456_v54, %v3836_v18  ;;  %v3902_v54 = vmov 0.0  }
 0x358   :  { %1556 = vst [vmem:[#allocation2 + $0xf8] sm:$0xff] %v1503_v20 }
 0x359   :  { %1559 = vst [vmem:[#allocation2 + $0x110] sm:$0xff] %v1457_v24  ;;  %v1365_v42 = vpop.f32.mrf.mxu0  ;;  %v3904_v24 = vmov 0.0  }
 0x35a   :  { %v1366_v46 = vadd.f32 %v1365_v42, %v3830_v12  ;;  %v1414_v34 = vpop.f32.mrf.mxu1 }
 0x35b   :  { %v1415_v47 = vadd.f32 %v1414_v34, %v3832_v13 }
 0x35c   :  { %1569 = vst [vmem:[#allocation2 + $0x160] sm:$0xff] %v1366_v46 }
 0x35d   :  { %v1505_v25 = vpop.f32.mrf.mxu3  ;;  %v1458_v30 = vpop.f32.mrf.mxu2  ;;  %1570 = vst [vmem:[#allocation2 + $0x168] sm:$0xff] %v1415_v47 }
 0x35e   :  { %v1506_v27 = vadd.f32 %v1505_v25, %v3838_v19  ;;  %v1459_v31 = vadd.f32 %v1458_v30, %v3836_v18 }
 0x360   :  { %1560 = vst [vmem:[#allocation2 + $0x118] sm:$0xff] %v1506_v27 }
 0x361   :  { %1563 = vst [vmem:[#allocation2 + $0x130] sm:$0xff] %v1459_v31  ;;  %v1368_v53 = vpop.f32.mrf.mxu0 }
 0x362   :  { %v1369_v44 = vadd.f32 %v1368_v53, %v3830_v12  ;;  %v1417_v48 = vpop.f32.mrf.mxu1 }
 0x363   :  { %v1418_v49 = vadd.f32 %v1417_v48, %v3832_v13 }
 0x364   :  { %1573 = vst [vmem:[#allocation2 + $0x180] sm:$0xff] %v1369_v44 }
 0x365   :  { %v1507_v32 = vpop.f32.mrf.mxu3  ;;  %v1461_v39 = vpop.f32.mrf.mxu2  ;;  %1574 = vst [vmem:[#allocation2 + $0x188] sm:$0xff] %v1418_v49 }
 0x366   :  { %v1508_v35 = vadd.f32 %v1507_v32, %v3838_v19  ;;  %v1462_v40 = vadd.f32 %v1461_v39, %v3836_v18 }
 0x368   :  { %1564 = vst [vmem:[#allocation2 + $0x138] sm:$0xff] %v1508_v35 }
 0x369   :  { %1567 = vst [vmem:[#allocation2 + $0x150] sm:$0xff] %v1462_v40  ;;  %v1370_v59 = vpop.f32.mrf.mxu0 }
 0x36a   :  { %v1371_v61 = vadd.f32 %v1370_v59, %v3830_v12  ;;  %v1419_v62 = vpop.f32.mrf.mxu1 }
 0x36b   :  { %v1420_v63 = vadd.f32 %v1419_v62, %v3832_v13 }
 0x36c   :  { %1577 = vst [vmem:[#allocation2 + $0x1a0] sm:$0xff] %v1371_v61 }
 0x36d   :  { %v1510_v41 = vpop.f32.mrf.mxu3  ;;  %v1463_v50 = vpop.f32.mrf.mxu2  ;;  %1578 = vst [vmem:[#allocation2 + $0x1a8] sm:$0xff] %v1420_v63 }
 0x36e   :  { %v1511_v45 = vadd.f32 %v1510_v41, %v3838_v19  ;;  %v1464_v51 = vadd.f32 %v1463_v50, %v3836_v18 }
 0x370   :  { %1568 = vst [vmem:[#allocation2 + $0x158] sm:$0xff] %v1511_v45 }
 0x371   :  { %1571 = vst [vmem:[#allocation2 + $0x170] sm:$0xff] %v1464_v51  ;;  %v1373_v3 = vpop.f32.mrf.mxu0 }
 0x372   :  { %v1374_v5 = vadd.f32 %v1373_v3, %v3830_v12  ;;  %v1422_v6 = vpop.f32.mrf.mxu1 }
 0x373   :  { %v1423_v7 = vadd.f32 %v1422_v6, %v3832_v13 }
 0x374   :  { %1581 = vst [vmem:[#allocation2 + $0x1c0] sm:$0xff] %v1374_v5 }
 0x375   :  { %v1512_v52 = vpop.f32.mrf.mxu3  ;;  %v1466_v56 = vpop.f32.mrf.mxu2  ;;  %1582 = vst [vmem:[#allocation2 + $0x1c8] sm:$0xff] %v1423_v7 }
 0x376   :  { %v1513_v43 = vadd.f32 %v1512_v52, %v3838_v19  ;;  %v1467_v57 = vadd.f32 %v1466_v56, %v3836_v18 }
 0x378   :  { %1572 = vst [vmem:[#allocation2 + $0x178] sm:$0xff] %v1513_v43 }
 0x379   :  { %1575 = vst [vmem:[#allocation2 + $0x190] sm:$0xff] %v1467_v57  ;;  %v1375_v11 = vpop.f32.mrf.mxu0 }
 0x37a   :  { %v1376_v15 = vadd.f32 %v1375_v11, %v3830_v12  ;;  %v1424_v16 = vpop.f32.mrf.mxu1 }
 0x37b   :  { %v1425_v17 = vadd.f32 %v1424_v16, %v3832_v13 }
 0x37c   :  { %1585 = vst [vmem:[#allocation2 + $0x1e0] sm:$0xff] %v1376_v15 }
 0x37d   :  { %v1515_v58 = vpop.f32.mrf.mxu3  ;;  %v1468_v0 = vpop.f32.mrf.mxu2  ;;  %1586 = vst [vmem:[#allocation2 + $0x1e8] sm:$0xff] %v1425_v17 }
 0x37e   :  { %v1516_v60 = vadd.f32 %v1515_v58, %v3838_v19  ;;  %v1469_v1 = vadd.f32 %v1468_v0, %v3836_v18 }
 0x380   :  { %1576 = vst [vmem:[#allocation2 + $0x198] sm:$0xff] %v1516_v60 }
 0x381   :  { %1579 = vst [vmem:[#allocation2 + $0x1b0] sm:$0xff] %v1469_v1 }
 0x385   :  { %v1517_v2 = vpop.f32.mrf.mxu3  ;;  %v1471_v8 = vpop.f32.mrf.mxu2 }
 0x386   :  { %v1518_v4 = vadd.f32 %v1517_v2, %v3838_v19  ;;  %v1472_v9 = vadd.f32 %v1471_v8, %v3836_v18 }
 0x388   :  { %1580 = vst [vmem:[#allocation2 + $0x1b8] sm:$0xff] %v1518_v4 }
 0x389   :  { %1583 = vst [vmem:[#allocation2 + $0x1d0] sm:$0xff] %v1472_v9 }
 0x38d   :  { %v1520_v10 = vpop.f32.mrf.mxu3  ;;  %v1473_v20 = vpop.f32.mrf.mxu2 }
 0x38e   :  { %v1521_v14 = vadd.f32 %v1520_v10, %v3838_v19  ;;  %v1474_v21 = vadd.f32 %v1473_v20, %v3836_v18 }
 0x390   :  { %1584 = vst [vmem:[#allocation2 + $0x1d8] sm:$0xff] %v1521_v14 }
 0x391   :  { %1587 = vst [vmem:[#allocation2 + $0x1f0] sm:$0xff] %v1474_v21 }
 0x395   :  { %v1522_v22 = vpop.f32.mrf.mxu3 }
 0x396   :  { %v1523_v23 = vadd.f32 %v1522_v22, %v3838_v19 }
 0x398   :  { %1588 = vst [vmem:[#allocation2 + $0x1f8] sm:$0xff] %v1523_v23 }
 0x399 LB: > { %v2589_v12 = vld [vmem:[%s4125_s4 + $0x1e0] sm:$0xf]  ;;  %v2751_v13 = vld [vmem:[%s4125_s4 + $0x1ec] sm:$0xf0]  ;;  %v2749_v18 = vld [vmem:[%s4125_s4 + $0x1e4] sm:$0xf]  ;;  %s2896_s5 = sphi %s3906_s5, %s1594_s5   ;;  %v2892_v24 = vphi %v3904_v24, %v1916_v24   ;;  %v2888_v54 = vphi %v3902_v54, %v1914_v54  }
 0x39a   : > { %v2590_v19 = vor.u32 %v2751_v13, %v2589_v12  ;;  %v2591_v25 = vld [vmem:[%s4125_s4 + $0x1f0] sm:$0xf0]  ;;  %v2750_v26 = vld [vmem:[%s4125_s4 + $0x1ec] sm:$0xf]  ;;  %v2599_v27 = vld [vmem:[%s4125_s4 + $0x1f8] sm:$0xf0] }
 0x39b   : > { %v2594_v28 = vor.u32 %v2749_v18, %v2591_v25  ;;  %v2602_v29 = vor.u32 %v2750_v26, %v2599_v27  ;;  %v2573_v55 = vld [vmem:[%s4125_s4 + $0x1c0] sm:$0xf]  ;;  %v2747_v30 = vld [vmem:[%s4125_s4 + $0x1cc] sm:$0xf0]  ;;  %v2745_v31 = vld [vmem:[%s4125_s4 + $0x1c4] sm:$0xf] }
 0x39c   : > { %1798 = vmatpush.bf16.msra.mxu0 %v2590_v19  ;;  %v2574_v32 = vor.u32 %v2747_v30, %v2573_v55  ;;  %v2575_v33 = vld [vmem:[%s4125_s4 + $0x1d0] sm:$0xf0]  ;;  %v2746_v35 = vld [vmem:[%s4125_s4 + $0x1cc] sm:$0xf]  ;;  %v2583_v36 = vld [vmem:[%s4125_s4 + $0x1d8] sm:$0xf0] }
 0x39d   : > { %1811 = vmatpush.bf16.msra.mxu1 %v2594_v28  ;;  %1837 = vmatpush.bf16.msra.mxu3 %v2602_v29  ;;  %v2578_v37 = vor.u32 %v2745_v31, %v2575_v33  ;;  %v2586_v38 = vor.u32 %v2746_v35, %v2583_v36  ;;  %v2597_v39 = vld [vmem:[%s4125_s4 + $0x1e8] sm:$0xf]  ;;  %v2752_v40 = vld [vmem:[%s4125_s4 + $0x1f4] sm:$0xf0]  ;;  %v2557_v41 = vld [vmem:[%s4125_s4 + $0x1a0] sm:$0xf] }
 0x39e   : > { %v2598_v42 = vor.u32 %v2752_v40, %v2597_v39  ;;  %v2743_v45 = vld [vmem:[%s4125_s4 + $0x1ac] sm:$0xf0]  ;;  %v2741_v46 = vld [vmem:[%s4125_s4 + $0x1a4] sm:$0xf]  ;;  %v2559_v34 = vld [vmem:[%s4125_s4 + $0x1b0] sm:$0xf0] }
 0x39f   : > { %v2742_v47 = vld [vmem:[%s4125_s4 + $0x1ac] sm:$0xf]  ;;  %v2567_v50 = vld [vmem:[%s4125_s4 + $0x1b8] sm:$0xf0]  ;;  %v2581_v51 = vld [vmem:[%s4125_s4 + $0x1c8] sm:$0xf]  ;;  %v2558_v52 = vor.u32 %v2743_v45, %v2557_v41  ;;  %v2562_v48 = vor.u32 %v2741_v46, %v2559_v34 }
 0x3a0   : > { %1799 = vmatpush.bf16.msra.mxu0 %v2574_v32  ;;  %1824 = vmatpush.bf16.msra.mxu2 %v2598_v42  ;;  %v2748_v53 = vld [vmem:[%s4125_s4 + $0x1d4] sm:$0xf0]  ;;  %v2541_v43 = vld [vmem:[%s4125_s4 + $0x180] sm:$0xf]  ;;  %v2739_v44 = vld [vmem:[%s4125_s4 + $0x18c] sm:$0xf0]  ;;  %v2570_v49 = vor.u32 %v2742_v47, %v2567_v50 }
 0x3a1   : > { %1812 = vmatpush.bf16.msra.mxu1 %v2578_v37  ;;  %1838 = vmatpush.bf16.msra.mxu3 %v2586_v38  ;;  %v2582_v56 = vor.u32 %v2748_v53, %v2581_v51  ;;  %v2737_v57 = vld [vmem:[%s4125_s4 + $0x184] sm:$0xf]  ;;  %v2543_v58 = vld [vmem:[%s4125_s4 + $0x190] sm:$0xf0]  ;;  %v2738_v59 = vld [vmem:[%s4125_s4 + $0x18c] sm:$0xf]  ;;  %v2542_v63 = vor.u32 %v2739_v44, %v2541_v43 }
 0x3a2   : > { %v2551_v60 = vld [vmem:[%s4125_s4 + $0x198] sm:$0xf0]  ;;  %v2565_v61 = vld [vmem:[%s4125_s4 + $0x1a8] sm:$0xf]  ;;  %v2744_v62 = vld [vmem:[%s4125_s4 + $0x1b4] sm:$0xf0]  ;;  %v2546_v3 = vor.u32 %v2737_v57, %v2543_v58 }
 0x3a3   : > { %v2566_v0 = vor.u32 %v2744_v62, %v2565_v61  ;;  %v2525_v1 = vld [vmem:[%s4125_s4 + $0x160] sm:$0xf]  ;;  %v2735_v2 = vld [vmem:[%s4125_s4 + $0x16c] sm:$0xf0]  ;;  %v2554_v4 = vor.u32 %v2738_v59, %v2551_v60  ;;  %v2733_v5 = vld [vmem:[%s4125_s4 + $0x164] sm:$0xf] }
 0x3a4   : > { %1800 = vmatpush.bf16.msra.mxu0 %v2558_v52  ;;  %1825 = vmatpush.bf16.msra.mxu2 %v2582_v56  ;;  %v2549_v6 = vld [vmem:[%s4125_s4 + $0x188] sm:$0xf]  ;;  %v2740_v7 = vld [vmem:[%s4125_s4 + $0x194] sm:$0xf0]  ;;  %v2527_v8 = vld [vmem:[%s4125_s4 + $0x170] sm:$0xf0]  ;;  %v2526_v11 = vor.u32 %v2735_v2, %v2525_v1 }
 0x3a5   : > { %1813 = vmatpush.bf16.msra.mxu1 %v2562_v48  ;;  %1839 = vmatpush.bf16.msra.mxu3 %v2570_v49  ;;  %v2734_v9 = vld [vmem:[%s4125_s4 + $0x16c] sm:$0xf]  ;;  %v2535_v10 = vld [vmem:[%s4125_s4 + $0x178] sm:$0xf0]  ;;  %v2550_v14 = vor.u32 %v2740_v7, %v2549_v6  ;;  %v2509_v15 = vld [vmem:[%s4125_s4 + $0x140] sm:$0xf]  ;;  %v2530_v17 = vor.u32 %v2733_v5, %v2527_v8  ;;  %v1604_v49 = vpack.c.bf16 %v2892_v24, %v2892_v24 }
 0x3a6   : > { %v2731_v16 = vld [vmem:[%s4125_s4 + $0x14c] sm:$0xf0]  ;;  %v2538_v20 = vor.u32 %v2734_v9, %v2535_v10  ;;  %v2729_v21 = vld [vmem:[%s4125_s4 + $0x144] sm:$0xf]  ;;  %v2533_v22 = vld [vmem:[%s4125_s4 + $0x168] sm:$0xf] }
 0x3a7   : > { %v2736_v23 = vld [vmem:[%s4125_s4 + $0x174] sm:$0xf0]  ;;  %v2511_v12 = vld [vmem:[%s4125_s4 + $0x150] sm:$0xf0]  ;;  %v2730_v13 = vld [vmem:[%s4125_s4 + $0x14c] sm:$0xf]  ;;  %v2510_v19 = vor.u32 %v2731_v16, %v2509_v15 }
 0x3a8   : > { %1801 = vmatpush.bf16.msra.mxu0 %v2542_v63  ;;  %1826 = vmatpush.bf16.msra.mxu2 %v2566_v0  ;;  %v2519_v18 = vld [vmem:[%s4125_s4 + $0x158] sm:$0xf0]  ;;  %v2534_v25 = vor.u32 %v2736_v23, %v2533_v22  ;;  %v2493_v26 = vld [vmem:[%s4125_s4 + $0x120] sm:$0xf]  ;;  %v2727_v27 = vld [vmem:[%s4125_s4 + $0x12c] sm:$0xf0]  ;;  %v2514_v28 = vor.u32 %v2729_v21, %v2511_v12 }
 0x3a9   : > { %1814 = vmatpush.bf16.msra.mxu1 %v2546_v3  ;;  %1840 = vmatpush.bf16.msra.mxu3 %v2554_v4  ;;  %v2522_v29 = vor.u32 %v2730_v13, %v2519_v18  ;;  %v2725_v55 = vld [vmem:[%s4125_s4 + $0x124] sm:$0xf]  ;;  %v2517_v30 = vld [vmem:[%s4125_s4 + $0x148] sm:$0xf]  ;;  %v2732_v31 = vld [vmem:[%s4125_s4 + $0x154] sm:$0xf0]  ;;  %v2494_v36 = vor.u32 %v2727_v27, %v2493_v26 }
 0x3aa   : > { %v2495_v32 = vld [vmem:[%s4125_s4 + $0x130] sm:$0xf0]  ;;  %v2726_v33 = vld [vmem:[%s4125_s4 + $0x12c] sm:$0xf]  ;;  %v2503_v35 = vld [vmem:[%s4125_s4 + $0x138] sm:$0xf0]  ;;  %v2518_v37 = vor.u32 %v2732_v31, %v2517_v30 }
 0x3ab   : > { %v2477_v38 = vld [vmem:[%s4125_s4 + $0x100] sm:$0xf]  ;;  %v2723_v39 = vld [vmem:[%s4125_s4 + $0x10c] sm:$0xf0]  ;;  %v2498_v40 = vor.u32 %v2725_v55, %v2495_v32  ;;  %v2506_v41 = vor.u32 %v2726_v33, %v2503_v35  ;;  %v2721_v42 = vld [vmem:[%s4125_s4 + $0x104] sm:$0xf] }
 0x3ac   : > { %1802 = vmatpush.bf16.msra.mxu0 %v2526_v11  ;;  %1827 = vmatpush.bf16.msra.mxu2 %v2550_v14  ;;  %v2501_v45 = vld [vmem:[%s4125_s4 + $0x128] sm:$0xf]  ;;  %v2728_v46 = vld [vmem:[%s4125_s4 + $0x134] sm:$0xf0]  ;;  %v2479_v34 = vld [vmem:[%s4125_s4 + $0x110] sm:$0xf0]  ;;  %v2478_v51 = vor.u32 %v2723_v39, %v2477_v38 }
 0x3ad   : > { %1815 = vmatpush.bf16.msra.mxu1 %v2530_v17  ;;  %1841 = vmatpush.bf16.msra.mxu3 %v2538_v20  ;;  %v2722_v47 = vld [vmem:[%s4125_s4 + $0x10c] sm:$0xf]  ;;  %v2487_v50 = vld [vmem:[%s4125_s4 + $0x118] sm:$0xf0]  ;;  %v2502_v52 = vor.u32 %v2728_v46, %v2501_v45  ;;  %v2482_v53 = vor.u32 %v2721_v42, %v2479_v34  ;;  %v2485_v44 = vld [vmem:[%s4125_s4 + $0x108] sm:$0xf] }
 0x3ae   : > { %v2490_v43 = vor.u32 %v2722_v47, %v2487_v50  ;;  %v2724_v48 = vld [vmem:[%s4125_s4 + $0x114] sm:$0xf0]  ;;  %s2720_s15 = sshll.u32 %s2896_s5, 5  ;;  %s2606_s17 = sshll.u32 %s2896_s5, 3 }
 0x3af   : > { %v2486_v56 = vor.u32 %v2724_v48, %v2485_v44  ;;  %s1599_s16 = scalar_lea.vmem [#allocation2], %s2720_s15  ;;  %s1918_s20 = scalar_lea.vmem %s4126_s6, %s2606_s17 }
 0x3b0   : > { %1803 = vmatpush.bf16.msra.mxu0 %v2510_v19  ;;  %1828 = vmatpush.bf16.msra.mxu2 %v2534_v25  ;;  %v1600_v57 = vld [vmem:[%s1599_s16] sm:$0xff]  ;;  %v1601_v58 = vld [vmem:[%s1599_s16 + $0x8] sm:$0xff]  ;;  %v1603_v0 = vld [vmem:[%s1599_s16 + $0x18] sm:$0xff]  ;;  %s1594_s5 = sadd.s32 1, %s2896_s5  }
 0x3b1   : > { %1816 = vmatpush.bf16.msra.mxu1 %v2514_v28  ;;  %1842 = vmatpush.bf16.msra.mxu3 %v2522_v29  ;;  %v1602_v11 = vld [vmem:[%s1599_s16 + $0x10] sm:$0xff]  ;;  %p1591_p1 = scmp.ge.s32.totalorder %s1594_s5, 16  }
 0x3b4   : > { %1804 = vmatpush.bf16.msra.mxu0 %v2494_v36  ;;  %1829 = vmatpush.bf16.msra.mxu2 %v2518_v37 }
 0x3b5   : > { %1817 = vmatpush.bf16.msra.mxu1 %v2498_v40  ;;  %1843 = vmatpush.bf16.msra.mxu3 %v2506_v41 }
 0x3b8   : > { %1805 = vmatpush.bf16.msra.mxu0 %v2478_v51  ;;  %1830 = vmatpush.bf16.msra.mxu2 %v2502_v52 }
 0x3b9   : > { %1818 = vmatpush.bf16.msra.mxu1 %v2482_v53  ;;  %1844 = vmatpush.bf16.msra.mxu3 %v2490_v43 }
 0x3bb   : > { %1806 = vmatmul.bf16.vlgmr.msra.gmra.mxu0 %v1604_v49 }
 0x3bc   : > { %1819 = vmatmul.bf16.vlgmr.msra.gmra.mxu1 %v1604_v49  ;;  %1845 = vmatmul.bf16.vlgmr.msra.gmra.mxu3 %v1604_v49 }
 0x3bd   : > { %1831 = vmatpush.bf16.msra.mxu2 %v2486_v56 }
 0x3c0   : > { %1832 = vmatmul.bf16.vlgmr.msra.gmra.mxu2 %v1604_v49 }
 0x438   : > { %v1807_v59 = vpop.f32.mrf.mxu0 }
 0x439   : > { %v1850_v60 = vadd.f32 %v1807_v59, %v1600_v57  ;;  %v1820_v61 = vpop.f32.mrf.mxu1 }
 0x43a   : > { %v1851_v62 = vadd.f32 %v1820_v61, %v1601_v58 }
 0x43b   : > { %v2603_v63 = vmul.f32 -1.442695, %v1850_v60 }
 0x43c   : > { %v2604_v24 = vmul.f32 -1.442695, %v1851_v62 }
 0x43d   : > { %2834 = vpow2.f32 %v2603_v63 }
 0x43e   : > { %2836 = vpow2.f32 %v2604_v24 }
 0x43f   : > { %v1846_v1 = vpop.f32.mrf.mxu3 }
 0x440   : > { %v1853_v2 = vadd.f32 %v1846_v1, %v1603_v0  ;;  %v1809_v3 = vpop.f32.mrf.mxu0 }
 0x441   : > { %v1822_v4 = vpop.f32.mrf.mxu1 }
 0x442   : > { %v2605_v5 = vmul.f32 -1.442695, %v1853_v2 }
 0x443   : > { %v2835_v6 = vpop.eup %2834  ;;  %v1833_v7 = vpop.f32.mrf.mxu2 }
 0x444   : > { %v2837_v8 = vpop.eup %2836  ;;  %v1857_v9 = vadd.f32 1.0, %v2835_v6  ;;  %2838 = vpow2.f32 %v2605_v5  ;;  %v1852_v16 = vadd.f32 %v1833_v7, %v1602_v11 }
 0x445   : > { %v1876_v10 = vadd.f32 1.0, %v2837_v8 }
 0x446   : > { %2840 = vrcp.f32 %v1857_v9  ;;  %v1869_v19 = vand.u32 2147483648, %v1857_v9  ;;  %v1867_v27 = vand.u32 2147483647, %v1857_v9  ;;  %vm1863_vm14 = vweird.f32 %v1857_v9 }
 0x447   : > { %2842 = vrcp.f32 %v1876_v10  ;;  %v1848_v14 = vpop.f32.mrf.mxu3  ;;  %v1888_v25 = vand.u32 2147483648, %v1876_v10  ;;  %v1886_v29 = vand.u32 2147483647, %v1876_v10  ;;  %vm1882_vm15 = vweird.f32 %v1876_v10 }
 0x448   : > { %v1870_v33 = vor.u32 1.1754944e-38, %v1869_v19  ;;  %vm1868_vm2 = vcmp.eq.f32.partialorder %v1867_v27, 8.507059e+37 }
 0x449   : > { %v1889_v36 = vor.u32 1.1754944e-38, %v1888_v25  ;;  %vm1887_vm3 = vcmp.eq.f32.partialorder %v1886_v29, 8.507059e+37 }
 0x44a   : > { %v2839_v15 = vpop.eup %2838 }
 0x44b   : > { %v1896_v17 = vadd.f32 1.0, %v2839_v15  ;;  %v1835_v20 = vpop.f32.mrf.mxu2 }
 0x44c   : > { %v2841_v21 = vpop.eup %2840 }
 0x44d   : > { %v2843_v22 = vpop.eup %2842  ;;  %v1859_v23 = vmul.f32 %v2841_v21, %v1857_v9  ;;  %2844 = vrcp.f32 %v1896_v17  ;;  %vm1864_vm12 = vweird.f32 %v2841_v21  ;;  %v1908_v47 = vand.u32 2147483648, %v1896_v17 }
 0x44e   : > { %v1878_v12 = vmul.f32 %v2843_v22, %v1876_v10  ;;  %2846 = vtanh.f32 %v1852_v16  ;;  %vm1883_vm13 = vweird.f32 %v2843_v22  ;;  %vm1865_vm0 = vmor %vm1863_vm14, %vm1864_vm12  ;;  %vm1902_vm5 = vweird.f32 %v1896_v17 }
 0x44f   : > { %v1860_v13 = vsub.f32 1.0, %v1859_v23  ;;  %vm1884_vm1 = vmor %vm1882_vm15, %vm1883_vm13  ;;  %v1906_v50 = vand.u32 2147483647, %v1896_v17  ;;  %v1909_v52 = vor.u32 1.1754944e-38, %v1908_v47 }
 0x450   : > { %v1879_v18 = vsub.f32 1.0, %v1878_v12 }
 0x451   : > { %v1861_v26 = vmul.f32 %v2841_v21, %v1860_v13  ;;  %vm1907_vm7 = vcmp.eq.f32.partialorder %v1906_v50, 8.507059e+37 }
 0x452   : > { %v1880_v28 = vmul.f32 %v2843_v22, %v1879_v18 }
 0x453   : > { %v2845_v55 = vpop.eup %2844  ;;  %v1862_v30 = vadd.f32 %v2841_v21, %v1861_v26 }
 0x454   : > { %v2847_v31 = vpop.eup %2846  ;;  %v1898_v32 = vmul.f32 %v2845_v55, %v1896_v17  ;;  %v1881_v35 = vadd.f32 %v2843_v22, %v1880_v28  ;;  %vm1903_vm4 = vweird.f32 %v2845_v55 }
 0x455   : > { %v1866_v37 = vsel %vm1865_vm0, %v2841_v21, %v1862_v30  ;;  %vm1904_vm6 = vmor %vm1902_vm5, %vm1903_vm4 }
 0x456   : > { %v1899_v38 = vsub.f32 1.0, %v1898_v32  ;;  %v1871_v39 = vsel %vm1868_vm2, %v1870_v33, %v1866_v37  ;;  %v1885_v40 = vsel %vm1884_vm1, %v2843_v22, %v1881_v35 }
 0x457   : > { %v1890_v41 = vsel %vm1887_vm3, %v1889_v36, %v1885_v40  ;;  %v1913_v42 = vmul.f32 %v2847_v31, %v1871_v39 }
 0x458   : > { %v1900_v45 = vmul.f32 %v2845_v55, %v1899_v38  ;;  %v1912_v46 = vmul.f32 %v2888_v54, %v1890_v41 }
 0x45a   : > { %v1914_v54 = vadd.f32 %v1913_v42, %v1912_v46   ;;  %v1901_v34 = vadd.f32 %v2845_v55, %v1900_v45 }
 0x45c   : > { %2848 = vtanh.f32 %v1914_v54  ;;  %v1905_v51 = vsel %vm1904_vm6, %v2845_v55, %v1901_v34 }
 0x45d   : > { %v1910_v43 = vsel %vm1907_vm7, %v1909_v52, %v1905_v51 }
 0x461   :  { %1593 = sbr.rel (!%p1591_p1) target bundleno = 921 (0x399), region = 76 }
 0x462   : > { %v2849_v53 = vpop.eup %2848 }
 0x463   : > { %v1916_v24 = vmul.f32 %v2849_v53, %v1910_v43  }
 0x465   : > { %1919 = vst [vmem:[%s1918_s20] sm:$0xff] %v1916_v24 }

// kernel: lstmattn_forward.3
= control target key start
LH: loop header
LB: loop body
LE: loop exit
PB: predicated region body
PF: predicated region fallthrough
CT: control target
= control target key end

     0   :  { %s6842_s0 = inlined_call_operand.vmem [shape: f32[8,16,128], index: 0, kind: input, shape index: {}]   ;;  %s6843_s1 = inlined_call_operand.vmem [shape: f32[16,1,16], index: 1, kind: input, shape index: {}]   ;;  %s6844_s2 = inlined_call_operand.vmem [shape: bf16[128,128], index: 2, kind: input, shape index: {}]   ;;  %s6845_s3 = inlined_call_operand.vmem [shape: f32[1,128], index: 3, kind: input, shape index: {}]   ;;  %s6846_s4 = inlined_call_operand.vmem [shape: bf16[128,128], index: 4, kind: input, shape index: {}]   ;;  %s6847_s5 = inlined_call_operand.vmem [shape: f32[1,128], index: 5, kind: input, shape index: {}]   ;;  %s6848_s6 = inlined_call_operand.vmem [shape: bf16[128,128], index: 6, kind: input, shape index: {}]   ;;  %s6849_s7 = inlined_call_operand.vmem [shape: f32[1,128], index: 7, kind: input, shape index: {}]   ;;  %s6850_s8 = inlined_call_operand.vmem [shape: bf16[128,128], index: 8, kind: input, shape index: {}]   ;;  %s6851_s9 = inlined_call_operand.vmem [shape: f32[1,128], index: 9, kind: input, shape index: {}]   ;;  %s6852_s10 = inlined_call_operand.vmem [shape: f32[1,128], index: 10, kind: input, shape index: {}]   ;;  %s6853_s11 = inlined_call_operand.vmem [shape: f32[1,128], index: 11, kind: input, shape index: {}]   ;;  %s6854_s12 = inlined_call_operand.vmem [shape: bf16[128,128], index: 12, kind: input, shape index: {}]   ;;  %s6855_s13 = inlined_call_operand.vmem [shape: f32[1,128], index: 13, kind: input, shape index: {}]   ;;  %s6856_s14 = inlined_call_operand.vmem [shape: bf16[128,128], index: 14, kind: input, shape index: {}]   ;;  %s6857_s15 = inlined_call_operand.vmem [shape: f32[1,128], index: 15, kind: input, shape index: {}]   ;;  %s6858_s16 = inlined_call_operand.vmem [shape: f32[1,128], index: 16, kind: input, shape index: {}]   ;;  %s6859_s17 = inlined_call_operand.vmem [shape: f32[1,128], index: 17, kind: input, shape index: {}]   ;;  %s6860_s18 = inlined_call_operand.vmem [shape: f32[1,128], index: 18, kind: input, shape index: {}]   ;;  %s6861_s19 = inlined_call_operand.<no memory space> [shape: f32[1,1], index: 19, kind: input, shape index: {}]   ;;  %s6862_s20 = inlined_call_operand.hbm [shape: f32[8,16], index: 20, kind: output, shape index: {}]  }
   0x1   :  { %6867 = sst [smem:[#allocation6_spill]] %s6842_s0  ;;  %v25_v0 = vstv %s6861_s19 }
   0x2   :  { %6868 = sst [smem:[#allocation7_spill]] %s6843_s1  ;;  %26 = vst [vmem:[#allocation2] sm:$0x1] %v25_v0 }
   0x3   :  { %6869 = sst [smem:[#allocation8_spill]] %s6844_s2 }
   0x4   :  { %6870 = sst [smem:[#allocation9_spill]] %s6845_s3 }
   0x5   :  { %6871 = sst [smem:[#allocation10_spill]] %s6846_s4 }
   0x6   :  { %s6872_s2 = sld [smem:[#allocation8_spill]] }
   0xc   :  { %v4042_v1 = vld [vmem:[%s6872_s2 + $0x38] sm:$0xff]  ;;  %v4041_v2 = vld [vmem:[%s6872_s2 + $0x30] sm:$0xff]  ;;  %v4040_v3 = vld [vmem:[%s6872_s2 + $0x28] sm:$0xff] }
   0xd   :  { %161 = vmatpush.bf16.msra.mxu0 %v4042_v1  ;;  %4083 = vmatpush.bf16.msra.mxu1 %v4042_v1  ;;  %v4039_v4 = vld [vmem:[%s6872_s2 + $0x20] sm:$0xff]  ;;  %v4038_v5 = vld [vmem:[%s6872_s2 + $0x18] sm:$0xff] }
  0x11   :  { %162 = vmatpush.bf16.msra.mxu0 %v4041_v2  ;;  %4084 = vmatpush.bf16.msra.mxu1 %v4041_v2 }
  0x15   :  { %163 = vmatpush.bf16.msra.mxu0 %v4040_v3  ;;  %4085 = vmatpush.bf16.msra.mxu1 %v4040_v3 }
  0x19   :  { %164 = vmatpush.bf16.msra.mxu0 %v4039_v4  ;;  %4086 = vmatpush.bf16.msra.mxu1 %v4039_v4 }
  0x1a   :  { %27 = vsyncpa [#allocation4], 0  ;;  %v4037_v6 = vld [vmem:[%s6872_s2 + $0x10] sm:$0xff]  ;;  %v4036_v7 = vld [vmem:[%s6872_s2 + $0x8] sm:$0xff]  ;;  %s6873_s3 = sld [smem:[#allocation6_spill]]  ;;  %vm642_vm0 = vcmask 523264  }
  0x1b   :  { %v4035_v8 = vld [vmem:[%s6872_s2] sm:$0xff]  ;;  %s6874_s29 = sld [smem:[#allocation10_spill]]  ;;  %v4058_v37 = vld [vmem:[%s6848_s6 + $0x38] sm:$0xff]  ;;  %v4057_v39 = vld [vmem:[%s6848_s6 + $0x30] sm:$0xff]  ;;  %vm1181_vm1 = vcmask 130048  }
  0x1c   :  { %4091 = vmatpush.bf16.msra.mxu2 %v4058_v37  ;;  %v4056_v40 = vld [vmem:[%s6848_s6 + $0x28] sm:$0xff]  ;;  %v4055_v41 = vld [vmem:[%s6848_s6 + $0x20] sm:$0xff]  ;;  %v4054_v44 = vld [vmem:[%s6848_s6 + $0x18] sm:$0xff]  ;;  %s6875_s2 = sld [smem:[#allocation9_spill]] }
  0x1d   :  { %165 = vmatpush.bf16.msra.mxu0 %v4038_v5  ;;  %4087 = vmatpush.bf16.msra.mxu1 %v4038_v5  ;;  %v4053_v46 = vld [vmem:[%s6848_s6 + $0x10] sm:$0xff]  ;;  %v4052_v47 = vld [vmem:[%s6848_s6 + $0x8] sm:$0xff]  ;;  %v4051_v48 = vld [vmem:[%s6848_s6] sm:$0xff]  ;;  %s4513_s6 = smov 64   ;;  %s6876_s22 = sld [smem:[#allocation7_spill]] }
  0x20   :  { %v69_v9 = vld [vmem:[%s6873_s3] sm:$0xff]  ;;  %v70_v10 = vld [vmem:[%s6873_s3 + $0x8] sm:$0xff]  ;;  %v71_v11 = vld [vmem:[%s6873_s3 + $0x10] sm:$0xff]  ;;  %4092 = vmatpush.bf16.msra.mxu2 %v4057_v39 }
  0x21   :  { %166 = vmatpush.bf16.msra.mxu0 %v4037_v6  ;;  %4088 = vmatpush.bf16.msra.mxu1 %v4037_v6  ;;  %v72_v12 = vld [vmem:[%s6873_s3 + $0x18] sm:$0xff]  ;;  %v4661_v13 = vpack.c.bf16 %v70_v10, %v69_v9  ;;  %v73_v15 = vld [vmem:[%s6873_s3 + $0x20] sm:$0xff]  ;;  %v74_v16 = vld [vmem:[%s6873_s3 + $0x28] sm:$0xff] }
  0x22   :  { %v4663_v14 = vpack.c.bf16 %v72_v12, %v71_v11  ;;  %v4673_v17 = vpack.c.bf16 %v74_v16, %v73_v15  ;;  %v75_v18 = vld [vmem:[%s6873_s3 + $0x30] sm:$0xff]  ;;  %v76_v19 = vld [vmem:[%s6873_s3 + $0x38] sm:$0xff]  ;;  %v77_v21 = vld [vmem:[%s6873_s3 + $0x40] sm:$0xff] }
  0x23   :  { %v4682_v20 = vpack.c.bf16 %v76_v19, %v75_v18  ;;  %v78_v22 = vld [vmem:[%s6873_s3 + $0x48] sm:$0xff]  ;;  %v4050_v24 = vld [vmem:[%s6874_s29 + $0x38] sm:$0xff]  ;;  %v4049_v25 = vld [vmem:[%s6874_s29 + $0x30] sm:$0xff] }
  0x24   :  { %v4691_v23 = vpack.c.bf16 %v78_v22, %v77_v21  ;;  %v4048_v26 = vld [vmem:[%s6874_s29 + $0x28] sm:$0xff]  ;;  %v79_v27 = vld [vmem:[%s6873_s3 + $0x50] sm:$0xff]  ;;  %v80_v28 = vld [vmem:[%s6873_s3 + $0x58] sm:$0xff]  ;;  %4093 = vmatpush.bf16.msra.mxu2 %v4056_v40 }
  0x25   :  { %167 = vmatpush.bf16.msra.mxu0 %v4036_v7  ;;  %4089 = vmatpush.bf16.msra.mxu1 %v4036_v7  ;;  %v4047_v29 = vld [vmem:[%s6874_s29 + $0x20] sm:$0xff]  ;;  %v4712_v30 = vpack.c.bf16 %v80_v28, %v79_v27  ;;  %v4046_v31 = vld [vmem:[%s6874_s29 + $0x18] sm:$0xff]  ;;  %v4045_v32 = vld [vmem:[%s6874_s29 + $0x10] sm:$0xff] }
  0x26   :  { %v4044_v33 = vld [vmem:[%s6874_s29 + $0x8] sm:$0xff]  ;;  %v81_v34 = vld [vmem:[%s6873_s3 + $0x60] sm:$0xff]  ;;  %v83_v42 = vld [vmem:[%s6873_s3 + $0x70] sm:$0xff] }
  0x27   :  { %v82_v35 = vld [vmem:[%s6873_s3 + $0x68] sm:$0xff]  ;;  %v4043_v36 = vld [vmem:[%s6874_s29] sm:$0xff]  ;;  %v84_v43 = vld [vmem:[%s6873_s3 + $0x78] sm:$0xff] }
  0x28   :  { %v4736_v38 = vpack.c.bf16 %v82_v35, %v81_v34  ;;  %4094 = vmatpush.bf16.msra.mxu2 %v4055_v41  ;;  %v4757_v45 = vpack.c.bf16 %v84_v43, %v83_v42  ;;  %v4775_v49 = vld [vmem:[%s6875_s2] ss:$0 sm:$0xff] }
  0x29   :  { %168 = vmatpush.bf16.msra.mxu0 %v4035_v8  ;;  %4090 = vmatpush.bf16.msra.mxu1 %v4035_v8 }
  0x2c   :  { %169 = vmatmul.bf16.vlgmr.msra.gmra.mxu0 %v4661_v13  ;;  %174 = vmatmul.bf16.vlgmr.msra.gmra.mxu1 %v4663_v14 }
  0x2d   :  { %294 = vmatpush.bf16.msrb.mxu1 %v4050_v24  ;;  %427 = vmatpush.bf16.msrb.mxu0 %v4058_v37 }
  0x2e   :  { %4095 = vmatpush.bf16.msra.mxu2 %v4054_v44 }
  0x31   :  { %295 = vmatpush.bf16.msrb.mxu1 %v4049_v25  ;;  %428 = vmatpush.bf16.msrb.mxu0 %v4057_v39 }
  0x32   :  { %4096 = vmatpush.bf16.msra.mxu2 %v4053_v46 }
  0x35   :  { %296 = vmatpush.bf16.msrb.mxu1 %v4048_v26  ;;  %429 = vmatpush.bf16.msrb.mxu0 %v4056_v40 }
  0x36   :  { %4097 = vmatpush.bf16.msra.mxu2 %v4052_v47 }
  0x39   :  { %297 = vmatpush.bf16.msrb.mxu1 %v4047_v29  ;;  %430 = vmatpush.bf16.msrb.mxu0 %v4055_v41 }
  0x3a   :  { %4098 = vmatpush.bf16.msra.mxu2 %v4051_v48 }
  0x3c   :  { %179 = vmatmul.bf16.gmra.mxu1 %v4673_v17 }
  0x3d   :  { %298 = vmatpush.bf16.msrb.mxu1 %v4046_v31  ;;  %431 = vmatpush.bf16.msrb.mxu0 %v4054_v44 }
  0x3e   :  { %440 = vmatmul.bf16.vlgmr.msra.gmra.mxu2 %v4663_v14 }
  0x41   :  { %299 = vmatpush.bf16.msrb.mxu1 %v4045_v32  ;;  %432 = vmatpush.bf16.msrb.mxu0 %v4053_v46 }
  0x45   :  { %300 = vmatpush.bf16.msrb.mxu1 %v4044_v33  ;;  %433 = vmatpush.bf16.msrb.mxu0 %v4052_v47 }
  0x49   :  { %301 = vmatpush.bf16.msrb.mxu1 %v4043_v36  ;;  %434 = vmatpush.bf16.msrb.mxu0 %v4051_v48 }
  0x4c   :  { %184 = vmatmul.bf16.gmra.mxu1 %v4682_v20  ;;  %435 = vmatmul.bf16.vlgmr.msrb.gmra.mxu0 %v4661_v13 }
  0x4e   :  { %445 = vmatmul.bf16.gmra.mxu2 %v4673_v17 }
  0x5c   :  { %189 = vmatmul.bf16.gmra.mxu1 %v4691_v23 }
  0x5e   :  { %450 = vmatmul.bf16.gmra.mxu2 %v4682_v20 }
  0x6c   :  { %194 = vmatmul.bf16.gmra.mxu1 %v4712_v30 }
  0x6e   :  { %455 = vmatmul.bf16.gmra.mxu2 %v4691_v23 }
  0x7c   :  { %199 = vmatmul.bf16.gmra.mxu1 %v4736_v38 }
  0x7e   :  { %460 = vmatmul.bf16.gmra.mxu2 %v4712_v30 }
  0x8c   :  { %204 = vmatmul.bf16.gmra.mxu1 %v4757_v45 }
  0x8e   :  { %465 = vmatmul.bf16.gmra.mxu2 %v4736_v38 }
  0x9c   :  { %302 = vmatmul.bf16.vlgmr.msrb.gmra.mxu1 %v4661_v13 }
  0x9e   :  { %470 = vmatmul.bf16.gmra.mxu2 %v4757_v45 }
  0xa9   :  { %v170_v50 = vpop.f32.mrf.mxu0  ;;  %v175_v51 = vpop.f32.mrf.mxu1 }
  0xaa   :  { %v171_v52 = vadd.f32 %v4775_v49, %v170_v50  ;;  %v176_v53 = vadd.f32 %v4775_v49, %v175_v51 }
  0xac   :  { %v4780_v54 = vpack.c.bf16 %v171_v52, %v171_v52  ;;  %v212_v55 = vpack.c.bf16 %v176_v53, %v176_v53  ;;  %307 = vmatmul.bf16.gmra.mxu1 %v4663_v14 }
  0xae   :  { %512 = vrot.lane.b32.xlu0 %v212_v55, %s4513_s6  ;;  %508 = vrot.lane.b32.xlu1 %v4780_v54, %s4513_s6  ;;  %v663_v62 = vunpack.c.l.b16 %v212_v55  ;;  %v636_v43 = vunpack.c.l.b16 %v4780_v54 }
  0xb1   :  { %v172_v56 = vpop.f32.mrf.mxu0  ;;  %v177_v57 = vpop.f32.mrf.mxu1 }
  0xb2   :  { %v173_v58 = vadd.f32 %v4775_v49, %v172_v56  ;;  %v178_v59 = vadd.f32 %v4775_v49, %v177_v57 }
  0xb4   :  { %v4788_v60 = vpack.c.bf16 %v173_v58, %v173_v58  ;;  %v213_v61 = vpack.c.bf16 %v178_v59, %v178_v59  ;;  %v4847_v59 = vld [vmem:[%s6847_s5] ss:$0 sm:$0xff] }
  0xb6   :  { %v664_v63 = vunpack.c.l.b16 %v213_v61  ;;  %510 = vrot.lane.b32.xlu1 %v4788_v60, %s4513_s6  ;;  %v637_v44 = vunpack.c.l.b16 %v4788_v60 }
  0xb8   :  { %v4793_v0 = vpack.c.b16 %v664_v63, %v663_v62  ;;  %v638_v50 = vpack.c.b16 %v637_v44, %v636_v43 }
  0xb9   :  { %v180_v1 = vpop.f32.mrf.mxu1 }
  0xba   :  { %v181_v2 = vadd.f32 %v4775_v49, %v180_v1 }
  0xbc   :  { %312 = vmatmul.bf16.gmra.mxu1 %v4673_v17  ;;  %v214_v4 = vpack.c.bf16 %v181_v2, %v181_v2 }
  0xbe   :  { %514 = vrot.lane.b32.xlu1 %v213_v61, %s4513_s6  ;;  %v689_v7 = vunpack.c.l.b16 %v214_v4 }
  0xc1   :  { %v182_v3 = vpop.f32.mrf.mxu1  ;;  %v4852_v62 = vpop.f32.mrf.mxu2 }
  0xc2   :  { %v183_v5 = vadd.f32 %v4775_v49, %v182_v3 }
  0xc4   :  { %v215_v6 = vpack.c.bf16 %v183_v5, %v183_v5 }
  0xc6   :  { %518 = vrot.lane.b32.xlu2 %v215_v6, %s4513_s6  ;;  %v690_v8 = vunpack.c.l.b16 %v215_v6  ;;  %516 = vrot.lane.b32.xlu1 %v214_v4, %s4513_s6 }
  0xc8   :  { %v4802_v9 = vpack.c.b16 %v690_v8, %v689_v7 }
  0xc9   :  { %v185_v10 = vpop.f32.mrf.mxu1  ;;  %v4856_v2 = vpop.f32.mrf.mxu2 }
  0xca   :  { %v186_v11 = vadd.f32 %v4775_v49, %v185_v10  ;;  %v436_v4 = vpop.f32.mrf.mxu0 }
  0xcc   :  { %v216_v12 = vpack.c.bf16 %v186_v11, %v186_v11  ;;  %317 = vmatmul.bf16.gmra.mxu1 %v4682_v20 }
  0xce   :  { %520 = vrot.lane.b32.xlu1 %v216_v12, %s4513_s6  ;;  %v715_v16 = vunpack.c.l.b16 %v216_v12 }
  0xd1   :  { %v187_v13 = vpop.f32.mrf.mxu1  ;;  %v446_v12 = vpop.f32.mrf.mxu2 }
  0xd2   :  { %v188_v14 = vadd.f32 %v4775_v49, %v187_v13 }
  0xd4   :  { %v217_v15 = vpack.c.bf16 %v188_v14, %v188_v14  ;;  %v4864_v14 = vld [vmem:[%s6849_s7] ss:$0 sm:$0xff] }
  0xd6   :  { %v716_v17 = vunpack.c.l.b16 %v217_v15  ;;  %522 = vrot.lane.b32.xlu2 %v217_v15, %s4513_s6  ;;  %v437_v15 = vadd.f32 %v4864_v14, %v436_v4 }
  0xd8   :  { %v4810_v18 = vpack.c.b16 %v716_v17, %v715_v16  ;;  %v438_v16 = vpop.f32.mrf.mxu0 }
  0xd9   :  { %v190_v19 = vpop.f32.mrf.mxu1 }
  0xda   :  { %v191_v21 = vadd.f32 %v4775_v49, %v190_v19 }
  0xdc   :  { %v218_v22 = vpack.c.bf16 %v191_v21, %v191_v21  ;;  %322 = vmatmul.bf16.gmra.mxu1 %v4691_v23  ;;  %v4870_v21 = vpack.c.bf16 %v437_v15, %v437_v15 }
  0xde   :  { %524 = vrot.lane.b32.xlu0 %v218_v22, %s4513_s6  ;;  %v741_v26 = vunpack.c.l.b16 %v218_v22  ;;  %v439_v22 = vadd.f32 %v4864_v14, %v438_v16 }
  0xe1   :  { %v192_v20 = vpop.f32.mrf.mxu1 }
  0xe2   :  { %v193_v24 = vadd.f32 %v4775_v49, %v192_v20  ;;  %v448_v20 = vpop.f32.mrf.mxu2 }
  0xe4   :  { %v219_v25 = vpack.c.bf16 %v193_v24, %v193_v24  ;;  %v447_v24 = vadd.f32 %v4864_v14, %v446_v12  ;;  %v444_v12 = vadd.f32 %v4864_v14, %v4856_v2 }
  0xe6   :  { %v742_v27 = vunpack.c.l.b16 %v219_v25  ;;  %526 = vrot.lane.b32.xlu1 %v219_v25, %s4513_s6  ;;  %v449_v25 = vadd.f32 %v4864_v14, %v448_v20 }
  0xe8   :  { %v4818_v28 = vpack.c.b16 %v742_v27, %v741_v26  ;;  %v480_v27 = vpack.c.bf16 %v447_v24, %v447_v24 }
  0xe9   :  { %v195_v29 = vpop.f32.mrf.mxu1 }
  0xea   :  { %v196_v31 = vadd.f32 %v4775_v49, %v195_v29  ;;  %v481_v29 = vpack.c.bf16 %v449_v25, %v449_v25 }
  0xec   :  { %v220_v32 = vpack.c.bf16 %v196_v31, %v196_v31  ;;  %327 = vmatmul.bf16.gmra.mxu1 %v4712_v30 }
  0xee   :  { %528 = vrot.lane.b32.xlu1 %v220_v32, %s4513_s6  ;;  %v767_v35 = vunpack.c.l.b16 %v220_v32 }
  0xf1   :  { %v197_v23 = vpop.f32.mrf.mxu1 }
  0xf2   :  { %v198_v33 = vadd.f32 %v4775_v49, %v197_v23  ;;  %v1571_v23 = vunpack.c.l.b16 %v4870_v21 }
  0xf4   :  { %v221_v34 = vpack.c.bf16 %v198_v33, %v198_v33  ;;  %v477_v33 = vpack.c.bf16 %v439_v22, %v439_v22 }
  0xf6   :  { %v768_v36 = vunpack.c.l.b16 %v221_v34  ;;  %530 = vrot.lane.b32.xlu2 %v221_v34, %s4513_s6  ;;  %v1623_v34 = vunpack.c.l.b16 %v480_v27 }
  0xf8   :  { %v4826_v37 = vpack.c.b16 %v768_v36, %v767_v35  ;;  %v1624_v35 = vunpack.c.l.b16 %v481_v29 }
  0xf9   :  { %v200_v39 = vpop.f32.mrf.mxu1 }
  0xfa   :  { %v201_v40 = vadd.f32 %v4775_v49, %v200_v39  ;;  %v1572_v39 = vunpack.c.l.b16 %v477_v33 }
  0xfc   :  { %v222_v41 = vpack.c.bf16 %v201_v40, %v201_v40  ;;  %332 = vmatmul.bf16.gmra.mxu1 %v4736_v38  ;;  %v4881_v43 = vpack.c.b16 %v1572_v39, %v1571_v23 }
  0xfe   :  { %532 = vrot.lane.b32.xlu2 %v222_v41, %s4513_s6  ;;  %v793_v47 = vunpack.c.l.b16 %v222_v41  ;;  %v4877_v41 = vpack.c.b16 %v1624_v35, %v1623_v34 }
 0x101   :  { %v202_v30 = vpop.f32.mrf.mxu1 }
 0x102   :  { %v203_v42 = vadd.f32 %v4775_v49, %v202_v30 }
 0x104   :  { %v223_v46 = vpack.c.bf16 %v203_v42, %v203_v42 }
 0x106   :  { %v794_v48 = vunpack.c.l.b16 %v223_v46  ;;  %534 = vrot.lane.b32.xlu0 %v223_v46, %s4513_s6 }
 0x108   :  { %v4835_v51 = vpack.c.b16 %v794_v48, %v793_v47 }
 0x109   :  { %v205_v52 = vpop.f32.mrf.mxu1 }
 0x10a   :  { %v206_v38 = vadd.f32 %v4775_v49, %v205_v52 }
 0x10c   :  { %v224_v53 = vpack.c.bf16 %v206_v38, %v206_v38  ;;  %337 = vmatmul.bf16.gmra.mxu1 %v4757_v45 }
 0x10e   :  { %536 = vrot.lane.b32.xlu0 %v224_v53, %s4513_s6  ;;  %v819_v57 = vunpack.c.l.b16 %v224_v53 }
 0x111   :  { %v207_v55 = vpop.f32.mrf.mxu1 }
 0x112   :  { %v208_v54 = vadd.f32 %v4775_v49, %v207_v55 }
 0x114   :  { %v4841_v56 = vpack.c.bf16 %v208_v54, %v208_v54 }
 0x116   :  { %v820_v58 = vunpack.c.l.b16 %v4841_v56 }
 0x118   :  { %v4849_v60 = vpack.c.b16 %v820_v58, %v819_v57 }
 0x119   :  { %v303_v61 = vpop.f32.mrf.mxu1 }
 0x11a   :  { %v304_v45 = vadd.f32 %v4847_v59, %v303_v61 }
 0x11c   :  { %v343_v63 = vpack.c.bf16 %v304_v45, %v304_v45 }
 0x11e   :  { %556 = vrot.lane.b32.xlu0 %v343_v63, %s4513_s6  ;;  %v639_v5 = vunpack.c.l.b16 %v343_v63 }
 0x120   :  { %v4923_v20 = vpop.permute.xlu0 %512 }
 0x121   :  { %v305_v49 = vpop.f32.mrf.mxu1 }
 0x122   :  { %v306_v1 = vadd.f32 %v4847_v59, %v305_v49 }
 0x124   :  { %v344_v3 = vpack.c.bf16 %v306_v1, %v306_v1 }
 0x126   :  { %558 = vrot.lane.b32.xlu0 %v344_v3, %s4513_s6  ;;  %v640_v6 = vunpack.c.l.b16 %v344_v3 }
 0x128   :  { %v641_v7 = vpack.c.b16 %v640_v6, %v639_v5 }
 0x129   :  { %v308_v8 = vpop.f32.mrf.mxu1 }
 0x12a   :  { %v309_v10 = vadd.f32 %v4847_v59, %v308_v8  ;;  %v647_v11 = vsel %vm642_vm0, %v641_v7, 0 }
 0x12b   :  { %656 = vmatpush.bf16.xpose.msra.mxu3 %v647_v11 }
 0x12c   :  { %v345_v13 = vpack.c.bf16 %v309_v10, %v309_v10 }
 0x12e   :  { %560 = vrot.lane.b32.xlu2 %v345_v13, %s4513_s6  ;;  %v666_v31 = vunpack.c.l.b16 %v345_v13 }
 0x131   :  { %v310_v17 = vpop.f32.mrf.mxu1 }
 0x132   :  { %v311_v19 = vadd.f32 %v4847_v59, %v310_v17  ;;  %3891 = vmatmul.msk.bf16.vlgmr.msra.gmra.mxu3 %vm642_vm0, %v638_v50  ;;  %v4919_v17 = vpop.permute.xlu2 %518 }
 0x134   :  { %v346_v26 = vpack.c.bf16 %v311_v19, %v311_v19  ;;  %v4921_v19 = vpack.c.bf16 %v444_v12, %v444_v12 }
 0x136   :  { %v667_v32 = vunpack.c.l.b16 %v346_v26  ;;  %562 = vrot.lane.b32.xlu2 %v346_v26, %s4513_s6 }
 0x138   :  { %v668_v36 = vpack.c.b16 %v667_v32, %v666_v31 }
 0x139   :  { %v313_v40 = vpop.f32.mrf.mxu1 }
 0x13a   :  { %v314_v30 = vadd.f32 %v4847_v59, %v313_v40  ;;  %v673_v42 = vsel %vm642_vm0, %v668_v36, 0  ;;  %v4934_v26 = vpop.permute.xlu2 %522 }
 0x13b   :  { %682 = vmatpush.bf16.xpose.msrb.mxu3 %v673_v42 }
 0x13c   :  { %v347_v44 = vpack.c.bf16 %v314_v30, %v314_v30 }
 0x13e   :  { %564 = vrot.lane.b32.xlu2 %v347_v44, %s4513_s6  ;;  %v692_v50 = vunpack.c.l.b16 %v347_v44 }
 0x141   :  { %v315_v46 = vpop.f32.mrf.mxu1 }
 0x142   :  { %v316_v47 = vadd.f32 %v4847_v59, %v315_v46  ;;  %3892 = vmatmul.msk.bf16.vlgmr.msrb.gmra.mxu3 %vm642_vm0, %v4793_v0  ;;  %v442_v0 = vadd.f32 %v4864_v14, %v4852_v62  ;;  %v509_v46 = vpop.permute.xlu1 %508 }
 0x144   :  { %v348_v48 = vpack.c.bf16 %v316_v47, %v316_v47  ;;  %v4898_v45 = vpack.c.bf16 %v442_v0, %v442_v0 }
 0x146   :  { %v693_v52 = vunpack.c.l.b16 %v348_v48  ;;  %566 = vrot.lane.b32.xlu0 %v348_v48, %s4513_s6  ;;  %606 = vrot.lane.b32.xlu2 %v477_v33, %s4513_s6 }
 0x148   :  { %v694_v38 = vpack.c.b16 %v693_v52, %v692_v50 }
 0x149   :  { %v318_v53 = vpop.f32.mrf.mxu1 }
 0x14a   :  { %v319_v55 = vadd.f32 %v4847_v59, %v318_v53  ;;  %v699_v54 = vsel %vm642_vm0, %v694_v38, 0 }
 0x14b   :  { %708 = vmatpush.bf16.xpose.msra.mxu3 %v699_v54 }
 0x14c   :  { %v349_v57 = vpack.c.bf16 %v319_v55, %v319_v55 }
 0x14e   :  { %568 = vrot.lane.b32.xlu0 %v349_v57, %s4513_s6  ;;  %612 = vrot.lane.b32.xlu2 %v480_v27, %s4513_s6  ;;  %v718_v49 = vunpack.c.l.b16 %v349_v57 }
 0x150   :  { %v4943_v35 = vpop.permute.xlu2 %530 }
 0x151   :  { %v320_v58 = vpop.f32.mrf.mxu1 }
 0x152   :  { %v321_v61 = vadd.f32 %v4847_v59, %v320_v58  ;;  %3893 = vmatmul.msk.bf16.vlgmr.msra.gmra.mxu3 %vm642_vm0, %v4802_v9 }
 0x154   :  { %v350_v63 = vpack.c.bf16 %v321_v61, %v321_v61 }
 0x156   :  { %v719_v1 = vunpack.c.l.b16 %v350_v63  ;;  %608 = vrot.lane.b32.xlu0 %v4898_v45, %s4513_s6  ;;  %570 = vrot.lane.b32.xlu1 %v350_v63, %s4513_s6 }
 0x158   :  { %v720_v3 = vpack.c.b16 %v719_v1, %v718_v49  ;;  %v4951_v44 = vpop.permute.xlu2 %532 }
 0x159   :  { %v323_v4 = vpop.f32.mrf.mxu1 }
 0x15a   :  { %v324_v62 = vadd.f32 %v4847_v59, %v323_v4  ;;  %v725_v5 = vsel %vm642_vm0, %v720_v3, 0 }
 0x15b   :  { %734 = vmatpush.bf16.xpose.msrb.mxu3 %v725_v5 }
 0x15c   :  { %v351_v6 = vpack.c.bf16 %v324_v62, %v324_v62 }
 0x15e   :  { %614 = vrot.lane.b32.xlu0 %v481_v29, %s4513_s6  ;;  %538 = vrot.lane.b32.xlu1 %v4841_v56, %s4513_s6  ;;  %v744_v10 = vunpack.c.l.b16 %v351_v6  ;;  %v4936_v29 = vpop.permute.xlu0 %524 }
 0x15f   :  { %572 = vrot.lane.b32.xlu2 %v351_v6, %s4513_s6 }
 0x161   :  { %v325_v9 = vpop.f32.mrf.mxu1 }
 0x162   :  { %v326_v7 = vadd.f32 %v4847_v59, %v325_v9  ;;  %3894 = vmatmul.msk.bf16.vlgmr.msrb.gmra.mxu3 %vm642_vm0, %v4810_v18  ;;  %v451_v18 = vpop.f32.mrf.mxu2 }
 0x163   :  { %v452_v2 = vadd.f32 %v4864_v14, %v451_v18 }
 0x164   :  { %v352_v8 = vpack.c.bf16 %v326_v7, %v326_v7 }
 0x165   :  { %v4932_v25 = vpack.c.bf16 %v452_v2, %v452_v2 }
 0x166   :  { %v745_v11 = vunpack.c.l.b16 %v352_v8  ;;  %574 = vrot.lane.b32.xlu0 %v352_v8, %s4513_s6  ;;  %604 = vrot.lane.b32.xlu1 %v4870_v21, %s4513_s6 }
 0x168   :  { %v746_v56 = vpack.c.b16 %v745_v11, %v744_v10 }
 0x169   :  { %v328_v13 = vpop.f32.mrf.mxu1 }
 0x16a   :  { %v329_v15 = vadd.f32 %v4847_v59, %v328_v13  ;;  %v751_v16 = vsel %vm642_vm0, %v746_v56, 0  ;;  %v845_v13 = vunpack.c.l.b16 %v509_v46 }
 0x16b   :  { %760 = vmatpush.bf16.xpose.msra.mxu3 %v751_v16 }
 0x16c   :  { %v353_v22 = vpack.c.bf16 %v329_v15, %v329_v15 }
 0x16e   :  { %610 = vrot.lane.b32.xlu1 %v4921_v19, %s4513_s6  ;;  %576 = vrot.lane.b32.xlu2 %v353_v22, %s4513_s6  ;;  %v770_v31 = vunpack.c.l.b16 %v353_v22 }
 0x171   :  { %v330_v21 = vpop.f32.mrf.mxu1 }
 0x172   :  { %v331_v24 = vadd.f32 %v4847_v59, %v330_v21  ;;  %3895 = vmatmul.msk.bf16.vlgmr.msra.gmra.mxu3 %vm642_vm0, %v4818_v28 }
 0x174   :  { %v354_v27 = vpack.c.bf16 %v331_v24, %v331_v24 }
 0x176   :  { %v771_v32 = vunpack.c.l.b16 %v354_v27  ;;  %578 = vrot.lane.b32.xlu0 %v354_v27, %s4513_s6  ;;  %616 = vrot.lane.b32.xlu1 %v4932_v25, %s4513_s6  ;;  %v4156_v27 = vld [vmem:[%s6876_s22] ss:$0 sm:$0xff] }
 0x178   :  { %v772_v23 = vpack.c.b16 %v771_v32, %v770_v31  ;;  %v4945_v39 = vpop.permute.xlu0 %534 }
 0x179   :  { %v333_v33 = vpop.f32.mrf.mxu1 }
 0x17a   :  { %v334_v34 = vadd.f32 %v4847_v59, %v333_v33  ;;  %v777_v28 = vsel %vm642_vm0, %v772_v23, 0 }
 0x17b   :  { %786 = vmatpush.bf16.xpose.msrb.mxu3 %v777_v28 }
 0x17c   :  { %v355_v36 = vpack.c.bf16 %v334_v34, %v334_v34 }
 0x17e   :  { %580 = vrot.lane.b32.xlu0 %v355_v36, %s4513_s6  ;;  %v796_v47 = vunpack.c.l.b16 %v355_v36 }
 0x180   :  { %v4954_v50 = vpop.permute.xlu0 %536 }
 0x181   :  { %v335_v40 = vpop.f32.mrf.mxu1 }
 0x182   :  { %v336_v30 = vadd.f32 %v4847_v59, %v335_v40  ;;  %3896 = vmatmul.msk.bf16.vlgmr.msrb.gmra.mxu3 %vm642_vm0, %v4826_v37  ;;  %v511_v37 = vpop.permute.xlu1 %510  ;;  %v871_v40 = vunpack.c.l.b16 %v4923_v20 }
 0x183   :  { %v846_v15 = vunpack.c.l.b16 %v511_v37 }
 0x184   :  { %v356_v42 = vpack.c.bf16 %v336_v30, %v336_v30 }
 0x185   :  { %v847_v18 = vpack.c.b16 %v846_v15, %v845_v13 }
 0x186   :  { %v797_v48 = vunpack.c.l.b16 %v356_v42  ;;  %582 = vrot.lane.b32.xlu1 %v356_v42, %s4513_s6 }
 0x188   :  { %v798_v52 = vpack.c.b16 %v797_v48, %v796_v47  ;;  %v561_v57 = vpop.permute.xlu2 %560 }
 0x189   :  { %v338_v38 = vpop.f32.mrf.mxu1 }
 0x18a   :  { %v339_v53 = vadd.f32 %v4847_v59, %v338_v38  ;;  %v803_v55 = vsel %vm642_vm0, %v798_v52, 0  ;;  %v515_v9 = vpop.permute.xlu1 %514 }
 0x18b   :  { %812 = vmatpush.bf16.xpose.msra.mxu3 %v803_v55  ;;  %v872_v34 = vunpack.c.l.b16 %v515_v9 }
 0x18c   :  { %v357_v54 = vpack.c.bf16 %v339_v53, %v339_v53  ;;  %v898_v53 = vunpack.c.l.b16 %v4919_v17 }
 0x18d   :  { %v873_v47 = vpack.c.b16 %v872_v34, %v871_v40 }
 0x18e   :  { %584 = vrot.lane.b32.xlu1 %v357_v54, %s4513_s6  ;;  %v822_v49 = vunpack.c.l.b16 %v357_v54 }
 0x190   :  { %v557_v0 = vpop.permute.xlu0 %556  ;;  %v563_v3 = vpop.permute.xlu2 %562 }
 0x191   :  { %v340_v58 = vpop.f32.mrf.mxu1  ;;  %v848_v5 = vunpack.c.l.b16 %v557_v0  ;;  %v875_v7 = vunpack.c.l.b16 %v563_v3 }
 0x192   :  { %v341_v61 = vadd.f32 %v4847_v59, %v340_v58  ;;  %3897 = vmatmul.msk.bf16.vlgmr.msra.gmra.mxu3 %vm642_vm0, %v4835_v51  ;;  %v874_v59 = vunpack.c.l.b16 %v561_v57  ;;  %v517_v56 = vpop.permute.xlu1 %516  ;;  %v4157_v57 = vld [vmem:[%s6876_s22 + $0x1] ss:$0 sm:$0xff] }
 0x193   :  { %v897_v46 = vunpack.c.l.b16 %v517_v56 }
 0x194   :  { %v358_v63 = vpack.c.bf16 %v341_v61, %v341_v61  ;;  %v876_v51 = vpack.c.b16 %v875_v7, %v874_v59 }
 0x195   :  { %v899_v54 = vpack.c.b16 %v898_v53, %v897_v46  ;;  %v1598_v53 = vunpack.c.l.b16 %v4921_v19  ;;  %v976_v19 = vunpack.c.l.b16 %v4943_v35 }
 0x196   :  { %v823_v1 = vunpack.c.l.b16 %v358_v63  ;;  %586 = vrot.lane.b32.xlu2 %v358_v63, %s4513_s6  ;;  %v881_v12 = vsel %vm642_vm0, %v876_v51, 0 }
 0x198   :  { %v824_v4 = vpack.c.b16 %v823_v1, %v822_v49  ;;  %v559_v62 = vpop.permute.xlu0 %558  ;;  %v565_v21 = vpop.permute.xlu2 %564 }
 0x199   :  { %v849_v6 = vunpack.c.l.b16 %v559_v62  ;;  %v900_v31 = vunpack.c.l.b16 %v565_v21 }
 0x19a   :  { %v829_v8 = vsel %vm642_vm0, %v824_v4, 0  ;;  %v521_v16 = vpop.permute.xlu1 %520 }
 0x19b   :  { %v850_v10 = vpack.c.b16 %v849_v6, %v848_v5  ;;  %838 = vmatpush.bf16.xpose.msrb.mxu3 %v829_v8  ;;  %v923_v9 = vunpack.c.l.b16 %v521_v16 }
 0x19d   :  { %v855_v11 = vsel %vm642_vm0, %v850_v10, 0  ;;  %v924_v10 = vunpack.c.l.b16 %v4934_v26 }
 0x19f   :  { %v925_v51 = vpack.c.b16 %v924_v10, %v923_v9 }
 0x1a0   :  { %v4985_v55 = vpop.permute.xlu2 %606 }
 0x1a2   :  { %3898 = vmatmul.msk.bf16.vlgmr.msrb.gmra.mxu3 %vm642_vm0, %v4849_v60  ;;  %v4969_v2 = vpop.permute.xlu1 %526 }
 0x1a3   :  { %864 = vmatpush.bf16.xpose.msra.mxu3 %v855_v11 }
 0x1a8   :  { %v5000_v4 = vpop.permute.xlu2 %612 }
 0x1aa   :  { %v4980_v48 = vpop.permute.xlu1 %528 }
 0x1ab   :  { %890 = vmatpush.bf16.xpose.msrb.mxu3 %v881_v12  ;;  %v4158_v12 = vld [vmem:[%s6876_s22 + $0x2] ss:$0 sm:$0xff] }
 0x1b2   :  { %3899 = vmatmul.msk.bf16.vlgmr.msra.gmra.mxu3 %vm642_vm0, %v847_v18 }
 0x1b5   :  { %v658_v22 = vpop.f32.mrf.mxu3 }
 0x1b6   :  { %v1053_v24 = vmul.f32 0.125, %v658_v22 }
 0x1b8   :  { %v567_v60 = vpop.permute.xlu0 %566  ;;  %v4974_v23 = vadd.f32 %v4156_v27, %v1053_v24 }
 0x1b9   :  { %v901_v32 = vunpack.c.l.b16 %v567_v60  ;;  %v573_v13 = vpop.permute.xlu2 %572 }
 0x1ba   :  { %v1182_v42 = vsel %vm1181_vm1, %v4974_v23, -inf  ;;  %v952_v26 = vunpack.c.l.b16 %v573_v13 }
 0x1bb   :  { %v902_v33 = vpack.c.b16 %v901_v32, %v900_v31 }
 0x1bd   :  { %v660_v28 = vpop.f32.mrf.mxu3  ;;  %v907_v36 = vsel %vm642_vm0, %v902_v33, 0  ;;  %v950_v33 = vunpack.c.l.b16 %v4969_v2 }
 0x1be   :  { %v1054_v30 = vmul.f32 0.125, %v660_v28  ;;  %916 = vmatpush.bf16.xpose.msra.mxu0 %v907_v36  ;;  %v949_v28 = vunpack.c.l.b16 %v4936_v29  ;;  %v1597_v29 = vunpack.c.l.b16 %v4898_v45 }
 0x1bf   :  { %1183 = vmax.xlane.f32.xlu2 %v1182_v42 }
 0x1c0   :  { %v569_v52 = vpop.permute.xlu0 %568  ;;  %v4982_v38 = vadd.f32 %v4156_v27, %v1054_v30  ;;  %v951_v40 = vpack.c.b16 %v950_v33, %v949_v28  ;;  %v4159_v30 = vld [vmem:[%s6876_s22 + $0x3] ss:$0 sm:$0xff] }
 0x1c1   :  { %v926_v63 = vunpack.c.l.b16 %v569_v52 }
 0x1c2   :  { %3900 = vmatmul.msk.bf16.vlgmr.msrb.gmra.mxu3 %vm642_vm0, %v873_v47  ;;  %v1185_v20 = vsel %vm1181_vm1, %v4982_v38, -inf }
 0x1c3   :  { %1186 = vmax.xlane.f32.xlu0 %v1185_v20 }
 0x1c5   :  { %v684_v37 = vpop.f32.mrf.mxu3  ;;  %3901 = vmatmul.msk.bf16.vlgmr.msra.gmra.mxu0 %vm642_vm0, %v899_v54 }
 0x1c6   :  { %v1055_v0 = vmul.f32 0.125, %v684_v37 }
 0x1c8   :  { %v4994_v58 = vpop.permute.xlu0 %608  ;;  %v571_v17 = vpop.permute.xlu1 %570  ;;  %v4996_v61 = vadd.f32 %v4157_v57, %v1055_v0  ;;  %v1599_v0 = vpack.c.b16 %v1598_v53, %v1597_v29 }
 0x1c9   :  { %v927_v49 = vunpack.c.l.b16 %v571_v17 }
 0x1ca   :  { %v1188_v1 = vsel %vm1181_vm1, %v4996_v61, -inf }
 0x1cb   :  { %v928_v3 = vpack.c.b16 %v927_v49, %v926_v63  ;;  %1189 = vmax.xlane.f32.xlu1 %v1188_v1 }
 0x1cd   :  { %v686_v62 = vpop.f32.mrf.mxu3  ;;  %v933_v5 = vsel %vm642_vm0, %v928_v3, 0  ;;  %v975_v3 = vunpack.c.l.b16 %v4980_v48  ;;  %v453_v48 = vpop.f32.mrf.mxu2 }
 0x1ce   :  { %v1056_v6 = vmul.f32 0.125, %v686_v62  ;;  %942 = vmatpush.bf16.xpose.msra.mxu1 %v933_v5  ;;  %v454_v13 = vadd.f32 %v4864_v14, %v453_v48  ;;  %v4162_v48 = vld [vmem:[%s6876_s22 + $0x6] ss:$0 sm:$0xff] }
 0x1cf   :  { %v977_v5 = vpack.c.b16 %v976_v19, %v975_v3 }
 0x1d0   :  { %v5003_v7 = vpop.permute.xlu0 %614  ;;  %v5005_v8 = vadd.f32 %v4157_v57, %v1056_v6  ;;  %v5008_v59 = vpop.permute.xlu1 %538  ;;  %v4160_v6 = vld [vmem:[%s6876_s22 + $0x4] ss:$0 sm:$0xff] }
 0x1d2   :  { %v1191_v11 = vsel %vm1181_vm1, %v5005_v8, -inf }
 0x1d3   :  { %1192 = vmax.xlane.f32.xlu2 %v1191_v11 }
 0x1d5   :  { %v710_v56 = vpop.f32.mrf.mxu3  ;;  %3902 = vmatmul.msk.bf16.vlgmr.msra.gmra.mxu1 %vm642_vm0, %v925_v51 }
 0x1d6   :  { %v1057_v15 = vmul.f32 0.125, %v710_v56 }
 0x1d8   :  { %v575_v16 = vpop.permute.xlu0 %574  ;;  %v5016_v18 = vadd.f32 %v4158_v12, %v1057_v15  ;;  %v5020_v27 = vpop.permute.xlu1 %604 }
 0x1d9   :  { %v953_v22 = vunpack.c.l.b16 %v575_v16 }
 0x1da   :  { %v1194_v21 = vsel %vm1181_vm1, %v5016_v18, -inf }
 0x1db   :  { %1195 = vmax.xlane.f32.xlu2 %v1194_v21  ;;  %v954_v24 = vpack.c.b16 %v953_v22, %v952_v26  ;;  %v5061_v21 = vpack.c.bf16 %v454_v13, %v454_v13 }
 0x1dd   :  { %v712_v60 = vpop.f32.mrf.mxu3  ;;  %v959_v31 = vsel %vm642_vm0, %v954_v24, 0 }
 0x1de   :  { %v1058_v32 = vmul.f32 0.125, %v712_v60  ;;  %968 = vmatpush.bf16.xpose.msrb.mxu2 %v959_v31  ;;  %v1002_v31 = vunpack.c.l.b16 %v4945_v39 }
 0x1e0   :  { %v5025_v34 = vadd.f32 %v4158_v12, %v1058_v32  ;;  %v5034_v46 = vpop.permute.xlu1 %610  ;;  %v1001_v32 = vunpack.c.l.b16 %v4951_v44 }
 0x1e2   :  { %v1197_v36 = vsel %vm1181_vm1, %v5025_v34, -inf }
 0x1e3   :  { %1198 = vmax.xlane.f32.xlu0 %v1197_v36  ;;  %v1649_v36 = vunpack.c.l.b16 %v4932_v25 }
 0x1e5   :  { %v736_v42 = vpop.f32.mrf.mxu3  ;;  %3903 = vmatmul.msk.bf16.vlgmr.msrb.gmra.mxu2 %vm642_vm0, %v951_v40 }
 0x1e6   :  { %1585 = vmatpush.bf16.msra.mxu2 %v4881_v43  ;;  %v1059_v2 = vmul.f32 0.125, %v736_v42  ;;  %v577_v43 = vpop.permute.xlu2 %576  ;;  %v1650_v42 = vunpack.c.l.b16 %v5061_v21 }
 0x1e7   :  { %v978_v54 = vunpack.c.l.b16 %v577_v43 }
 0x1e8   :  { %v579_v47 = vpop.permute.xlu0 %578  ;;  %v5036_v52 = vadd.f32 %v4159_v30, %v1059_v2  ;;  %v5043_v1 = vpop.permute.xlu1 %616  ;;  %v1651_v39 = vpack.c.b16 %v1650_v42, %v1649_v36 }
 0x1e9   :  { %v979_v20 = vunpack.c.l.b16 %v579_v47  ;;  %v456_v2 = vpop.f32.mrf.mxu2  ;;  %v1003_v47 = vpack.c.b16 %v1002_v31, %v1001_v32 }
 0x1ea   :  { %v1200_v57 = vsel %vm1181_vm1, %v5036_v52, -inf }
 0x1eb   :  { %v980_v37 = vpack.c.b16 %v979_v20, %v978_v54  ;;  %1201 = vmax.xlane.f32.xlu2 %v1200_v57  ;;  %v457_v20 = vadd.f32 %v4864_v14, %v456_v2  ;;  %v1028_v54 = vunpack.c.l.b16 %v5008_v59  ;;  %v4163_v2 = vld [vmem:[%s6876_s22 + $0x7] ss:$0 sm:$0xff] }
 0x1ed   :  { %v738_v17 = vpop.f32.mrf.mxu3  ;;  %v985_v63 = vsel %vm642_vm0, %v980_v37, 0  ;;  %v5081_v37 = vpack.c.bf16 %v457_v20, %v457_v20 }
 0x1ee   :  { %v1060_v49 = vmul.f32 0.125, %v738_v17  ;;  %994 = vmatpush.bf16.xpose.msra.mxu3 %v985_v63 }
 0x1ef   :  { %v1675_v19 = vunpack.c.l.b16 %v5081_v37 }
 0x1f0   :  { %v5046_v45 = vadd.f32 %v4159_v30, %v1060_v49  ;;  %v581_v11 = vpop.permute.xlu0 %580  ;;  %v587_v60 = vpop.permute.xlu2 %586 }
 0x1f1   :  { %v1004_v56 = vunpack.c.l.b16 %v581_v11  ;;  %v1031_v40 = vunpack.c.l.b16 %v587_v60  ;;  %v458_v17 = vpop.f32.mrf.mxu2 }
 0x1f2   :  { %v1203_v62 = vsel %vm1181_vm1, %v5046_v45, -inf  ;;  %v459_v49 = vadd.f32 %v4864_v14, %v458_v17 }
 0x1f3   :  { %1204 = vmax.xlane.f32.xlu0 %v1203_v62 }
 0x1f4   :  { %v5088_v62 = vpack.c.bf16 %v459_v49, %v459_v49 }
 0x1f5   :  { %v762_v9 = vpop.f32.mrf.mxu3  ;;  %3904 = vmatmul.msk.bf16.vlgmr.msra.gmra.mxu3 %vm642_vm0, %v977_v5 }
 0x1f6   :  { %1611 = vmatpush.bf16.msrb.mxu3 %v1599_v0  ;;  %v1061_v10 = vmul.f32 0.125, %v762_v9  ;;  %v1027_v0 = vunpack.c.l.b16 %v4954_v50 }
 0x1f8   :  { %v583_v51 = vpop.permute.xlu1 %582  ;;  %v5055_v12 = vadd.f32 %v4160_v6, %v1061_v10  ;;  %v1029_v3 = vpack.c.b16 %v1028_v54, %v1027_v0 }
 0x1f9   :  { %v1005_v35 = vunpack.c.l.b16 %v583_v51  ;;  %v461_v10 = vpop.f32.mrf.mxu2 }
 0x1fa   :  { %v1206_v15 = vsel %vm1181_vm1, %v5055_v12, -inf }
 0x1fb   :  { %v1006_v16 = vpack.c.b16 %v1005_v35, %v1004_v56  ;;  %1207 = vmax.xlane.f32.xlu2 %v1206_v15 }
 0x1fd   :  { %v764_v26 = vpop.f32.mrf.mxu3  ;;  %v1011_v22 = vsel %vm642_vm0, %v1006_v16, 0  ;;  %v462_v16 = vadd.f32 %v4864_v14, %v461_v10 }
 0x1fe   :  { %v1062_v24 = vmul.f32 0.125, %v764_v26  ;;  %1020 = vmatpush.bf16.xpose.msrb.mxu0 %v1011_v22 }
 0x1ff   :  { %v5105_v22 = vpack.c.bf16 %v462_v16, %v462_v16 }
 0x200   :  { %v585_v33 = vpop.permute.xlu1 %584  ;;  %v5066_v28 = vadd.f32 %v4160_v6, %v1062_v24  ;;  %v1676_v6 = vunpack.c.l.b16 %v5088_v62 }
 0x201   :  { %v1030_v30 = vunpack.c.l.b16 %v585_v33  ;;  %v463_v13 = vpop.f32.mrf.mxu2  ;;  %v1701_v32 = vunpack.c.l.b16 %v5105_v22 }
 0x202   :  { %v1209_v43 = vsel %vm1181_vm1, %v5066_v28, -inf  ;;  %v1677_v50 = vpack.c.b16 %v1676_v6, %v1675_v19  ;;  %v464_v26 = vadd.f32 %v4864_v14, %v463_v13 }
 0x203   :  { %v1032_v29 = vpack.c.b16 %v1031_v40, %v1030_v30  ;;  %1210 = vmax.xlane.f32.xlu0 %v1209_v43 }
 0x204   :  { %1689 = vmatpush.bf16.msrb.mxu2 %v1677_v50  ;;  %v5107_v24 = vpack.c.bf16 %v464_v26, %v464_v26  ;;  %v4164_v50 = vld [vmem:[%s6876_s22 + $0x8] ss:$0 sm:$0xff] }
 0x205   :  { %v788_v44 = vpop.f32.mrf.mxu3  ;;  %3905 = vmatmul.msk.bf16.vlgmr.msrb.gmra.mxu0 %vm642_vm0, %v1003_v47  ;;  %v1037_v25 = vsel %vm642_vm0, %v1032_v29, 0 }
 0x206   :  { %1637 = vmatpush.bf16.msra.mxu0 %v4877_v41  ;;  %v4161_v41 = vld [vmem:[%s6876_s22 + $0x5] ss:$0 sm:$0xff]  ;;  %v1063_v53 = vmul.f32 0.125, %v788_v44  ;;  %1046 = vmatpush.bf16.xpose.msrb.mxu1 %v1037_v25  ;;  %v1702_v33 = vunpack.c.l.b16 %v5107_v24 }
 0x208   :  { %v5079_v57 = vadd.f32 %v4161_v41, %v1063_v53  ;;  %v1703_v40 = vpack.c.b16 %v1702_v33, %v1701_v32 }
 0x209   :  { %v466_v30 = vpop.f32.mrf.mxu2 }
 0x20a   :  { %v1212_v63 = vsel %vm1181_vm1, %v5079_v57, -inf  ;;  %1715 = vmatpush.bf16.msra.mxu3 %v1703_v40  ;;  %v467_v44 = vadd.f32 %v4864_v14, %v466_v30 }
 0x20b   :  { %1213 = vmax.xlane.f32.xlu1 %v1212_v63 }
 0x20c   :  { %v5124_v53 = vpack.c.bf16 %v467_v44, %v467_v44 }
 0x20d   :  { %v790_v59 = vpop.f32.mrf.mxu3  ;;  %3906 = vmatmul.msk.bf16.vlgmr.msrb.gmra.mxu1 %vm642_vm0, %v1029_v3 }
 0x20e   :  { %1663 = vmatpush.bf16.msra.mxu1 %v1651_v39  ;;  %v1064_v5 = vmul.f32 0.125, %v790_v59  ;;  %v1727_v17 = vunpack.c.l.b16 %v5124_v53 }
 0x210   :  { %v5092_v9 = vadd.f32 %v4161_v41, %v1064_v5 }
 0x211   :  { %v468_v41 = vpop.f32.mrf.mxu2 }
 0x212   :  { %v1215_v11 = vsel %vm1181_vm1, %v5092_v9, -inf  ;;  %v469_v25 = vadd.f32 %v4864_v14, %v468_v41 }
 0x213   :  { %1216 = vmax.xlane.f32.xlu2 %v1215_v11 }
 0x214   :  { %v5126_v20 = vpack.c.bf16 %v469_v25, %v469_v25  ;;  %v4165_v25 = vld [vmem:[%s6876_s22 + $0xa] ss:$0 sm:$0xff] }
 0x215   :  { %v814_v51 = vpop.f32.mrf.mxu3 }
 0x216   :  { %v1065_v56 = vmul.f32 0.125, %v814_v51  ;;  %v1728_v63 = vunpack.c.l.b16 %v5126_v20 }
 0x218   :  { %v5099_v35 = vadd.f32 %v4162_v48, %v1065_v56  ;;  %v1729_v3 = vpack.c.b16 %v1728_v63, %v1727_v17 }
 0x219   :  { %v471_v19 = vpop.f32.mrf.mxu2 }
 0x21a   :  { %v1218_v15 = vsel %vm1181_vm1, %v5099_v35, -inf  ;;  %1741 = vmatpush.bf16.msrb.mxu0 %v1729_v3 }
 0x21b   :  { %1219 = vmax.xlane.f32.xlu1 %v1218_v15 }
 0x21d   :  { %v816_v60 = vpop.f32.mrf.mxu3 }
 0x21e   :  { %v1066_v31 = vmul.f32 0.125, %v816_v60 }
 0x220   :  { %v5111_v36 = vadd.f32 %v4162_v48, %v1066_v31 }
 0x221   :  { %v473_v15 = vpop.f32.mrf.mxu2 }
 0x222   :  { %v1221_v42 = vsel %vm1181_vm1, %v5111_v36, -inf  ;;  %v474_v26 = vadd.f32 %v4864_v14, %v473_v15 }
 0x223   :  { %1222 = vmax.xlane.f32.xlu2 %v1221_v42 }
 0x224   :  { %v5147_v31 = vpack.c.bf16 %v474_v26, %v474_v26 }
 0x225   :  { %v840_v43 = vpop.f32.mrf.mxu3 }
 0x226   :  { %v1067_v47 = vmul.f32 0.125, %v840_v43 }
 0x228   :  { %v5118_v29 = vadd.f32 %v4163_v2, %v1067_v47 }
 0x22a   :  { %v1224_v39 = vsel %vm1181_vm1, %v5118_v29, -inf }
 0x22b   :  { %1225 = vmax.xlane.f32.xlu1 %v1224_v39 }
 0x22d   :  { %v842_v54 = vpop.f32.mrf.mxu3 }
 0x22e   :  { %v1068_v0 = vmul.f32 0.125, %v842_v54 }
 0x230   :  { %v5130_v49 = vadd.f32 %v4163_v2, %v1068_v0 }
 0x232   :  { %v1184_v59 = vpop.xlane.xlu2 %1183  ;;  %v1227_v5 = vsel %vm1181_vm1, %v5130_v49, -inf }
 0x233   :  { %v1278_v6 = vsub.f32 %v4974_v23, %v1184_v59  ;;  %1228 = vmax.xlane.f32.xlu2 %v1227_v5  ;;  %v472_v23 = vadd.f32 %v4864_v14, %v471_v19 }
 0x235   :  { %v1310_v10 = vmul.f32 1.442695, %v1278_v6  ;;  %v866_v11 = vpop.f32.mrf.mxu3  ;;  %v5145_v60 = vpack.c.bf16 %v472_v23, %v472_v23  ;;  %v4166_v6 = vld [vmem:[%s6876_s22 + $0x9] ss:$0 sm:$0xff] }
 0x236   :  { %v1069_v48 = vmul.f32 0.125, %v866_v11  ;;  %v1187_v51 = vpop.xlane.xlu0 %1186 }
 0x237   :  { %4181 = vpow2.f32 %v1310_v10  ;;  %v1279_v13 = vsub.f32 %v4982_v38, %v1187_v51  ;;  %v1753_v42 = vunpack.c.l.b16 %v5145_v60  ;;  %v1754_v38 = vunpack.c.l.b16 %v5147_v31 }
 0x238   :  { %v5138_v56 = vadd.f32 %v4164_v50, %v1069_v48 }
 0x239   :  { %v1312_v32 = vmul.f32 1.442695, %v1279_v13  ;;  %v1755_v47 = vpack.c.b16 %v1754_v38, %v1753_v42 }
 0x23a   :  { %v1230_v16 = vsel %vm1181_vm1, %v5138_v56, -inf }
 0x23b   :  { %1231 = vmax.xlane.f32.xlu0 %v1230_v16  ;;  %4183 = vpow2.f32 %v1312_v32  ;;  %1767 = vmatpush.bf16.msrb.mxu1 %v1755_v47 }
 0x23d   :  { %v868_v33 = vpop.f32.mrf.mxu3  ;;  %v5151_v2 = vpop.eup %4181 }
 0x23e   :  { %v1070_v40 = vmul.f32 0.125, %v868_v33  ;;  %v1190_v30 = vpop.xlane.xlu1 %1189  ;;  %v1374_v39 = vsel %vm1181_vm1, %v5151_v2, 0.0 }
 0x23f   :  { %v1280_v14 = vsub.f32 %v4996_v61, %v1190_v30 }
 0x240   :  { %v5153_v43 = vadd.f32 %v4164_v50, %v1070_v40 }
 0x241   :  { %v1314_v0 = vmul.f32 1.442695, %v1280_v14  ;;  %v5165_v61 = vpop.eup %4183 }
 0x242   :  { %v918_v41 = vpop.f32.mrf.mxu0  ;;  %v1233_v44 = vsel %vm1181_vm1, %v5153_v43, -inf  ;;  %v1377_v5 = vsel %vm1181_vm1, %v5165_v61, 0.0 }
 0x243   :  { %v1073_v54 = vmul.f32 0.125, %v918_v41  ;;  %1375 = vadd.xlane.f32.xlu0 %v1374_v39  ;;  %1234 = vmax.xlane.f32.xlu1 %v1233_v44  ;;  %4185 = vpow2.f32 %v1314_v0 }
 0x245   :  { %v892_v17 = vpop.f32.mrf.mxu3  ;;  %v5163_v3 = vadd.f32 %v4165_v25, %v1073_v54 }
 0x246   :  { %v1193_v63 = vpop.xlane.xlu2 %1192  ;;  %v1071_v19 = vmul.f32 0.125, %v892_v17 }
 0x247   :  { %v1242_v59 = vsel %vm1181_vm1, %v5163_v3, -inf  ;;  %v1281_v23 = vsub.f32 %v5005_v8, %v1193_v63 }
 0x248   :  { %v5174_v48 = vadd.f32 %v4166_v6, %v1071_v19 }
 0x249   :  { %v5176_v51 = vpop.eup %4185  ;;  %v1316_v8 = vmul.f32 1.442695, %v1281_v23 }
 0x24a   :  { %v920_v13 = vpop.f32.mrf.mxu0  ;;  %v1380_v40 = vsel %vm1181_vm1, %v5176_v51, 0.0  ;;  %v1236_v30 = vsel %vm1181_vm1, %v5174_v48, -inf }
 0x24b   :  { %1243 = vmax.xlane.f32.xlu0 %v1242_v59  ;;  %1378 = vadd.xlane.f32.xlu1 %v1377_v5  ;;  %v1074_v32 = vmul.f32 0.125, %v920_v13 }
 0x24d   :  { %v894_v50 = vpop.f32.mrf.mxu3  ;;  %v5193_v41 = vadd.f32 %v4165_v25, %v1074_v32 }
 0x24e   :  { %v1072_v10 = vmul.f32 0.125, %v894_v50  ;;  %v1196_v11 = vpop.xlane.xlu2 %1195 }
 0x24f   :  { %v1282_v15 = vsub.f32 %v5016_v18, %v1196_v11  ;;  %v4167_v18 = vld [vmem:[%s6876_s22 + $0xb] ss:$0 sm:$0xff]  ;;  %v1245_v17 = vsel %vm1181_vm1, %v5193_v41, -inf }
 0x250   :  { %v5179_v16 = vadd.f32 %v4166_v6, %v1072_v10 }
 0x251   :  { %v1318_v26 = vmul.f32 1.442695, %v1282_v15 }
 0x252   :  { %v944_v33 = vpop.f32.mrf.mxu1  ;;  %v1239_v42 = vsel %vm1181_vm1, %v5179_v16, -inf }
 0x253   :  { %4187 = vpow2.f32 %v1318_v26  ;;  %v1075_v38 = vmul.f32 0.125, %v944_v33  ;;  %1381 = vadd.xlane.f32.xlu0 %v1380_v40  ;;  %1237 = vmax.xlane.f32.xlu1 %v1236_v30 }
 0x254   :  { %1240 = vmax.xlane.f32.xlu2 %v1239_v42  ;;  %4189 = vpow2.f32 %v1316_v8 }
 0x255   :  { %v5191_v14 = vadd.f32 %v4167_v18, %v1075_v38 }
 0x256   :  { %v1199_v47 = vpop.xlane.xlu0 %1198 }
 0x257   :  { %v1283_v39 = vsub.f32 %v5025_v34, %v1199_v47  ;;  %v1248_v0 = vsel %vm1181_vm1, %v5191_v14, -inf }
 0x259   :  { %v5196_v44 = vpop.eup %4187  ;;  %v1320_v54 = vmul.f32 1.442695, %v1283_v39 }
 0x25a   :  { %v1386_v63 = vsel %vm1181_vm1, %v5196_v44, 0.0  ;;  %v5204_v19 = vpop.eup %4189  ;;  %v946_v34 = vpop.f32.mrf.mxu1 }
 0x25b   :  { %4191 = vpow2.f32 %v1320_v54  ;;  %1249 = vmax.xlane.f32.xlu0 %v1248_v0  ;;  %1246 = vmax.xlane.f32.xlu1 %v1245_v17  ;;  %v1076_v50 = vmul.f32 0.125, %v946_v34  ;;  %v1383_v11 = vsel %vm1181_vm1, %v5204_v19, 0.0 }
 0x25c   :  { %1387 = vadd.xlane.f32.xlu2 %v1386_v63 }
 0x25d   :  { %v5213_v15 = vadd.f32 %v4167_v18, %v1076_v50 }
 0x25e   :  { %v1202_v25 = vpop.xlane.xlu2 %1201 }
 0x25f   :  { %v1284_v59 = vsub.f32 %v5036_v52, %v1202_v25  ;;  %v4168_v52 = vld [vmem:[%s6876_s22 + $0xc] ss:$0 sm:$0xff]  ;;  %v1251_v30 = vsel %vm1181_vm1, %v5213_v15, -inf }
 0x261   :  { %v5207_v5 = vpop.eup %4191  ;;  %v1322_v6 = vmul.f32 1.442695, %v1284_v59 }
 0x262   :  { %v1389_v10 = vsel %vm1181_vm1, %v5207_v5, 0.0 }
 0x263   :  { %4193 = vpow2.f32 %v1322_v6  ;;  %1390 = vadd.xlane.f32.xlu0 %v1389_v10  ;;  %1384 = vadd.xlane.f32.xlu1 %v1383_v11  ;;  %v4169_v11 = vld [vmem:[%s6876_s22 + $0xd] ss:$0 sm:$0xff] }
 0x266   :  { %v1205_v13 = vpop.xlane.xlu0 %1204 }
 0x267   :  { %v1285_v23 = vsub.f32 %v5046_v45, %v1205_v13 }
 0x268   :  { %v970_v26 = vpop.f32.mrf.mxu2 }
 0x269   :  { %v5219_v32 = vpop.eup %4193  ;;  %v1324_v33 = vmul.f32 1.442695, %v1285_v23  ;;  %v1077_v40 = vmul.f32 0.125, %v970_v26 }
 0x26a   :  { %v1392_v42 = vsel %vm1181_vm1, %v5219_v32, 0.0 }
 0x26b   :  { %1252 = vmax.xlane.f32.xlu1 %v1251_v30  ;;  %1393 = vadd.xlane.f32.xlu2 %v1392_v42  ;;  %v5225_v18 = vadd.f32 %v4168_v52, %v1077_v40  ;;  %4195 = vpow2.f32 %v1324_v33  ;;  %v4170_v42 = vld [vmem:[%s6876_s22 + $0xe] ss:$0 sm:$0xff] }
 0x26d   :  { %v1254_v45 = vsel %vm1181_vm1, %v5225_v18, -inf }
 0x26e   :  { %v1208_v38 = vpop.xlane.xlu2 %1207  ;;  %1255 = vmax.xlane.f32.xlu0 %v1254_v45 }
 0x26f   :  { %v1286_v8 = vsub.f32 %v5055_v12, %v1208_v38 }
 0x270   :  { %v972_v54 = vpop.f32.mrf.mxu2 }
 0x271   :  { %v1326_v47 = vmul.f32 1.442695, %v1286_v8  ;;  %v5230_v39 = vpop.eup %4195  ;;  %v1078_v0 = vmul.f32 0.125, %v972_v54 }
 0x272   :  { %v1395_v17 = vsel %vm1181_vm1, %v5230_v39, 0.0 }
 0x273   :  { %4197 = vpow2.f32 %v1326_v47  ;;  %v5237_v50 = vadd.f32 %v4168_v52, %v1078_v0 }
 0x275   :  { %v1257_v13 = vsel %vm1181_vm1, %v5237_v50, -inf }
 0x276   :  { %v1211_v63 = vpop.xlane.xlu0 %1210  ;;  %1396 = vadd.xlane.f32.xlu0 %v1395_v17 }
 0x277   :  { %v1287_v25 = vsub.f32 %v5066_v28, %v1211_v63 }
 0x278   :  { %v996_v34 = vpop.f32.mrf.mxu3 }
 0x279   :  { %v5235_v59 = vpop.eup %4197  ;;  %v1328_v6 = vmul.f32 1.442695, %v1287_v25  ;;  %v1079_v12 = vmul.f32 0.125, %v996_v34 }
 0x27a   :  { %v1398_v10 = vsel %vm1181_vm1, %v5235_v59, 0.0 }
 0x27b   :  { %1399 = vadd.xlane.f32.xlu2 %v1398_v10  ;;  %4199 = vpow2.f32 %v1328_v6  ;;  %v5246_v23 = vadd.f32 %v4169_v11, %v1079_v12 }
 0x27d   :  { %v1260_v30 = vsel %vm1181_vm1, %v5246_v23, -inf }
 0x27e   :  { %v1214_v28 = vpop.xlane.xlu1 %1213  ;;  %1258 = vmax.xlane.f32.xlu0 %v1257_v13 }
 0x27f   :  { %v1288_v52 = vsub.f32 %v5079_v57, %v1214_v28 }
 0x280   :  { %v998_v33 = vpop.f32.mrf.mxu3 }
 0x281   :  { %v5249_v26 = vpop.eup %4199  ;;  %v1330_v38 = vmul.f32 1.442695, %v1288_v52  ;;  %v1080_v8 = vmul.f32 0.125, %v998_v33 }
 0x282   :  { %v1022_v40 = vpop.f32.mrf.mxu0  ;;  %v1401_v47 = vsel %vm1181_vm1, %v5249_v26, 0.0 }
 0x283   :  { %v1081_v45 = vmul.f32 0.125, %v1022_v40  ;;  %1261 = vmax.xlane.f32.xlu2 %v1260_v30  ;;  %4201 = vpow2.f32 %v1330_v38  ;;  %v5261_v63 = vadd.f32 %v4169_v11, %v1080_v8 }
 0x285   :  { %v5258_v57 = vadd.f32 %v4170_v42, %v1081_v45  ;;  %v1263_v12 = vsel %vm1181_vm1, %v5261_v63, -inf }
 0x286   :  { %v1217_v54 = vpop.xlane.xlu2 %1216  ;;  %1402 = vadd.xlane.f32.xlu0 %v1401_v47 }
 0x287   :  { %v1289_v0 = vsub.f32 %v5092_v9, %v1217_v54  ;;  %v1266_v34 = vsel %vm1181_vm1, %v5258_v57, -inf }
 0x289   :  { %v1332_v17 = vmul.f32 1.442695, %v1289_v0  ;;  %v5269_v28 = vpop.eup %4201 }
 0x28a   :  { %v1024_v25 = vpop.f32.mrf.mxu0  ;;  %v1404_v40 = vsel %vm1181_vm1, %v5269_v28, 0.0 }
 0x28b   :  { %v1082_v6 = vmul.f32 0.125, %v1024_v25  ;;  %1267 = vmax.xlane.f32.xlu2 %v1266_v34  ;;  %4203 = vpow2.f32 %v1332_v17  ;;  %v1048_v25 = vpop.f32.mrf.mxu1 }
 0x28c   :  { %v1083_v34 = vmul.f32 0.125, %v1048_v25 }
 0x28d   :  { %v5267_v10 = vadd.f32 %v4170_v42, %v1082_v6  ;;  %v5293_v6 = vld [vmem:[%s6876_s22 + $0xf] ss:$0 sm:$0xff] }
 0x28e   :  { %v1220_v13 = vpop.xlane.xlu1 %1219  ;;  %1264 = vmax.xlane.f32.xlu0 %v1263_v12 }
 0x28f   :  { %v1290_v9 = vsub.f32 %v5099_v35, %v1220_v13  ;;  %v1269_v11 = vsel %vm1181_vm1, %v5267_v10, -inf }
 0x290   :  { %1270 = vmax.xlane.f32.xlu1 %v1269_v11  ;;  %v5299_v11 = vadd.f32 %v5293_v6, %v1083_v34 }
 0x291   :  { %v1334_v52 = vmul.f32 1.442695, %v1290_v9  ;;  %v5274_v33 = vpop.eup %4203 }
 0x292   :  { %v1407_v30 = vsel %vm1181_vm1, %v5274_v33, 0.0 }
 0x293   :  { %1405 = vadd.xlane.f32.xlu2 %v1404_v40  ;;  %4205 = vpow2.f32 %v1334_v52  ;;  %v1272_v40 = vsel %vm1181_vm1, %v5299_v11, -inf }
 0x296   :  { %v1223_v42 = vpop.xlane.xlu2 %1222  ;;  %1408 = vadd.xlane.f32.xlu0 %v1407_v30 }
 0x297   :  { %v1291_v45 = vsub.f32 %v5111_v36, %v1223_v42 }
 0x299   :  { %v1336_v35 = vmul.f32 1.442695, %v1291_v45  ;;  %v5281_v38 = vpop.eup %4205 }
 0x29a   :  { %v1410_v8 = vsel %vm1181_vm1, %v5281_v38, 0.0 }
 0x29b   :  { %4207 = vpow2.f32 %v1336_v35 }
 0x29e   :  { %v1226_v47 = vpop.xlane.xlu1 %1225  ;;  %1411 = vadd.xlane.f32.xlu0 %v1410_v8 }
 0x29f   :  { %v1292_v54 = vsub.f32 %v5118_v29, %v1226_v47 }
 0x2a1   :  { %v1338_v0 = vmul.f32 1.442695, %v1292_v54  ;;  %v5286_v17 = vpop.eup %4207 }
 0x2a2   :  { %v1413_v36 = vsel %vm1181_vm1, %v5286_v17, 0.0 }
 0x2a3   :  { %4209 = vpow2.f32 %v1338_v0 }
 0x2a6   :  { %v1229_v12 = vpop.xlane.xlu2 %1228  ;;  %1414 = vadd.xlane.f32.xlu0 %v1413_v36 }
 0x2a7   :  { %v1293_v13 = vsub.f32 %v5130_v49, %v1229_v12 }
 0x2a9   :  { %v5296_v9 = vpop.eup %4209  ;;  %v1340_v29 = vmul.f32 1.442695, %v1293_v13 }
 0x2aa   :  { %v1416_v52 = vsel %vm1181_vm1, %v5296_v9, 0.0 }
 0x2ab   :  { %4211 = vpow2.f32 %v1340_v29  ;;  %1417 = vadd.xlane.f32.xlu2 %v1416_v52 }
 0x2ae   :  { %v1232_v30 = vpop.xlane.xlu0 %1231  ;;  %1273 = vmax.xlane.f32.xlu0 %v1272_v40 }
 0x2af   :  { %v1294_v42 = vsub.f32 %v5138_v56, %v1232_v30 }
 0x2b1   :  { %v5306_v45 = vpop.eup %4211  ;;  %v1342_v49 = vmul.f32 1.442695, %v1294_v42 }
 0x2b2   :  { %v1419_v35 = vsel %vm1181_vm1, %v5306_v45, 0.0 }
 0x2b3   :  { %4213 = vpow2.f32 %v1342_v49  ;;  %1420 = vadd.xlane.f32.xlu2 %v1419_v35 }
 0x2b6   :  { %v1376_v8 = vpop.xlane.xlu0 %1375  ;;  %v1235_v47 = vpop.xlane.xlu1 %1234 }
 0x2b7   :  { %v1295_v54 = vsub.f32 %v5153_v43, %v1235_v47  ;;  %4215 = vrcp.f32 %v1376_v8 }
 0x2b9   :  { %v5311_v0 = vpop.eup %4213  ;;  %v1344_v25 = vmul.f32 1.442695, %v1295_v54 }
 0x2ba   :  { %v1422_v34 = vsel %vm1181_vm1, %v5311_v0, 0.0 }
 0x2bb   :  { %4217 = vpow2.f32 %v1344_v25  ;;  %1423 = vadd.xlane.f32.xlu1 %v1422_v34 }
 0x2bd   :  { %v4216_v12 = vpop.eup %4215 }
 0x2be   :  { %v1244_v56 = vpop.xlane.xlu0 %1243  ;;  %v1379_v36 = vpop.xlane.xlu1 %1378  ;;  %v1502_v43 = vmul.f32 %v4216_v12, %v5151_v2  ;;  %v1779_v2 = vunpack.c.l.b16 %v5020_v27 }
 0x2bf   :  { %v1298_v13 = vsub.f32 %v5163_v3, %v1244_v56  ;;  %4219 = vrcp.f32 %v1379_v36 }
 0x2c0   :  { %v1534_v42 = vpack.c.bf16 %v1502_v43, %v1502_v43 }
 0x2c1   :  { %v5316_v29 = vpop.eup %4217  ;;  %v1350_v52 = vmul.f32 1.442695, %v1298_v13 }
 0x2c2   :  { %620 = vrot.lane.b32.xlu0 %v5081_v37, %s4513_s6  ;;  %v1425_v40 = vsel %vm1181_vm1, %v5316_v29, 0.0  ;;  %v1568_v37 = vunpack.c.l.b16 %v1534_v42 }
 0x2c3   :  { %4221 = vpow2.f32 %v1350_v52  ;;  %1426 = vadd.xlane.f32.xlu2 %v1425_v40 }
 0x2c5   :  { %v4220_v30 = vpop.eup %4219 }
 0x2c6   :  { %v1503_v49 = vmul.f32 %v4220_v30, %v5165_v61  ;;  %v1382_v35 = vpop.xlane.xlu0 %1381  ;;  %v1238_v3 = vpop.xlane.xlu1 %1237  ;;  %v1780_v61 = vunpack.c.l.b16 %v4985_v55 }
 0x2c7   :  { %v1241_v8 = vpop.xlane.xlu2 %1240 }
 0x2c8   :  { %v1535_v47 = vpack.c.bf16 %v1503_v49, %v1503_v49  ;;  %v1297_v54 = vsub.f32 %v5179_v16, %v1241_v8  ;;  %v1781_v13 = vpack.c.b16 %v1780_v61, %v1779_v2  ;;  %v1296_v61 = vsub.f32 %v5174_v48, %v1238_v3 }
 0x2c9   :  { %v5325_v25 = vpop.eup %4221 }
 0x2ca   :  { %v1569_v34 = vunpack.c.l.b16 %v1535_v47  ;;  %v1348_v56 = vmul.f32 1.442695, %v1297_v54  ;;  %622 = vrot.lane.b32.xlu0 %v5088_v62, %s4513_s6  ;;  %v1434_v36 = vsel %vm1181_vm1, %v5325_v25, 0.0 }
 0x2cb   :  { %1435 = vadd.xlane.f32.xlu1 %v1434_v36  ;;  %v1832_v36 = vunpack.c.l.b16 %v5003_v7  ;;  %v1346_v7 = vmul.f32 1.442695, %v1296_v61 }
 0x2cc   :  { %v1570_v12 = vpack.c.b16 %v1569_v34, %v1568_v37  ;;  %4223 = vpow2.f32 %v1348_v56 }
 0x2ce   :  { %v5333_v16 = vpop.xlane.xlu0 %1249  ;;  %3907 = vmatmul.msk.bf16.vlgmr.msra.gmra.mxu2 %vm1181_vm1, %v1570_v12  ;;  %v5336_v27 = vpop.xlane.xlu1 %1246 }
 0x2cf   :  { %1793 = vmatpush.bf16.msra.mxu2 %v1781_v13  ;;  %v1388_v52 = vpop.xlane.xlu2 %1387 }
 0x2d0   :  { %4225 = vrcp.f32 %v1388_v52 }
 0x2d1   :  { %4227 = vrcp.f32 %v1382_v35 }
 0x2d2   :  { %v5338_v43 = vpop.eup %4223 }
 0x2d3   :  { %v1431_v62 = vsel %vm1181_vm1, %v5338_v43, 0.0 }
 0x2d4   :  { %1432 = vadd.xlane.f32.xlu1 %v1431_v62  ;;  %v1831_v62 = vunpack.c.l.b16 %v5000_v4 }
 0x2d6   :  { %v1391_v55 = vpop.xlane.xlu0 %1390  ;;  %v1385_v40 = vpop.xlane.xlu1 %1384 }
 0x2d7   :  { %v4226_v30 = vpop.eup %4225  ;;  %4229 = vrcp.f32 %v1391_v55 }
 0x2d8   :  { %v4228_v42 = vpop.eup %4227  ;;  %4231 = vrcp.f32 %v1385_v40  ;;  %v1506_v49 = vmul.f32 %v4226_v30, %v5196_v44  ;;  %v1805_v40 = vunpack.c.l.b16 %v4994_v58  ;;  %v1833_v30 = vpack.c.b16 %v1832_v36, %v1831_v62 }
 0x2d9   :  { %v1504_v8 = vmul.f32 %v4228_v42, %v5176_v51  ;;  %v1806_v51 = vunpack.c.l.b16 %v5034_v46 }
 0x2da   :  { %v1538_v35 = vpack.c.bf16 %v1506_v49, %v1506_v49 }
 0x2db   :  { %618 = vrot.lane.b32.xlu2 %v5061_v21, %s4513_s6  ;;  %v1536_v37 = vpack.c.bf16 %v1504_v8, %v1504_v8  ;;  %v1807_v48 = vpack.c.b16 %v1806_v51, %v1805_v40 }
 0x2dc   :  { %v1620_v21 = vunpack.c.l.b16 %v1538_v35 }
 0x2dd   :  { %v4230_v47 = vpop.eup %4229  ;;  %v1594_v55 = vunpack.c.l.b16 %v1536_v37 }
 0x2de   :  { %v4232_v54 = vpop.eup %4231  ;;  %v1507_v2 = vmul.f32 %v4230_v47, %v5207_v5  ;;  %v1394_v44 = vpop.xlane.xlu2 %1393 }
 0x2df   :  { %v1505_v34 = vmul.f32 %v4232_v54, %v5204_v19  ;;  %4233 = vrcp.f32 %v1394_v44 }
 0x2e0   :  { %v1539_v56 = vpack.c.bf16 %v1507_v2, %v1507_v2  ;;  %4235 = vpow2.f32 %v1346_v7 }
 0x2e1   :  { %v1537_v12 = vpack.c.bf16 %v1505_v34, %v1505_v34  ;;  %v5350_v13 = vpop.xlane.xlu0 %1255 }
 0x2e2   :  { %v1621_v52 = vunpack.c.l.b16 %v1539_v56 }
 0x2e3   :  { %v1595_v5 = vunpack.c.l.b16 %v1537_v12 }
 0x2e4   :  { %v1622_v19 = vpack.c.b16 %v1621_v52, %v1620_v21 }
 0x2e5   :  { %v1596_v42 = vpack.c.b16 %v1595_v5, %v1594_v55  ;;  %v4234_v3 = vpop.eup %4233 }
 0x2e6   :  { %3909 = vmatmul.msk.bf16.vlgmr.msra.gmra.mxu0 %vm1181_vm1, %v1622_v19  ;;  %v1508_v4 = vmul.f32 %v4234_v3, %v5219_v32  ;;  %v5360_v49 = vpop.eup %4235 }
 0x2e7   :  { %3908 = vmatmul.msk.bf16.vlgmr.msrb.gmra.mxu3 %vm1181_vm1, %v1596_v42  ;;  %1845 = vmatpush.bf16.msra.mxu0 %v1833_v30  ;;  %v1428_v37 = vsel %vm1181_vm1, %v5360_v49, 0.0  ;;  %v1253_v30 = vpop.xlane.xlu1 %1252 }
 0x2e8   :  { %1819 = vmatpush.bf16.msrb.mxu3 %v1807_v48  ;;  %v1540_v47 = vpack.c.bf16 %v1508_v4, %v1508_v4 }
 0x2e9   :  { %v1397_v46 = vpop.xlane.xlu0 %1396 }
 0x2ea   :  { %4237 = vrcp.f32 %v1397_v46  ;;  %v1646_v34 = vunpack.c.l.b16 %v1540_v47 }
 0x2ed   :  { %624 = vrot.lane.b32.xlu1 %v5105_v22, %s4513_s6  ;;  %v1050_v22 = vpop.f32.mrf.mxu1 }
 0x2ee   :  { %v1400_v58 = vpop.xlane.xlu2 %1399  ;;  %v1084_v44 = vmul.f32 0.125, %v1050_v22 }
 0x2ef   :  { %4239 = vrcp.f32 %v1400_v58  ;;  %v1302_v58 = vsub.f32 %v5225_v18, %v5350_v13 }
 0x2f0   :  { %v4238_v8 = vpop.eup %4237  ;;  %v5372_v62 = vadd.f32 %v5293_v6, %v1084_v44 }
 0x2f1   :  { %v1509_v54 = vmul.f32 %v4238_v8, %v5230_v39  ;;  %v5363_v35 = vpop.xlane.xlu0 %1258  ;;  %v1299_v39 = vsub.f32 %v5193_v41, %v5336_v27 }
 0x2f2   :  { %v1275_v41 = vsel %vm1181_vm1, %v5372_v62, -inf }
 0x2f3   :  { %v1541_v2 = vpack.c.bf16 %v1509_v54, %v1509_v54  ;;  %v1352_v21 = vmul.f32 1.442695, %v1299_v39  ;;  %v1358_v54 = vmul.f32 1.442695, %v1302_v58 }
 0x2f4   :  { %1429 = vadd.xlane.f32.xlu0 %v1428_v37 }
 0x2f5   :  { %v1647_v32 = vunpack.c.l.b16 %v1541_v2  ;;  %v4240_v12 = vpop.eup %4239 }
 0x2f6   :  { %v1262_v56 = vpop.xlane.xlu2 %1261  ;;  %v1510_v51 = vmul.f32 %v4240_v12, %v5235_v59  ;;  %v1301_v59 = vsub.f32 %v5213_v15, %v1253_v30 }
 0x2f7   :  { %v1648_v36 = vpack.c.b16 %v1647_v32, %v1646_v34 }
 0x2f8   :  { %v1542_v5 = vpack.c.bf16 %v1510_v51, %v1510_v51 }
 0x2f9   :  { %v1403_v61 = vpop.xlane.xlu0 %1402  ;;  %3910 = vmatmul.msk.bf16.vlgmr.msra.gmra.mxu1 %vm1181_vm1, %v1648_v36  ;;  %v1304_v36 = vsub.f32 %v5246_v23, %v1262_v56 }
 0x2fa   :  { %4241 = vrcp.f32 %v1403_v61  ;;  %v1672_v27 = vunpack.c.l.b16 %v1542_v5 }
 0x2fb   :  { %4243 = vpow2.f32 %v1352_v21 }
 0x2fe   :  { %v1268_v52 = vpop.xlane.xlu2 %1267 }
 0x2ff   :  { %v1306_v44 = vsub.f32 %v5258_v57, %v1268_v52 }
 0x300   :  { %v4242_v55 = vpop.eup %4241 }
 0x301   :  { %v1511_v40 = vmul.f32 %v4242_v55, %v5249_v26  ;;  %v5375_v19 = vpop.xlane.xlu0 %1264  ;;  %v5380_v46 = vpop.eup %4243  ;;  %v1356_v26 = vmul.f32 1.442695, %v1301_v59  ;;  %v1300_v55 = vsub.f32 %v5191_v14, %v5333_v16  ;;  %v1366_v5 = vmul.f32 1.442695, %v1306_v44 }
 0x302   :  { %v1437_v4 = vsel %vm1181_vm1, %v5380_v46, 0.0 }
 0x303   :  { %v1543_v7 = vpack.c.bf16 %v1511_v40, %v1511_v40  ;;  %v1354_v52 = vmul.f32 1.442695, %v1300_v55 }
 0x304   :  { %1276 = vmax.xlane.f32.xlu2 %v1275_v41 }
 0x305   :  { %v1673_v42 = vunpack.c.l.b16 %v1543_v7 }
 0x306   :  { %v1406_v48 = vpop.xlane.xlu2 %1405 }
 0x307   :  { %v1674_v6 = vpack.c.b16 %v1673_v42, %v1672_v27  ;;  %4245 = vrcp.f32 %v1406_v48  ;;  %v1271_v42 = vpop.xlane.xlu1 %1270 }
 0x308   :  { %628 = vrot.lane.b32.xlu0 %v5124_v53, %s4513_s6 }
 0x309   :  { %3911 = vmatmul.msk.bf16.vlgmr.msrb.gmra.mxu2 %vm1181_vm1, %v1674_v6  ;;  %v1409_v3 = vpop.xlane.xlu0 %1408  ;;  %v1303_v6 = vsub.f32 %v5237_v50, %v5363_v35  ;;  %v1305_v50 = vsub.f32 %v5261_v63, %v5375_v19 }
 0x30a   :  { %4247 = vrcp.f32 %v1409_v3 }
 0x30b   :  { %4249 = vpow2.f32 %v1356_v26 }
 0x30c   :  { %1438 = vadd.xlane.f32.xlu2 %v1437_v4 }
 0x30d   :  { %v4246_v15 = vpop.eup %4245 }
 0x30e   :  { %v1512_v8 = vmul.f32 %v4246_v15, %v5269_v28  ;;  %v1362_v28 = vmul.f32 1.442695, %v1304_v36 }
 0x310   :  { %v4248_v47 = vpop.eup %4247  ;;  %v1544_v2 = vpack.c.bf16 %v1512_v8, %v1512_v8 }
 0x311   :  { %v1513_v53 = vmul.f32 %v4248_v47, %v5274_v33  ;;  %v1412_v37 = vpop.xlane.xlu0 %1411  ;;  %v5391_v34 = vpop.eup %4249 }
 0x312   :  { %4251 = vrcp.f32 %v1412_v37  ;;  %v1698_v22 = vunpack.c.l.b16 %v1544_v2  ;;  %v1443_v18 = vsel %vm1181_vm1, %v5391_v34, 0.0 }
 0x313   :  { %v1545_v32 = vpack.c.bf16 %v1513_v53, %v1513_v53  ;;  %4253 = vpow2.f32 %v1358_v54 }
 0x315   :  { %v1699_v61 = vunpack.c.l.b16 %v1545_v32 }
 0x317   :  { %v1700_v13 = vpack.c.b16 %v1699_v61, %v1698_v22  ;;  %1444 = vadd.xlane.f32.xlu1 %v1443_v18 }
 0x318   :  { %v4252_v33 = vpop.eup %4251 }
 0x319   :  { %3912 = vmatmul.msk.bf16.vlgmr.msra.gmra.mxu3 %vm1181_vm1, %v1700_v13  ;;  %v1415_v12 = vpop.xlane.xlu0 %1414  ;;  %v5397_v39 = vpop.eup %4253  ;;  %v1514_v23 = vmul.f32 %v4252_v33, %v5281_v38 }
 0x31a   :  { %4255 = vrcp.f32 %v1415_v12  ;;  %v1446_v56 = vsel %vm1181_vm1, %v5397_v39, 0.0 }
 0x31b   :  { %4257 = vpow2.f32 %v1362_v28  ;;  %v1546_v40 = vpack.c.bf16 %v1514_v23, %v1514_v23  ;;  %v1307_v28 = vsub.f32 %v5267_v10, %v1271_v42 }
 0x31d   :  { %v1724_v38 = vunpack.c.l.b16 %v1546_v40  ;;  %v1368_v40 = vmul.f32 1.442695, %v1307_v28 }
 0x31e   :  { %v1418_v51 = vpop.xlane.xlu2 %1417 }
 0x31f   :  { %1447 = vadd.xlane.f32.xlu1 %v1446_v56  ;;  %4259 = vrcp.f32 %v1418_v51 }
 0x320   :  { %v4256_v21 = vpop.eup %4255  ;;  %4261 = vpow2.f32 %v1366_v5  ;;  %v1857_v5 = vunpack.c.l.b16 %v5043_v1 }
 0x321   :  { %v1515_v30 = vmul.f32 %v4256_v21, %v5286_v17  ;;  %v1274_v7 = vpop.xlane.xlu0 %1273  ;;  %v5406_v41 = vpop.eup %4257 }
 0x322   :  { %v1308_v27 = vsub.f32 %v5299_v11, %v1274_v7  ;;  %v1452_v14 = vsel %vm1181_vm1, %v5406_v41, 0.0  ;;  %v1360_v11 = vmul.f32 1.442695, %v1303_v6 }
 0x323   :  { %v1547_v57 = vpack.c.bf16 %v1515_v30, %v1515_v30 }
 0x324   :  { %626 = vrot.lane.b32.xlu2 %v5107_v24, %s4513_s6  ;;  %v1370_v26 = vmul.f32 1.442695, %v1308_v27 }
 0x325   :  { %v1725_v59 = vunpack.c.l.b16 %v1547_v57  ;;  %v4260_v17 = vpop.eup %4259 }
 0x326   :  { %v1421_v16 = vpop.xlane.xlu2 %1420  ;;  %v1516_v24 = vmul.f32 %v4260_v17, %v5296_v9  ;;  %v5417_v3 = vpop.eup %4261 }
 0x327   :  { %v1726_v48 = vpack.c.b16 %v1725_v59, %v1724_v38  ;;  %1453 = vadd.xlane.f32.xlu1 %v1452_v14  ;;  %4263 = vrcp.f32 %v1421_v16  ;;  %v1458_v54 = vsel %vm1181_vm1, %v5417_v3, 0.0 }
 0x328   :  { %4265 = vpow2.f32 %v1354_v52  ;;  %v1548_v58 = vpack.c.bf16 %v1516_v24, %v1516_v24 }
 0x329   :  { %3913 = vmatmul.msk.bf16.vlgmr.msrb.gmra.mxu0 %vm1181_vm1, %v1726_v48  ;;  %4267 = vpow2.f32 %v1370_v26 }
 0x32a   :  { %4269 = vpow2.f32 %v1360_v11  ;;  %v1750_v2 = vunpack.c.l.b16 %v1548_v58 }
 0x32d   :  { %v4264_v4 = vpop.eup %4263 }
 0x32e   :  { %v5419_v15 = vpop.eup %4265  ;;  %v1517_v8 = vmul.f32 %v4264_v4, %v5306_v45  ;;  %v1424_v47 = vpop.xlane.xlu1 %1423  ;;  %v1364_v45 = vmul.f32 1.442695, %v1305_v50 }
 0x32f   :  { %1459 = vadd.xlane.f32.xlu1 %v1458_v54  ;;  %4271 = vrcp.f32 %v1424_v47  ;;  %v1440_v35 = vsel %vm1181_vm1, %v5419_v15, 0.0  ;;  %v5428_v37 = vpop.eup %4267 }
 0x330   :  { %v1549_v9 = vpack.c.bf16 %v1517_v8, %v1517_v8  ;;  %v5430_v22 = vpop.eup %4269  ;;  %v1464_v63 = vsel %vm1181_vm1, %v5428_v37, 0.0 }
 0x331   :  { %v1449_v18 = vsel %vm1181_vm1, %v5430_v22, 0.0 }
 0x332   :  { %v1751_v53 = vunpack.c.l.b16 %v1549_v9  ;;  %1441 = vadd.xlane.f32.xlu0 %v1440_v35 }
 0x334   :  { %v1752_v32 = vpack.c.b16 %v1751_v53, %v1750_v2  ;;  %v621_v36 = vpop.permute.xlu0 %620 }
 0x335   :  { %v4272_v19 = vpop.eup %4271  ;;  %v1883_v44 = vunpack.c.l.b16 %v621_v36 }
 0x336   :  { %3914 = vmatmul.msk.bf16.vlgmr.msrb.gmra.mxu1 %vm1181_vm1, %v1752_v32  ;;  %v1427_v61 = vpop.xlane.xlu2 %1426  ;;  %v1518_v13 = vmul.f32 %v4272_v19, %v5311_v0 }
 0x337   :  { %4273 = vrcp.f32 %v1427_v61  ;;  %1465 = vadd.xlane.f32.xlu1 %v1464_v63 }
 0x338   :  { %4275 = vpow2.f32 %v1364_v45  ;;  %v1550_v51 = vpack.c.bf16 %v1518_v13, %v1518_v13 }
 0x339   :  { %4277 = vpow2.f32 %v1368_v40 }
 0x33a   :  { %1450 = vadd.xlane.f32.xlu0 %v1449_v18  ;;  %v1776_v52 = vunpack.c.l.b16 %v1550_v51 }
 0x33c   :  { %v623_v12 = vpop.permute.xlu0 %622 }
 0x33d   :  { %v4274_v33 = vpop.eup %4273  ;;  %v1884_v23 = vunpack.c.l.b16 %v623_v12 }
 0x33e   :  { %v5439_v56 = vpop.eup %4275  ;;  %v1519_v21 = vmul.f32 %v4274_v33, %v5316_v29  ;;  %v619_v55 = vpop.permute.xlu2 %618 }
 0x33f   :  { %v1885_v30 = vpack.c.b16 %v1884_v23, %v1883_v44  ;;  %v1858_v7 = vunpack.c.l.b16 %v619_v55  ;;  %v1455_v10 = vsel %vm1181_vm1, %v5439_v56, 0.0  ;;  %v5446_v29 = vpop.eup %4277  ;;  %v1436_v27 = vpop.xlane.xlu1 %1435 }
 0x340   :  { %v1551_v57 = vpack.c.bf16 %v1519_v21, %v1519_v21  ;;  %v1461_v1 = vsel %vm1181_vm1, %v5446_v29, 0.0 }
 0x341   :  { %v1859_v0 = vpack.c.b16 %v1858_v7, %v1857_v5  ;;  %1897 = vmatpush.bf16.msrb.mxu2 %v1885_v30 }
 0x342   :  { %v1777_v38 = vunpack.c.l.b16 %v1551_v57  ;;  %1456 = vadd.xlane.f32.xlu0 %v1455_v10 }
 0x343   :  { %1871 = vmatpush.bf16.msra.mxu1 %v1859_v0 }
 0x344   :  { %v1778_v59 = vpack.c.b16 %v1777_v38, %v1776_v52 }
 0x346   :  { %3915 = vmatmul.msk.bf16.vlgmr.msra.gmra.mxu2 %vm1181_vm1, %v1778_v59 }
 0x347   :  { %v1433_v42 = vpop.xlane.xlu1 %1432 }
 0x348   :  { %4279 = vrcp.f32 %v1433_v42 }
 0x34d   :  { %1462 = vadd.xlane.f32.xlu2 %v1461_v1 }
 0x34e   :  { %v4280_v16 = vpop.eup %4279 }
 0x34f   :  { %v1521_v17 = vmul.f32 %v4280_v16, %v5338_v43 }
 0x350   :  { %634 = vrot.lane.b32.xlu1 %v5147_v31, %s4513_s6 }
 0x351   :  { %v1553_v6 = vpack.c.bf16 %v1521_v17, %v1521_v17  ;;  %v5469_v28 = vpop.f32.mrf.mxu2 }
 0x353   :  { %v1803_v31 = vunpack.c.l.b16 %v1553_v6 }
 0x356   :  { %630 = vrot.lane.b32.xlu0 %v5126_v20, %s4513_s6 }
 0x359   :  { %v5473_v40 = vpop.f32.mrf.mxu2 }
 0x35f   :  { %v625_v50 = vpop.permute.xlu1 %624 }
 0x360   :  { %v1909_v53 = vunpack.c.l.b16 %v625_v50 }
 0x365   :  { %632 = vrot.lane.b32.xlu2 %v5145_v60, %s4513_s6 }
 0x367   :  { %v1430_v14 = vpop.xlane.xlu0 %1429 }
 0x368   :  { %4281 = vrcp.f32 %v1430_v14 }
 0x369   :  { %4283 = vrcp.f32 %v1436_v27 }
 0x36e   :  { %v4282_v48 = vpop.eup %4281 }
 0x36f   :  { %v1520_v26 = vmul.f32 %v4282_v48, %v5360_v49  ;;  %v4284_v47 = vpop.eup %4283 }
 0x370   :  { %v1522_v54 = vmul.f32 %v4284_v47, %v5325_v25 }
 0x371   :  { %v1552_v24 = vpack.c.bf16 %v1520_v26, %v1520_v26 }
 0x372   :  { %v1554_v35 = vpack.c.bf16 %v1522_v54, %v1522_v54 }
 0x373   :  { %v1802_v11 = vunpack.c.l.b16 %v1552_v24 }
 0x374   :  { %v1828_v61 = vunpack.c.l.b16 %v1554_v35 }
 0x375   :  { %v1804_v4 = vpack.c.b16 %v1803_v31, %v1802_v11 }
 0x377   :  { %v1277_v58 = vpop.xlane.xlu2 %1276  ;;  %3916 = vmatmul.msk.bf16.vlgmr.msrb.gmra.mxu3 %vm1181_vm1, %v1804_v4 }
 0x378   :  { %v1309_v20 = vsub.f32 %v5372_v62, %v1277_v58 }
 0x37a   :  { %v1372_v60 = vmul.f32 1.442695, %v1309_v20  ;;  %v5467_v18 = vpop.permute.xlu0 %628 }
 0x37c   :  { %4285 = vpow2.f32 %v1372_v60 }
 0x37f   :  { %v1439_v8 = vpop.xlane.xlu2 %1438 }
 0x380   :  { %4287 = vrcp.f32 %v1439_v8 }
 0x382   :  { %v5460_v43 = vpop.eup %4285 }
 0x383   :  { %v1467_v49 = vsel %vm1181_vm1, %v5460_v43, 0.0 }
 0x384   :  { %1468 = vadd.xlane.f32.xlu0 %v1467_v49 }
 0x386   :  { %v4288_v9 = vpop.eup %4287 }
 0x387   :  { %v1523_v2 = vmul.f32 %v4288_v9, %v5380_v46  ;;  %v627_v62 = vpop.permute.xlu2 %626  ;;  %v1935_v9 = vunpack.c.l.b16 %v5467_v18 }
 0x388   :  { %v1910_v45 = vunpack.c.l.b16 %v627_v62 }
 0x389   :  { %v1555_v32 = vpack.c.bf16 %v1523_v2, %v1523_v2 }
 0x38a   :  { %v1911_v36 = vpack.c.b16 %v1910_v45, %v1909_v53  ;;  %v1445_v25 = vpop.xlane.xlu1 %1444 }
 0x38b   :  { %v1829_v63 = vunpack.c.l.b16 %v1555_v32  ;;  %4289 = vrcp.f32 %v1445_v25  ;;  %v5491_v25 = vpop.f32.mrf.mxu3 }
 0x38c   :  { %1923 = vmatpush.bf16.msra.mxu3 %v1911_v36  ;;  %v5478_v27 = vpop.f32.mrf.mxu2 }
 0x38d   :  { %v1830_v19 = vpack.c.b16 %v1829_v63, %v1828_v61 }
 0x38f   :  { %3917 = vmatmul.msk.bf16.vlgmr.msra.gmra.mxu0 %vm1181_vm1, %v1830_v19 }
 0x391   :  { %v4290_v46 = vpop.eup %4289 }
 0x392   :  { %v1448_v13 = vpop.xlane.xlu1 %1447  ;;  %v1525_v33 = vmul.f32 %v4290_v46, %v5391_v34 }
 0x393   :  { %v5493_v18 = vpop.f32.mrf.mxu3 }
 0x394   :  { %v1557_v51 = vpack.c.bf16 %v1525_v33, %v1525_v33  ;;  %v5483_v4 = vpop.f32.mrf.mxu2 }
 0x396   :  { %v1855_v7 = vunpack.c.l.b16 %v1557_v51  ;;  %v4065_v51 = vld [vmem:[%s6850_s8 + $0x30] sm:$0xff] }
 0x39a   :  { %v1454_v44 = vpop.xlane.xlu1 %1453 }
 0x3a2   :  { %v1460_v38 = vpop.xlane.xlu1 %1459 }
 0x3a5   :  { %v1442_v12 = vpop.xlane.xlu0 %1441 }
 0x3a6   :  { %4291 = vrcp.f32 %v1442_v12  ;;  %v5497_v12 = vpop.f32.mrf.mxu3 }
 0x3a7   :  { %4293 = vrcp.f32 %v1448_v13  ;;  %v5495_v13 = vpop.f32.mrf.mxu0 }
 0x3ac   :  { %v4292_v23 = vpop.eup %4291 }
 0x3ad   :  { %v1524_v21 = vmul.f32 %v4292_v23, %v5419_v15  ;;  %v1451_v55 = vpop.xlane.xlu0 %1450  ;;  %v4294_v5 = vpop.eup %4293 }
 0x3ae   :  { %4295 = vrcp.f32 %v1451_v55  ;;  %v1526_v57 = vmul.f32 %v4294_v5, %v5397_v39  ;;  %v5501_v33 = vpop.f32.mrf.mxu3 }
 0x3af   :  { %v1556_v30 = vpack.c.bf16 %v1524_v21, %v1524_v21  ;;  %4297 = vrcp.f32 %v1454_v44  ;;  %v5499_v46 = vpop.f32.mrf.mxu0  ;;  %v4066_v44 = vld [vmem:[%s6850_s8 + $0x38] sm:$0xff] }
 0x3b0   :  { %v1558_v34 = vpack.c.bf16 %v1526_v57, %v1526_v57  ;;  %2138 = vmatpush.bf16.msra.mxu2 %v4066_v44 }
 0x3b1   :  { %v1854_v0 = vunpack.c.l.b16 %v1556_v30 }
 0x3b2   :  { %v1880_v14 = vunpack.c.l.b16 %v1558_v34 }
 0x3b3   :  { %v1856_v10 = vpack.c.b16 %v1855_v7, %v1854_v0  ;;  %v4064_v7 = vld [vmem:[%s6850_s8 + $0x28] sm:$0xff] }
 0x3b4   :  { %v4296_v52 = vpop.eup %4295  ;;  %2139 = vmatpush.bf16.msra.mxu2 %v4065_v51 }
 0x3b5   :  { %v1527_v59 = vmul.f32 %v4296_v52, %v5430_v22  ;;  %3918 = vmatmul.msk.bf16.vlgmr.msra.gmra.mxu1 %vm1181_vm1, %v1856_v10  ;;  %v1457_v15 = vpop.xlane.xlu0 %1456  ;;  %v4298_v1 = vpop.eup %4297  ;;  %v4063_v52 = vld [vmem:[%s6850_s8 + $0x20] sm:$0xff] }
 0x3b6   :  { %4299 = vrcp.f32 %v1457_v15  ;;  %v1528_v16 = vmul.f32 %v4298_v1, %v5406_v41  ;;  %v1466_v22 = vpop.xlane.xlu1 %1465 }
 0x3b7   :  { %v1559_v42 = vpack.c.bf16 %v1527_v59, %v1527_v59  ;;  %4301 = vrcp.f32 %v1460_v38  ;;  %v5509_v55 = vpop.f32.mrf.mxu0 }
 0x3b8   :  { %v1560_v6 = vpack.c.bf16 %v1528_v16, %v1528_v16  ;;  %2140 = vmatpush.bf16.msra.mxu2 %v4064_v7  ;;  %v4060_v16 = vld [vmem:[%s6850_s8 + $0x8] sm:$0xff] }
 0x3b9   :  { %v1881_v17 = vunpack.c.l.b16 %v1559_v42 }
 0x3ba   :  { %v1906_v58 = vunpack.c.l.b16 %v1560_v6 }
 0x3bb   :  { %v1882_v39 = vpack.c.b16 %v1881_v17, %v1880_v14 }
 0x3bc   :  { %v4300_v48 = vpop.eup %4299  ;;  %2141 = vmatpush.bf16.msra.mxu2 %v4063_v52 }
 0x3bd   :  { %v1529_v26 = vmul.f32 %v4300_v48, %v5439_v56  ;;  %3919 = vmatmul.msk.bf16.vlgmr.msrb.gmra.mxu2 %vm1181_vm1, %v1882_v39  ;;  %v4302_v11 = vpop.eup %4301  ;;  %v1665_v39 = vpop.f32.mrf.mxu1  ;;  %v4059_v48 = vld [vmem:[%s6850_s8] sm:$0xff] }
 0x3be   :  { %v1530_v41 = vmul.f32 %v4302_v11, %v5417_v3 }
 0x3bf   :  { %v1561_v24 = vpack.c.bf16 %v1529_v26, %v1529_v26  ;;  %v5522_v42 = vpop.f32.mrf.mxu0 }
 0x3c0   :  { %v1463_v31 = vpop.xlane.xlu2 %1462  ;;  %v1562_v54 = vpack.c.bf16 %v1530_v41, %v1530_v41 }
 0x3c1   :  { %v1907_v20 = vunpack.c.l.b16 %v1561_v24  ;;  %4303 = vrcp.f32 %v1463_v31 }
 0x3c2   :  { %v635_v8 = vpop.permute.xlu1 %634  ;;  %v1932_v61 = vunpack.c.l.b16 %v1562_v54  ;;  %4305 = vrcp.f32 %v1466_v22 }
 0x3c3   :  { %v1908_v60 = vpack.c.b16 %v1907_v20, %v1906_v58  ;;  %v1962_v35 = vunpack.c.l.b16 %v635_v8 }
 0x3c5   :  { %3920 = vmatmul.msk.bf16.vlgmr.msra.gmra.mxu3 %vm1181_vm1, %v1908_v60  ;;  %v1667_v22 = vpop.f32.mrf.mxu1 }
 0x3c7   :  { %v4304_v47 = vpop.eup %4303 }
 0x3c8   :  { %v1531_v56 = vmul.f32 %v4304_v47, %v5446_v29  ;;  %v633_v49 = vpop.permute.xlu2 %632  ;;  %v631_v50 = vpop.permute.xlu0 %630 }
 0x3c9   :  { %v1961_v2 = vunpack.c.l.b16 %v633_v49  ;;  %v1936_v62 = vunpack.c.l.b16 %v631_v50  ;;  %v1795_v53 = vpop.f32.mrf.mxu2  ;;  %v4306_v21 = vpop.eup %4305 }
 0x3ca   :  { %v1563_v45 = vpack.c.bf16 %v1531_v56, %v1531_v56  ;;  %v1532_v30 = vmul.f32 %v4306_v21, %v5428_v37  ;;  %v4062_v37 = vld [vmem:[%s6850_s8 + $0x18] sm:$0xff] }
 0x3cb   :  { %v1963_v32 = vpack.c.b16 %v1962_v35, %v1961_v2  ;;  %v1937_v36 = vpack.c.b16 %v1936_v62, %v1935_v9  ;;  %2142 = vmatpush.bf16.msra.mxu2 %v4062_v37 }
 0x3cc   :  { %v1933_v3 = vunpack.c.l.b16 %v1563_v45  ;;  %v1564_v0 = vpack.c.bf16 %v1532_v30, %v1532_v30 }
 0x3cd   :  { %1949 = vmatpush.bf16.msrb.mxu0 %v1937_v36  ;;  %1975 = vmatpush.bf16.msrb.mxu1 %v1963_v32  ;;  %v5536_v24 = vpop.f32.mrf.mxu1 }
 0x3ce   :  { %v1934_v63 = vpack.c.b16 %v1933_v3, %v1932_v61  ;;  %v1958_v59 = vunpack.c.l.b16 %v1564_v0 }
 0x3d0   :  { %3921 = vmatmul.msk.bf16.vlgmr.msrb.gmra.mxu0 %vm1181_vm1, %v1934_v63 }
 0x3d1   :  { %v1797_v19 = vpop.f32.mrf.mxu2 }
 0x3d2   :  { %v4111_v29 = vpack.i.bf16 %v1797_v19, %v1795_v53 }
 0x3d4   :  { %4112 = vrot.lane.b32.xlu2 %v4111_v29, %s4513_s6 }
 0x3d5   :  { %v5538_v31 = vpop.f32.mrf.mxu1 }
 0x3f7   :  { %v1469_v23 = vpop.xlane.xlu0 %1468 }
 0x3f8   :  { %4307 = vrcp.f32 %v1469_v23 }
 0x3fa   :  { %v1821_v5 = vpop.f32.mrf.mxu3 }
 0x3fe   :  { %v4308_v57 = vpop.eup %4307 }
 0x3ff   :  { %v1533_v10 = vmul.f32 %v4308_v57, %v5460_v43  ;;  %v4061_v43 = vld [vmem:[%s6850_s8 + $0x10] sm:$0xff] }
 0x400   :  { %2143 = vmatpush.bf16.msra.mxu2 %v4061_v43 }
 0x401   :  { %v1565_v38 = vpack.c.bf16 %v1533_v10, %v1533_v10 }
 0x402   :  { %v1823_v34 = vpop.f32.mrf.mxu3 }
 0x403   :  { %v1959_v15 = vunpack.c.l.b16 %v1565_v38  ;;  %v4116_v1 = vpack.i.bf16 %v1823_v34, %v1821_v5  ;;  %v4471_v34 = vld [vmem:[%s6873_s3] sm:$0xff] }
 0x404   :  { %2144 = vmatpush.bf16.msra.mxu2 %v4060_v16 }
 0x405   :  { %v1960_v14 = vpack.c.b16 %v1959_v15, %v1958_v59  ;;  %4117 = vrot.lane.b32.xlu1 %v4116_v1, %s4513_s6 }
 0x407   :  { %3922 = vmatmul.msk.bf16.vlgmr.msrb.gmra.mxu1 %vm1181_vm1, %v1960_v14 }
 0x408   :  { %2145 = vmatpush.bf16.msra.mxu2 %v4059_v48 }
 0x40c   :  { %v1847_v17 = vpop.f32.mrf.mxu0 }
 0x414   :  { %v1849_v6 = vpop.f32.mrf.mxu0 }
 0x415   :  { %v4121_v26 = vpack.i.bf16 %v1849_v6, %v1847_v17 }
 0x417   :  { %4122 = vrot.lane.b32.xlu2 %v4121_v26, %s4513_s6 }
 0x42e   :  { %v4113_v11 = vpop.permute.xlu2 %4112 }
 0x42f   :  { %v4115_v58 = vunpack.i.h.bf16 %v4113_v11  ;;  %v4114_v20 = vunpack.i.l.bf16 %v4113_v11 }
 0x431   :  { %v2047_v60 = vsel %vm642_vm0, %v5473_v40, %v4115_v58  ;;  %v2046_v41 = vsel %vm642_vm0, %v5469_v28, %v4114_v20 }
 0x432   :  { %v2062_v8 = vpack.c.bf16 %v2047_v60, %v2046_v41  ;;  %v1873_v47 = vpop.f32.mrf.mxu1 }
 0x434   :  { %2146 = vmatmul.bf16.vlgmr.msra.gmra.mxu2 %v2062_v8 }
 0x43a   :  { %v1875_v54 = vpop.f32.mrf.mxu1 }
 0x43b   :  { %v4126_v56 = vpack.i.bf16 %v1875_v54, %v1873_v47 }
 0x43d   :  { %4127 = vrot.lane.b32.xlu1 %v4126_v56, %s4513_s6 }
 0x440   :  { %v1899_v49 = vpop.f32.mrf.mxu2 }
 0x448   :  { %v1901_v50 = vpop.f32.mrf.mxu2  ;;  %v1925_v9 = vpop.f32.mrf.mxu3 }
 0x449   :  { %v4131_v35 = vpack.i.bf16 %v1901_v50, %v1899_v49 }
 0x44b   :  { %4132 = vrot.lane.b32.xlu0 %v4131_v35, %s4513_s6 }
 0x44d   :  { %v1951_v2 = vpop.f32.mrf.mxu0 }
 0x450   :  { %v1927_v62 = vpop.f32.mrf.mxu3 }
 0x451   :  { %v4136_v53 = vpack.i.bf16 %v1927_v62, %v1925_v9 }
 0x453   :  { %4137 = vrot.lane.b32.xlu2 %v4136_v53, %s4513_s6 }
 0x455   :  { %v1953_v40 = vpop.f32.mrf.mxu0 }
 0x456   :  { %v4141_v28 = vpack.i.bf16 %v1953_v40, %v1951_v2 }
 0x458   :  { %4142 = vrot.lane.b32.xlu1 %v4141_v28, %s4513_s6 }
 0x471   :  { %v4123_v19 = vpop.permute.xlu2 %4122 }
 0x472   :  { %v4125_v29 = vunpack.i.h.bf16 %v4123_v19  ;;  %v4124_v44 = vunpack.i.l.bf16 %v4123_v19  ;;  %v4476_v19 = vld [vmem:[%s6873_s3 + $0x28] sm:$0xff] }
 0x474   :  { %v2050_v51 = vsel %vm642_vm0, %v5495_v13, %v4124_v44  ;;  %v2051_v21 = vsel %vm642_vm0, %v5499_v46, %v4125_v29  ;;  %v5562_v13 = vld [vmem:[%s6851_s9] ss:$0 sm:$0xff] }
 0x475   :  { %v2064_v5 = vpack.c.bf16 %v2051_v21, %v2050_v51 }
 0x477   :  { %v4118_v45 = vpop.permute.xlu1 %4117 }
 0x478   :  { %v4120_v32 = vunpack.i.h.bf16 %v4118_v45  ;;  %v4119_v36 = vunpack.i.l.bf16 %v4118_v45  ;;  %v4475_v45 = vld [vmem:[%s6873_s3 + $0x20] sm:$0xff] }
 0x47a   :  { %v2048_v61 = vsel %vm642_vm0, %v5491_v25, %v4119_v36  ;;  %v2049_v3 = vsel %vm642_vm0, %v5493_v18, %v4120_v32  ;;  %v4514_v36 = vmov 128.0  }
 0x47b   :  { %v2063_v63 = vpack.c.bf16 %v2049_v3, %v2048_v61  ;;  %4309 = vrcp.f32 %v4514_v36  ;;  %v4483_v36 = vld [vmem:[%s6873_s3 + $0x60] sm:$0xff] }
 0x47d   :  { %2151 = vmatmul.bf16.gmra.mxu2 %v2063_v63 }
 0x481   :  { %v4310_v63 = vpop.eup %4309 }
 0x482   :  { %v2238_v44 = vmul.f32 128.0, %v4310_v63  ;;  %vm2242_vm2 = vweird.f32 %v4310_v63 }
 0x484   :  { %v1977_v23 = vpop.f32.mrf.mxu1 }
 0x48c   :  { %v1979_v30 = vpop.f32.mrf.mxu1 }
 0x48d   :  { %v4146_v7 = vpack.i.bf16 %v1979_v30, %v1977_v23  ;;  %2156 = vmatmul.bf16.gmra.mxu2 %v2064_v5  ;;  %v2239_v23 = vsub.f32 1.0, %v2238_v44 }
 0x48f   :  { %4147 = vrot.lane.b32.xlu2 %v4146_v7, %s4513_s6  ;;  %v2240_v51 = vmul.f32 %v4310_v63, %v2239_v23 }
 0x491   :  { %v2241_v21 = vadd.f32 %v4310_v63, %v2240_v51  ;;  %v4069_v51 = vld [vmem:[%s6854_s12 + $0x10] sm:$0xff] }
 0x493   :  { %v5610_v5 = vsel %vm2242_vm2, %v4310_v63, %v2241_v21  ;;  %v4071_v63 = vld [vmem:[%s6854_s12 + $0x20] sm:$0xff]  ;;  %v4068_v21 = vld [vmem:[%s6854_s12 + $0x8] sm:$0xff] }
 0x4ad   :  { %v4138_v26 = vpop.permute.xlu2 %4137 }
 0x4ae   :  { %v4139_v11 = vunpack.i.l.bf16 %v4138_v26 }
 0x4af   :  { %v4128_v25 = vpop.permute.xlu1 %4127 }
 0x4b0   :  { %v4130_v18 = vunpack.i.h.bf16 %v4128_v25  ;;  %v4129_v57 = vunpack.i.l.bf16 %v4128_v25  ;;  %v2056_v58 = vsel %vm642_vm0, %v5497_v12, %v4139_v11 }
 0x4b2   :  { %v2052_v0 = vsel %vm642_vm0, %v1665_v39, %v4129_v57  ;;  %v2053_v10 = vsel %vm642_vm0, %v1667_v22, %v4130_v18  ;;  %v4472_v39 = vld [vmem:[%s6873_s3 + $0x8] sm:$0xff]  ;;  %v4140_v22 = vunpack.i.h.bf16 %v4138_v26 }
 0x4b3   :  { %v2065_v52 = vpack.c.bf16 %v2053_v10, %v2052_v0  ;;  %v4480_v26 = vld [vmem:[%s6873_s3 + $0x48] sm:$0xff] }
 0x4b5   :  { %2161 = vmatmul.bf16.gmra.mxu2 %v2065_v52 }
 0x4b7   :  { %v2147_v46 = vpop.f32.mrf.mxu2 }
 0x4b8   :  { %v2148_v38 = vadd.f32 %v5562_v13, %v2147_v46  ;;  %v4477_v46 = vld [vmem:[%s6873_s3 + $0x30] sm:$0xff] }
 0x4ba   :  { %v5568_v59 = vadd.f32 %v4471_v34, %v2148_v38 }
 0x4bc   :  { %2205 = vadd.xlane.f32.xlu1 %v5568_v59 }
 0x4bd   :  { %v4133_v15 = vpop.permute.xlu0 %4132 }
 0x4be   :  { %v4135_v1 = vunpack.i.h.bf16 %v4133_v15  ;;  %v4134_v37 = vunpack.i.l.bf16 %v4133_v15 }
 0x4bf   :  { %v2149_v14 = vpop.f32.mrf.mxu2 }
 0x4c0   :  { %v2150_v43 = vadd.f32 %v5562_v13, %v2149_v14  ;;  %v2054_v16 = vsel %vm642_vm0, %v5478_v27, %v4134_v37  ;;  %v2055_v17 = vsel %vm642_vm0, %v5483_v4, %v4135_v1  ;;  %v2057_v27 = vsel %vm642_vm0, %v5501_v33, %v4140_v22  ;;  %v4478_v1 = vld [vmem:[%s6873_s3 + $0x38] sm:$0xff] }
 0x4c1   :  { %v2066_v6 = vpack.c.bf16 %v2055_v17, %v2054_v16  ;;  %v2067_v4 = vpack.c.bf16 %v2057_v27, %v2056_v58  ;;  %v4479_v17 = vld [vmem:[%s6873_s3 + $0x40] sm:$0xff] }
 0x4c2   :  { %v5579_v48 = vadd.f32 %v4472_v39, %v2150_v43 }
 0x4c4   :  { %2207 = vadd.xlane.f32.xlu2 %v5579_v48 }
 0x4c5   :  { %2166 = vmatmul.bf16.gmra.mxu2 %v2066_v6 }
 0x4ca   :  { %v4143_v20 = vpop.permute.xlu1 %4142 }
 0x4cb   :  { %v4145_v60 = vunpack.i.h.bf16 %v4143_v20  ;;  %v4144_v41 = vunpack.i.l.bf16 %v4143_v20 }
 0x4cd   :  { %v2058_v8 = vsel %vm642_vm0, %v5509_v55, %v4144_v41  ;;  %v2059_v47 = vsel %vm642_vm0, %v5522_v42, %v4145_v60  ;;  %v4473_v55 = vld [vmem:[%s6873_s3 + $0x10] sm:$0xff] }
 0x4ce   :  { %v2068_v54 = vpack.c.bf16 %v2059_v47, %v2058_v8 }
 0x4d5   :  { %2171 = vmatmul.bf16.gmra.mxu2 %v2067_v4 }
 0x4e5   :  { %2176 = vmatmul.bf16.gmra.mxu2 %v2068_v54 }
 0x4e9   :  { %v4148_v56 = vpop.permute.xlu2 %4147 }
 0x4ea   :  { %v4150_v49 = vunpack.i.h.bf16 %v4148_v56  ;;  %v4149_v50 = vunpack.i.l.bf16 %v4148_v56 }
 0x4ec   :  { %v2060_v12 = vsel %vm642_vm0, %v5536_v24, %v4149_v50  ;;  %v2061_v33 = vsel %vm642_vm0, %v5538_v31, %v4150_v49  ;;  %v4474_v24 = vld [vmem:[%s6873_s3 + $0x18] sm:$0xff] }
 0x4ed   :  { %v2069_v9 = vpack.c.bf16 %v2061_v33, %v2060_v12 }
 0x4f5   :  { %2181 = vmatmul.bf16.gmra.mxu2 %v2069_v9  ;;  %v4481_v9 = vld [vmem:[%s6873_s3 + $0x50] sm:$0xff] }
 0x500   :  { %v2152_v35 = vpop.f32.mrf.mxu2 }
 0x501   :  { %v2153_v2 = vadd.f32 %v5562_v13, %v2152_v35 }
 0x503   :  { %v2189_v42 = vadd.f32 %v4473_v55, %v2153_v2 }
 0x505   :  { %2209 = vadd.xlane.f32.xlu0 %v2189_v42 }
 0x508   :  { %v2154_v62 = vpop.f32.mrf.mxu2 }
 0x509   :  { %v2155_v53 = vadd.f32 %v5562_v13, %v2154_v62 }
 0x50b   :  { %v2190_v40 = vadd.f32 %v4474_v24, %v2155_v53  ;;  %v4482_v24 = vld [vmem:[%s6873_s3 + $0x58] sm:$0xff] }
 0x50d   :  { %2211 = vadd.xlane.f32.xlu1 %v2190_v40 }
 0x510   :  { %v2157_v31 = vpop.f32.mrf.mxu2 }
 0x511   :  { %v2158_v28 = vadd.f32 %v5562_v13, %v2157_v31 }
 0x513   :  { %v2191_v32 = vadd.f32 %v4475_v45, %v2158_v28  ;;  %v4074_v28 = vld [vmem:[%s6854_s12 + $0x38] sm:$0xff] }
 0x514   :  { %2646 = vmatpush.bf16.msra.mxu0 %v4074_v28  ;;  %4099 = vmatpush.bf16.msrb.mxu3 %v4074_v28 }
 0x515   :  { %2213 = vadd.xlane.f32.xlu2 %v2191_v32 }
 0x518   :  { %v2159_v61 = vpop.f32.mrf.mxu2 }
 0x519   :  { %v2160_v3 = vadd.f32 %v5562_v13, %v2159_v61 }
 0x51b   :  { %v2192_v29 = vadd.f32 %v4476_v19, %v2160_v3  ;;  %v4072_v3 = vld [vmem:[%s6854_s12 + $0x28] sm:$0xff]  ;;  %v4070_v19 = vld [vmem:[%s6854_s12 + $0x18] sm:$0xff] }
 0x51d   :  { %2215 = vadd.xlane.f32.xlu0 %v2192_v29 }
 0x52f   :  { %v2206_v30 = vpop.xlane.xlu1 %2205 }
 0x530   :  { %v2244_v7 = vmul.f32 %v5610_v5, %v2206_v30 }
 0x532   :  { %v5614_v25 = vsub.f32 %v5568_v59, %v2244_v7 }
 0x534   :  { %v2276_v18 = vmul.f32 %v5614_v25, %v5614_v25 }
 0x536   :  { %2292 = vadd.xlane.f32.xlu0 %v2276_v18 }
 0x537   :  { %v2208_v57 = vpop.xlane.xlu2 %2207 }
 0x538   :  { %v2162_v0 = vpop.f32.mrf.mxu2  ;;  %v2245_v52 = vmul.f32 %v5610_v5, %v2208_v57  ;;  %v4067_v57 = vld [vmem:[%s6854_s12] sm:$0xff] }
 0x539   :  { %v2163_v10 = vadd.f32 %v5562_v13, %v2162_v0 }
 0x53a   :  { %v5627_v34 = vsub.f32 %v5579_v48, %v2245_v52 }
 0x53b   :  { %v5623_v38 = vadd.f32 %v4477_v46, %v2163_v10 }
 0x53c   :  { %v2277_v14 = vmul.f32 %v5627_v34, %v5627_v34 }
 0x53d   :  { %2217 = vadd.xlane.f32.xlu1 %v5623_v38 }
 0x540   :  { %v2164_v59 = vpop.f32.mrf.mxu2 }
 0x541   :  { %v2165_v15 = vadd.f32 %v5562_v13, %v2164_v59 }
 0x543   :  { %v5633_v37 = vadd.f32 %v4478_v1, %v2165_v15 }
 0x545   :  { %2219 = vadd.xlane.f32.xlu2 %v5633_v37  ;;  %2294 = vadd.xlane.f32.xlu1 %v2277_v14 }
 0x548   :  { %v2167_v43 = vpop.f32.mrf.mxu2 }
 0x549   :  { %v2168_v16 = vadd.f32 %v5562_v13, %v2167_v43 }
 0x54b   :  { %v5642_v39 = vadd.f32 %v4479_v17, %v2168_v16 }
 0x54d   :  { %2221 = vadd.xlane.f32.xlu2 %v5642_v39 }
 0x550   :  { %v2169_v48 = vpop.f32.mrf.mxu2 }
 0x551   :  { %v2170_v6 = vadd.f32 %v5562_v13, %v2169_v48 }
 0x553   :  { %v5649_v22 = vadd.f32 %v4480_v26, %v2170_v6  ;;  %v4484_v26 = vld [vmem:[%s6873_s3 + $0x68] sm:$0xff] }
 0x555   :  { %2223 = vadd.xlane.f32.xlu0 %v5649_v22 }
 0x558   :  { %v2172_v41 = vpop.f32.mrf.mxu2 }
 0x559   :  { %v2173_v56 = vadd.f32 %v5562_v13, %v2172_v41 }
 0x55b   :  { %v5671_v35 = vadd.f32 %v4481_v9, %v2173_v56 }
 0x560   :  { %v2174_v12 = vpop.f32.mrf.mxu2 }
 0x561   :  { %v2175_v55 = vadd.f32 %v5562_v13, %v2174_v12 }
 0x568   :  { %v2177_v31 = vpop.f32.mrf.mxu2 }
 0x569   :  { %v2178_v45 = vadd.f32 %v5562_v13, %v2177_v31 }
 0x56b   :  { %v5696_v61 = vadd.f32 %v4483_v36, %v2178_v45 }
 0x570   :  { %v2179_v18 = vpop.f32.mrf.mxu2 }
 0x571   :  { %v2180_v14 = vadd.f32 %v5562_v13, %v2179_v18 }
 0x578   :  { %v2210_v11 = vpop.xlane.xlu0 %2209  ;;  %v2182_v48 = vpop.f32.mrf.mxu2 }
 0x579   :  { %v2246_v58 = vmul.f32 %v5610_v5, %v2210_v11  ;;  %v5733_v11 = vadd.f32 %v4484_v26, %v2180_v14 }
 0x57b   :  { %v5653_v27 = vsub.f32 %v2189_v42, %v2246_v58 }
 0x57d   :  { %v2278_v4 = vmul.f32 %v5653_v27, %v5653_v27 }
 0x57f   :  { %2296 = vadd.xlane.f32.xlu1 %v2278_v4 }
 0x580   :  { %v2212_v20 = vpop.xlane.xlu1 %2211  ;;  %v2184_v9 = vpop.f32.mrf.mxu2 }
 0x581   :  { %v2247_v60 = vmul.f32 %v5610_v5, %v2212_v20 }
 0x583   :  { %v5658_v8 = vsub.f32 %v2190_v40, %v2247_v60  ;;  %v5683_v40 = vadd.f32 %v4482_v24, %v2175_v55 }
 0x585   :  { %v2279_v47 = vmul.f32 %v5658_v8, %v5658_v8 }
 0x587   :  { %2298 = vadd.xlane.f32.xlu2 %v2279_v47 }
 0x588   :  { %v2214_v54 = vpop.xlane.xlu2 %2213 }
 0x589   :  { %v2248_v49 = vmul.f32 %v5610_v5, %v2214_v54 }
 0x58b   :  { %v5664_v50 = vsub.f32 %v2191_v32, %v2248_v49  ;;  %v4073_v32 = vld [vmem:[%s6854_s12 + $0x30] sm:$0xff] }
 0x58c   :  { %2647 = vmatpush.bf16.msra.mxu0 %v4073_v32  ;;  %4100 = vmatpush.bf16.msrb.mxu3 %v4073_v32  ;;  %v4485_v49 = vld [vmem:[%s6873_s3 + $0x70] sm:$0xff]  ;;  %v5760_v32 = vld [vmem:[%s6852_s10] ss:$0 sm:$0xff] }
 0x58d   :  { %v2280_v33 = vmul.f32 %v5664_v50, %v5664_v50 }
 0x58f   :  { %2300 = vadd.xlane.f32.xlu0 %v2280_v33  ;;  %2225 = vadd.xlane.f32.xlu2 %v5671_v35 }
 0x590   :  { %v2216_v2 = vpop.xlane.xlu0 %2215  ;;  %2648 = vmatpush.bf16.msra.mxu0 %v4072_v3  ;;  %4101 = vmatpush.bf16.msrb.mxu3 %v4072_v3  ;;  %v4486_v3 = vld [vmem:[%s6873_s3 + $0x78] sm:$0xff] }
 0x591   :  { %v2249_v42 = vmul.f32 %v5610_v5, %v2216_v2 }
 0x593   :  { %v5676_v62 = vsub.f32 %v2192_v29, %v2249_v42 }
 0x594   :  { %2649 = vmatpush.bf16.msra.mxu0 %v4071_v63  ;;  %4102 = vmatpush.bf16.msrb.mxu3 %v4071_v63 }
 0x595   :  { %v2281_v53 = vmul.f32 %v5676_v62, %v5676_v62 }
 0x597   :  { %2302 = vadd.xlane.f32.xlu1 %v2281_v53  ;;  %2227 = vadd.xlane.f32.xlu0 %v5683_v40  ;;  %v2185_v53 = vadd.f32 %v5562_v13, %v2184_v9 }
 0x598   :  { %2650 = vmatpush.bf16.msra.mxu0 %v4070_v19  ;;  %4103 = vmatpush.bf16.msrb.mxu3 %v4070_v19 }
 0x599   :  { %v5767_v63 = vadd.f32 %v4486_v3, %v2185_v53 }
 0x59c   :  { %2651 = vmatpush.bf16.msra.mxu0 %v4069_v51  ;;  %4104 = vmatpush.bf16.msrb.mxu3 %v4069_v51 }
 0x59f   :  { %2229 = vadd.xlane.f32.xlu0 %v5696_v61 }
 0x5a0   :  { %2652 = vmatpush.bf16.msra.mxu0 %v4068_v21  ;;  %4105 = vmatpush.bf16.msrb.mxu3 %v4068_v21 }
 0x5a4   :  { %2653 = vmatpush.bf16.msra.mxu0 %v4067_v57  ;;  %4106 = vmatpush.bf16.msrb.mxu3 %v4067_v57 }
 0x5a9   :  { %v2293_v29 = vpop.xlane.xlu0 %2292 }
 0x5aa   :  { %v2324_v44 = vmul.f32 %v2293_v29, %v5610_v5  ;;  %v5775_v29 = vld [vmem:[%s6853_s11] ss:$0 sm:$0xff]  ;;  %s3786_s11 = sshll.u32 %s6862_s20, 4  ;;  %s3787_s11 = int_to_ptr.hbm [resolvable:$true] %s3786_s11 }
 0x5ac   :  { %v2340_v23 = vadd.f32 1e-12, %v2324_v44 }
 0x5ae   :  { %4311 = vrsqrt.f32 %v2340_v23  ;;  %vm2362_vm4 = vweird.f32 %v2340_v23 }
 0x5b0   :  { %v2218_v30 = vpop.xlane.xlu1 %2217 }
 0x5b1   :  { %v2250_v7 = vmul.f32 %v5610_v5, %v2218_v30 }
 0x5b3   :  { %v5720_v0 = vsub.f32 %v5623_v38, %v2250_v7 }
 0x5b4   :  { %v4312_v10 = vpop.eup %4311 }
 0x5b5   :  { %v2357_v52 = vmul.f32 %v4312_v10, %v2340_v23  ;;  %v2282_v46 = vmul.f32 %v5720_v0, %v5720_v0  ;;  %vm2363_vm3 = vweird.f32 %v4312_v10 }
 0x5b6   :  { %vm2364_vm5 = vmor %vm2362_vm4, %vm2363_vm3 }
 0x5b7   :  { %2304 = vadd.xlane.f32.xlu1 %v2282_v46  ;;  %v2358_v59 = vmul.f32 %v4312_v10, %v2357_v52 }
 0x5b8   :  { %v2295_v15 = vpop.xlane.xlu1 %2294  ;;  %v2220_v1 = vpop.xlane.xlu2 %2219 }
 0x5b9   :  { %v2325_v43 = vmul.f32 %v2295_v15, %v5610_v5  ;;  %v2251_v16 = vmul.f32 %v5610_v5, %v2220_v1  ;;  %v2359_v6 = vmul.f32 0.5, %v2358_v59 }
 0x5bb   :  { %v2341_v17 = vadd.f32 1e-12, %v2325_v43  ;;  %v5728_v38 = vsub.f32 %v5633_v37, %v2251_v16  ;;  %v2360_v4 = vsub.f32 1.5, %v2359_v6  ;;  %v2183_v37 = vadd.f32 %v5562_v13, %v2182_v48 }
 0x5bd   :  { %4313 = vrsqrt.f32 %v2341_v17  ;;  %v2283_v58 = vmul.f32 %v5728_v38, %v5728_v38  ;;  %v2361_v54 = vmul.f32 %v4312_v10, %v2360_v4  ;;  %v5746_v12 = vadd.f32 %v4485_v49, %v2183_v37 }
 0x5be   :  { %vm2372_vm7 = vweird.f32 %v2341_v17 }
 0x5bf   :  { %2231 = vadd.xlane.f32.xlu1 %v5733_v11  ;;  %2306 = vadd.xlane.f32.xlu2 %v2283_v58 }
 0x5c0   :  { %v2222_v20 = vpop.xlane.xlu2 %2221 }
 0x5c1   :  { %v2252_v60 = vmul.f32 %v5610_v5, %v2222_v20 }
 0x5c3   :  { %v4314_v41 = vpop.eup %4313  ;;  %v5741_v47 = vsub.f32 %v5642_v39, %v2252_v60  ;;  %v2365_v39 = vsel %vm2364_vm5, %v4312_v10, %v2361_v54 }
 0x5c4   :  { %v2367_v56 = vmul.f32 %v4314_v41, %v2341_v17  ;;  %vm2373_vm6 = vweird.f32 %v4314_v41  ;;  %v2516_v28 = vmul.f32 %v2365_v39, %v5614_v25 }
 0x5c5   :  { %v2284_v33 = vmul.f32 %v5741_v47, %v5741_v47  ;;  %vm2374_vm8 = vmor %vm2372_vm7, %vm2373_vm6 }
 0x5c6   :  { %v2368_v2 = vmul.f32 %v4314_v41, %v2367_v56  ;;  %v2535_v19 = vmul.f32 %v5760_v32, %v2516_v28 }
 0x5c7   :  { %2233 = vadd.xlane.f32.xlu1 %v5746_v12  ;;  %2308 = vadd.xlane.f32.xlu2 %v2284_v33 }
 0x5c8   :  { %v2369_v55 = vmul.f32 0.5, %v2368_v2  ;;  %v2224_v42 = vpop.xlane.xlu0 %2223  ;;  %v5779_v23 = vadd.f32 %v5775_v29, %v2535_v19 }
 0x5c9   :  { %v2253_v24 = vmul.f32 %v5610_v5, %v2224_v42 }
 0x5ca   :  { %v2370_v31 = vsub.f32 1.5, %v2369_v55 }
 0x5cb   :  { %v5755_v45 = vsub.f32 %v5649_v22, %v2253_v24 }
 0x5cc   :  { %v2371_v36 = vmul.f32 %v4314_v41, %v2370_v31 }
 0x5cd   :  { %v2285_v13 = vmul.f32 %v5755_v45, %v5755_v45 }
 0x5ce   :  { %v2375_v25 = vsel %vm2374_vm8, %v4314_v41, %v2371_v36 }
 0x5cf   :  { %v2517_v22 = vmul.f32 %v2375_v25, %v5627_v34  ;;  %2310 = vadd.xlane.f32.xlu0 %v2285_v13  ;;  %2235 = vadd.xlane.f32.xlu2 %v5767_v63 }
 0x5d1   :  { %v2536_v44 = vmul.f32 %v5760_v32, %v2517_v22 }
 0x5d3   :  { %v5782_v51 = vadd.f32 %v5775_v29, %v2536_v44 }
 0x5d5   :  { %v2570_v34 = vpack.c.bf16 %v5782_v51, %v5779_v23 }
 0x5d7   :  { %2654 = vmatmul.bf16.vlgmr.msra.gmra.mxu0 %v2570_v34 }
 0x5f2   :  { %v2297_v21 = vpop.xlane.xlu1 %2296 }
 0x5f3   :  { %v2326_v30 = vmul.f32 %v2297_v21, %v5610_v5 }
 0x5f5   :  { %v2342_v7 = vadd.f32 1e-12, %v2326_v30 }
 0x5f7   :  { %4315 = vrsqrt.f32 %v2342_v7  ;;  %vm2382_vm10 = vweird.f32 %v2342_v7 }
 0x5fa   :  { %v2299_v18 = vpop.xlane.xlu2 %2298 }
 0x5fb   :  { %v2327_v57 = vmul.f32 %v2299_v18, %v5610_v5 }
 0x5fd   :  { %v4316_v10 = vpop.eup %4315  ;;  %v2343_v52 = vadd.f32 1e-12, %v2327_v57 }
 0x5fe   :  { %v2377_v46 = vmul.f32 %v4316_v10, %v2342_v7  ;;  %vm2383_vm9 = vweird.f32 %v4316_v10 }
 0x5ff   :  { %4317 = vrsqrt.f32 %v2343_v52  ;;  %vm2384_vm11 = vmor %vm2382_vm10, %vm2383_vm9  ;;  %vm2392_vm13 = vweird.f32 %v2343_v52 }
 0x600   :  { %v2378_v59 = vmul.f32 %v4316_v10, %v2377_v46 }
 0x602   :  { %v2379_v15 = vmul.f32 0.5, %v2378_v59  ;;  %v2301_v1 = vpop.xlane.xlu0 %2300  ;;  %v2226_v14 = vpop.xlane.xlu2 %2225 }
 0x603   :  { %v2328_v43 = vmul.f32 %v2301_v1, %v5610_v5  ;;  %v2254_v16 = vmul.f32 %v5610_v5, %v2226_v14 }
 0x604   :  { %v2380_v17 = vsub.f32 1.5, %v2379_v15 }
 0x605   :  { %v4318_v48 = vpop.eup %4317  ;;  %v2344_v6 = vadd.f32 1e-12, %v2328_v43  ;;  %v5791_v26 = vsub.f32 %v5671_v35, %v2254_v16 }
 0x606   :  { %v2381_v58 = vmul.f32 %v4316_v10, %v2380_v17  ;;  %v2387_v4 = vmul.f32 %v4318_v48, %v2343_v52  ;;  %vm2393_vm12 = vweird.f32 %v4318_v48 }
 0x607   :  { %4319 = vrsqrt.f32 %v2344_v6  ;;  %v2286_v20 = vmul.f32 %v5791_v26, %v5791_v26  ;;  %vm2394_vm14 = vmor %vm2392_vm13, %vm2393_vm12  ;;  %vm2402_vm0 = vweird.f32 %v2344_v6 }
 0x608   :  { %v2388_v37 = vmul.f32 %v4318_v48, %v2387_v4  ;;  %v2385_v56 = vsel %vm2384_vm11, %v4316_v10, %v2381_v58 }
 0x609   :  { %2312 = vadd.xlane.f32.xlu0 %v2286_v20  ;;  %v2518_v55 = vmul.f32 %v2385_v56, %v5653_v27 }
 0x60a   :  { %v2389_v60 = vmul.f32 0.5, %v2388_v37  ;;  %v2303_v41 = vpop.xlane.xlu1 %2302  ;;  %v2228_v54 = vpop.xlane.xlu0 %2227 }
 0x60b   :  { %v2329_v49 = vmul.f32 %v2303_v41, %v5610_v5  ;;  %v2255_v35 = vmul.f32 %v5610_v5, %v2228_v54  ;;  %v2537_v13 = vmul.f32 %v5760_v32, %v2518_v55 }
 0x60c   :  { %v2390_v33 = vsub.f32 1.5, %v2389_v60 }
 0x60d   :  { %v4320_v9 = vpop.eup %4319  ;;  %v2345_v2 = vadd.f32 1e-12, %v2329_v49  ;;  %v5798_v39 = vsub.f32 %v5683_v40, %v2255_v35  ;;  %v5811_v34 = vadd.f32 %v5775_v29, %v2537_v13  ;;  %v4082_v35 = vld [vmem:[%s6856_s14 + $0x38] sm:$0xff] }
 0x60e   :  { %v2391_v42 = vmul.f32 %v4318_v48, %v2390_v33  ;;  %v2397_v53 = vmul.f32 %v4320_v9, %v2344_v6  ;;  %vm2403_vm15 = vweird.f32 %v4320_v9  ;;  %2915 = vmatpush.bf16.msrb.mxu0 %v4082_v35  ;;  %v5890_v35 = vld [vmem:[%s6855_s13] ss:$0 sm:$0xff] }
 0x60f   :  { %4321 = vrsqrt.f32 %v2345_v2  ;;  %v2287_v24 = vmul.f32 %v5798_v39, %v5798_v39  ;;  %vm2404_vm2 = vmor %vm2402_vm0, %vm2403_vm15  ;;  %vm2412_vm4 = vweird.f32 %v2345_v2 }
 0x610   :  { %v2398_v31 = vmul.f32 %v4320_v9, %v2397_v53  ;;  %v2395_v28 = vsel %vm2394_vm14, %v4318_v48, %v2391_v42  ;;  %v4081_v53 = vld [vmem:[%s6856_s14 + $0x30] sm:$0xff] }
 0x611   :  { %2314 = vadd.xlane.f32.xlu1 %v2287_v24  ;;  %v2519_v36 = vmul.f32 %v2395_v28, %v5658_v8 }
 0x612   :  { %v2399_v3 = vmul.f32 0.5, %v2398_v31  ;;  %v2230_v40 = vpop.xlane.xlu0 %2229  ;;  %2916 = vmatpush.bf16.msrb.mxu0 %v4081_v53 }
 0x613   :  { %v2256_v25 = vmul.f32 %v5610_v5, %v2230_v40  ;;  %v2538_v27 = vmul.f32 %v5760_v32, %v2519_v36 }
 0x614   :  { %v2400_v22 = vsub.f32 1.5, %v2399_v3 }
 0x615   :  { %v4322_v19 = vpop.eup %4321  ;;  %v5808_v44 = vsub.f32 %v5696_v61, %v2256_v25  ;;  %v5814_v21 = vadd.f32 %v5775_v29, %v2538_v27  ;;  %v4080_v25 = vld [vmem:[%s6856_s14 + $0x28] sm:$0xff] }
 0x616   :  { %v2401_v8 = vmul.f32 %v4320_v9, %v2400_v22  ;;  %v2407_v30 = vmul.f32 %v4322_v19, %v2345_v2  ;;  %vm2413_vm3 = vweird.f32 %v4322_v19  ;;  %2917 = vmatpush.bf16.msrb.mxu0 %v4080_v25 }
 0x617   :  { %v2288_v7 = vmul.f32 %v5808_v44, %v5808_v44  ;;  %v2571_v18 = vpack.c.bf16 %v5814_v21, %v5811_v34  ;;  %vm2414_vm5 = vmor %vm2412_vm4, %vm2413_vm3 }
 0x618   :  { %v2408_v57 = vmul.f32 %v4322_v19, %v2407_v30  ;;  %v2405_v61 = vsel %vm2404_vm2, %v4320_v9, %v2401_v8 }
 0x619   :  { %2316 = vadd.xlane.f32.xlu2 %v2288_v7  ;;  %2659 = vmatmul.bf16.gmra.mxu0 %v2571_v18  ;;  %v2520_v46 = vmul.f32 %v2405_v61, %v5664_v50  ;;  %v4079_v18 = vld [vmem:[%s6856_s14 + $0x20] sm:$0xff] }
 0x61a   :  { %v2409_v10 = vmul.f32 0.5, %v2408_v57  ;;  %2918 = vmatpush.bf16.msrb.mxu0 %v4079_v18 }
 0x61b   :  { %v2539_v1 = vmul.f32 %v5760_v32, %v2520_v46 }
 0x61c   :  { %v2410_v52 = vsub.f32 1.5, %v2409_v10 }
 0x61d   :  { %v5825_v16 = vadd.f32 %v5775_v29, %v2539_v1 }
 0x61e   :  { %v2411_v59 = vmul.f32 %v4322_v19, %v2410_v52 }
 0x620   :  { %v2415_v15 = vsel %vm2414_vm5, %v4322_v19, %v2411_v59 }
 0x621   :  { %v2521_v14 = vmul.f32 %v2415_v15, %v5676_v62 }
 0x623   :  { %v2540_v43 = vmul.f32 %v5760_v32, %v2521_v14  ;;  %v4078_v14 = vld [vmem:[%s6856_s14 + $0x18] sm:$0xff] }
 0x624   :  { %2919 = vmatpush.bf16.msrb.mxu0 %v4078_v14 }
 0x625   :  { %v5828_v17 = vadd.f32 %v5775_v29, %v2540_v43 }
 0x627   :  { %v2572_v48 = vpack.c.bf16 %v5828_v17, %v5825_v16 }
 0x629   :  { %2664 = vmatmul.bf16.vlgmr.msrb.gmra.mxu3 %v2572_v48 }
 0x62a   :  { %v2305_v50 = vpop.xlane.xlu1 %2304 }
 0x62b   :  { %v2330_v6 = vmul.f32 %v2305_v50, %v5610_v5  ;;  %v4077_v50 = vld [vmem:[%s6856_s14 + $0x10] sm:$0xff] }
 0x62c   :  { %2920 = vmatpush.bf16.msrb.mxu0 %v4077_v50 }
 0x62d   :  { %v2346_v58 = vadd.f32 1e-12, %v2330_v6 }
 0x62f   :  { %4323 = vrsqrt.f32 %v2346_v58  ;;  %vm2422_vm7 = vweird.f32 %v2346_v58 }
 0x632   :  { %v2232_v4 = vpop.xlane.xlu1 %2231  ;;  %v2307_v20 = vpop.xlane.xlu2 %2306 }
 0x633   :  { %v2257_v62 = vmul.f32 %v5610_v5, %v2232_v4  ;;  %v2331_v37 = vmul.f32 %v2307_v20, %v5610_v5 }
 0x635   :  { %v4324_v60 = vpop.eup %4323  ;;  %v5836_v41 = vsub.f32 %v5733_v11, %v2257_v62  ;;  %v2347_v54 = vadd.f32 1e-12, %v2331_v37 }
 0x636   :  { %v2417_v56 = vmul.f32 %v4324_v60, %v2346_v58  ;;  %vm2423_vm6 = vweird.f32 %v4324_v60 }
 0x637   :  { %4325 = vrsqrt.f32 %v2347_v54  ;;  %v2289_v49 = vmul.f32 %v5836_v41, %v5836_v41  ;;  %vm2424_vm8 = vmor %vm2422_vm7, %vm2423_vm6  ;;  %vm2432_vm10 = vweird.f32 %v2347_v54 }
 0x638   :  { %v2418_v33 = vmul.f32 %v4324_v60, %v2417_v56 }
 0x639   :  { %2318 = vadd.xlane.f32.xlu0 %v2289_v49 }
 0x63a   :  { %v2419_v9 = vmul.f32 0.5, %v2418_v33  ;;  %v2234_v2 = vpop.xlane.xlu1 %2233  ;;  %v2309_v55 = vpop.xlane.xlu2 %2308  ;;  %v4075_v33 = vld [vmem:[%s6856_s14] sm:$0xff] }
 0x63b   :  { %v2258_v42 = vmul.f32 %v5610_v5, %v2234_v2  ;;  %v2332_v11 = vmul.f32 %v2309_v55, %v5610_v5 }
 0x63c   :  { %v2420_v24 = vsub.f32 1.5, %v2419_v9 }
 0x63d   :  { %v4326_v31 = vpop.eup %4325  ;;  %v5849_v28 = vsub.f32 %v5746_v12, %v2258_v42  ;;  %v2348_v36 = vadd.f32 1e-12, %v2332_v11 }
 0x63e   :  { %v2421_v13 = vmul.f32 %v4324_v60, %v2420_v24  ;;  %v2427_v3 = vmul.f32 %v4326_v31, %v2347_v54  ;;  %vm2433_vm9 = vweird.f32 %v4326_v31 }
 0x63f   :  { %4327 = vrsqrt.f32 %v2348_v36  ;;  %v2290_v40 = vmul.f32 %v5849_v28, %v5849_v28  ;;  %vm2434_vm11 = vmor %vm2432_vm10, %vm2433_vm9  ;;  %vm2442_vm13 = vweird.f32 %v2348_v36 }
 0x640   :  { %v2428_v27 = vmul.f32 %v4326_v31, %v2427_v3  ;;  %v2425_v12 = vsel %vm2424_vm8, %v4324_v60, %v2421_v13 }
 0x641   :  { %2320 = vadd.xlane.f32.xlu1 %v2290_v40  ;;  %v2522_v10 = vmul.f32 %v2425_v12, %v5720_v0 }
 0x642   :  { %v2429_v22 = vmul.f32 0.5, %v2428_v27  ;;  %v2311_v19 = vpop.xlane.xlu0 %2310  ;;  %v2236_v8 = vpop.xlane.xlu2 %2235 }
 0x643   :  { %v2333_v30 = vmul.f32 %v2311_v19, %v5610_v5  ;;  %v2259_v7 = vmul.f32 %v5610_v5, %v2236_v8 }
 0x644   :  { %v2430_v57 = vsub.f32 1.5, %v2429_v22 }
 0x645   :  { %v4328_v61 = vpop.eup %4327  ;;  %v2349_v52 = vadd.f32 1e-12, %v2333_v30  ;;  %v5863_v46 = vsub.f32 %v5767_v63, %v2259_v7  ;;  %v2541_v63 = vmul.f32 %v5760_v32, %v2522_v10 }
 0x646   :  { %v2431_v59 = vmul.f32 %v4326_v31, %v2430_v57  ;;  %v2437_v15 = vmul.f32 %v4328_v61, %v2348_v36  ;;  %vm2443_vm12 = vweird.f32 %v4328_v61 }
 0x647   :  { %4329 = vrsqrt.f32 %v2349_v52  ;;  %v2291_v1 = vmul.f32 %v5863_v46, %v5863_v46  ;;  %v5877_v62 = vadd.f32 %v5775_v29, %v2541_v63  ;;  %vm2444_vm14 = vmor %vm2442_vm13, %vm2443_vm12  ;;  %vm2452_vm0 = vweird.f32 %v2349_v52 }
 0x648   :  { %v2435_v43 = vsel %vm2434_vm11, %v4326_v31, %v2431_v59  ;;  %v2438_v48 = vmul.f32 %v4328_v61, %v2437_v15 }
 0x649   :  { %v2523_v0 = vmul.f32 %v2435_v43, %v5728_v38  ;;  %2322 = vadd.xlane.f32.xlu2 %v2291_v1  ;;  %v4076_v38 = vld [vmem:[%s6856_s14 + $0x8] sm:$0xff] }
 0x64a   :  { %v2439_v6 = vmul.f32 0.5, %v2438_v48  ;;  %2921 = vmatpush.bf16.msrb.mxu0 %v4076_v38 }
 0x64b   :  { %v2542_v58 = vmul.f32 %v5760_v32, %v2523_v0 }
 0x64c   :  { %v2440_v4 = vsub.f32 1.5, %v2439_v6 }
 0x64d   :  { %v4330_v20 = vpop.eup %4329  ;;  %v5880_v37 = vadd.f32 %v5775_v29, %v2542_v58 }
 0x64e   :  { %v2441_v60 = vmul.f32 %v4328_v61, %v2440_v4  ;;  %v2447_v54 = vmul.f32 %v4330_v20, %v2349_v52  ;;  %vm2453_vm15 = vweird.f32 %v4330_v20  ;;  %2922 = vmatpush.bf16.msrb.mxu0 %v4075_v33 }
 0x64f   :  { %v2573_v56 = vpack.c.bf16 %v5880_v37, %v5877_v62  ;;  %vm2454_vm2 = vmor %vm2452_vm0, %vm2453_vm15 }
 0x650   :  { %v2448_v49 = vmul.f32 %v4330_v20, %v2447_v54  ;;  %v2445_v9 = vsel %vm2444_vm14, %v4328_v61, %v2441_v60 }
 0x651   :  { %2669 = vmatmul.bf16.gmra.mxu3 %v2573_v56  ;;  %v2524_v11 = vmul.f32 %v2445_v9, %v5741_v47 }
 0x652   :  { %v2449_v2 = vmul.f32 0.5, %v2448_v49 }
 0x653   :  { %v2543_v40 = vmul.f32 %v5760_v32, %v2524_v11 }
 0x654   :  { %v2450_v55 = vsub.f32 1.5, %v2449_v2  ;;  %v2655_v42 = vpop.f32.mrf.mxu0 }
 0x655   :  { %v2656_v53 = vadd.f32 %v5890_v35, %v2655_v42  ;;  %v5902_v19 = vadd.f32 %v5775_v29, %v2543_v40 }
 0x656   :  { %v2451_v24 = vmul.f32 %v4330_v20, %v2450_v55 }
 0x657   :  { %v2711_v31 = vmul.f32 0.044715, %v2656_v53  ;;  %v2695_v1 = vmul.f32 0.5, %v2656_v53 }
 0x658   :  { %v2455_v36 = vsel %vm2454_vm2, %v4330_v20, %v2451_v24 }
 0x659   :  { %v2525_v13 = vmul.f32 %v2455_v36, %v5755_v45  ;;  %v2727_v3 = vmul.f32 %v2711_v31, %v2656_v53 }
 0x65b   :  { %v2743_v25 = vmul.f32 %v2727_v3, %v2656_v53  ;;  %v2544_v27 = vmul.f32 %v5760_v32, %v2525_v13 }
 0x65c   :  { %v2657_v12 = vpop.f32.mrf.mxu0 }
 0x65d   :  { %v2759_v22 = vadd.f32 %v2743_v25, %v2656_v53  ;;  %v2658_v47 = vadd.f32 %v5890_v35, %v2657_v12  ;;  %v5905_v8 = vadd.f32 %v5775_v29, %v2544_v27 }
 0x65f   :  { %v2712_v30 = vmul.f32 0.044715, %v2658_v47  ;;  %v2574_v45 = vpack.c.bf16 %v5905_v8, %v5902_v19  ;;  %v2775_v7 = vmul.f32 0.7978846, %v2759_v22  ;;  %v2696_v14 = vmul.f32 0.5, %v2658_v47 }
 0x661   :  { %v2728_v18 = vmul.f32 %v2712_v30, %v2658_v47  ;;  %2674 = vmatmul.bf16.gmra.mxu3 %v2574_v45  ;;  %4331 = vtanh.f32 %v2775_v7 }
 0x663   :  { %v2744_v57 = vmul.f32 %v2728_v18, %v2658_v47 }
 0x665   :  { %v2760_v61 = vadd.f32 %v2744_v57, %v2658_v47 }
 0x667   :  { %v2776_v10 = vmul.f32 0.7978846, %v2760_v61  ;;  %v4332_v52 = vpop.eup %4331 }
 0x668   :  { %v2807_v59 = vadd.f32 1.0, %v4332_v52 }
 0x669   :  { %4333 = vtanh.f32 %v2776_v10 }
 0x66a   :  { %v2823_v48 = vmul.f32 %v2807_v59, %v2695_v1 }
 0x66f   :  { %v4334_v15 = vpop.eup %4333 }
 0x670   :  { %v2808_v43 = vadd.f32 1.0, %v4334_v15 }
 0x672   :  { %v2824_v0 = vmul.f32 %v2808_v43, %v2696_v14 }
 0x674   :  { %v2839_v63 = vpack.c.bf16 %v2824_v0, %v2823_v48 }
 0x676   :  { %2923 = vmatmul.bf16.vlgmr.msrb.gmra.mxu0 %v2839_v63 }
 0x67c   :  { %v2313_v50 = vpop.xlane.xlu0 %2312 }
 0x67d   :  { %v2334_v6 = vmul.f32 %v2313_v50, %v5610_v5 }
 0x67f   :  { %v2350_v58 = vadd.f32 1e-12, %v2334_v6 }
 0x681   :  { %4335 = vrsqrt.f32 %v2350_v58  ;;  %vm2462_vm4 = vweird.f32 %v2350_v58 }
 0x684   :  { %v2315_v4 = vpop.xlane.xlu1 %2314 }
 0x685   :  { %v2335_v20 = vmul.f32 %v2315_v4, %v5610_v5 }
 0x687   :  { %v4336_v38 = vpop.eup %4335  ;;  %v2351_v60 = vadd.f32 1e-12, %v2335_v20 }
 0x688   :  { %v2457_v54 = vmul.f32 %v4336_v38, %v2350_v58  ;;  %vm2463_vm3 = vweird.f32 %v4336_v38 }
 0x689   :  { %4337 = vrsqrt.f32 %v2351_v60  ;;  %vm2464_vm5 = vmor %vm2462_vm4, %vm2463_vm3  ;;  %vm2472_vm7 = vweird.f32 %v2351_v60 }
 0x68a   :  { %v2458_v56 = vmul.f32 %v4336_v38, %v2457_v54 }
 0x68c   :  { %v2459_v49 = vmul.f32 0.5, %v2458_v56  ;;  %v2317_v11 = vpop.xlane.xlu2 %2316 }
 0x68d   :  { %v2336_v36 = vmul.f32 %v2317_v11, %v5610_v5 }
 0x68e   :  { %v2460_v33 = vsub.f32 1.5, %v2459_v49 }
 0x68f   :  { %v4338_v9 = vpop.eup %4337  ;;  %v2352_v22 = vadd.f32 1e-12, %v2336_v36 }
 0x690   :  { %v2461_v2 = vmul.f32 %v4336_v38, %v2460_v33  ;;  %v2467_v55 = vmul.f32 %v4338_v9, %v2351_v60  ;;  %vm2473_vm6 = vweird.f32 %v4338_v9 }
 0x691   :  { %vm2474_vm8 = vmor %vm2472_vm7, %vm2473_vm6  ;;  %4339 = vrsqrt.f32 %v2352_v22  ;;  %vm2482_vm10 = vweird.f32 %v2352_v22 }
 0x692   :  { %v2468_v42 = vmul.f32 %v4338_v9, %v2467_v55  ;;  %v2465_v53 = vsel %vm2464_vm5, %v4336_v38, %v2461_v2 }
 0x693   :  { %v2526_v3 = vmul.f32 %v2465_v53, %v5791_v26 }
 0x694   :  { %v2469_v24 = vmul.f32 0.5, %v2468_v42 }
 0x695   :  { %v2545_v30 = vmul.f32 %v5760_v32, %v2526_v3 }
 0x696   :  { %v2470_v31 = vsub.f32 1.5, %v2469_v24  ;;  %v2660_v13 = vpop.f32.mrf.mxu0 }
 0x697   :  { %v2661_v40 = vadd.f32 %v5890_v35, %v2660_v13  ;;  %v5919_v61 = vadd.f32 %v5775_v29, %v2545_v30  ;;  %v4340_v14 = vpop.eup %4339 }
 0x698   :  { %v2471_v25 = vmul.f32 %v4338_v9, %v2470_v31  ;;  %v2477_v0 = vmul.f32 %v4340_v14, %v2352_v22  ;;  %vm2483_vm9 = vweird.f32 %v4340_v14 }
 0x699   :  { %v2713_v27 = vmul.f32 0.044715, %v2661_v40  ;;  %v2697_v2 = vmul.f32 0.5, %v2661_v40  ;;  %vm2484_vm11 = vmor %vm2482_vm10, %vm2483_vm9 }
 0x69a   :  { %v2475_v12 = vsel %vm2474_vm8, %v4338_v9, %v2471_v25  ;;  %v2478_v50 = vmul.f32 %v4340_v14, %v2477_v0 }
 0x69b   :  { %v2527_v47 = vmul.f32 %v2475_v12, %v5798_v39  ;;  %v2729_v45 = vmul.f32 %v2713_v27, %v2661_v40 }
 0x69c   :  { %v2479_v56 = vmul.f32 0.5, %v2478_v50 }
 0x69d   :  { %v2546_v7 = vmul.f32 %v5760_v32, %v2527_v47  ;;  %v2745_v18 = vmul.f32 %v2729_v45, %v2661_v40 }
 0x69e   :  { %v2662_v57 = vpop.f32.mrf.mxu0  ;;  %v2480_v53 = vsub.f32 1.5, %v2479_v56 }
 0x69f   :  { %v2663_v26 = vadd.f32 %v5890_v35, %v2662_v57  ;;  %v5922_v10 = vadd.f32 %v5775_v29, %v2546_v7  ;;  %v2761_v52 = vadd.f32 %v2745_v18, %v2661_v40 }
 0x6a0   :  { %v2481_v40 = vmul.f32 %v4340_v14, %v2480_v53 }
 0x6a1   :  { %v2714_v59 = vmul.f32 0.044715, %v2663_v26  ;;  %v2575_v39 = vpack.c.bf16 %v5922_v10, %v5919_v61  ;;  %v2777_v1 = vmul.f32 0.7978846, %v2761_v52  ;;  %v2698_v55 = vmul.f32 0.5, %v2663_v26 }
 0x6a3   :  { %2679 = vmatmul.bf16.gmra.mxu3 %v2575_v39  ;;  %v2730_v15 = vmul.f32 %v2714_v59, %v2663_v26  ;;  %4341 = vtanh.f32 %v2777_v1  ;;  %v2485_v59 = vsel %vm2484_vm11, %v4340_v14, %v2481_v40 }
 0x6a5   :  { %v2746_v43 = vmul.f32 %v2730_v15, %v2663_v26 }
 0x6a7   :  { %v2762_v48 = vadd.f32 %v2746_v43, %v2663_v26 }
 0x6a9   :  { %v2778_v63 = vmul.f32 0.7978846, %v2762_v48  ;;  %v4342_v4 = vpop.eup %4341 }
 0x6aa   :  { %v2809_v49 = vadd.f32 1.0, %v4342_v4 }
 0x6ab   :  { %4343 = vtanh.f32 %v2778_v63  ;;  %v2528_v63 = vmul.f32 %v2485_v59, %v5808_v44 }
 0x6ac   :  { %v2665_v6 = vpop.f32.mrf.mxu3  ;;  %v2319_v58 = vpop.xlane.xlu0 %2318  ;;  %v2825_v36 = vmul.f32 %v2809_v49, %v2697_v2 }
 0x6ad   :  { %v5927_v20 = vadd.f32 %v5890_v35, %v2665_v6  ;;  %v2337_v38 = vmul.f32 %v2319_v58, %v5610_v5 }
 0x6af   :  { %v2715_v60 = vmul.f32 0.044715, %v5927_v20  ;;  %v2353_v54 = vadd.f32 1e-12, %v2337_v38 }
 0x6b1   :  { %v4344_v33 = vpop.eup %4343  ;;  %v2731_v9 = vmul.f32 %v2715_v60, %v5927_v20  ;;  %4345 = vrsqrt.f32 %v2353_v54  ;;  %vm2492_vm13 = vweird.f32 %v2353_v54  ;;  %v2547_v60 = vmul.f32 %v5760_v32, %v2528_v63 }
 0x6b2   :  { %v2810_v42 = vadd.f32 1.0, %v4344_v33 }
 0x6b3   :  { %v2747_v11 = vmul.f32 %v2731_v9, %v5927_v20  ;;  %v5942_v2 = vadd.f32 %v5775_v29, %v2547_v60 }
 0x6b4   :  { %v2667_v24 = vpop.f32.mrf.mxu3  ;;  %v2321_v31 = vpop.xlane.xlu1 %2320  ;;  %v2826_v13 = vmul.f32 %v2810_v42, %v2698_v55 }
 0x6b5   :  { %v2668_v3 = vadd.f32 %v5890_v35, %v2667_v24  ;;  %v2338_v25 = vmul.f32 %v2321_v31, %v5610_v5  ;;  %v2763_v12 = vadd.f32 %v2747_v11, %v5927_v20  ;;  %v2699_v24 = vmul.f32 0.5, %v5927_v20 }
 0x6b6   :  { %v2840_v27 = vpack.c.bf16 %v2826_v13, %v2825_v36 }
 0x6b7   :  { %v4346_v47 = vpop.eup %4345  ;;  %v2716_v30 = vmul.f32 0.044715, %v2668_v3  ;;  %v2354_v45 = vadd.f32 1e-12, %v2338_v25  ;;  %v2779_v26 = vmul.f32 0.7978846, %v2763_v12 }
 0x6b8   :  { %v2487_v7 = vmul.f32 %v4346_v47, %v2353_v54  ;;  %2928 = vmatmul.bf16.gmra.mxu0 %v2840_v27  ;;  %vm2493_vm12 = vweird.f32 %v4346_v47  ;;  %v2700_v31 = vmul.f32 0.5, %v2668_v3 }
 0x6b9   :  { %v2732_v18 = vmul.f32 %v2716_v30, %v2668_v3  ;;  %4347 = vrsqrt.f32 %v2354_v45  ;;  %vm2494_vm14 = vmor %vm2492_vm13, %vm2493_vm12  ;;  %vm2502_vm0 = vweird.f32 %v2354_v45 }
 0x6ba   :  { %v2488_v57 = vmul.f32 %v4346_v47, %v2487_v7  ;;  %4349 = vtanh.f32 %v2779_v26 }
 0x6bb   :  { %v2748_v52 = vmul.f32 %v2732_v18, %v2668_v3 }
 0x6bc   :  { %v2489_v39 = vmul.f32 0.5, %v2488_v57  ;;  %v2323_v15 = vpop.xlane.xlu2 %2322 }
 0x6bd   :  { %v2339_v1 = vmul.f32 %v2323_v15, %v5610_v5  ;;  %v2764_v43 = vadd.f32 %v2748_v52, %v2668_v3 }
 0x6be   :  { %v2490_v48 = vsub.f32 1.5, %v2489_v39 }
 0x6bf   :  { %v4348_v0 = vpop.eup %4347  ;;  %v2355_v50 = vadd.f32 1e-12, %v2339_v1  ;;  %v2780_v6 = vmul.f32 0.7978846, %v2764_v43 }
 0x6c0   :  { %v2491_v58 = vmul.f32 %v4346_v47, %v2490_v48  ;;  %v2497_v22 = vmul.f32 %v4348_v0, %v2354_v45  ;;  %v4350_v56 = vpop.eup %4349  ;;  %vm2503_vm15 = vweird.f32 %v4348_v0 }
 0x6c1   :  { %4351 = vrsqrt.f32 %v2355_v50  ;;  %v2811_v55 = vadd.f32 1.0, %v4350_v56  ;;  %vm2504_vm2 = vmor %vm2502_vm0, %vm2503_vm15  ;;  %vm2512_vm4 = vweird.f32 %v2355_v50 }
 0x6c2   :  { %v2495_v4 = vsel %vm2494_vm14, %v4346_v47, %v2491_v58  ;;  %v2498_v14 = vmul.f32 %v4348_v0, %v2497_v22  ;;  %4353 = vtanh.f32 %v2780_v6 }
 0x6c3   :  { %v2529_v38 = vmul.f32 %v2495_v4, %v5836_v41  ;;  %v2827_v25 = vmul.f32 %v2811_v55, %v2699_v24 }
 0x6c4   :  { %v2499_v49 = vmul.f32 0.5, %v2498_v14 }
 0x6c5   :  { %v2548_v33 = vmul.f32 %v5760_v32, %v2529_v38 }
 0x6c6   :  { %v2500_v9 = vsub.f32 1.5, %v2499_v49 }
 0x6c7   :  { %v4352_v44 = vpop.eup %4351  ;;  %v5945_v54 = vadd.f32 %v5775_v29, %v2548_v33 }
 0x6c8   :  { %v4354_v42 = vpop.eup %4353  ;;  %v2501_v11 = vmul.f32 %v4348_v0, %v2500_v9  ;;  %v2507_v53 = vmul.f32 %v4352_v44, %v2355_v50  ;;  %vm2513_vm3 = vweird.f32 %v4352_v44 }
 0x6c9   :  { %v2576_v41 = vpack.c.bf16 %v5945_v54, %v5942_v2  ;;  %v2812_v36 = vadd.f32 1.0, %v4354_v42  ;;  %vm2514_vm5 = vmor %vm2512_vm4, %vm2513_vm3 }
 0x6ca   :  { %v2508_v13 = vmul.f32 %v4352_v44, %v2507_v53  ;;  %v2505_v12 = vsel %vm2504_vm2, %v4348_v0, %v2501_v11  ;;  %v5969_v11 = vld [vmem:[%s6857_s15] ss:$0 sm:$0xff] }
 0x6cb   :  { %2684 = vmatmul.bf16.gmra.mxu3 %v2576_v41  ;;  %v2828_v27 = vmul.f32 %v2812_v36, %v2700_v31  ;;  %v2530_v7 = vmul.f32 %v2505_v12, %v5849_v28 }
 0x6cc   :  { %v2509_v47 = vmul.f32 0.5, %v2508_v13 }
 0x6cd   :  { %v2841_v30 = vpack.c.bf16 %v2828_v27, %v2827_v25  ;;  %v2549_v45 = vmul.f32 %v5760_v32, %v2530_v7 }
 0x6ce   :  { %v2510_v40 = vsub.f32 1.5, %v2509_v47 }
 0x6cf   :  { %2933 = vmatmul.bf16.gmra.mxu0 %v2841_v30  ;;  %v5956_v39 = vadd.f32 %v5775_v29, %v2549_v45 }
 0x6d0   :  { %v2511_v18 = vmul.f32 %v4352_v44, %v2510_v40 }
 0x6d2   :  { %v2515_v20 = vsel %vm2514_vm5, %v4352_v44, %v2511_v18 }
 0x6d3   :  { %v2531_v3 = vmul.f32 %v2515_v20, %v5863_v46 }
 0x6d4   :  { %v2670_v57 = vpop.f32.mrf.mxu3 }
 0x6d5   :  { %v2671_v26 = vadd.f32 %v5890_v35, %v2670_v57  ;;  %v2550_v52 = vmul.f32 %v5760_v32, %v2531_v3 }
 0x6d7   :  { %v2717_v59 = vmul.f32 0.044715, %v2671_v26  ;;  %v5959_v28 = vadd.f32 %v5775_v29, %v2550_v52  ;;  %v2701_v53 = vmul.f32 0.5, %v2671_v26 }
 0x6d9   :  { %v2733_v15 = vmul.f32 %v2717_v59, %v2671_v26  ;;  %v2577_v1 = vpack.c.bf16 %v5959_v28, %v5956_v39 }
 0x6db   :  { %2689 = vmatmul.bf16.gmra.mxu3 %v2577_v1  ;;  %v2749_v46 = vmul.f32 %v2733_v15, %v2671_v26 }
 0x6dc   :  { %v2672_v43 = vpop.f32.mrf.mxu3 }
 0x6dd   :  { %v2673_v48 = vadd.f32 %v5890_v35, %v2672_v43  ;;  %v2765_v0 = vadd.f32 %v2749_v46, %v2671_v26 }
 0x6df   :  { %v2718_v63 = vmul.f32 0.044715, %v2673_v48  ;;  %v2781_v32 = vmul.f32 0.7978846, %v2765_v0  ;;  %v2702_v41 = vmul.f32 0.5, %v2673_v48 }
 0x6e1   :  { %v2734_v50 = vmul.f32 %v2718_v63, %v2673_v48  ;;  %4355 = vtanh.f32 %v2781_v32 }
 0x6e3   :  { %v2750_v6 = vmul.f32 %v2734_v50, %v2673_v48 }
 0x6e4   :  { %v2675_v58 = vpop.f32.mrf.mxu3 }
 0x6e5   :  { %v2676_v22 = vadd.f32 %v5890_v35, %v2675_v58  ;;  %v2766_v4 = vadd.f32 %v2750_v6, %v2673_v48 }
 0x6e7   :  { %v2719_v29 = vmul.f32 0.044715, %v2676_v22  ;;  %v2782_v14 = vmul.f32 0.7978846, %v2766_v4  ;;  %v4356_v60 = vpop.eup %4355  ;;  %v2703_v59 = vmul.f32 0.5, %v2676_v22 }
 0x6e8   :  { %v2813_v44 = vadd.f32 1.0, %v4356_v60 }
 0x6e9   :  { %v2735_v38 = vmul.f32 %v2719_v29, %v2676_v22  ;;  %4357 = vtanh.f32 %v2782_v14 }
 0x6ea   :  { %v2829_v13 = vmul.f32 %v2813_v44, %v2701_v53 }
 0x6eb   :  { %v2751_v56 = vmul.f32 %v2735_v38, %v2676_v22 }
 0x6ec   :  { %v2677_v49 = vpop.f32.mrf.mxu3 }
 0x6ed   :  { %v2678_v33 = vadd.f32 %v5890_v35, %v2677_v49  ;;  %v2767_v9 = vadd.f32 %v2751_v56, %v2676_v22 }
 0x6ef   :  { %v4358_v55 = vpop.eup %4357  ;;  %v2720_v42 = vmul.f32 0.044715, %v2678_v33  ;;  %v2783_v36 = vmul.f32 0.7978846, %v2767_v9  ;;  %v2704_v15 = vmul.f32 0.5, %v2678_v33 }
 0x6f0   :  { %v2814_v24 = vadd.f32 1.0, %v4358_v55 }
 0x6f1   :  { %v2736_v31 = vmul.f32 %v2720_v42, %v2678_v33  ;;  %4359 = vtanh.f32 %v2783_v36 }
 0x6f2   :  { %v2830_v25 = vmul.f32 %v2814_v24, %v2702_v41 }
 0x6f3   :  { %v2924_v27 = vpop.f32.mrf.mxu0  ;;  %v2752_v12 = vmul.f32 %v2736_v31, %v2678_v33 }
 0x6f4   :  { %v2925_v47 = vadd.f32 %v5969_v11, %v2924_v27  ;;  %v2842_v30 = vpack.c.bf16 %v2830_v25, %v2829_v13 }
 0x6f5   :  { %v2768_v40 = vadd.f32 %v2752_v12, %v2678_v33 }
 0x6f6   :  { %v5973_v7 = vadd.f32 %v2925_v47, %v5779_v23  ;;  %2938 = vmatmul.bf16.gmra.mxu0 %v2842_v30 }
 0x6f7   :  { %v2784_v18 = vmul.f32 0.7978846, %v2768_v40  ;;  %v4360_v20 = vpop.eup %4359 }
 0x6f8   :  { %2982 = vadd.xlane.f32.xlu0 %v5973_v7  ;;  %v2815_v26 = vadd.f32 1.0, %v4360_v20 }
 0x6f9   :  { %4361 = vtanh.f32 %v2784_v18 }
 0x6fa   :  { %v2831_v1 = vmul.f32 %v2815_v26, %v2703_v59 }
 0x6fb   :  { %v2926_v3 = vpop.f32.mrf.mxu0 }
 0x6fc   :  { %v2927_v45 = vadd.f32 %v5969_v11, %v2926_v3 }
 0x6fe   :  { %v5978_v57 = vadd.f32 %v2927_v45, %v5782_v51 }
 0x6ff   :  { %v4362_v52 = vpop.eup %4361 }
 0x700   :  { %2984 = vadd.xlane.f32.xlu1 %v5978_v57  ;;  %v2816_v23 = vadd.f32 1.0, %v4362_v52 }
 0x702   :  { %v2832_v46 = vmul.f32 %v2816_v23, %v2704_v15 }
 0x704   :  { %v2843_v43 = vpack.c.bf16 %v2832_v46, %v2831_v1 }
 0x706   :  { %2943 = vmatmul.bf16.gmra.mxu0 %v2843_v43 }
 0x726   :  { %v2680_v48 = vpop.f32.mrf.mxu3 }
 0x727   :  { %v2681_v0 = vadd.f32 %v5890_v35, %v2680_v48 }
 0x729   :  { %v2721_v63 = vmul.f32 0.044715, %v2681_v0  ;;  %v2705_v24 = vmul.f32 0.5, %v2681_v0 }
 0x72b   :  { %v2737_v50 = vmul.f32 %v2721_v63, %v2681_v0 }
 0x72d   :  { %v2753_v32 = vmul.f32 %v2737_v50, %v2681_v0 }
 0x72e   :  { %v2682_v6 = vpop.f32.mrf.mxu3 }
 0x72f   :  { %v2683_v51 = vadd.f32 %v5890_v35, %v2682_v6  ;;  %v2769_v58 = vadd.f32 %v2753_v32, %v2681_v0 }
 0x731   :  { %v2722_v4 = vmul.f32 0.044715, %v2683_v51  ;;  %v2785_v14 = vmul.f32 0.7978846, %v2769_v58  ;;  %v2706_v31 = vmul.f32 0.5, %v2683_v51 }
 0x733   :  { %v2738_v29 = vmul.f32 %v2722_v4, %v2683_v51  ;;  %4363 = vtanh.f32 %v2785_v14 }
 0x735   :  { %v2929_v22 = vpop.f32.mrf.mxu0  ;;  %v2754_v38 = vmul.f32 %v2738_v29, %v2683_v51 }
 0x736   :  { %v2930_v60 = vadd.f32 %v5969_v11, %v2929_v22 }
 0x737   :  { %v2770_v56 = vadd.f32 %v2754_v38, %v2683_v51 }
 0x738   :  { %v5985_v49 = vadd.f32 %v2930_v60, %v5811_v34 }
 0x739   :  { %v2786_v33 = vmul.f32 0.7978846, %v2770_v56  ;;  %v4364_v9 = vpop.eup %4363 }
 0x73a   :  { %2986 = vadd.xlane.f32.xlu2 %v5985_v49  ;;  %v2817_v53 = vadd.f32 1.0, %v4364_v9 }
 0x73b   :  { %4365 = vtanh.f32 %v2786_v33 }
 0x73c   :  { %v2833_v34 = vmul.f32 %v2817_v53, %v2705_v24 }
 0x73d   :  { %v2931_v44 = vpop.f32.mrf.mxu0 }
 0x73e   :  { %v2932_v55 = vadd.f32 %v5969_v11, %v2931_v44 }
 0x740   :  { %v5990_v42 = vadd.f32 %v2932_v55, %v5814_v21 }
 0x741   :  { %v4366_v41 = vpop.eup %4365 }
 0x742   :  { %2988 = vadd.xlane.f32.xlu0 %v5990_v42  ;;  %v2818_v36 = vadd.f32 1.0, %v4366_v41 }
 0x744   :  { %v2834_v13 = vmul.f32 %v2818_v36, %v2706_v31 }
 0x746   :  { %v2844_v25 = vpack.c.bf16 %v2834_v13, %v2833_v34 }
 0x748   :  { %2948 = vmatmul.bf16.gmra.mxu0 %v2844_v25 }
 0x74c   :  { %v2934_v27 = vpop.f32.mrf.mxu0 }
 0x74d   :  { %v2935_v12 = vadd.f32 %v5969_v11, %v2934_v27 }
 0x74e   :  { %v2685_v47 = vpop.f32.mrf.mxu3 }
 0x74f   :  { %v5995_v30 = vadd.f32 %v2935_v12, %v5825_v16  ;;  %v2686_v21 = vadd.f32 %v5890_v35, %v2685_v47 }
 0x751   :  { %v2723_v40 = vmul.f32 0.044715, %v2686_v21  ;;  %2990 = vadd.xlane.f32.xlu1 %v5995_v30  ;;  %v2707_v38 = vmul.f32 0.5, %v2686_v21 }
 0x753   :  { %v2739_v18 = vmul.f32 %v2723_v40, %v2686_v21 }
 0x754   :  { %v2936_v20 = vpop.f32.mrf.mxu0 }
 0x755   :  { %v2937_v3 = vadd.f32 %v5969_v11, %v2936_v20  ;;  %v2755_v45 = vmul.f32 %v2739_v18, %v2686_v21 }
 0x756   :  { %v2687_v26 = vpop.f32.mrf.mxu3 }
 0x757   :  { %v6001_v52 = vadd.f32 %v2937_v3, %v5828_v17  ;;  %v2688_v59 = vadd.f32 %v5890_v35, %v2687_v26  ;;  %v2771_v15 = vadd.f32 %v2755_v45, %v2686_v21 }
 0x759   :  { %v2724_v23 = vmul.f32 0.044715, %v2688_v59  ;;  %2992 = vadd.xlane.f32.xlu2 %v6001_v52  ;;  %v2787_v1 = vmul.f32 0.7978846, %v2771_v15  ;;  %v2708_v60 = vmul.f32 0.5, %v2688_v59 }
 0x75b   :  { %v2740_v16 = vmul.f32 %v2724_v23, %v2688_v59  ;;  %4367 = vtanh.f32 %v2787_v1 }
 0x75d   :  { %v2756_v46 = vmul.f32 %v2740_v16, %v2688_v59 }
 0x75e   :  { %v2690_v43 = vpop.f32.mrf.mxu3 }
 0x75f   :  { %v2691_v48 = vadd.f32 %v5890_v35, %v2690_v43  ;;  %v2772_v0 = vadd.f32 %v2756_v46, %v2688_v59 }
 0x761   :  { %v2725_v63 = vmul.f32 0.044715, %v2691_v48  ;;  %v2788_v50 = vmul.f32 0.7978846, %v2772_v0  ;;  %v4368_v17 = vpop.eup %4367  ;;  %v2709_v12 = vmul.f32 0.5, %v2691_v48 }
 0x762   :  { %v2819_v29 = vadd.f32 1.0, %v4368_v17 }
 0x763   :  { %v2741_v32 = vmul.f32 %v2725_v63, %v2691_v48  ;;  %4369 = vtanh.f32 %v2788_v50 }
 0x764   :  { %v2835_v44 = vmul.f32 %v2819_v29, %v2707_v38 }
 0x765   :  { %v2757_v6 = vmul.f32 %v2741_v32, %v2691_v48 }
 0x766   :  { %v2692_v51 = vpop.f32.mrf.mxu3 }
 0x767   :  { %v2693_v58 = vadd.f32 %v5890_v35, %v2692_v51  ;;  %v2773_v4 = vadd.f32 %v2757_v6, %v2691_v48 }
 0x769   :  { %v4370_v14 = vpop.eup %4369  ;;  %v2726_v22 = vmul.f32 0.044715, %v2693_v58  ;;  %v2789_v9 = vmul.f32 0.7978846, %v2773_v4  ;;  %v2710_v47 = vmul.f32 0.5, %v2693_v58 }
 0x76a   :  { %v2820_v56 = vadd.f32 1.0, %v4370_v14 }
 0x76b   :  { %v2742_v33 = vmul.f32 %v2726_v22, %v2693_v58  ;;  %4371 = vtanh.f32 %v2789_v9 }
 0x76c   :  { %v2836_v55 = vmul.f32 %v2820_v56, %v2708_v60 }
 0x76d   :  { %v2758_v53 = vmul.f32 %v2742_v33, %v2693_v58 }
 0x76e   :  { %v2845_v41 = vpack.c.bf16 %v2836_v55, %v2835_v44 }
 0x76f   :  { %v2774_v24 = vadd.f32 %v2758_v53, %v2693_v58 }
 0x770   :  { %2953 = vmatmul.bf16.gmra.mxu0 %v2845_v41 }
 0x771   :  { %v2790_v31 = vmul.f32 0.7978846, %v2774_v24  ;;  %v4372_v34 = vpop.eup %4371 }
 0x772   :  { %v2821_v25 = vadd.f32 1.0, %v4372_v34 }
 0x773   :  { %v2939_v36 = vpop.f32.mrf.mxu0  ;;  %4373 = vtanh.f32 %v2790_v31 }
 0x774   :  { %v2940_v35 = vadd.f32 %v5969_v11, %v2939_v36  ;;  %v2837_v20 = vmul.f32 %v2821_v25, %v2709_v12 }
 0x776   :  { %v6009_v13 = vadd.f32 %v2940_v35, %v5877_v62 }
 0x778   :  { %2994 = vadd.xlane.f32.xlu0 %v6009_v13 }
 0x779   :  { %v4374_v27 = vpop.eup %4373 }
 0x77a   :  { %v2822_v21 = vadd.f32 1.0, %v4374_v27 }
 0x77b   :  { %v2941_v40 = vpop.f32.mrf.mxu0 }
 0x77c   :  { %v2942_v18 = vadd.f32 %v5969_v11, %v2941_v40  ;;  %v2838_v3 = vmul.f32 %v2822_v21, %v2710_v47 }
 0x77e   :  { %v6014_v45 = vadd.f32 %v2942_v18, %v5880_v37  ;;  %v2846_v26 = vpack.c.bf16 %v2838_v3, %v2837_v20 }
 0x780   :  { %2996 = vadd.xlane.f32.xlu1 %v6014_v45  ;;  %2958 = vmatmul.bf16.gmra.mxu0 %v2846_v26 }
 0x783   :  { %v2944_v62 = vpop.f32.mrf.mxu0 }
 0x784   :  { %v2945_v59 = vadd.f32 %v5969_v11, %v2944_v62 }
 0x786   :  { %v6019_v15 = vadd.f32 %v2945_v59, %v5902_v19 }
 0x788   :  { %2998 = vadd.xlane.f32.xlu2 %v6019_v15 }
 0x78b   :  { %v2946_v23 = vpop.f32.mrf.mxu0 }
 0x78c   :  { %v2947_v16 = vadd.f32 %v5969_v11, %v2946_v23 }
 0x78e   :  { %v6024_v1 = vadd.f32 %v2947_v16, %v5905_v8 }
 0x790   :  { %3000 = vadd.xlane.f32.xlu0 %v6024_v1 }
 0x7c5   :  { %v2949_v37 = vpop.f32.mrf.mxu0 }
 0x7c6   :  { %v2950_v46 = vadd.f32 %v5969_v11, %v2949_v37 }
 0x7c8   :  { %v6029_v43 = vadd.f32 %v2950_v46, %v5919_v61  ;;  %v2983_v61 = vpop.xlane.xlu0 %2982 }
 0x7c9   :  { %v3014_v6 = vmul.f32 %v2983_v61, %v5610_v5 }
 0x7ca   :  { %3002 = vadd.xlane.f32.xlu1 %v6029_v43 }
 0x7cd   :  { %v2951_v19 = vpop.f32.mrf.mxu0 }
 0x7ce   :  { %v2952_v48 = vadd.f32 %v5969_v11, %v2951_v19 }
 0x7d0   :  { %v6034_v0 = vadd.f32 %v2952_v48, %v5922_v10  ;;  %v6049_v10 = vsub.f32 %v5973_v7, %v3014_v6  ;;  %v2989_v58 = vpop.xlane.xlu0 %2988  ;;  %v2987_v7 = vpop.xlane.xlu2 %2986 }
 0x7d1   :  { %v3017_v14 = vmul.f32 %v2989_v58, %v5610_v5  ;;  %v3016_v55 = vmul.f32 %v2987_v7, %v5610_v5 }
 0x7d2   :  { %3004 = vadd.xlane.f32.xlu2 %v6034_v0  ;;  %v3046_v38 = vmul.f32 %v6049_v10, %v6049_v10 }
 0x7d3   :  { %v6061_v60 = vsub.f32 %v5990_v42, %v3017_v14 }
 0x7d5   :  { %v3049_v24 = vmul.f32 %v6061_v60, %v6061_v60 }
 0x7d8   :  { %v2993_v36 = vpop.xlane.xlu2 %2992 }
 0x7d9   :  { %v3019_v25 = vmul.f32 %v2993_v36, %v5610_v5 }
 0x7eb   :  { %v2995_v33 = vpop.xlane.xlu0 %2994 }
 0x7ec   :  { %v3020_v53 = vmul.f32 %v2995_v33, %v5610_v5 }
 0x7ed   :  { %v2954_v8 = vpop.f32.mrf.mxu0 }
 0x7ee   :  { %v2955_v63 = vadd.f32 %v5969_v11, %v2954_v8  ;;  %v6082_v31 = vsub.f32 %v6009_v13, %v3020_v53 }
 0x7f0   :  { %v6039_v50 = vadd.f32 %v2955_v63, %v5942_v2  ;;  %v2985_v2 = vpop.xlane.xlu1 %2984  ;;  %v3052_v12 = vmul.f32 %v6082_v31, %v6082_v31 }
 0x7f2   :  { %3006 = vadd.xlane.f32.xlu0 %v6039_v50 }
 0x7f5   :  { %v2956_v32 = vpop.f32.mrf.mxu0 }
 0x7f6   :  { %v2957_v17 = vadd.f32 %v5969_v11, %v2956_v32  ;;  %v4515_v32 = vmov 0  }
 0x7f7   :  { %4151 = vset.pattern.permute.xlu2 %v4515_v32  ;;  %4152 = vset.pattern.permute.xlu0 %v4515_v32 }
 0x7f8   :  { %v6045_v51 = vadd.f32 %v2957_v17, %v5945_v54  ;;  %v3015_v54 = vmul.f32 %v2985_v2, %v5610_v5  ;;  %v2991_v44 = vpop.xlane.xlu1 %2990 }
 0x7f9   :  { %v3018_v42 = vmul.f32 %v2991_v44, %v5610_v5 }
 0x7fa   :  { %3008 = vadd.xlane.f32.xlu1 %v6045_v51  ;;  %v6064_v56 = vsub.f32 %v5978_v57, %v3015_v54 }
 0x7fb   :  { %v2999_v18 = vpop.xlane.xlu2 %2998 }
 0x7fc   :  { %v3047_v57 = vmul.f32 %v6064_v56, %v6064_v56  ;;  %v3022_v20 = vmul.f32 %v2999_v18, %v5610_v5 }
 0x7fd   :  { %v2959_v4 = vpop.f32.mrf.mxu0 }
 0x7fe   :  { %v2960_v29 = vadd.f32 %v5969_v11, %v2959_v4 }
 0x800   :  { %v6054_v22 = vadd.f32 %v2960_v29, %v5956_v39  ;;  %v2997_v34 = vpop.xlane.xlu1 %2996 }
 0x801   :  { %v3021_v47 = vmul.f32 %v2997_v34, %v5610_v5 }
 0x802   :  { %3062 = vadd.xlane.f32.xlu1 %v3046_v38  ;;  %3010 = vadd.xlane.f32.xlu2 %v6054_v22 }
 0x803   :  { %v3001_v35 = vpop.xlane.xlu0 %3000  ;;  %v6103_v40 = vsub.f32 %v6014_v45, %v3021_v47 }
 0x804   :  { %v3023_v27 = vmul.f32 %v3001_v35, %v5610_v5 }
 0x805   :  { %v2961_v9 = vpop.f32.mrf.mxu0  ;;  %v3053_v62 = vmul.f32 %v6103_v40, %v6103_v40 }
 0x806   :  { %v2962_v39 = vadd.f32 %v5969_v11, %v2961_v9  ;;  %v6079_v11 = vsub.f32 %v5985_v49, %v3016_v55  ;;  %v6100_v21 = vsub.f32 %v6024_v1, %v3023_v27  ;;  %v4177_v27 = vld [vmem:[#allocation2] ss:$0 sm:$0xff] }
 0x808   :  { %v6070_v41 = vadd.f32 %v2962_v39, %v5959_v28  ;;  %v6085_v28 = vsub.f32 %v5995_v30, %v3018_v42  ;;  %v3048_v49 = vmul.f32 %v6079_v11, %v6079_v11  ;;  %v6097_v30 = vsub.f32 %v6001_v52, %v3019_v25 }
 0x809   :  { %v3055_v3 = vmul.f32 %v6100_v21, %v6100_v21  ;;  %v6113_v52 = vsub.f32 %v6019_v15, %v3022_v20 }
 0x80a   :  { %3068 = vadd.xlane.f32.xlu1 %v3049_v24  ;;  %3012 = vadd.xlane.f32.xlu0 %v6070_v41  ;;  %v3050_v13 = vmul.f32 %v6085_v28, %v6085_v28  ;;  %v3051_v26 = vmul.f32 %v6097_v30, %v6097_v30 }
 0x80b   :  { %3064 = vadd.xlane.f32.xlu2 %v3047_v57  ;;  %v3054_v45 = vmul.f32 %v6113_v52, %v6113_v52 }
 0x812   :  { %3074 = vadd.xlane.f32.xlu1 %v3052_v12  ;;  %3066 = vadd.xlane.f32.xlu0 %v3048_v49 }
 0x813   :  { %3070 = vadd.xlane.f32.xlu2 %v3050_v13 }
 0x81a   :  { %3080 = vadd.xlane.f32.xlu1 %v3055_v3  ;;  %3072 = vadd.xlane.f32.xlu0 %v3051_v26 }
 0x81b   :  { %3076 = vadd.xlane.f32.xlu2 %v3053_v62 }
 0x822   :  { %3078 = vadd.xlane.f32.xlu0 %v3054_v45 }
 0x83d   :  { %v3003_v59 = vpop.xlane.xlu1 %3002 }
 0x83e   :  { %v3024_v23 = vmul.f32 %v3003_v59, %v5610_v5 }
 0x840   :  { %v6119_v16 = vsub.f32 %v6029_v43, %v3024_v23 }
 0x842   :  { %v3056_v1 = vmul.f32 %v6119_v16, %v6119_v16 }
 0x844   :  { %3082 = vadd.xlane.f32.xlu2 %v3056_v1 }
 0x845   :  { %v3005_v37 = vpop.xlane.xlu2 %3004 }
 0x846   :  { %v3025_v46 = vmul.f32 %v3005_v37, %v5610_v5 }
 0x848   :  { %v6125_v15 = vsub.f32 %v6034_v0, %v3025_v46 }
 0x84a   :  { %v3057_v19 = vmul.f32 %v6125_v15, %v6125_v15 }
 0x84c   :  { %3084 = vadd.xlane.f32.xlu0 %v3057_v19 }
 0x865   :  { %v3007_v48 = vpop.xlane.xlu0 %3006 }
 0x866   :  { %v3026_v8 = vmul.f32 %v3007_v48, %v5610_v5 }
 0x868   :  { %v6131_v43 = vsub.f32 %v6039_v50, %v3026_v8 }
 0x86a   :  { %v3058_v63 = vmul.f32 %v6131_v43, %v6131_v43 }
 0x86c   :  { %3086 = vadd.xlane.f32.xlu1 %v3058_v63 }
 0x86d   :  { %v3009_v61 = vpop.xlane.xlu1 %3008 }
 0x86e   :  { %v3027_v0 = vmul.f32 %v3009_v61, %v5610_v5 }
 0x870   :  { %v6137_v17 = vsub.f32 %v6045_v51, %v3027_v0 }
 0x872   :  { %v3059_v6 = vmul.f32 %v6137_v17, %v6137_v17 }
 0x874   :  { %3088 = vadd.xlane.f32.xlu2 %v3059_v6 }
 0x875   :  { %v3063_v58 = vpop.xlane.xlu1 %3062  ;;  %v3011_v50 = vpop.xlane.xlu2 %3010 }
 0x876   :  { %v3028_v4 = vmul.f32 %v3011_v50, %v5610_v5  ;;  %v3094_v29 = vmul.f32 %v3063_v58, %v5610_v5 }
 0x878   :  { %v6143_v2 = vsub.f32 %v6054_v22, %v3028_v4  ;;  %v6148_v54 = vadd.f32 1e-12, %v3094_v29 }
 0x87a   :  { %v3060_v14 = vmul.f32 %v6143_v2, %v6143_v2  ;;  %4375 = vrsqrt.f32 %v6148_v54  ;;  %vm3132_vm4 = vweird.f32 %v6148_v54 }
 0x87c   :  { %3090 = vadd.xlane.f32.xlu0 %v3060_v14 }
 0x87d   :  { %v3069_v38 = vpop.xlane.xlu1 %3068  ;;  %v3013_v51 = vpop.xlane.xlu0 %3012 }
 0x87e   :  { %v3029_v7 = vmul.f32 %v3013_v51, %v5610_v5  ;;  %v3065_v33 = vpop.xlane.xlu2 %3064  ;;  %v3097_v24 = vmul.f32 %v3069_v38, %v5610_v5 }
 0x87f   :  { %v3095_v9 = vmul.f32 %v3065_v33, %v5610_v5 }
 0x880   :  { %v6153_v44 = vsub.f32 %v6070_v41, %v3029_v7  ;;  %v6162_v35 = vpop.eup %4375  ;;  %v6170_v47 = vadd.f32 1e-12, %v3097_v24 }
 0x881   :  { %v3111_v22 = vadd.f32 1e-12, %v3095_v9  ;;  %v3127_v18 = vmul.f32 %v6162_v35, %v6148_v54  ;;  %vm3133_vm10 = vweird.f32 %v6162_v35 }
 0x882   :  { %v3061_v39 = vmul.f32 %v6153_v44, %v6153_v44 }
 0x883   :  { %4377 = vrsqrt.f32 %v3111_v22  ;;  %v3128_v46 = vmul.f32 %v6162_v35, %v3127_v18  ;;  %vm3142_vm7 = vweird.f32 %v3111_v22 }
 0x884   :  { %3092 = vadd.xlane.f32.xlu1 %v3061_v39  ;;  %v6203_v39 = vld [vmem:[%s6858_s16] ss:$0 sm:$0xff] }
 0x885   :  { %v3075_v55 = vpop.xlane.xlu1 %3074  ;;  %v3067_v53 = vpop.xlane.xlu0 %3066  ;;  %v3129_v14 = vmul.f32 0.5, %v3128_v46 }
 0x886   :  { %v3100_v42 = vmul.f32 %v3075_v55, %v5610_v5  ;;  %v3096_v57 = vmul.f32 %v3067_v53, %v5610_v5  ;;  %v3071_v36 = vpop.xlane.xlu2 %3070 }
 0x887   :  { %v3098_v41 = vmul.f32 %v3071_v36, %v5610_v5 }
 0x888   :  { %v6164_v34 = vadd.f32 1e-12, %v3100_v42  ;;  %v6166_v25 = vadd.f32 1e-12, %v3096_v57 }
 0x889   :  { %v4378_v12 = vpop.eup %4377  ;;  %v6168_v49 = vadd.f32 1e-12, %v3098_v41 }
 0x88a   :  { %v3137_v13 = vmul.f32 %v4378_v12, %v3111_v22  ;;  %4379 = vrsqrt.f32 %v6164_v34  ;;  %vm3143_vm6 = vweird.f32 %v4378_v12  ;;  %vm3152_vm12 = vweird.f32 %v6166_v25 }
 0x88b   :  { %4381 = vrsqrt.f32 %v6166_v25  ;;  %vm3144_vm8 = vmor %vm3142_vm7, %vm3143_vm6  ;;  %vm3172_vm14 = vweird.f32 %v6168_v49  ;;  %vm3192_vm2 = vweird.f32 %v6164_v34 }
 0x88c   :  { %v3138_v20 = vmul.f32 %v4378_v12, %v3137_v13  ;;  %4383 = vrsqrt.f32 %v6168_v49  ;;  %3396 = vperm.xlu2 %4151, %v4177_v27   ;;  %v3130_v27 = vsub.f32 1.5, %v3129_v14  ;;  %v6216_v13 = vld [vmem:[%s6859_s17] ss:$0 sm:$0xff]  ;;  %vm6257_vm6 = vmor %vm3132_vm4, %vm3133_vm10 }
 0x88d   :  { %v3081_v3 = vpop.xlane.xlu1 %3080  ;;  %v3073_v26 = vpop.xlane.xlu0 %3072  ;;  %4385 = vrsqrt.f32 %v6170_v47 }
 0x88e   :  { %v3139_v62 = vmul.f32 0.5, %v3138_v20  ;;  %v3103_v45 = vmul.f32 %v3081_v3, %v5610_v5  ;;  %v3099_v59 = vmul.f32 %v3073_v26, %v5610_v5  ;;  %v3077_v23 = vpop.xlane.xlu2 %3076 }
 0x88f   :  { %v3101_v1 = vmul.f32 %v3077_v23, %v5610_v5 }
 0x890   :  { %v6181_v37 = vpop.eup %4379  ;;  %v3140_v19 = vsub.f32 1.5, %v3139_v62  ;;  %v6184_v48 = vadd.f32 1e-12, %v3103_v45  ;;  %v6188_v61 = vadd.f32 1e-12, %v3099_v59 }
 0x891   :  { %v4382_v8 = vpop.eup %4381  ;;  %v3187_v63 = vmul.f32 %v6181_v37, %v6164_v34  ;;  %v6192_v58 = vadd.f32 1e-12, %v3101_v1  ;;  %vm3193_vm15 = vweird.f32 %v6181_v37 }
 0x892   :  { %v4384_v32 = vpop.eup %4383  ;;  %v3141_v0 = vmul.f32 %v4378_v12, %v3140_v19  ;;  %v3147_v6 = vmul.f32 %v4382_v8, %v6166_v25  ;;  %4387 = vrsqrt.f32 %v6184_v48  ;;  %vm3153_vm9 = vweird.f32 %v4382_v8  ;;  %vm6244_vm3 = vmor %vm3192_vm2, %vm3193_vm15 }
 0x893   :  { %v3188_v50 = vmul.f32 %v6181_v37, %v3187_v63  ;;  %v3167_v4 = vmul.f32 %v4384_v32, %v6168_v49  ;;  %v6196_v29 = vpop.eup %4385  ;;  %4389 = vrsqrt.f32 %v6188_v61  ;;  %vm3173_vm11 = vweird.f32 %v4384_v32  ;;  %vm3154_vm13 = vmor %vm3152_vm12, %vm3153_vm9  ;;  %v6236_v49 = vld [vmem:[%s6860_s18] ss:$0 sm:$0xff]  ;;  %s4516_s18 = smov [#allocation3]  }
 0x894   :  { %v3145_v38 = vsel %vm3144_vm8, %v4378_v12, %v3141_v0  ;;  %v3148_v51 = vmul.f32 %v4382_v8, %v3147_v6  ;;  %4391 = vrsqrt.f32 %v6192_v58  ;;  %v3157_v53 = vmul.f32 %v6196_v29, %v6170_v47  ;;  %vm3174_vm0 = vmor %vm3172_vm14, %vm3173_vm11  ;;  %s3784_s26 = sshll.u32 %s4516_s18, 4  ;;  %s3785_s26 = int_to_ptr.vmem [resolvable:$true] %s3784_s26 }
 0x895   :  { %v3287_v7 = vmul.f32 %v3145_v38, %v6064_v56  ;;  %v3189_v33 = vmul.f32 0.5, %v3188_v50  ;;  %v3168_v9 = vmul.f32 %v4384_v32, %v3167_v4  ;;  %v3079_v22 = vpop.xlane.xlu0 %3078  ;;  %v3131_v4 = vmul.f32 %v6162_v35, %v3130_v27 }
 0x896   :  { %v3149_v55 = vmul.f32 0.5, %v3148_v51  ;;  %v3102_v42 = vmul.f32 %v3079_v22, %v5610_v5  ;;  %v3158_v62 = vmul.f32 %v6196_v29, %v3157_v53  ;;  %vm3182_vm8 = vweird.f32 %v6188_v61 }
 0x897   :  { %v3169_v24 = vmul.f32 0.5, %v3168_v9  ;;  %v3306_v56 = vmul.f32 %v6203_v39, %v3287_v7  ;;  %v3190_v36 = vsub.f32 1.5, %v3189_v33  ;;  %vm3202_vm10 = vweird.f32 %v6192_v58 }
 0x898   :  { %v6210_v57 = vpop.eup %4387  ;;  %v3150_v41 = vsub.f32 1.5, %v3149_v55  ;;  %v6221_v3 = vadd.f32 1e-12, %v3102_v42  ;;  %v3159_v34 = vmul.f32 0.5, %v3158_v62  ;;  %vm3163_vm12 = vweird.f32 %v6196_v29 }
 0x899   :  { %v3170_v12 = vsub.f32 1.5, %v3169_v24  ;;  %v3217_v20 = vmul.f32 %v6210_v57, %v6184_v48  ;;  %v4390_v26 = vpop.eup %4389  ;;  %v3325_v59 = vadd.f32 %v6216_v13, %v3306_v56  ;;  %v3191_v1 = vmul.f32 %v6181_v37, %v3190_v36 }
 0x89a   :  { %v3151_v18 = vmul.f32 %v4382_v8, %v3150_v41  ;;  %v4392_v23 = vpop.eup %4391  ;;  %v3177_v46 = vmul.f32 %v4390_v26, %v6188_v61  ;;  %4393 = vrsqrt.f32 %v6221_v3  ;;  %vm3183_vm5 = vweird.f32 %v4390_v26 }
 0x89b   :  { %v3171_v45 = vmul.f32 %v4384_v32, %v3170_v12  ;;  %v3197_v0 = vmul.f32 %v4392_v23, %v6192_v58  ;;  %v3345_v14 = vmul.f32 %v6236_v49, %v3325_v59  ;;  %v3135_v24 = vsel %vm6257_vm6, %v6162_v35, %v3131_v4  ;;  %vm3184_vm9 = vmor %vm3182_vm8, %vm3183_vm5 }
 0x89c   :  { %v3155_v25 = vsel %vm3154_vm13, %v4382_v8, %v3151_v18  ;;  %v3218_v8 = vmul.f32 %v6210_v57, %v3217_v20  ;;  %v3178_v50 = vmul.f32 %v4390_v26, %v3177_v46  ;;  %vm3203_vm7 = vweird.f32 %v4392_v23 }
 0x89d   :  { %v3288_v19 = vmul.f32 %v3155_v25, %v6079_v11  ;;  %v3175_v63 = vsel %vm3174_vm0, %v4384_v32, %v3171_v45  ;;  %v3198_v32 = vmul.f32 %v4392_v23, %v3197_v0  ;;  %3362 = vadd.xlane.f32.xlu0 %v3345_v14  ;;  %v3160_v36 = vsub.f32 1.5, %v3159_v34  ;;  %vm3204_vm11 = vmor %vm3202_vm10, %vm3203_vm7 }
 0x89e   :  { %v3290_v6 = vmul.f32 %v3175_v63, %v6085_v28  ;;  %v3195_v28 = vsel %vm6244_vm3, %v6181_v37, %v3191_v1  ;;  %v3179_v38 = vmul.f32 0.5, %v3178_v50  ;;  %v3219_v22 = vmul.f32 0.5, %v3218_v8 }
 0x89f   :  { %v3307_v51 = vmul.f32 %v6203_v39, %v3288_v19  ;;  %v3199_v33 = vmul.f32 0.5, %v3198_v32  ;;  %v3292_v54 = vmul.f32 %v3195_v28, %v6082_v31  ;;  %v3286_v31 = vmul.f32 %v3135_v24, %v6049_v10 }
 0x8a0   :  { %v3309_v7 = vmul.f32 %v6203_v39, %v3290_v6  ;;  %v3180_v55 = vsub.f32 1.5, %v3179_v38  ;;  %v4394_v56 = vpop.eup %4393  ;;  %v3220_v20 = vsub.f32 1.5, %v3219_v22  ;;  %v3161_v25 = vmul.f32 %v6196_v29, %v3160_v36 }
 0x8a1   :  { %v3326_v37 = vadd.f32 %v6216_v13, %v3307_v51  ;;  %v3200_v42 = vsub.f32 1.5, %v3199_v33  ;;  %v3207_v18 = vmul.f32 %v4394_v56, %v6221_v3  ;;  %v3311_v1 = vmul.f32 %v6203_v39, %v3292_v54 }
 0x8a2   :  { %v3328_v53 = vadd.f32 %v6216_v13, %v3309_v7  ;;  %v3181_v41 = vmul.f32 %v4390_v26, %v3180_v55  ;;  %vm3162_vm13 = vweird.f32 %v6170_v47  ;;  %vm3223_vm14 = vweird.f32 %v6210_v57 }
 0x8a3   :  { %v3346_v27 = vmul.f32 %v6236_v49, %v3326_v37  ;;  %v3201_v12 = vmul.f32 %v4392_v23, %v3200_v42  ;;  %v3208_v59 = vmul.f32 %v4394_v56, %v3207_v18  ;;  %vm3164_vm15 = vmor %vm3162_vm13, %vm3163_vm12  ;;  %vm3213_vm0 = vweird.f32 %v4394_v56 }
 0x8a4   :  { %v3348_v35 = vmul.f32 %v6236_v49, %v3328_v53  ;;  %v3185_v62 = vsel %vm3184_vm9, %v4390_v26, %v3181_v41  ;;  %v3221_v26 = vmul.f32 %v6210_v57, %v3220_v20  ;;  %v3330_v63 = vadd.f32 %v6216_v13, %v3311_v1 }
 0x8a5   :  { %3364 = vadd.xlane.f32.xlu1 %v3346_v27  ;;  %v3291_v45 = vmul.f32 %v3185_v62, %v6097_v30  ;;  %v3205_v61 = vsel %vm3204_vm11, %v4392_v23, %v3201_v12  ;;  %v3209_v46 = vmul.f32 0.5, %v3208_v59  ;;  %v3305_v30 = vmul.f32 %v6203_v39, %v3286_v31 }
 0x8a6   :  { %v3293_v58 = vmul.f32 %v3205_v61, %v6103_v40  ;;  %3368 = vadd.xlane.f32.xlu0 %v3348_v35  ;;  %v3165_v40 = vsel %vm3164_vm15, %v6196_v29, %v3161_v25  ;;  %vm3222_vm2 = vweird.f32 %v6184_v48  ;;  %vm3212_vm4 = vweird.f32 %v6221_v3 }
 0x8a7   :  { %v3310_v10 = vmul.f32 %v6203_v39, %v3291_v45  ;;  %v3210_v23 = vsub.f32 1.5, %v3209_v46  ;;  %vm3224_vm3 = vmor %vm3222_vm2, %vm3223_vm14  ;;  %v3289_v50 = vmul.f32 %v3165_v40, %v6061_v60  ;;  %v3350_v34 = vmul.f32 %v6236_v49, %v3330_v63 }
 0x8a8   :  { %v3312_v6 = vmul.f32 %v6203_v39, %v3293_v58  ;;  %v3225_v8 = vsel %vm3224_vm3, %v6210_v57, %v3221_v26  ;;  %vm3214_vm5 = vmor %vm3212_vm4, %vm3213_vm0  ;;  %v3324_v29 = vadd.f32 %v6216_v13, %v3305_v30 }
 0x8a9   :  { %v3329_v19 = vadd.f32 %v6216_v13, %v3310_v10  ;;  %v3211_v0 = vmul.f32 %v4394_v56, %v3210_v23  ;;  %v3295_v11 = vmul.f32 %v3225_v8, %v6100_v21  ;;  %v3308_v14 = vmul.f32 %v6203_v39, %v3289_v50 }
 0x8aa   :  { %v3331_v3 = vadd.f32 %v6216_v13, %v3312_v6  ;;  %v3344_v57 = vmul.f32 %v6236_v49, %v3324_v29 }
 0x8ab   :  { %v3349_v47 = vmul.f32 %v6236_v49, %v3329_v19  ;;  %v3215_v4 = vsel %vm3214_vm5, %v4394_v56, %v3211_v0  ;;  %v3314_v38 = vmul.f32 %v6203_v39, %v3295_v11  ;;  %v3327_v51 = vadd.f32 %v6216_v13, %v3308_v14 }
 0x8ac   :  { %v3294_v48 = vmul.f32 %v3215_v4, %v6113_v52  ;;  %v3351_v28 = vmul.f32 %v6236_v49, %v3331_v3 }
 0x8ad   :  { %3370 = vadd.xlane.f32.xlu1 %v3349_v47  ;;  %v3333_v33 = vadd.f32 %v6216_v13, %v3314_v38  ;;  %v3347_v22 = vmul.f32 %v6236_v49, %v3327_v51 }
 0x8ae   :  { %3372 = vadd.xlane.f32.xlu0 %v3350_v34  ;;  %v3313_v32 = vmul.f32 %v6203_v39, %v3294_v48 }
 0x8af   :  { %v3353_v55 = vmul.f32 %v6236_v49, %v3333_v33 }
 0x8b0   :  { %v3332_v60 = vadd.f32 %v6216_v13, %v3313_v32 }
 0x8b2   :  { %v3352_v52 = vmul.f32 %v6236_v49, %v3332_v60 }
 0x8b5   :  { %3360 = vadd.xlane.f32.xlu2 %v3344_v57  ;;  %3374 = vadd.xlane.f32.xlu1 %v3351_v28 }
 0x8b6   :  { %3376 = vadd.xlane.f32.xlu0 %v3352_v52 }
 0x8b7   :  { %v3083_v21 = vpop.xlane.xlu2 %3082 }
 0x8b8   :  { %v3104_v7 = vmul.f32 %v3083_v21, %v5610_v5 }
 0x8ba   :  { %v3120_v9 = vadd.f32 1e-12, %v3104_v7 }
 0x8bc   :  { %4395 = vrsqrt.f32 %v3120_v9  ;;  %vm3232_vm7 = vweird.f32 %v3120_v9 }
 0x8bd   :  { %3366 = vadd.xlane.f32.xlu2 %v3347_v22  ;;  %3378 = vadd.xlane.f32.xlu1 %v3353_v55 }
 0x8bf   :  { %v3085_v37 = vpop.xlane.xlu0 %3084 }
 0x8c0   :  { %v3105_v53 = vmul.f32 %v3085_v37, %v5610_v5 }
 0x8c2   :  { %v4396_v24 = vpop.eup %4395  ;;  %v3121_v54 = vadd.f32 1e-12, %v3105_v53 }
 0x8c3   :  { %v3227_v42 = vmul.f32 %v4396_v24, %v3120_v9  ;;  %vm3233_vm6 = vweird.f32 %v4396_v24 }
 0x8c4   :  { %4397 = vrsqrt.f32 %v3121_v54  ;;  %vm3234_vm8 = vmor %vm3232_vm7, %vm3233_vm6  ;;  %vm3242_vm10 = vweird.f32 %v3121_v54 }
 0x8c5   :  { %v3228_v56 = vmul.f32 %v4396_v24, %v3227_v42 }
 0x8c7   :  { %v3229_v36 = vmul.f32 0.5, %v3228_v56 }
 0x8c9   :  { %v3230_v41 = vsub.f32 1.5, %v3229_v36 }
 0x8ca   :  { %v4398_v27 = vpop.eup %4397 }
 0x8cb   :  { %v3231_v12 = vmul.f32 %v4396_v24, %v3230_v41  ;;  %v3237_v18 = vmul.f32 %v4398_v27, %v3121_v54  ;;  %vm3243_vm9 = vweird.f32 %v4398_v27 }
 0x8cc   :  { %vm3244_vm11 = vmor %vm3242_vm10, %vm3243_vm9 }
 0x8cd   :  { %v3235_v35 = vsel %vm3234_vm8, %v4396_v24, %v3231_v12  ;;  %v3238_v31 = vmul.f32 %v4398_v27, %v3237_v18 }
 0x8ce   :  { %v3296_v20 = vmul.f32 %v3235_v35, %v6119_v16 }
 0x8cf   :  { %v3239_v62 = vmul.f32 0.5, %v3238_v31 }
 0x8d0   :  { %v3315_v45 = vmul.f32 %v6203_v39, %v3296_v20 }
 0x8d1   :  { %v3240_v61 = vsub.f32 1.5, %v3239_v62 }
 0x8d2   :  { %v3334_v59 = vadd.f32 %v6216_v13, %v3315_v45 }
 0x8d3   :  { %v3241_v1 = vmul.f32 %v4398_v27, %v3240_v61 }
 0x8d4   :  { %v3354_v25 = vmul.f32 %v6236_v49, %v3334_v59 }
 0x8d5   :  { %v3245_v58 = vsel %vm3244_vm11, %v4398_v27, %v3241_v1 }
 0x8d6   :  { %v3297_v46 = vmul.f32 %v3245_v58, %v6125_v15  ;;  %3380 = vadd.xlane.f32.xlu0 %v3354_v25 }
 0x8d8   :  { %v3316_v10 = vmul.f32 %v6203_v39, %v3297_v46 }
 0x8da   :  { %v3335_v16 = vadd.f32 %v6216_v13, %v3316_v10 }
 0x8dc   :  { %v3355_v26 = vmul.f32 %v6236_v49, %v3335_v16 }
 0x8de   :  { %3382 = vadd.xlane.f32.xlu1 %v3355_v26 }
 0x8df   :  { %v3087_v30 = vpop.xlane.xlu1 %3086 }
 0x8e0   :  { %v3106_v23 = vmul.f32 %v3087_v30, %v5610_v5 }
 0x8e2   :  { %v3122_v19 = vadd.f32 1e-12, %v3106_v23 }
 0x8e4   :  { %4399 = vrsqrt.f32 %v3122_v19  ;;  %vm3252_vm13 = vweird.f32 %v3122_v19 }
 0x8e7   :  { %v3089_v63 = vpop.xlane.xlu2 %3088 }
 0x8e8   :  { %v3107_v40 = vmul.f32 %v3089_v63, %v5610_v5 }
 0x8ea   :  { %v4400_v0 = vpop.eup %4399  ;;  %v3123_v47 = vadd.f32 1e-12, %v3107_v40 }
 0x8eb   :  { %v3247_v6 = vmul.f32 %v4400_v0, %v3122_v19  ;;  %vm3253_vm12 = vweird.f32 %v4400_v0 }
 0x8ec   :  { %4401 = vrsqrt.f32 %v3123_v47  ;;  %vm3254_vm14 = vmor %vm3252_vm13, %vm3253_vm12  ;;  %vm3262_vm0 = vweird.f32 %v3123_v47 }
 0x8ed   :  { %v3248_v15 = vmul.f32 %v4400_v0, %v3247_v6 }
 0x8ef   :  { %v3249_v8 = vmul.f32 0.5, %v3248_v15  ;;  %v3091_v50 = vpop.xlane.xlu0 %3090  ;;  %v6339_v16 = vpop.permute.xlu2 %3396 }
 0x8f0   :  { %v3108_v4 = vmul.f32 %v3091_v50, %v5610_v5 }
 0x8f1   :  { %v3250_v34 = vsub.f32 1.5, %v3249_v8 }
 0x8f2   :  { %v4402_v29 = vpop.eup %4401  ;;  %v3124_v48 = vadd.f32 1e-12, %v3108_v4 }
 0x8f3   :  { %v3251_v11 = vmul.f32 %v4400_v0, %v3250_v34  ;;  %v3257_v3 = vmul.f32 %v4402_v29, %v3123_v47  ;;  %vm3263_vm15 = vweird.f32 %v4402_v29 }
 0x8f4   :  { %4403 = vrsqrt.f32 %v3124_v48  ;;  %vm3264_vm2 = vmor %vm3262_vm0, %vm3263_vm15  ;;  %vm3272_vm4 = vweird.f32 %v3124_v48 }
 0x8f5   :  { %v3255_v32 = vsel %vm3254_vm14, %v4400_v0, %v3251_v11  ;;  %v3258_v57 = vmul.f32 %v4402_v29, %v3257_v3 }
 0x8f6   :  { %v3298_v14 = vmul.f32 %v3255_v32, %v6131_v43 }
 0x8f7   :  { %v3259_v60 = vmul.f32 0.5, %v3258_v57  ;;  %v3093_v28 = vpop.xlane.xlu1 %3092 }
 0x8f8   :  { %v3109_v38 = vmul.f32 %v3093_v28, %v5610_v5  ;;  %v3317_v52 = vmul.f32 %v6203_v39, %v3298_v14 }
 0x8f9   :  { %v3260_v21 = vsub.f32 1.5, %v3259_v60 }
 0x8fa   :  { %v4404_v51 = vpop.eup %4403  ;;  %v3125_v7 = vadd.f32 1e-12, %v3109_v38  ;;  %v3336_v33 = vadd.f32 %v6216_v13, %v3317_v52 }
 0x8fb   :  { %v3261_v9 = vmul.f32 %v4402_v29, %v3260_v21  ;;  %v3267_v22 = vmul.f32 %v4404_v51, %v3124_v48  ;;  %vm3273_vm3 = vweird.f32 %v4404_v51 }
 0x8fc   :  { %4405 = vrsqrt.f32 %v3125_v7  ;;  %v3356_v55 = vmul.f32 %v6236_v49, %v3336_v33  ;;  %vm3274_vm5 = vmor %vm3272_vm4, %vm3273_vm3  ;;  %vm3282_vm7 = vweird.f32 %v3125_v7 }
 0x8fd   :  { %v3265_v43 = vsel %vm3264_vm2, %v4402_v29, %v3261_v9  ;;  %v3268_v37 = vmul.f32 %v4404_v51, %v3267_v22 }
 0x8fe   :  { %v3299_v53 = vmul.f32 %v3265_v43, %v6137_v17  ;;  %3384 = vadd.xlane.f32.xlu2 %v3356_v55 }
 0x8ff   :  { %v3269_v5 = vmul.f32 0.5, %v3268_v37  ;;  %v3735_v37 = vlaneseq }
 0x900   :  { %v3318_v24 = vmul.f32 %v6203_v39, %v3299_v53 }
 0x901   :  { %v3270_v54 = vsub.f32 1.5, %v3269_v5 }
 0x902   :  { %v4406_v42 = vpop.eup %4405  ;;  %v3337_v56 = vadd.f32 %v6216_v13, %v3318_v24 }
 0x903   :  { %v3271_v36 = vmul.f32 %v4404_v51, %v3270_v54  ;;  %v3277_v41 = vmul.f32 %v4406_v42, %v3125_v7  ;;  %vm3283_vm6 = vweird.f32 %v4406_v42 }
 0x904   :  { %v3357_v27 = vmul.f32 %v6236_v49, %v3337_v56  ;;  %vm3284_vm8 = vmor %vm3282_vm7, %vm3283_vm6 }
 0x905   :  { %v3275_v12 = vsel %vm3274_vm5, %v4404_v51, %v3271_v36  ;;  %v3278_v18 = vmul.f32 %v4406_v42, %v3277_v41  ;;  %v6374_v41 = vand.u32 127, %v3735_v37 }
 0x906   :  { %v3300_v35 = vmul.f32 %v3275_v12, %v6143_v2  ;;  %3386 = vadd.xlane.f32.xlu0 %v3357_v27 }
 0x907   :  { %v3279_v17 = vmul.f32 0.5, %v3278_v18 }
 0x908   :  { %v3319_v31 = vmul.f32 %v6203_v39, %v3300_v35 }
 0x909   :  { %v3280_v20 = vsub.f32 1.5, %v3279_v17 }
 0x90a   :  { %v3338_v62 = vadd.f32 %v6216_v13, %v3319_v31 }
 0x90b   :  { %v3281_v45 = vmul.f32 %v4406_v42, %v3280_v20 }
 0x90c   :  { %v3358_v61 = vmul.f32 %v6236_v49, %v3338_v62 }
 0x90d   :  { %v3285_v59 = vsel %vm3284_vm8, %v4406_v42, %v3281_v45 }
 0x90e   :  { %v3301_v1 = vmul.f32 %v3285_v59, %v6153_v44  ;;  %3388 = vadd.xlane.f32.xlu1 %v3358_v61 }
 0x910   :  { %v3320_v25 = vmul.f32 %v6203_v39, %v3301_v1  ;;  %v3363_v46 = vpop.xlane.xlu0 %3362 }
 0x911   :  { %v3400_v40 = vadd.f32 %v6339_v16, %v3363_v46 }
 0x912   :  { %v3339_v2 = vadd.f32 %v6216_v13, %v3320_v25  ;;  %v6387_v25 = vadd.s32 4294967288, %v6374_v41 }
 0x913   :  { %v4020_v13 = vmul.f32 -1.442695, %v3400_v40 }
 0x914   :  { %v3359_v58 = vmul.f32 %v6236_v49, %v3339_v2 }
 0x916   :  { %3390 = vadd.xlane.f32.xlu0 %v3359_v58 }
 0x918   :  { %v3365_v10 = vpop.xlane.xlu1 %3364 }
 0x919   :  { %v3401_v26 = vadd.f32 %v6339_v16, %v3365_v10  ;;  %v3369_v30 = vpop.xlane.xlu0 %3368 }
 0x91a   :  { %v3403_v23 = vadd.f32 %v6339_v16, %v3369_v30 }
 0x91b   :  { %v4021_v19 = vmul.f32 -1.442695, %v3401_v26 }
 0x91c   :  { %v4023_v44 = vmul.f32 -1.442695, %v3403_v23 }
 0x91d   :  { %4407 = vpow2.f32 %v4021_v19 }
 0x91e   :  { %4409 = vpow2.f32 %v4023_v44 }
 0x91f   :  { %4411 = vpow2.f32 %v4020_v13 }
 0x920   :  { %v3371_v63 = vpop.xlane.xlu1 %3370 }
 0x921   :  { %v3373_v49 = vpop.xlane.xlu0 %3372  ;;  %v3404_v47 = vadd.f32 %v6339_v16, %v3371_v63 }
 0x922   :  { %v3405_v50 = vadd.f32 %v6339_v16, %v3373_v49 }
 0x923   :  { %v4408_v0 = vpop.eup %4407  ;;  %v4024_v4 = vmul.f32 -1.442695, %v3404_v47 }
 0x924   :  { %v4410_v15 = vpop.eup %4409  ;;  %v6345_v8 = vadd.f32 1.0, %v4408_v0  ;;  %v4025_v11 = vmul.f32 -1.442695, %v3405_v50 }
 0x925   :  { %v6349_v29 = vadd.f32 1.0, %v4410_v15  ;;  %v4412_v48 = vpop.eup %4411 }
 0x926   :  { %4413 = vrcp.f32 %v6345_v8  ;;  %v6355_v28 = vadd.f32 1.0, %v4412_v48  ;;  %v3518_v45 = vand.u32 2147483647, %v6345_v8  ;;  %v3520_v61 = vand.u32 2147483648, %v6345_v8 }
 0x927   :  { %4415 = vpow2.f32 %v4024_v4  ;;  %vm3514_vm9 = vweird.f32 %v6345_v8  ;;  %vm3544_vm12 = vweird.f32 %v6349_v29  ;;  %v3550_v15 = vand.u32 2147483648, %v6349_v29 }
 0x928   :  { %v3361_v39 = vpop.xlane.xlu2 %3360  ;;  %v3375_v6 = vpop.xlane.xlu1 %3374  ;;  %4417 = vrcp.f32 %v6349_v29  ;;  %v3505_v18 = vand.u32 2147483648, %v6355_v28  ;;  %v3503_v10 = vand.u32 2147483647, %v6355_v28  ;;  %vm6402_vm10 = vcmp.eq.f32.partialorder %v3518_v45, 8.507059e+37 }
 0x929   :  { %v3406_v34 = vadd.f32 %v6339_v16, %v3375_v6  ;;  %v3377_v32 = vpop.xlane.xlu0 %3376  ;;  %v3399_v14 = vadd.f32 %v6339_v16, %v3361_v39  ;;  %4419 = vpow2.f32 %v4025_v11  ;;  %v3521_v40 = vor.u32 1.1754944e-38, %v3520_v61 }
 0x92a   :  { %v3407_v38 = vadd.f32 %v6339_v16, %v3377_v32  ;;  %v6394_v26 = vor.u32 1.1754944e-38, %v3505_v18  ;;  %v3548_v39 = vand.u32 2147483647, %v6349_v29  ;;  %vm3499_vm4 = vweird.f32 %v6355_v28 }
 0x92b   :  { %v4026_v57 = vmul.f32 -1.442695, %v3406_v34  ;;  %v4019_v51 = vmul.f32 -1.442695, %v3399_v14 }
 0x92c   :  { %v6358_v21 = vpop.eup %4413  ;;  %v4027_v9 = vmul.f32 -1.442695, %v3407_v38  ;;  %vm6431_vm15 = vcmp.eq.f32.partialorder %v3548_v39, 8.507059e+37 }
 0x92d   :  { %4421 = vpow2.f32 %v4026_v57  ;;  %v4416_v7 = vpop.eup %4415  ;;  %v3510_v53 = vmul.f32 %v6358_v21, %v6345_v8  ;;  %vm3515_vm11 = vweird.f32 %v6358_v21 }
 0x92e   :  { %4423 = vrcp.f32 %v6355_v28  ;;  %v6362_v55 = vpop.eup %4417  ;;  %v6366_v5 = vadd.f32 1.0, %v4416_v7  ;;  %vm6427_vm14 = vmor %vm3514_vm9, %vm3515_vm11 }
 0x92f   :  { %v4420_v43 = vpop.eup %4419  ;;  %4425 = vpow2.f32 %v4019_v51  ;;  %v3540_v54 = vmul.f32 %v6362_v55, %v6349_v29  ;;  %v3511_v27 = vsub.f32 1.0, %v3510_v53  ;;  %vm3545_vm13 = vweird.f32 %v6362_v55 }
 0x930   :  { %v3367_v3 = vpop.xlane.xlu2 %3366  ;;  %v3379_v52 = vpop.xlane.xlu1 %3378  ;;  %v6372_v36 = vadd.f32 1.0, %v4420_v43  ;;  %v3565_v8 = vand.u32 2147483648, %v6366_v5  ;;  %vm6447_vm0 = vmor %vm3544_vm12, %vm3545_vm13  ;;  %v3551_v43 = vor.u32 1.1754944e-38, %v3550_v15  ;;  %vm3559_vm2 = vweird.f32 %v6366_v5 }
 0x931   :  { %v3402_v60 = vadd.f32 %v6339_v16, %v3367_v3  ;;  %v3408_v22 = vadd.f32 %v6339_v16, %v3379_v52  ;;  %v3541_v17 = vsub.f32 1.0, %v3540_v54  ;;  %v3512_v1 = vmul.f32 %v6358_v21, %v3511_v27 }
 0x932   :  { %v3580_v37 = vand.u32 2147483648, %v6372_v36  ;;  %v3563_v54 = vand.u32 2147483647, %v6366_v5  ;;  %v3578_v18 = vand.u32 2147483647, %v6372_v36  ;;  %vm3574_vm6 = vweird.f32 %v6372_v36 }
 0x933   :  { %v4022_v33 = vmul.f32 -1.442695, %v3402_v60  ;;  %v4422_v24 = vpop.eup %4421  ;;  %v4028_v42 = vmul.f32 -1.442695, %v3408_v22  ;;  %v3542_v23 = vmul.f32 %v6362_v55, %v3541_v17  ;;  %v3513_v0 = vadd.f32 %v6358_v21, %v3512_v1 }
 0x934   :  { %v6370_v56 = vpop.eup %4423  ;;  %v6377_v12 = vadd.f32 1.0, %v4422_v24  ;;  %v6487_v45 = vor.u32 1.1754944e-38, %v3580_v37  ;;  %vm6491_vm7 = vcmp.eq.f32.partialorder %v3563_v54, 8.507059e+37 }
 0x935   :  { %4427 = vpow2.f32 %v4022_v33  ;;  %v4426_v35 = vpop.eup %4425  ;;  %v3495_v20 = vmul.f32 %v6370_v56, %v6355_v28  ;;  %v3543_v48 = vadd.f32 %v6362_v55, %v3542_v23  ;;  %v3517_v38 = vsel %vm6427_vm14, %v6358_v21, %v3513_v0 }
 0x936   :  { %4429 = vpow2.f32 %v4027_v9  ;;  %v6390_v2 = vadd.f32 1.0, %v4426_v35  ;;  %v6464_v24 = vsel %vm6402_vm10, %v3521_v40, %v3517_v38  ;;  %vm3500_vm3 = vweird.f32 %v6370_v56 }
 0x937   :  { %4431 = vrcp.f32 %v6366_v5  ;;  %v3496_v63 = vsub.f32 1.0, %v3495_v20  ;;  %v3547_v21 = vsel %vm6447_vm0, %v6362_v55, %v3543_v48  ;;  %vm3589_vm8 = vweird.f32 %v6377_v12 }
 0x938   :  { %4433 = vpow2.f32 %v4028_v42  ;;  %v6472_v42 = vor.u32 1.1754944e-38, %v3565_v8  ;;  %v6479_v17 = vsel %vm6431_vm15, %v3551_v43, %v3547_v21  ;;  %vm6511_vm10 = vcmp.eq.f32.partialorder %v3578_v18, 8.507059e+37 }
 0x939   :  { %4435 = vrcp.f32 %v6372_v36  ;;  %v3497_v3 = vmul.f32 %v6370_v56, %v3496_v63  ;;  %v3745_v44 = vperm.slane %v6479_v17, %v6374_v41  ;;  %v3490_v8 = vand.u32 2147483648, %v6390_v2 }
 0x93a   :  { %4437 = vrcp.f32 %v6377_v12  ;;  %vm3484_vm13 = vweird.f32 %v6390_v2  ;;  %vm6544_vm15 = vcmp.eq.f32.partialorder %v3503_v10, 8.507059e+37 }
 0x93b   :  { %v4428_v62 = vpop.eup %4427  ;;  %4439 = vrcp.f32 %v6390_v2  ;;  %v6458_v53 = vadd.f32 %v6370_v56, %v3497_v3 }
 0x93c   :  { %v4430_v59 = vpop.eup %4429  ;;  %v6400_v19 = vadd.f32 1.0, %v4428_v62  ;;  %v3742_v62 = vperm.slane %v6464_v24, %v6374_v41 }
 0x93d   :  { %v6396_v30 = vpop.eup %4431  ;;  %v6407_v13 = vadd.f32 1.0, %v4430_v59 }
 0x93e   :  { %v4434_v49 = vpop.eup %4433  ;;  %v3555_v50 = vmul.f32 %v6396_v30, %v6366_v5  ;;  %4441 = vrcp.f32 %v6400_v19  ;;  %vm3560_vm5 = vweird.f32 %v6396_v30 }
 0x93f   :  { %v6413_v6 = vpop.eup %4435  ;;  %4443 = vrcp.f32 %v6407_v13  ;;  %v6436_v14 = vadd.f32 1.0, %v4434_v49  ;;  %v3593_v49 = vand.u32 2147483647, %v6377_v12  ;;  %v3610_v3 = vand.u32 2147483648, %v6407_v13  ;;  %vm6524_vm11 = vmor %vm3559_vm2, %vm3560_vm5 }
 0x940   :  { %v6419_v34 = vpop.eup %4437  ;;  %v3570_v52 = vmul.f32 %v6413_v6, %v6372_v36  ;;  %v3556_v33 = vsub.f32 1.0, %v3555_v50  ;;  %vm3575_vm9 = vweird.f32 %v6413_v6  ;;  %vm3604_vm0 = vweird.f32 %v6407_v13  ;;  %vm6559_vm2 = vmor %vm3499_vm4, %vm3500_vm3 }
 0x941   :  { %v3585_v9 = vmul.f32 %v6419_v34, %v6377_v12  ;;  %v6460_v29 = vpop.eup %4439  ;;  %vm6529_vm12 = vcmp.eq.f32.partialorder %v3593_v49, 8.507059e+37  ;;  %vm3590_vm14 = vweird.f32 %v6419_v34  ;;  %vm6567_vm5 = vmor %vm3574_vm6, %vm3575_vm9 }
 0x942   :  { %v3571_v27 = vsub.f32 1.0, %v3570_v52  ;;  %v3480_v61 = vmul.f32 %v6460_v29, %v6390_v2  ;;  %vm6588_vm3 = vmor %vm3589_vm8, %vm3590_vm14  ;;  %vm3485_vm4 = vweird.f32 %v6460_v29  ;;  %vm3740_vm14 = vcmask 130112  }
 0x943   :  { %v3586_v20 = vsub.f32 1.0, %v3585_v9  ;;  %v3625_v9 = vand.u32 2147483648, %v6436_v14 }
 0x944   :  { %v6470_v55 = vpop.eup %4441  ;;  %v3572_v40 = vmul.f32 %v6413_v6, %v3571_v27  ;;  %v3481_v32 = vsub.f32 1.0, %v3480_v61  ;;  %v3491_v61 = vor.u32 1.1754944e-38, %v3490_v8 }
 0x945   :  { %v6475_v35 = vpop.eup %4443  ;;  %v3525_v23 = vmul.f32 %v6470_v55, %v6400_v19  ;;  %v3587_v15 = vmul.f32 %v6419_v34, %v3586_v20  ;;  %v6571_v20 = vor.u32 1.1754944e-38, %v3610_v3 }
 0x946   :  { %v3600_v39 = vmul.f32 %v6475_v35, %v6407_v13  ;;  %v3573_v7 = vadd.f32 %v6413_v6, %v3572_v40  ;;  %v3482_v54 = vmul.f32 %v6460_v29, %v3481_v32  ;;  %vm3605_vm8 = vweird.f32 %v6475_v35 }
 0x947   :  { %v3526_v52 = vsub.f32 1.0, %v3525_v23  ;;  %v3588_v5 = vadd.f32 %v6419_v34, %v3587_v15 }
 0x948   :  { %v3577_v36 = vsel %vm6567_vm5, %v6413_v6, %v3573_v7  ;;  %v3483_v40 = vadd.f32 %v6460_v29, %v3482_v54 }
 0x949   :  { %v3381_v58 = vpop.xlane.xlu0 %3380  ;;  %v3592_v6 = vsel %vm6588_vm3, %v6419_v34, %v3588_v5  ;;  %vm3763_vm3 = vcmask 1041409  }
 0x94a   :  { %v3409_v47 = vadd.f32 %v6339_v16, %v3381_v58 }
 0x94c   :  { %v4029_v51 = vmul.f32 -1.442695, %v3409_v47 }
 0x951   :  { %v3383_v31 = vpop.xlane.xlu1 %3382 }
 0x952   :  { %v3410_v46 = vadd.f32 %v6339_v16, %v3383_v31  ;;  %v3557_v31 = vmul.f32 %v6396_v30, %v3556_v33  ;;  %v3601_v33 = vsub.f32 1.0, %v3600_v39 }
 0x954   :  { %v4030_v4 = vmul.f32 -1.442695, %v3410_v46  ;;  %v3595_v46 = vand.u32 2147483648, %v6377_v12  ;;  %v3558_v47 = vadd.f32 %v6396_v30, %v3557_v31  ;;  %v3502_v12 = vsel %vm6559_vm2, %v6370_v56, %v6458_v53 }
 0x955   :  { %vm3619_vm2 = vweird.f32 %v6436_v14 }
 0x956   :  { %4445 = vpow2.f32 %v4030_v4  ;;  %v3596_v38 = vor.u32 1.1754944e-38, %v3595_v46  ;;  %v3562_v21 = vsel %vm6524_vm11, %v6396_v30, %v3558_v47  ;;  %v3602_v46 = vmul.f32 %v6475_v35, %v3601_v33 }
 0x957   :  { %4447 = vrcp.f32 %v6436_v14  ;;  %v6578_v28 = vsel %vm6491_vm7, %v6472_v42, %v3562_v21  ;;  %v6612_v47 = vsel %vm6511_vm10, %v6487_v45, %v3577_v36  ;;  %vm3530_vm7 = vweird.f32 %v6470_v55  ;;  %vm6634_vm10 = vmor %vm3484_vm13, %vm3485_vm4 }
 0x958   :  { %4449 = vpow2.f32 %v4029_v51  ;;  %v3603_v56 = vadd.f32 %v6475_v35, %v3602_v46  ;;  %v3746_v45 = vperm.slane %v6578_v28, %v6387_v25  ;;  %vm3529_vm11 = vweird.f32 %v6400_v19  ;;  %vm6661_vm13 = vmor %vm3604_vm0, %vm3605_vm8 }
 0x959   :  { %v3748_v3 = vperm.slane %v6612_v47, %v6374_v41  ;;  %v3487_v32 = vsel %vm6634_vm10, %v6460_v29, %v3483_v40 }
 0x95c   :  { %v4446_v1 = vpop.eup %4445 }
 0x95d   :  { %v6506_v0 = vpop.eup %4447  ;;  %v6517_v57 = vadd.f32 1.0, %v4446_v1 }
 0x95e   :  { %v4450_v4 = vpop.eup %4449  ;;  %v3615_v27 = vmul.f32 %v6506_v0, %v6436_v14 }
 0x95f   :  { %v6540_v43 = vadd.f32 1.0, %v4450_v4  ;;  %v3597_v4 = vsel %vm6529_vm12, %v3596_v38, %v3592_v6  ;;  %vm6648_vm12 = vmor %vm3529_vm11, %vm3530_vm7  ;;  %v3655_v47 = vand.u32 2147483648, %v6517_v57 }
 0x960   :  { %v3616_v39 = vsub.f32 1.0, %v3615_v27  ;;  %v3749_v33 = vperm.slane %v3597_v4, %v6387_v25 }
 0x961   :  { %vm3634_vm7 = vweird.f32 %v6540_v43 }
 0x971   :  { %v3385_v11 = vpop.xlane.xlu2 %3384 }
 0x972   :  { %v3411_v60 = vadd.f32 %v6339_v16, %v3385_v11  ;;  %v3608_v11 = vand.u32 2147483647, %v6407_v13  ;;  %v3607_v13 = vsel %vm6661_vm13, %v6475_v35, %v3603_v56 }
 0x974   :  { %v4031_v22 = vmul.f32 -1.442695, %v3411_v60  ;;  %vm6620_vm9 = vcmp.eq.f32.partialorder %v3608_v11, 8.507059e+37  ;;  %v3533_v11 = vand.u32 2147483647, %v6400_v19 }
 0x976   :  { %4451 = vpow2.f32 %v4031_v22  ;;  %v3488_v22 = vand.u32 2147483647, %v6390_v2  ;;  %vm3534_vm0 = vcmp.eq.f32.partialorder %v3533_v11, 8.507059e+37 }
 0x978   :  { %vm6593_vm6 = vcmp.eq.f32.partialorder %v3488_v22, 8.507059e+37 }
 0x979   :  { %v3387_v59 = vpop.xlane.xlu0 %3386 }
 0x97a   :  { %v3412_v63 = vadd.f32 %v6339_v16, %v3387_v59  ;;  %v3527_v59 = vmul.f32 %v6470_v55, %v3526_v52 }
 0x97c   :  { %v4032_v50 = vmul.f32 -1.442695, %v3412_v63  ;;  %v4452_v60 = vpop.eup %4451  ;;  %v3528_v34 = vadd.f32 %v6470_v55, %v3527_v59  ;;  %v3623_v59 = vand.u32 2147483647, %v6436_v14  ;;  %v3747_v14 = vsel %vm3740_vm14, %v3746_v45, %v3745_v44 }
 0x97d   :  { %v6553_v30 = vadd.f32 1.0, %v4452_v60  ;;  %v3617_v60 = vmul.f32 %v6506_v0, %v3616_v39  ;;  %v3638_v39 = vand.u32 2147483647, %v6540_v43 }
 0x97e   :  { %4453 = vpow2.f32 %v4032_v50  ;;  %v3535_v50 = vand.u32 2147483648, %v6400_v19  ;;  %v3507_v19 = vsel %vm6544_vm15, %v6394_v26, %v3502_v12  ;;  %v3532_v52 = vsel %vm6648_vm12, %v6470_v55, %v3528_v34 }
 0x97f   :  { %4455 = vrcp.f32 %v6517_v57  ;;  %v3492_v55 = vsel %vm6593_vm6, %v3491_v61, %v3487_v32  ;;  %vm3620_vm15 = vweird.f32 %v6506_v0  ;;  %v3618_v37 = vadd.f32 %v6506_v0, %v3617_v60 }
 0x980   :  { %4457 = vrcp.f32 %v6540_v43  ;;  %v3536_v22 = vor.u32 1.1754944e-38, %v3535_v50  ;;  %v3737_v61 = vperm.slane %v3492_v55, %v6374_v41  ;;  %vm6703_vm5 = vmor %vm3619_vm2, %vm3620_vm15  ;;  %v3739_v36 = vperm.slane %v3507_v19, %v6387_v25 }
 0x981   :  { %v3389_v18 = vpop.xlane.xlu1 %3388  ;;  %4459 = vrcp.f32 %v6553_v30  ;;  %v3622_v46 = vsel %vm6703_vm5, %v6506_v0, %v3618_v37  ;;  %v6718_v12 = vsel %vm3740_vm14, %v3749_v33, %v3748_v3  ;;  %vm3624_vm4 = vcmp.eq.f32.partialorder %v3623_v59, 8.507059e+37 }
 0x982   :  { %v3413_v1 = vadd.f32 %v6339_v16, %v3389_v18  ;;  %v3537_v54 = vsel %vm3534_vm0, %v3536_v22, %v3532_v52  ;;  %v3741_v17 = vsel %vm3740_vm14, %v3739_v36, %v3737_v61  ;;  %vm3765_vm6 = vcmask 1042434  }
 0x983   :  { %v3640_v3 = vand.u32 2147483648, %v6540_v43  ;;  %v3653_v32 = vand.u32 2147483647, %v6517_v57  ;;  %vm6748_vm11 = vcmp.eq.f32.partialorder %v3638_v39, 8.507059e+37  ;;  %vm3767_vm0 = vcmask 1043459  }
 0x984   :  { %v4454_v42 = vpop.eup %4453  ;;  %v4033_v63 = vmul.f32 -1.442695, %v3413_v1  ;;  %v6699_v1 = vsel %vm6620_vm9, %v6571_v20, %v3607_v13  ;;  %v3743_v20 = vperm.slane %v3537_v54, %v6387_v25  ;;  %vm3649_vm9 = vweird.f32 %v6517_v57 }
 0x985   :  { %v6607_v49 = vadd.f32 1.0, %v4454_v42  ;;  %v6616_v15 = vpop.eup %4455  ;;  %v3626_v42 = vor.u32 1.1754944e-38, %v3625_v9  ;;  %v3751_v44 = vperm.slane %v6699_v1, %v6374_v41  ;;  %v3668_v33 = vand.u32 2147483647, %v6553_v30 }
 0x986   :  { %4461 = vpow2.f32 %v4033_v63  ;;  %v6655_v8 = vpop.eup %4457  ;;  %v3645_v51 = vmul.f32 %v6616_v15, %v6517_v57  ;;  %v3744_v45 = vsel %vm3740_vm14, %v3743_v20, %v3742_v62  ;;  %vm3650_vm8 = vweird.f32 %v6616_v15 }
 0x987   :  { %4463 = vrcp.f32 %v6607_v49  ;;  %v6671_v26 = vpop.eup %4459  ;;  %v3630_v35 = vmul.f32 %v6655_v8, %v6540_v43  ;;  %v6723_v0 = vsel %vm3624_vm4, %v3626_v42, %v3622_v46  ;;  %vm3635_vm10 = vweird.f32 %v6655_v8  ;;  %vm6754_vm12 = vmor %vm3649_vm9, %vm3650_vm8 }
 0x988   :  { %v3646_v18 = vsub.f32 1.0, %v3645_v51  ;;  %v3660_v10 = vmul.f32 %v6671_v26, %v6553_v30  ;;  %v3656_v62 = vor.u32 1.1754944e-38, %v3655_v47  ;;  %v3764_v2 = vsel %vm3763_vm3, %v3744_v45, %v3741_v17  ;;  %vm6771_vm2 = vmor %vm3634_vm7, %vm3635_vm10 }
 0x989   :  { %v3391_v38 = vpop.xlane.xlu0 %3390  ;;  %v3631_v23 = vsub.f32 1.0, %v3630_v35  ;;  %v3685_v29 = vand.u32 2147483648, %v6607_v49  ;;  %vm3665_vm15 = vweird.f32 %v6671_v26  ;;  %v3670_v9 = vand.u32 2147483648, %v6553_v30 }
 0x98a   :  { %v3414_v7 = vadd.f32 %v6339_v16, %v3391_v38  ;;  %v3647_v6 = vmul.f32 %v6616_v15, %v3646_v18  ;;  %v3661_v63 = vsub.f32 1.0, %v3660_v10  ;;  %vm3679_vm5 = vweird.f32 %v6607_v49 }
 0x98b   :  { %v3632_v56 = vmul.f32 %v6655_v8, %v3631_v23  ;;  %v3683_v22 = vand.u32 2147483647, %v6607_v49  ;;  %vm3654_vm3 = vcmp.eq.f32.partialorder %v3653_v32, 8.507059e+37  ;;  %vm3664_vm4 = vweird.f32 %v6553_v30 }
 0x98c   :  { %v4462_v21 = vpop.eup %4461  ;;  %v4034_v16 = vmul.f32 -1.442695, %v3414_v7  ;;  %v3648_v4 = vadd.f32 %v6616_v15, %v3647_v6  ;;  %v3662_v48 = vmul.f32 %v6671_v26, %v3661_v63  ;;  %vm6789_vm7 = vmor %vm3664_vm4, %vm3665_vm15  ;;  %vm3669_vm9 = vcmp.eq.f32.partialorder %v3668_v33, 8.507059e+37 }
 0x98d   :  { %v6681_v5 = vpop.eup %4463  ;;  %v6686_v27 = vadd.f32 1.0, %v4462_v21  ;;  %v3633_v38 = vadd.f32 %v6655_v8, %v3632_v56  ;;  %v3641_v21 = vor.u32 1.1754944e-38, %v3640_v3  ;;  %vm3684_vm10 = vcmp.eq.f32.partialorder %v3683_v22, 8.507059e+37 }
 0x98e   :  { %v3675_v31 = vmul.f32 %v6681_v5, %v6607_v49  ;;  %4465 = vpow2.f32 %v4034_v16  ;;  %vm3680_vm13 = vweird.f32 %v6681_v5  ;;  %v3663_v52 = vadd.f32 %v6671_v26, %v3662_v48 }
 0x98f   :  { %4467 = vrcp.f32 %v6686_v27  ;;  %v3652_v7 = vsel %vm6754_vm12, %v6616_v15, %v3648_v4  ;;  %vm6782_vm8 = vmor %vm3679_vm5, %vm3680_vm13  ;;  %v3766_v15 = vsel %vm3765_vm6, %v3747_v14, %v3764_v2  ;;  %v3686_v49 = vor.u32 1.1754944e-38, %v3685_v29 }
 0x990   :  { %v3676_v58 = vsub.f32 1.0, %v3675_v31  ;;  %v3637_v30 = vsel %vm6771_vm2, %v6655_v8, %v3633_v38  ;;  %v3657_v37 = vsel %vm3654_vm3, %v3656_v62, %v3652_v7  ;;  %v3667_v18 = vsel %vm6789_vm7, %v6671_v26, %v3663_v52 }
 0x991   :  { %v3671_v31 = vor.u32 1.1754944e-38, %v3670_v9  ;;  %v3700_v8 = vand.u32 2147483648, %v6686_v27  ;;  %vm3694_vm12 = vweird.f32 %v6686_v27  ;;  %v3642_v26 = vsel %vm6748_vm11, %v3641_v21, %v3637_v30 }
 0x992   :  { %v3677_v53 = vmul.f32 %v6681_v5, %v3676_v58  ;;  %v3755_v46 = vperm.slane %v3657_v37, %v6387_v25  ;;  %v3752_v42 = vperm.slane %v6723_v0, %v6387_v25  ;;  %vm3769_vm11 = vcmask 1044484  }
 0x993   :  { %v3672_v36 = vsel %vm3669_vm9, %v3671_v31, %v3667_v18  ;;  %v3701_v58 = vor.u32 1.1754944e-38, %v3700_v8  ;;  %v3754_v17 = vperm.slane %v3642_v26, %v6374_v41  ;;  %vm3773_vm7 = vcmask 1046534  }
 0x994   :  { %v4466_v40 = vpop.eup %4465  ;;  %v3678_v57 = vadd.f32 %v6681_v5, %v3677_v53  ;;  %v3757_v47 = vperm.slane %v3672_v36, %v6374_v41 }
 0x995   :  { %v6728_v34 = vpop.eup %4467  ;;  %v6732_v50 = vadd.f32 1.0, %v4466_v40  ;;  %v3756_v0 = vsel %vm3740_vm14, %v3755_v46, %v3754_v17 }
 0x996   :  { %v3690_v11 = vmul.f32 %v6728_v34, %v6686_v27  ;;  %v3682_v54 = vsel %vm6782_vm8, %v6681_v5, %v3678_v57  ;;  %vm3695_vm6 = vweird.f32 %v6728_v34  ;;  %v3698_v5 = vand.u32 2147483647, %v6686_v27 }
 0x997   :  { %4469 = vrcp.f32 %v6732_v50  ;;  %v3687_v59 = vsel %vm3684_vm10, %v3686_v49, %v3682_v54  ;;  %v3715_v28 = vand.u32 2147483648, %v6732_v50  ;;  %vm6811_vm13 = vmor %vm3694_vm12, %vm3695_vm6  ;;  %v3713_v27 = vand.u32 2147483647, %v6732_v50 }
 0x998   :  { %v3691_v60 = vsub.f32 1.0, %v3690_v11  ;;  %v3758_v6 = vperm.slane %v3687_v59, %v6387_v25  ;;  %vm3709_vm2 = vweird.f32 %v6732_v50  ;;  %vm3699_vm5 = vcmp.eq.f32.partialorder %v3698_v5, 8.507059e+37 }
 0x999   :  { %v3716_v40 = vor.u32 1.1754944e-38, %v3715_v28  ;;  %vm3714_vm4 = vcmp.eq.f32.partialorder %v3713_v27, 8.507059e+37  ;;  %vm3771_vm8 = vcmask 1045509  }
 0x99a   :  { %v3692_v51 = vmul.f32 %v6728_v34, %v3691_v60  ;;  %v3759_v45 = vsel %vm3740_vm14, %v3758_v6, %v3757_v47 }
 0x99c   :  { %v3693_v10 = vadd.f32 %v6728_v34, %v3692_v51 }
 0x99d   :  { %v4470_v55 = vpop.eup %4469 }
 0x99e   :  { %v3705_v35 = vmul.f32 %v4470_v55, %v6732_v50  ;;  %v3697_v23 = vsel %vm6811_vm13, %v6728_v34, %v3693_v10  ;;  %vm3710_vm15 = vweird.f32 %v4470_v55  ;;  %v3768_v34 = vsel %vm3767_vm0, %v6718_v12, %v3766_v15 }
 0x99f   :  { %v3702_v39 = vsel %vm3699_vm5, %v3701_v58, %v3697_v23  ;;  %vm3711_vm3 = vmor %vm3709_vm2, %vm3710_vm15  ;;  %v3753_v50 = vsel %vm3740_vm14, %v3752_v42, %v3751_v44  ;;  %vm3775_vm0 = vcmask 1047559  }
 0x9a0   :  { %v3706_v61 = vsub.f32 1.0, %v3705_v35  ;;  %v3760_v12 = vperm.slane %v3702_v39, %v6374_v41  ;;  %v3770_v48 = vsel %vm3769_vm11, %v3753_v50, %v3768_v34 }
 0x9a1   :  { %v3772_v11 = vsel %vm3771_vm8, %v3756_v0, %v3770_v48 }
 0x9a2   :  { %v3707_v20 = vmul.f32 %v4470_v55, %v3706_v61  ;;  %v3774_v44 = vsel %vm3773_vm7, %v3759_v45, %v3772_v11 }
 0x9a4   :  { %v3708_v63 = vadd.f32 %v4470_v55, %v3707_v20 }
 0x9a6   :  { %v3712_v56 = vsel %vm3711_vm3, %v4470_v55, %v3708_v63 }
 0x9a7   :  { %v3717_v53 = vsel %vm3714_vm4, %v3716_v40, %v3712_v56 }
 0x9a8   :  { %v3761_v4 = vperm.slane %v3717_v53, %v6387_v25 }
 0x9aa   :  { %v3762_v1 = vsel %vm3740_vm14, %v3761_v4, %v3760_v12 }
 0x9ab   :  { %v3776_v3 = vsel %vm3775_vm0, %v3762_v1, %v3774_v44 }
 0x9ac   :  { %3778 = vst.msk [vmem:[#allocation3] sm:$0xff] %vm1181_vm1, %v3776_v3 }
 0x9ad   :  { %3789 = dma.vmem_to_hbm [thread:$0]  %s3785_s26, 128, %s3787_s11, [#allocation4]  }
 0x9ae   :  { %4511 = dma.done.wait [#allocation4], 128  }
 0x9af   :  { %4512 = vsyncadd [#allocation4], 4294967168 }
 0x9b0   :  { %3794 = vsyncpa [#allocation4], 1 }

</bundles_post_ra>
